<compile_context>
chip_gen: v7x
topology: tpu7x:2x2x1
jax: 0.10.0
libtpu: 0.0.40
codegen_flags: <defaults>
</compile_context>

<pallas_src>
import functools

import jax
import jax.numpy as jnp
import numpy as np
from jax.experimental import pallas as pl
from jax.experimental.pallas import tpu as pltpu

OUT = 8          # channel multiplier (PyTorch default 128; small for the test)
LANES = 128
EPS = 1e-5


def _rup(x, m):
    return ((x + m - 1) // m) * m


def _cp(c):
    return _rup(c, LANES)


# ------------------------------ Pallas kernels -------------------------------


def _matmul_bias_kernel(x_ref, w_ref, b_ref, o_ref):
    x = x_ref[...].astype(jnp.bfloat16)
    o_ref[...] = (
        jnp.dot(x, w_ref[...], preferred_element_type=jnp.float32) + b_ref[...]
    )


def _conv3x3_stats_kernel(x_ref, w_ref, b_ref, y_ref, s_ref, q_ref):
    """3x3 / stride-1 / pad-1 conv with fused bias + per-channel sum / sum-sq.

    x_ref : (1, H+2, W+2, Cin_p) f32   spatially padded input (per-batch block)
    w_ref : (9*Cin_p, Cout_p)    bf16  tap-stacked weight (di major, dj minor)
    b_ref : (1, Cout_p)          f32
    y_ref : (1, 1, W, Cout_p)    f32   one output row per grid step
    s_ref : (1, 1, Cout_p)       f32   per-batch running sum   (VMEM resident)
    q_ref : (1, 1, Cout_p)       f32   per-batch running sum^2 (VMEM resident)
    """
    h = pl.program_id(1)
    w_out = y_ref.shape[2]

    @pl.when(h == 0)
    def _init():
        s_ref[...] = jnp.zeros_like(s_ref)
        q_ref[...] = jnp.zeros_like(q_ref)

    rows = [x_ref[0, h + di] for di in range(3)]          # each (W+2, Cin_p) f32
    lhs = jnp.concatenate(
        [rows[di][dj:dj + w_out, :] for di in range(3) for dj in range(3)],
        axis=-1,
    ).astype(jnp.bfloat16)                                # (W, 9*Cin_p) bf16
    y = jnp.dot(lhs, w_ref[...], preferred_element_type=jnp.float32) + b_ref[...]
    y_ref[0, 0] = y
    s_ref[0] += jnp.sum(y, axis=0, keepdims=True)
    q_ref[0] += jnp.sum(y * y, axis=0, keepdims=True)


def _tconv4x4s2_kernel(x_ref, w_ref, b_ref, o00_ref, o01_ref, o10_ref, o11_ref,
                       *, apply_tanh):
    """4x4 / stride-2 / pad-1 ConvTranspose2d via sub-pixel decomposition.

    Each of the 4 output phases (r, c) is a 2x2 conv over the zero-padded
    input (no zero-inserted dilation, no redundant MXU work).  Phase outputs
    are interleaved into (2H, 2W) by a free reshape in the wrapper.

    x_ref   : (1, H+2, W+2, Cin_p)     f32 post-BN activation (per-batch block)
    w_ref   : (2, 2, 4*Cin_p, Cout_p)  bf16 per-phase tap-stacked weights
    b_ref   : (1, Cout_p)              f32
    o{r}{c} : (1, 1, W, Cout_p)        f32 phase output row
    """
    m = pl.program_id(1)
    w_in = o00_ref.shape[2]
    row_c = x_ref[0, m + 1]     # x[m]     (W+2, Cin_p)
    row_u = x_ref[0, m]         # x[m-1]   (zero-pad row at the top edge)
    row_d = x_ref[0, m + 2]     # x[m+1]   (zero-pad row at the bottom edge)
    outs = (o00_ref, o01_ref, o10_ref, o11_ref)
    for r in range(2):
        row_b = row_u if r == 0 else row_d
        for c in range(2):
            s1 = 0 if c == 0 else 2          # column window start for the b=1 tap
            lhs = jnp.concatenate(
                [row_c[1:1 + w_in, :], row_c[s1:s1 + w_in, :],
                 row_b[1:1 + w_in, :], row_b[s1:s1 + w_in, :]],
                axis=-1,
            ).astype(jnp.bfloat16)           # (W, 4*Cin_p) bf16
            y = (jnp.dot(lhs, w_ref[r, c], preferred_element_type=jnp.float32)
                 + b_ref[...])
            if apply_tanh:
                y = jnp.tanh(y)
            outs[r * 2 + c][0, 0] = y


def _bn_relu_kernel(x_ref, scale_ref, shift_ref, o_ref):
    o_ref[...] = jnp.maximum(x_ref[...] * scale_ref[...] + shift_ref[...], 0.0)


# ------------------------------ Pallas wrappers ------------------------------


def tconv1_matmul(z2d, wmat, bias):
    """ConvTranspose2d(k=4, s=1, p=0) on a 1x1 input == a single GEMM."""
    n_rows = z2d.shape[0]
    cols = wmat.shape[1]
    return pl.pallas_call(
        _matmul_bias_kernel,
        out_shape=jax.ShapeDtypeStruct((n_rows, cols), jnp.float32),
        grid=(1,),
        in_specs=[
            pl.BlockSpec(z2d.shape, lambda i: (0, 0)),
            pl.BlockSpec(wmat.shape, lambda i: (0, 0)),
            pl.BlockSpec(bias.shape, lambda i: (0, 0)),
        ],
        out_specs=pl.BlockSpec((n_rows, cols), lambda i: (0, 0)),
        compiler_params=pltpu.CompilerParams(dimension_semantics=("arbitrary",)),
    )(z2d, wmat, bias)


def conv3x3_stats(x, wmat, bias):
    """3x3 conv + bias with fused per-channel sum / sum-sq accumulation."""
    N, H, W, cin_p = x.shape
    cout_p = wmat.shape[1]
    xpad = jnp.pad(x, ((0, 0), (1, 1), (1, 1), (0, 0)))
    y, s, q = pl.pallas_call(
        _conv3x3_stats_kernel,
        out_shape=(
            jax.ShapeDtypeStruct((N, H, W, cout_p), jnp.float32),
            jax.ShapeDtypeStruct((N, 1, cout_p), jnp.float32),
            jax.ShapeDtypeStruct((N, 1, cout_p), jnp.float32),
        ),
        grid=(N, H),
        in_specs=[
            pl.BlockSpec((1, H + 2, W + 2, cin_p), lambda n, h: (n, 0, 0, 0)),
            pl.BlockSpec(wmat.shape, lambda n, h: (0, 0)),
            pl.BlockSpec(bias.shape, lambda n, h: (0, 0)),
        ],
        out_specs=(
            pl.BlockSpec((1, 1, W, cout_p), lambda n, h: (n, h, 0, 0)),
            pl.BlockSpec((1, 1, cout_p), lambda n, h: (n, 0, 0)),
            pl.BlockSpec((1, 1, cout_p), lambda n, h: (n, 0, 0)),
        ),
        compiler_params=pltpu.CompilerParams(
            dimension_semantics=("parallel", "arbitrary")),
    )(xpad, wmat, bias)
    cnt = float(N * H * W)
    total_s = jnp.sum(s, axis=0)          # (1, cout_p) f32
    total_q = jnp.sum(q, axis=0)
    mean = total_s / cnt
    var = total_q / cnt - mean * mean     # biased variance (BN training mode)
    return y, mean, var


def bn_relu(y, gamma_p, beta_p, mean, var):
    """BN (training stats) + ReLU.  Padded lanes have gamma=0 -> stay zero."""
    N, H, W, cp = y.shape
    scale = gamma_p / jnp.sqrt(var + EPS)        # (1, cp) f32
    shift = beta_p - mean * scale
    rows = N * H * W
    yf = y.reshape(rows, cp)                     # free reshape (row-major)
    out = pl.pallas_call(
        _bn_relu_kernel,
        out_shape=jax.ShapeDtypeStruct((rows, cp), jnp.float32),
        grid=(1,),
        in_specs=[
            pl.BlockSpec((rows, cp), lambda i: (0, 0)),
            pl.BlockSpec((1, cp), lambda i: (0, 0)),
            pl.BlockSpec((1, cp), lambda i: (0, 0)),
        ],
        out_specs=pl.BlockSpec((rows, cp), lambda i: (0, 0)),
        compiler_params=pltpu.CompilerParams(dimension_semantics=("arbitrary",)),
    )(yf, scale, shift)
    return out.reshape(N, H, W, cp)


def tconv4x4s2(x, wph, bias, apply_tanh=False):
    """Sub-pixel 4x4/stride-2/pad-1 transposed conv (optionally fused tanh)."""
    N, H, W, cin_p = x.shape
    cout_p = wph.shape[-1]
    xpad = jnp.pad(x, ((0, 0), (1, 1), (1, 1), (0, 0)))
    kern = functools.partial(_tconv4x4s2_kernel, apply_tanh=apply_tanh)
    phase = jax.ShapeDtypeStruct((N, H, W, cout_p), jnp.float32)
    outs = pl.pallas_call(
        kern,
        out_shape=(phase,) * 4,
        grid=(N, H),
        in_specs=[
            pl.BlockSpec((1, H + 2, W + 2, cin_p), lambda n, m: (n, 0, 0, 0)),
            pl.BlockSpec(wph.shape, lambda n, m: (0, 0, 0, 0)),
            pl.BlockSpec(bias.shape, lambda n, m: (0, 0)),
        ],
        out_specs=tuple(
            pl.BlockSpec((1, 1, W, cout_p), lambda n, m: (n, m, 0, 0))
            for _ in range(4)
        ),
        compiler_params=pltpu.CompilerParams(
            dimension_semantics=("parallel", "parallel")),
    )(xpad, wph, bias)
    ph = jnp.stack(outs).reshape(2, 2, N, H, W, cout_p)
    # (r, c, n, h, w, ch) -> (n, h, r, w, c, ch) -> (n, 2H, 2W, ch)
    return ph.transpose(2, 3, 0, 4, 1, 5).reshape(N, 2 * H, 2 * W, cout_p)


# --------------------- one-time parameter preparation ------------------------


def prepare_params(p):
    """Hoisted weight re-layout: pad to lanes, stack taps, cast GEMM weights to bf16."""

    def padmat(m, rows, cols):
        return jnp.pad(m, ((0, rows - m.shape[0]), (0, cols - m.shape[1])))

    def vec(v):
        c = v.shape[0]
        return jnp.pad(v, (0, _cp(c) - c)).reshape(1, _cp(c)).astype(jnp.float32)

    def conv_wmat(w):                       # torch (Cout, Cin, 3, 3)
        cout, cin = w.shape[0], w.shape[1]
        cinp, coutp = _cp(cin), _cp(cout)
        blocks = [padmat(jnp.transpose(w[:, :, di, dj]), cinp, coutp)
                  for di in range(3) for dj in range(3)]
        return jnp.concatenate(blocks, axis=0).astype(jnp.bfloat16)

    # kernel-tap index used by output phase (r/c) and tap (a/b) of the
    # sub-pixel decomposition of a k=4 / s=2 / p=1 transposed conv.
    KI = {(0, 0): 1, (0, 1): 3, (1, 0): 2, (1, 1): 0}

    def tconv_wmat(w):                      # torch (Cin, Cout, 4, 4)
        cin, cout = w.shape[0], w.shape[1]
        cinp, coutp = _cp(cin), _cp(cout)
        phases = []
        for r in range(2):
            row = []
            for c in range(2):
                taps = [padmat(w[:, :, KI[(r, a)], KI[(c, b)]], cinp, coutp)
                        for a in range(2) for b in range(2)]
                row.append(jnp.concatenate(taps, axis=0))      # (4*cinp, coutp)
            phases.append(jnp.stack(row))
        return jnp.stack(phases).astype(jnp.bfloat16)           # (2,2,4cinp,coutp)

    q = {}

    # tconv1 (k=4, s=1, p=0 on a 1x1 input) -> one GEMM weight (Cin_p, 16*Cout_p)
    w = p["tconv1_w"]
    cin, cout = w.shape[0], w.shape[1]
    cinp, coutp = _cp(cin), _cp(cout)
    cols = [padmat(w[:, :, i, j], cinp, coutp) for i in range(4) for j in range(4)]
    q["tconv1_w"] = jnp.concatenate(cols, axis=1).astype(jnp.bfloat16)
    bpad = jnp.pad(p["tconv1_b"], (0, coutp - cout))
    q["tconv1_b"] = jnp.tile(bpad, 16).reshape(1, 16 * coutp).astype(jnp.float32)

    for i in (1, 2, 3):
        q[f"conv{i}_w"] = conv_wmat(p[f"conv{i}_w"])
        q[f"conv{i}_b"] = vec(p[f"conv{i}_b"])
        q[f"bn{i}_g"] = vec(p[f"bn{i}_g"])      # padded lanes get gamma = 0
        q[f"bn{i}_b"] = vec(p[f"bn{i}_b"])
        q[f"tconv{i + 1}_w"] = tconv_wmat(p[f"tconv{i + 1}_w"])
        q[f"tconv{i + 1}_b"] = vec(p[f"tconv{i + 1}_b"])
    return q


# ------------------------------ full forward ---------------------------------


def generator_forward(q, z_nchw):
    n = z_nchw.shape[0]
    z2d = z_nchw.reshape(n, z_nchw.shape[1]).astype(jnp.float32)      # (N, 100)
    z2d = jnp.pad(z2d, ((0, 0), (0, q["tconv1_w"].shape[0] - z2d.shape[1])))

    coutp = q["tconv1_w"].shape[1] // 16
    x = tconv1_matmul(z2d, q["tconv1_w"], q["tconv1_b"]).reshape(n, 4, 4, coutp)

    for i in (1, 2, 3):
        y, mean, var = conv3x3_stats(x, q[f"conv{i}_w"], q[f"conv{i}_b"])
        x = bn_relu(y, q[f"bn{i}_g"], q[f"bn{i}_b"], mean, var)
        x = tconv4x4s2(x, q[f"tconv{i + 1}_w"], q[f"tconv{i + 1}_b"],
                       apply_tanh=(i == 3))

    # un-pad channels exactly once and return NCHW like the PyTorch module
    return jnp.transpose(x[..., :3], (0, 3, 1, 2))


# ---------------------------- params / reference -----------------------------


def init_params(key, out=OUT):
    ks = jax.random.split(key, 16)

    def w(k, shape):
        return (0.05 * jax.random.normal(k, shape)).astype(jnp.float32)

    p = {}
    p["tconv1_w"], p["tconv1_b"] = w(ks[0], (100, 4 * out, 4, 4)), w(ks[1], (4 * out,))
    p["conv1_w"], p["conv1_b"] = w(ks[2], (4 * out, 4 * out, 3, 3)), w(ks[3], (4 * out,))
    p["bn1_g"], p["bn1_b"] = jnp.ones((4 * out,), jnp.float32), jnp.zeros((4 * out,), jnp.float32)
    p["tconv2_w"], p["tconv2_b"] = w(ks[4], (4 * out, 2 * out, 4, 4)), w(ks[5], (2 * out,))
    p["conv2_w"], p["conv2_b"] = w(ks[6], (2 * out, 2 * out, 3, 3)), w(ks[7], (2 * out,))
    p["bn2_g"], p["bn2_b"] = jnp.ones((2 * out,), jnp.float32), jnp.zeros((2 * out,), jnp.float32)
    p["tconv3_w"], p["tconv3_b"] = w(ks[8], (2 * out, out, 4, 4)), w(ks[9], (out,))
    p["conv3_w"], p["conv3_b"] = w(ks[10], (out, out, 3, 3)), w(ks[11], (out,))
    p["bn3_g"], p["bn3_b"] = jnp.ones((out,), jnp.float32), jnp.zeros((out,), jnp.float32)
    p["tconv4_w"], p["tconv4_b"] = w(ks[12], (out, 3, 4, 4)), w(ks[13], (3,))
    return p


def _ref_conv(x, w, b, pad):
    y = jax.lax.conv_general_dilated(
        x, w, (1, 1), ((pad, pad), (pad, pad)),
        dimension_numbers=("NCHW", "OIHW", "NCHW"))
    return y + b[None, :, None, None]


def _ref_tconv(x, w, b, stride, pad):
    k = w.shape[2]
    w_conv = jnp.transpose(w[:, :, ::-1, ::-1], (1, 0, 2, 3))
    y = jax.lax.conv_general_dilated(
        x, w_conv, (1, 1), ((k - 1 - pad, k - 1 - pad),) * 2,
        lhs_dilation=(stride, stride),
        dimension_numbers=("NCHW", "OIHW", "NCHW"))
    return y + b[None, :, None, None]


def _ref_bn_relu(x, g, b, eps=EPS):
    mean = x.mean(axis=(0, 2, 3), keepdims=True)
    var = x.var(axis=(0, 2, 3), keepdims=True)
    y = (x - mean) / jnp.sqrt(var + eps) * g[None, :, None, None] + b[None, :, None, None]
    return jnp.maximum(y, 0.0)


def reference_forward(p, z):
    x = _ref_tconv(z, p["tconv1_w"], p["tconv1_b"], 1, 0)
    x = _ref_bn_relu(_ref_conv(x, p["conv1_w"], p["conv1_b"], 1), p["bn1_g"], p["bn1_b"])
    x = _ref_tconv(x, p["tconv2_w"], p["tconv2_b"], 2, 1)
    x = _ref_bn_relu(_ref_conv(x, p["conv2_w"], p["conv2_b"], 1), p["bn2_g"], p["bn2_b"])
    x = _ref_tconv(x, p["tconv3_w"], p["tconv3_b"], 2, 1)
    x = _ref_bn_relu(_ref_conv(x, p["conv3_w"], p["conv3_b"], 1), p["bn3_g"], p["bn3_b"])
    x = _ref_tconv(x, p["tconv4_w"], p["tconv4_b"], 2, 1)
    return jnp.tanh(x)


if __name__ == "__main__":
    key = jax.random.PRNGKey(0)
    params = init_params(key, out=OUT)
    prepared = prepare_params(params)          # one-time GEMM-layout weight prep
    z = jax.random.normal(jax.random.fold_in(key, 999), (2, 100, 1, 1), jnp.float32)

    fwd = jax.jit(generator_forward)
    y = jax.block_until_ready(fwd(prepared, z))
    assert y.shape == (2, 3, 32, 32), y.shape
    assert bool(jnp.all(jnp.isfinite(y)))

    y_ref = jax.block_until_ready(reference_forward(params, z))
    max_err = float(np.max(np.abs(np.asarray(y) - np.asarray(y_ref))))
    assert max_err < 5e-2, f"mismatch vs reference: max |diff| = {max_err}"

    print("KERNEL_OK")
</pallas_src>

<mosaic_0001>
module attributes {stable_mosaic.version = 11 : i64} {
  func.func @_matmul_bias_kernel(%arg0: i32, %arg1: memref<2x128xf32, #tpu.memory_space<vmem>>, %arg2: memref<128x2048xbf16, #tpu.memory_space<vmem>>, %arg3: memref<1x2048xf32, #tpu.memory_space<vmem>>, %arg4: memref<2x2048xf32, #tpu.memory_space<vmem>>) attributes {dimension_semantics = [#tpu.dimension_semantics<arbitrary>], iteration_bounds = array<i64: 1>, scalar_prefetch = 0 : i64, scratch_operands = 0 : i64, tpu.core_type = #tpu.core_type<tc>, window_params = [{pipeline_mode = #tpu.pipeline_mode<synchronous>, transform_indices = @transform_0, window_bounds = array<i64: 2, 128>}, {pipeline_mode = #tpu.pipeline_mode<synchronous>, transform_indices = @transform_1, window_bounds = array<i64: 128, 2048>}, {pipeline_mode = #tpu.pipeline_mode<synchronous>, transform_indices = @transform_2, window_bounds = array<i64: 1, 2048>}, {pipeline_mode = #tpu.pipeline_mode<synchronous>, transform_indices = @transform_3, window_bounds = array<i64: 2, 2048>}]} {
    %c0 = arith.constant 0 : index
    %c0_0 = arith.constant 0 : index
    %0 = vector.load %arg1[%c0, %c0_0] : memref<2x128xf32, #tpu.memory_space<vmem>>, vector<2x128xf32>
    %1 = arith.truncf %0 : vector<2x128xf32> to vector<2x128xbf16>
    %c0_1 = arith.constant 0 : index
    %c0_2 = arith.constant 0 : index
    %2 = vector.load %arg2[%c0_1, %c0_2] : memref<128x2048xbf16, #tpu.memory_space<vmem>>, vector<128x2048xbf16>
    %cst = arith.constant dense<0.000000e+00> : vector<2x2048xf32>
    %3 = tpu.matmul %1, %2, %cst {dimension_numbers = #tpu.dot_dimension_numbers<[1], [0], [0], [1], [0, 0, 1, 1], [], []>} : vector<2x128xbf16>, vector<128x2048xbf16>, vector<2x2048xf32> -> vector<2x2048xf32>
    %c0_3 = arith.constant 0 : index
    %c0_4 = arith.constant 0 : index
    %4 = vector.load %arg3[%c0_3, %c0_4] : memref<1x2048xf32, #tpu.memory_space<vmem>>, vector<1x2048xf32>
    %5 = vector.broadcast %4 : vector<1x2048xf32> to vector<2x2048xf32>
    %6 = arith.addf %3, %5 : vector<2x2048xf32>
    %c0_5 = arith.constant 0 : index
    %c0_6 = arith.constant 0 : index
    %7 = vector.load %arg4[%c0_5, %c0_6] : memref<2x2048xf32, #tpu.memory_space<vmem>>, vector<2x2048xf32>
    tpu.vector_store %arg4[%c0_5, %c0_6], %6 {strides = array<i32>} : memref<2x2048xf32, #tpu.memory_space<vmem>>, vector<2x2048xf32>,
    return
  }
  func.func @transform_0(%arg0: i32) -> (i32, i32) {
    %c0_i32 = arith.constant 0 : i32
    %c0_i32_0 = arith.constant 0 : i32
    %c0_i32_1 = arith.constant 0 : i32
    return %c0_i32, %c0_i32_0 : i32, i32
  }
  func.func @transform_1(%arg0: i32) -> (i32, i32) {
    %c0_i32 = arith.constant 0 : i32
    %c0_i32_0 = arith.constant 0 : i32
    %c0_i32_1 = arith.constant 0 : i32
    return %c0_i32, %c0_i32_0 : i32, i32
  }
  func.func @transform_2(%arg0: i32) -> (i32, i32) {
    %c0_i32 = arith.constant 0 : i32
    %c0_i32_0 = arith.constant 0 : i32
    %c0_i32_1 = arith.constant 0 : i32
    return %c0_i32, %c0_i32_0 : i32, i32
  }
  func.func @transform_3(%arg0: i32) -> (i32, i32) {
    %c0_i32 = arith.constant 0 : i32
    %c0_i32_0 = arith.constant 0 : i32
    %c0_i32_1 = arith.constant 0 : i32
    return %c0_i32, %c0_i32_0 : i32, i32
  }
}

module attributes {stable_mosaic.version = 11 : i64} {
  func.func @_conv3x3_stats_kernel(%arg0: i32, %arg1: i32, %arg2: memref<1x6x6x128xf32, #tpu.memory_space<vmem>>, %arg3: memref<1152x128xbf16, #tpu.memory_space<vmem>>, %arg4: memref<1x128xf32, #tpu.memory_space<vmem>>, %arg5: memref<1x1x4x128xf32, #tpu.memory_space<vmem>>, %arg6: memref<1x1x128xf32, #tpu.memory_space<vmem>>, %arg7: memref<1x1x128xf32, #tpu.memory_space<vmem>>) attributes {dimension_semantics = [#tpu.dimension_semantics<parallel>, #tpu.dimension_semantics<arbitrary>], iteration_bounds = array<i64: 2, 4>, scalar_prefetch = 0 : i64, scratch_operands = 0 : i64, tpu.core_type = #tpu.core_type<tc>, window_params = [{transform_indices = @transform_0, window_bounds = array<i64: 1, 6, 6, 128>}, {pipeline_mode = #tpu.pipeline_mode<synchronous>, transform_indices = @transform_1, window_bounds = array<i64: 1152, 128>}, {pipeline_mode = #tpu.pipeline_mode<synchronous>, transform_indices = @transform_2, window_bounds = array<i64: 1, 128>}, {transform_indices = @transform_3, window_bounds = array<i64: 1, 1, 4, 128>}, {transform_indices = @transform_4, window_bounds = array<i64: 1, 1, 128>}, {transform_indices = @transform_5, window_bounds = array<i64: 1, 1, 128>}]} {
    %c0_i32 = arith.constant 0 : i32
    %0 = arith.cmpi eq, %arg1, %c0_i32 : i32
    %1 = arith.extui %0 : i1 to i32
    %c0_i32_0 = arith.constant 0 : i32
    %2 = arith.cmpi ne, %1, %c0_i32_0 : i32
    scf.if %2 {
      %cst_32 = arith.constant 0.000000e+00 : f32
      %51 = vector.broadcast %cst_32 : f32 to vector<1x1x128xf32>
      %c0_33 = arith.constant 0 : index
      %c0_34 = arith.constant 0 : index
      %c0_35 = arith.constant 0 : index
      %52 = vector.load %arg6[%c0_33, %c0_34, %c0_35] : memref<1x1x128xf32, #tpu.memory_space<vmem>>, vector<1x1x128xf32>
      tpu.vector_store %arg6[%c0_33, %c0_34, %c0_35], %51 {strides = array<i32>} : memref<1x1x128xf32, #tpu.memory_space<vmem>>, vector<1x1x128xf32>,
      %cst_36 = arith.constant 0.000000e+00 : f32
      %53 = vector.broadcast %cst_36 : f32 to vector<1x1x128xf32>
      %c0_37 = arith.constant 0 : index
      %c0_38 = arith.constant 0 : index
      %c0_39 = arith.constant 0 : index
      %54 = vector.load %arg7[%c0_37, %c0_38, %c0_39] : memref<1x1x128xf32, #tpu.memory_space<vmem>>, vector<1x1x128xf32>
      tpu.vector_store %arg7[%c0_37, %c0_38, %c0_39], %53 {strides = array<i32>} : memref<1x1x128xf32, #tpu.memory_space<vmem>>, vector<1x1x128xf32>,
    } else {
    }
    %c0_i32_1 = arith.constant 0 : i32
    %3 = arith.addi %arg1, %c0_i32_1 : i32
    %c0 = arith.constant 0 : index
    %4 = arith.index_cast %3 : i32 to index
    %c0_2 = arith.constant 0 : index
    %c0_3 = arith.constant 0 : index
    %5 = vector.load %arg2[%c0, %4, %c0_2, %c0_3] : memref<1x6x6x128xf32, #tpu.memory_space<vmem>>, vector<1x1x6x128xf32>
    %6 = vector.shape_cast %5 : vector<1x1x6x128xf32> to vector<6x128xf32>
    %c1_i32 = arith.constant 1 : i32
    %7 = arith.addi %arg1, %c1_i32 : i32
    %c0_4 = arith.constant 0 : index
    %8 = arith.index_cast %7 : i32 to index
    %c0_5 = arith.constant 0 : index
    %c0_6 = arith.constant 0 : index
    %9 = vector.load %arg2[%c0_4, %8, %c0_5, %c0_6] : memref<1x6x6x128xf32, #tpu.memory_space<vmem>>, vector<1x1x6x128xf32>
    %10 = vector.shape_cast %9 : vector<1x1x6x128xf32> to vector<6x128xf32>
    %c2_i32 = arith.constant 2 : i32
    %11 = arith.addi %arg1, %c2_i32 : i32
    %c0_7 = arith.constant 0 : index
    %12 = arith.index_cast %11 : i32 to index
    %c0_8 = arith.constant 0 : index
    %c0_9 = arith.constant 0 : index
    %13 = vector.load %arg2[%c0_7, %12, %c0_8, %c0_9] : memref<1x6x6x128xf32, #tpu.memory_space<vmem>>, vector<1x1x6x128xf32>
    %14 = vector.shape_cast %13 : vector<1x1x6x128xf32> to vector<6x128xf32>
    %15 = vector.extract_strided_slice %6 {offsets = [0, 0], sizes = [4, 128], strides = [1, 1]} : vector<6x128xf32> to vector<4x128xf32>
    %16 = vector.extract_strided_slice %6 {offsets = [1, 0], sizes = [4, 128], strides = [1, 1]} : vector<6x128xf32> to vector<4x128xf32>
    %17 = vector.extract_strided_slice %6 {offsets = [2, 0], sizes = [4, 128], strides = [1, 1]} : vector<6x128xf32> to vector<4x128xf32>
    %18 = vector.extract_strided_slice %10 {offsets = [0, 0], sizes = [4, 128], strides = [1, 1]} : vector<6x128xf32> to vector<4x128xf32>
    %19 = vector.extract_strided_slice %10 {offsets = [1, 0], sizes = [4, 128], strides = [1, 1]} : vector<6x128xf32> to vector<4x128xf32>
    %20 = vector.extract_strided_slice %10 {offsets = [2, 0], sizes = [4, 128], strides = [1, 1]} : vector<6x128xf32> to vector<4x128xf32>
    %21 = vector.extract_strided_slice %14 {offsets = [0, 0], sizes = [4, 128], strides = [1, 1]} : vector<6x128xf32> to vector<4x128xf32>
    %22 = vector.extract_strided_slice %14 {offsets = [1, 0], sizes = [4, 128], strides = [1, 1]} : vector<6x128xf32> to vector<4x128xf32>
    %23 = vector.extract_strided_slice %14 {offsets = [2, 0], sizes = [4, 128], strides = [1, 1]} : vector<6x128xf32> to vector<4x128xf32>
    %24 = tpu.concatenate %15, %16, %17, %18, %19, %20, %21, %22, %23 in 1 : vector<4x128xf32>, vector<4x128xf32>, vector<4x128xf32>, vector<4x128xf32>, vector<4x128xf32>, vector<4x128xf32>, vector<4x128xf32>, vector<4x128xf32>, vector<4x128xf32> -> vector<4x1152xf32>
    %25 = arith.truncf %24 : vector<4x1152xf32> to vector<4x1152xbf16>
    %c0_10 = arith.constant 0 : index
    %c0_11 = arith.constant 0 : index
    %26 = vector.load %arg3[%c0_10, %c0_11] : memref<1152x128xbf16, #tpu.memory_space<vmem>>, vector<1152x128xbf16>
    %cst = arith.constant dense<0.000000e+00> : vector<4x128xf32>
    %27 = tpu.matmul %25, %26, %cst {dimension_numbers = #tpu.dot_dimension_numbers<[1], [0], [0], [1], [0, 0, 1, 1], [], []>} : vector<4x1152xbf16>, vector<1152x128xbf16>, vector<4x128xf32> -> vector<4x128xf32>
    %c0_12 = arith.constant 0 : index
    %c0_13 = arith.constant 0 : index
    %28 = vector.load %arg4[%c0_12, %c0_13] : memref<1x128xf32, #tpu.memory_space<vmem>>, vector<1x128xf32>
    %29 = vector.broadcast %28 : vector<1x128xf32> to vector<4x128xf32>
    %30 = arith.addf %27, %29 : vector<4x128xf32>
    %c0_14 = arith.constant 0 : index
    %c0_15 = arith.constant 0 : index
    %c0_16 = arith.constant 0 : index
    %c0_17 = arith.constant 0 : index
    %31 = vector.load %arg5[%c0_14, %c0_15, %c0_16, %c0_17] : memref<1x1x4x128xf32, #tpu.memory_space<vmem>>, vector<1x1x4x128xf32>
    %32 = vector.shape_cast %31 : vector<1x1x4x128xf32> to vector<4x128xf32>
    %33 = vector.shape_cast %30 : vector<4x128xf32> to vector<1x1x4x128xf32>
    tpu.vector_store %arg5[%c0_14, %c0_15, %c0_16, %c0_17], %33 {strides = array<i32>} : memref<1x1x4x128xf32, #tpu.memory_space<vmem>>, vector<1x1x4x128xf32>,
    %c0_18 = arith.constant 0 : index
    %c0_19 = arith.constant 0 : index
    %c0_20 = arith.constant 0 : index
    %34 = vector.load %arg6[%c0_18, %c0_19, %c0_20] : memref<1x1x128xf32, #tpu.memory_space<vmem>>, vector<1x1x128xf32>
    %35 = vector.shape_cast %34 : vector<1x1x128xf32> to vector<1x128xf32>
    %cst_21 = arith.constant dense<0.000000e+00> : vector<128xf32>
    %36 = vector.multi_reduction <add>, %30, %cst_21 [0] : vector<4x128xf32> to vector<128xf32>
    %37 = vector.shape_cast %36 : vector<128xf32> to vector<1x128xf32>
    %38 = arith.addf %35, %37 : vector<1x128xf32>
    %c0_22 = arith.constant 0 : index
    %c0_23 = arith.constant 0 : index
    %c0_24 = arith.constant 0 : index
    %39 = vector.load %arg6[%c0_22, %c0_23, %c0_24] : memref<1x1x128xf32, #tpu.memory_space<vmem>>, vector<1x1x128xf32>
    %40 = vector.shape_cast %39 : vector<1x1x128xf32> to vector<1x128xf32>
    %41 = vector.shape_cast %38 : vector<1x128xf32> to vector<1x1x128xf32>
    tpu.vector_store %arg6[%c0_22, %c0_23, %c0_24], %41 {strides = array<i32>} : memref<1x1x128xf32, #tpu.memory_space<vmem>>, vector<1x1x128xf32>,
    %c0_25 = arith.constant 0 : index
    %c0_26 = arith.constant 0 : index
    %c0_27 = arith.constant 0 : index
    %42 = vector.load %arg7[%c0_25, %c0_26, %c0_27] : memref<1x1x128xf32, #tpu.memory_space<vmem>>, vector<1x1x128xf32>
    %43 = vector.shape_cast %42 : vector<1x1x128xf32> to vector<1x128xf32>
    %44 = arith.mulf %30, %30 : vector<4x128xf32>
    %cst_28 = arith.constant dense<0.000000e+00> : vector<128xf32>
    %45 = vector.multi_reduction <add>, %44, %cst_28 [0] : vector<4x128xf32> to vector<128xf32>
    %46 = vector.shape_cast %45 : vector<128xf32> to vector<1x128xf32>
    %47 = arith.addf %43, %46 : vector<1x128xf32>
    %c0_29 = arith.constant 0 : index
    %c0_30 = arith.constant 0 : index
    %c0_31 = arith.constant 0 : index
    %48 = vector.load %arg7[%c0_29, %c0_30, %c0_31] : memref<1x1x128xf32, #tpu.memory_space<vmem>>, vector<1x1x128xf32>
    %49 = vector.shape_cast %48 : vector<1x1x128xf32> to vector<1x128xf32>
    %50 = vector.shape_cast %47 : vector<1x128xf32> to vector<1x1x128xf32>
    tpu.vector_store %arg7[%c0_29, %c0_30, %c0_31], %50 {strides = array<i32>} : memref<1x1x128xf32, #tpu.memory_space<vmem>>, vector<1x1x128xf32>,
    return
  }
  func.func @transform_0(%arg0: i32, %arg1: i32) -> (i32, i32, i32, i32) {
    %c0_i32 = arith.constant 0 : i32
    %c0_i32_0 = arith.constant 0 : i32
    %c0_i32_1 = arith.constant 0 : i32
    %c0_i32_2 = arith.constant 0 : i32
    return %arg0, %c0_i32, %c0_i32_0, %c0_i32_1 : i32, i32, i32, i32
  }
  func.func @transform_1(%arg0: i32, %arg1: i32) -> (i32, i32) {
    %c0_i32 = arith.constant 0 : i32
    %c0_i32_0 = arith.constant 0 : i32
    %c0_i32_1 = arith.constant 0 : i32
    return %c0_i32, %c0_i32_0 : i32, i32
  }
  func.func @transform_2(%arg0: i32, %arg1: i32) -> (i32, i32) {
    %c0_i32 = arith.constant 0 : i32
    %c0_i32_0 = arith.constant 0 : i32
    %c0_i32_1 = arith.constant 0 : i32
    return %c0_i32, %c0_i32_0 : i32, i32
  }
  func.func @transform_3(%arg0: i32, %arg1: i32) -> (i32, i32, i32, i32) {
    %c0_i32 = arith.constant 0 : i32
    %c0_i32_0 = arith.constant 0 : i32
    %c0_i32_1 = arith.constant 0 : i32
    return %arg0, %arg1, %c0_i32, %c0_i32_0 : i32, i32, i32, i32
  }
  func.func @transform_4(%arg0: i32, %arg1: i32) -> (i32, i32, i32) {
    %c0_i32 = arith.constant 0 : i32
    %c0_i32_0 = arith.constant 0 : i32
    %c0_i32_1 = arith.constant 0 : i32
    return %arg0, %c0_i32, %c0_i32_0 : i32, i32, i32
  }
  func.func @transform_5(%arg0: i32, %arg1: i32) -> (i32, i32, i32) {
    %c0_i32 = arith.constant 0 : i32
    %c0_i32_0 = arith.constant 0 : i32
    %c0_i32_1 = arith.constant 0 : i32
    return %arg0, %c0_i32, %c0_i32_0 : i32, i32, i32
  }
}

module attributes {stable_mosaic.version = 11 : i64} {
  func.func @_bn_relu_kernel(%arg0: i32, %arg1: memref<32x128xf32, #tpu.memory_space<vmem>>, %arg2: memref<1x128xf32, #tpu.memory_space<vmem>>, %arg3: memref<1x128xf32, #tpu.memory_space<vmem>>, %arg4: memref<32x128xf32, #tpu.memory_space<vmem>>) attributes {dimension_semantics = [#tpu.dimension_semantics<arbitrary>], iteration_bounds = array<i64: 1>, scalar_prefetch = 0 : i64, scratch_operands = 0 : i64, tpu.core_type = #tpu.core_type<tc>, window_params = [{pipeline_mode = #tpu.pipeline_mode<synchronous>, transform_indices = @transform_0, window_bounds = array<i64: 32, 128>}, {pipeline_mode = #tpu.pipeline_mode<synchronous>, transform_indices = @transform_1, window_bounds = array<i64: 1, 128>}, {pipeline_mode = #tpu.pipeline_mode<synchronous>, transform_indices = @transform_2, window_bounds = array<i64: 1, 128>}, {pipeline_mode = #tpu.pipeline_mode<synchronous>, transform_indices = @transform_3, window_bounds = array<i64: 32, 128>}]} {
    %c0 = arith.constant 0 : index
    %c0_0 = arith.constant 0 : index
    %0 = vector.load %arg1[%c0, %c0_0] : memref<32x128xf32, #tpu.memory_space<vmem>>, vector<32x128xf32>
    %c0_1 = arith.constant 0 : index
    %c0_2 = arith.constant 0 : index
    %1 = vector.load %arg2[%c0_1, %c0_2] : memref<1x128xf32, #tpu.memory_space<vmem>>, vector<1x128xf32>
    %2 = vector.broadcast %1 : vector<1x128xf32> to vector<32x128xf32>
    %3 = arith.mulf %0, %2 : vector<32x128xf32>
    %c0_3 = arith.constant 0 : index
    %c0_4 = arith.constant 0 : index
    %4 = vector.load %arg3[%c0_3, %c0_4] : memref<1x128xf32, #tpu.memory_space<vmem>>, vector<1x128xf32>
    %5 = vector.broadcast %4 : vector<1x128xf32> to vector<32x128xf32>
    %6 = arith.addf %3, %5 : vector<32x128xf32>
    %cst = arith.constant 0.000000e+00 : f32
    %7 = vector.broadcast %cst : f32 to vector<32x128xf32>
    %8 = arith.maximumf %6, %7 : vector<32x128xf32>
    %c0_5 = arith.constant 0 : index
    %c0_6 = arith.constant 0 : index
    %9 = vector.load %arg4[%c0_5, %c0_6] : memref<32x128xf32, #tpu.memory_space<vmem>>, vector<32x128xf32>
    tpu.vector_store %arg4[%c0_5, %c0_6], %8 {strides = array<i32>} : memref<32x128xf32, #tpu.memory_space<vmem>>, vector<32x128xf32>,
    return
  }
  func.func @transform_0(%arg0: i32) -> (i32, i32) {
    %c0_i32 = arith.constant 0 : i32
    %c0_i32_0 = arith.constant 0 : i32
    %c0_i32_1 = arith.constant 0 : i32
    return %c0_i32, %c0_i32_0 : i32, i32
  }
  func.func @transform_1(%arg0: i32) -> (i32, i32) {
    %c0_i32 = arith.constant 0 : i32
    %c0_i32_0 = arith.constant 0 : i32
    %c0_i32_1 = arith.constant 0 : i32
    return %c0_i32, %c0_i32_0 : i32, i32
  }
  func.func @transform_2(%arg0: i32) -> (i32, i32) {
    %c0_i32 = arith.constant 0 : i32
    %c0_i32_0 = arith.constant 0 : i32
    %c0_i32_1 = arith.constant 0 : i32
    return %c0_i32, %c0_i32_0 : i32, i32
  }
  func.func @transform_3(%arg0: i32) -> (i32, i32) {
    %c0_i32 = arith.constant 0 : i32
    %c0_i32_0 = arith.constant 0 : i32
    %c0_i32_1 = arith.constant 0 : i32
    return %c0_i32, %c0_i32_0 : i32, i32
  }
}

module attributes {stable_mosaic.version = 11 : i64} {
  func.func @_tconv4x4s2_kernel(%arg0: i32, %arg1: i32, %arg2: memref<1x6x6x128xf32, #tpu.memory_space<vmem>>, %arg3: memref<2x2x512x128xbf16, #tpu.memory_space<vmem>>, %arg4: memref<1x128xf32, #tpu.memory_space<vmem>>, %arg5: memref<1x1x4x128xf32, #tpu.memory_space<vmem>>, %arg6: memref<1x1x4x128xf32, #tpu.memory_space<vmem>>, %arg7: memref<1x1x4x128xf32, #tpu.memory_space<vmem>>, %arg8: memref<1x1x4x128xf32, #tpu.memory_space<vmem>>) attributes {dimension_semantics = [#tpu.dimension_semantics<parallel>, #tpu.dimension_semantics<parallel>], iteration_bounds = array<i64: 2, 4>, scalar_prefetch = 0 : i64, scratch_operands = 0 : i64, tpu.core_type = #tpu.core_type<tc>, window_params = [{transform_indices = @transform_0, window_bounds = array<i64: 1, 6, 6, 128>}, {pipeline_mode = #tpu.pipeline_mode<synchronous>, transform_indices = @transform_1, window_bounds = array<i64: 2, 2, 512, 128>}, {pipeline_mode = #tpu.pipeline_mode<synchronous>, transform_indices = @transform_2, window_bounds = array<i64: 1, 128>}, {transform_indices = @transform_3, window_bounds = array<i64: 1, 1, 4, 128>}, {transform_indices = @transform_4, window_bounds = array<i64: 1, 1, 4, 128>}, {transform_indices = @transform_5, window_bounds = array<i64: 1, 1, 4, 128>}, {transform_indices = @transform_6, window_bounds = array<i64: 1, 1, 4, 128>}]} {
    %c1_i32 = arith.constant 1 : i32
    %0 = arith.addi %arg1, %c1_i32 : i32
    %c0 = arith.constant 0 : index
    %1 = arith.index_cast %0 : i32 to index
    %c0_0 = arith.constant 0 : index
    %c0_1 = arith.constant 0 : index
    %2 = vector.load %arg2[%c0, %1, %c0_0, %c0_1] : memref<1x6x6x128xf32, #tpu.memory_space<vmem>>, vector<1x1x6x128xf32>
    %3 = vector.shape_cast %2 : vector<1x1x6x128xf32> to vector<6x128xf32>
    %c0_2 = arith.constant 0 : index
    %4 = arith.index_cast %arg1 : i32 to index
    %c0_3 = arith.constant 0 : index
    %c0_4 = arith.constant 0 : index
    %5 = vector.load %arg2[%c0_2, %4, %c0_3, %c0_4] : memref<1x6x6x128xf32, #tpu.memory_space<vmem>>, vector<1x1x6x128xf32>
    %6 = vector.shape_cast %5 : vector<1x1x6x128xf32> to vector<6x128xf32>
    %c2_i32 = arith.constant 2 : i32
    %7 = arith.addi %arg1, %c2_i32 : i32
    %c0_5 = arith.constant 0 : index
    %8 = arith.index_cast %7 : i32 to index
    %c0_6 = arith.constant 0 : index
    %c0_7 = arith.constant 0 : index
    %9 = vector.load %arg2[%c0_5, %8, %c0_6, %c0_7] : memref<1x6x6x128xf32, #tpu.memory_space<vmem>>, vector<1x1x6x128xf32>
    %10 = vector.shape_cast %9 : vector<1x1x6x128xf32> to vector<6x128xf32>
    %11 = vector.extract_strided_slice %3 {offsets = [1, 0], sizes = [4, 128], strides = [1, 1]} : vector<6x128xf32> to vector<4x128xf32>
    %12 = vector.extract_strided_slice %3 {offsets = [0, 0], sizes = [4, 128], strides = [1, 1]} : vector<6x128xf32> to vector<4x128xf32>
    %13 = vector.extract_strided_slice %6 {offsets = [1, 0], sizes = [4, 128], strides = [1, 1]} : vector<6x128xf32> to vector<4x128xf32>
    %14 = vector.extract_strided_slice %6 {offsets = [0, 0], sizes = [4, 128], strides = [1, 1]} : vector<6x128xf32> to vector<4x128xf32>
    %15 = tpu.concatenate %11, %12, %13, %14 in 1 : vector<4x128xf32>, vector<4x128xf32>, vector<4x128xf32>, vector<4x128xf32> -> vector<4x512xf32>
    %16 = arith.truncf %15 : vector<4x512xf32> to vector<4x512xbf16>
    %c0_8 = arith.constant 0 : index
    %c0_9 = arith.constant 0 : index
    %c0_10 = arith.constant 0 : index
    %c0_11 = arith.constant 0 : index
    %17 = vector.load %arg3[%c0_8, %c0_9, %c0_10, %c0_11] : memref<2x2x512x128xbf16, #tpu.memory_space<vmem>>, vector<1x1x512x128xbf16>
    %18 = vector.shape_cast %17 : vector<1x1x512x128xbf16> to vector<512x128xbf16>
    %cst = arith.constant dense<0.000000e+00> : vector<4x128xf32>
    %19 = tpu.matmul %16, %18, %cst {dimension_numbers = #tpu.dot_dimension_numbers<[1], [0], [0], [1], [0, 0, 1, 1], [], []>} : vector<4x512xbf16>, vector<512x128xbf16>, vector<4x128xf32> -> vector<4x128xf32>
    %c0_12 = arith.constant 0 : index
    %c0_13 = arith.constant 0 : index
    %20 = vector.load %arg4[%c0_12, %c0_13] : memref<1x128xf32, #tpu.memory_space<vmem>>, vector<1x128xf32>
    %21 = vector.broadcast %20 : vector<1x128xf32> to vector<4x128xf32>
    %22 = arith.addf %19, %21 : vector<4x128xf32>
    %c0_14 = arith.constant 0 : index
    %c0_15 = arith.constant 0 : index
    %c0_16 = arith.constant 0 : index
    %c0_17 = arith.constant 0 : index
    %23 = vector.load %arg5[%c0_14, %c0_15, %c0_16, %c0_17] : memref<1x1x4x128xf32, #tpu.memory_space<vmem>>, vector<1x1x4x128xf32>
    %24 = vector.shape_cast %23 : vector<1x1x4x128xf32> to vector<4x128xf32>
    %25 = vector.shape_cast %22 : vector<4x128xf32> to vector<1x1x4x128xf32>
    tpu.vector_store %arg5[%c0_14, %c0_15, %c0_16, %c0_17], %25 {strides = array<i32>} : memref<1x1x4x128xf32, #tpu.memory_space<vmem>>, vector<1x1x4x128xf32>,
    %26 = vector.extract_strided_slice %3 {offsets = [1, 0], sizes = [4, 128], strides = [1, 1]} : vector<6x128xf32> to vector<4x128xf32>
    %27 = vector.extract_strided_slice %3 {offsets = [2, 0], sizes = [4, 128], strides = [1, 1]} : vector<6x128xf32> to vector<4x128xf32>
    %28 = vector.extract_strided_slice %6 {offsets = [1, 0], sizes = [4, 128], strides = [1, 1]} : vector<6x128xf32> to vector<4x128xf32>
    %29 = vector.extract_strided_slice %6 {offsets = [2, 0], sizes = [4, 128], strides = [1, 1]} : vector<6x128xf32> to vector<4x128xf32>
    %30 = tpu.concatenate %26, %27, %28, %29 in 1 : vector<4x128xf32>, vector<4x128xf32>, vector<4x128xf32>, vector<4x128xf32> -> vector<4x512xf32>
    %31 = arith.truncf %30 : vector<4x512xf32> to vector<4x512xbf16>
    %c0_18 = arith.constant 0 : index
    %c1 = arith.constant 1 : index
    %c0_19 = arith.constant 0 : index
    %c0_20 = arith.constant 0 : index
    %32 = vector.load %arg3[%c0_18, %c1, %c0_19, %c0_20] : memref<2x2x512x128xbf16, #tpu.memory_space<vmem>>, vector<1x1x512x128xbf16>
    %33 = vector.shape_cast %32 : vector<1x1x512x128xbf16> to vector<512x128xbf16>
    %cst_21 = arith.constant dense<0.000000e+00> : vector<4x128xf32>
    %34 = tpu.matmul %31, %33, %cst_21 {dimension_numbers = #tpu.dot_dimension_numbers<[1], [0], [0], [1], [0, 0, 1, 1], [], []>} : vector<4x512xbf16>, vector<512x128xbf16>, vector<4x128xf32> -> vector<4x128xf32>
    %c0_22 = arith.constant 0 : index
    %c0_23 = arith.constant 0 : index
    %35 = vector.load %arg4[%c0_22, %c0_23] : memref<1x128xf32, #tpu.memory_space<vmem>>, vector<1x128xf32>
    %36 = vector.broadcast %35 : vector<1x128xf32> to vector<4x128xf32>
    %37 = arith.addf %34, %36 : vector<4x128xf32>
    %c0_24 = arith.constant 0 : index
    %c0_25 = arith.constant 0 : index
    %c0_26 = arith.constant 0 : index
    %c0_27 = arith.constant 0 : index
    %38 = vector.load %arg6[%c0_24, %c0_25, %c0_26, %c0_27] : memref<1x1x4x128xf32, #tpu.memory_space<vmem>>, vector<1x1x4x128xf32>
    %39 = vector.shape_cast %38 : vector<1x1x4x128xf32> to vector<4x128xf32>
    %40 = vector.shape_cast %37 : vector<4x128xf32> to vector<1x1x4x128xf32>
    tpu.vector_store %arg6[%c0_24, %c0_25, %c0_26, %c0_27], %40 {strides = array<i32>} : memref<1x1x4x128xf32, #tpu.memory_space<vmem>>, vector<1x1x4x128xf32>,
    %41 = vector.extract_strided_slice %3 {offsets = [1, 0], sizes = [4, 128], strides = [1, 1]} : vector<6x128xf32> to vector<4x128xf32>
    %42 = vector.extract_strided_slice %3 {offsets = [0, 0], sizes = [4, 128], strides = [1, 1]} : vector<6x128xf32> to vector<4x128xf32>
    %43 = vector.extract_strided_slice %10 {offsets = [1, 0], sizes = [4, 128], strides = [1, 1]} : vector<6x128xf32> to vector<4x128xf32>
    %44 = vector.extract_strided_slice %10 {offsets = [0, 0], sizes = [4, 128], strides = [1, 1]} : vector<6x128xf32> to vector<4x128xf32>
    %45 = tpu.concatenate %41, %42, %43, %44 in 1 : vector<4x128xf32>, vector<4x128xf32>, vector<4x128xf32>, vector<4x128xf32> -> vector<4x512xf32>
    %46 = arith.truncf %45 : vector<4x512xf32> to vector<4x512xbf16>
    %c1_28 = arith.constant 1 : index
    %c0_29 = arith.constant 0 : index
    %c0_30 = arith.constant 0 : index
    %c0_31 = arith.constant 0 : index
    %47 = vector.load %arg3[%c1_28, %c0_29, %c0_30, %c0_31] : memref<2x2x512x128xbf16, #tpu.memory_space<vmem>>, vector<1x1x512x128xbf16>
    %48 = vector.shape_cast %47 : vector<1x1x512x128xbf16> to vector<512x128xbf16>
    %cst_32 = arith.constant dense<0.000000e+00> : vector<4x128xf32>
    %49 = tpu.matmul %46, %48, %cst_32 {dimension_numbers = #tpu.dot_dimension_numbers<[1], [0], [0], [1], [0, 0, 1, 1], [], []>} : vector<4x512xbf16>, vector<512x128xbf16>, vector<4x128xf32> -> vector<4x128xf32>
    %c0_33 = arith.constant 0 : index
    %c0_34 = arith.constant 0 : index
    %50 = vector.load %arg4[%c0_33, %c0_34] : memref<1x128xf32, #tpu.memory_space<vmem>>, vector<1x128xf32>
    %51 = vector.broadcast %50 : vector<1x128xf32> to vector<4x128xf32>
    %52 = arith.addf %49, %51 : vector<4x128xf32>
    %c0_35 = arith.constant 0 : index
    %c0_36 = arith.constant 0 : index
    %c0_37 = arith.constant 0 : index
    %c0_38 = arith.constant 0 : index
    %53 = vector.load %arg7[%c0_35, %c0_36, %c0_37, %c0_38] : memref<1x1x4x128xf32, #tpu.memory_space<vmem>>, vector<1x1x4x128xf32>
    %54 = vector.shape_cast %53 : vector<1x1x4x128xf32> to vector<4x128xf32>
    %55 = vector.shape_cast %52 : vector<4x128xf32> to vector<1x1x4x128xf32>
    tpu.vector_store %arg7[%c0_35, %c0_36, %c0_37, %c0_38], %55 {strides = array<i32>} : memref<1x1x4x128xf32, #tpu.memory_space<vmem>>, vector<1x1x4x128xf32>,
    %56 = vector.extract_strided_slice %3 {offsets = [1, 0], sizes = [4, 128], strides = [1, 1]} : vector<6x128xf32> to vector<4x128xf32>
    %57 = vector.extract_strided_slice %3 {offsets = [2, 0], sizes = [4, 128], strides = [1, 1]} : vector<6x128xf32> to vector<4x128xf32>
    %58 = vector.extract_strided_slice %10 {offsets = [1, 0], sizes = [4, 128], strides = [1, 1]} : vector<6x128xf32> to vector<4x128xf32>
    %59 = vector.extract_strided_slice %10 {offsets = [2, 0], sizes = [4, 128], strides = [1, 1]} : vector<6x128xf32> to vector<4x128xf32>
    %60 = tpu.concatenate %56, %57, %58, %59 in 1 : vector<4x128xf32>, vector<4x128xf32>, vector<4x128xf32>, vector<4x128xf32> -> vector<4x512xf32>
    %61 = arith.truncf %60 : vector<4x512xf32> to vector<4x512xbf16>
    %c1_39 = arith.constant 1 : index
    %c1_40 = arith.constant 1 : index
    %c0_41 = arith.constant 0 : index
    %c0_42 = arith.constant 0 : index
    %62 = vector.load %arg3[%c1_39, %c1_40, %c0_41, %c0_42] : memref<2x2x512x128xbf16, #tpu.memory_space<vmem>>, vector<1x1x512x128xbf16>
    %63 = vector.shape_cast %62 : vector<1x1x512x128xbf16> to vector<512x128xbf16>
    %cst_43 = arith.constant dense<0.000000e+00> : vector<4x128xf32>
    %64 = tpu.matmul %61, %63, %cst_43 {dimension_numbers = #tpu.dot_dimension_numbers<[1], [0], [0], [1], [0, 0, 1, 1], [], []>} : vector<4x512xbf16>, vector<512x128xbf16>, vector<4x128xf32> -> vector<4x128xf32>
    %c0_44 = arith.constant 0 : index
    %c0_45 = arith.constant 0 : index
    %65 = vector.load %arg4[%c0_44, %c0_45] : memref<1x128xf32, #tpu.memory_space<vmem>>, vector<1x128xf32>
    %66 = vector.broadcast %65 : vector<1x128xf32> to vector<4x128xf32>
    %67 = arith.addf %64, %66 : vector<4x128xf32>
    %c0_46 = arith.constant 0 : index
    %c0_47 = arith.constant 0 : index
    %c0_48 = arith.constant 0 : index
    %c0_49 = arith.constant 0 : index
    %68 = vector.load %arg8[%c0_46, %c0_47, %c0_48, %c0_49] : memref<1x1x4x128xf32, #tpu.memory_space<vmem>>, vector<1x1x4x128xf32>
    %69 = vector.shape_cast %68 : vector<1x1x4x128xf32> to vector<4x128xf32>
    %70 = vector.shape_cast %67 : vector<4x128xf32> to vector<1x1x4x128xf32>
    tpu.vector_store %arg8[%c0_46, %c0_47, %c0_48, %c0_49], %70 {strides = array<i32>} : memref<1x1x4x128xf32, #tpu.memory_space<vmem>>, vector<1x1x4x128xf32>,
    return
  }
  func.func @transform_0(%arg0: i32, %arg1: i32) -> (i32, i32, i32, i32) {
    %c0_i32 = arith.constant 0 : i32
    %c0_i32_0 = arith.constant 0 : i32
    %c0_i32_1 = arith.constant 0 : i32
    %c0_i32_2 = arith.constant 0 : i32
    return %arg0, %c0_i32, %c0_i32_0, %c0_i32_1 : i32, i32, i32, i32
  }
  func.func @transform_1(%arg0: i32, %arg1: i32) -> (i32, i32, i32, i32) {
    %c0_i32 = arith.constant 0 : i32
    %c0_i32_0 = arith.constant 0 : i32
    %c0_i32_1 = arith.constant 0 : i32
    %c0_i32_2 = arith.constant 0 : i32
    %c0_i32_3 = arith.constant 0 : i32
    return %c0_i32, %c0_i32_0, %c0_i32_1, %c0_i32_2 : i32, i32, i32, i32
  }
  func.func @transform_2(%arg0: i32, %arg1: i32) -> (i32, i32) {
    %c0_i32 = arith.constant 0 : i32
    %c0_i32_0 = arith.constant 0 : i32
    %c0_i32_1 = arith.constant 0 : i32
    return %c0_i32, %c0_i32_0 : i32, i32
  }
  func.func @transform_3(%arg0: i32, %arg1: i32) -> (i32, i32, i32, i32) {
    %c0_i32 = arith.constant 0 : i32
    %c0_i32_0 = arith.constant 0 : i32
    %c0_i32_1 = arith.constant 0 : i32
    return %arg0, %arg1, %c0_i32, %c0_i32_0 : i32, i32, i32, i32
  }
  func.func @transform_4(%arg0: i32, %arg1: i32) -> (i32, i32, i32, i32) {
    %c0_i32 = arith.constant 0 : i32
    %c0_i32_0 = arith.constant 0 : i32
    %c0_i32_1 = arith.constant 0 : i32
    return %arg0, %arg1, %c0_i32, %c0_i32_0 : i32, i32, i32, i32
  }
  func.func @transform_5(%arg0: i32, %arg1: i32) -> (i32, i32, i32, i32) {
    %c0_i32 = arith.constant 0 : i32
    %c0_i32_0 = arith.constant 0 : i32
    %c0_i32_1 = arith.constant 0 : i32
    return %arg0, %arg1, %c0_i32, %c0_i32_0 : i32, i32, i32, i32
  }
  func.func @transform_6(%arg0: i32, %arg1: i32) -> (i32, i32, i32, i32) {
    %c0_i32 = arith.constant 0 : i32
    %c0_i32_0 = arith.constant 0 : i32
    %c0_i32_1 = arith.constant 0 : i32
    return %arg0, %arg1, %c0_i32, %c0_i32_0 : i32, i32, i32, i32
  }
}

module attributes {stable_mosaic.version = 11 : i64} {
  func.func @_conv3x3_stats_kernel(%arg0: i32, %arg1: i32, %arg2: memref<1x10x10x128xf32, #tpu.memory_space<vmem>>, %arg3: memref<1152x128xbf16, #tpu.memory_space<vmem>>, %arg4: memref<1x128xf32, #tpu.memory_space<vmem>>, %arg5: memref<1x1x8x128xf32, #tpu.memory_space<vmem>>, %arg6: memref<1x1x128xf32, #tpu.memory_space<vmem>>, %arg7: memref<1x1x128xf32, #tpu.memory_space<vmem>>) attributes {dimension_semantics = [#tpu.dimension_semantics<parallel>, #tpu.dimension_semantics<arbitrary>], iteration_bounds = array<i64: 2, 8>, scalar_prefetch = 0 : i64, scratch_operands = 0 : i64, tpu.core_type = #tpu.core_type<tc>, window_params = [{transform_indices = @transform_0, window_bounds = array<i64: 1, 10, 10, 128>}, {pipeline_mode = #tpu.pipeline_mode<synchronous>, transform_indices = @transform_1, window_bounds = array<i64: 1152, 128>}, {pipeline_mode = #tpu.pipeline_mode<synchronous>, transform_indices = @transform_2, window_bounds = array<i64: 1, 128>}, {transform_indices = @transform_3, window_bounds = array<i64: 1, 1, 8, 128>}, {transform_indices = @transform_4, window_bounds = array<i64: 1, 1, 128>}, {transform_indices = @transform_5, window_bounds = array<i64: 1, 1, 128>}]} {
    %c0_i32 = arith.constant 0 : i32
    %0 = arith.cmpi eq, %arg1, %c0_i32 : i32
    %1 = arith.extui %0 : i1 to i32
    %c0_i32_0 = arith.constant 0 : i32
    %2 = arith.cmpi ne, %1, %c0_i32_0 : i32
    scf.if %2 {
      %cst_32 = arith.constant 0.000000e+00 : f32
      %51 = vector.broadcast %cst_32 : f32 to vector<1x1x128xf32>
      %c0_33 = arith.constant 0 : index
      %c0_34 = arith.constant 0 : index
      %c0_35 = arith.constant 0 : index
      %52 = vector.load %arg6[%c0_33, %c0_34, %c0_35] : memref<1x1x128xf32, #tpu.memory_space<vmem>>, vector<1x1x128xf32>
      tpu.vector_store %arg6[%c0_33, %c0_34, %c0_35], %51 {strides = array<i32>} : memref<1x1x128xf32, #tpu.memory_space<vmem>>, vector<1x1x128xf32>,
      %cst_36 = arith.constant 0.000000e+00 : f32
      %53 = vector.broadcast %cst_36 : f32 to vector<1x1x128xf32>
      %c0_37 = arith.constant 0 : index
      %c0_38 = arith.constant 0 : index
      %c0_39 = arith.constant 0 : index
      %54 = vector.load %arg7[%c0_37, %c0_38, %c0_39] : memref<1x1x128xf32, #tpu.memory_space<vmem>>, vector<1x1x128xf32>
      tpu.vector_store %arg7[%c0_37, %c0_38, %c0_39], %53 {strides = array<i32>} : memref<1x1x128xf32, #tpu.memory_space<vmem>>, vector<1x1x128xf32>,
    } else {
    }
    %c0_i32_1 = arith.constant 0 : i32
    %3 = arith.addi %arg1, %c0_i32_1 : i32
    %c0 = arith.constant 0 : index
    %4 = arith.index_cast %3 : i32 to index
    %c0_2 = arith.constant 0 : index
    %c0_3 = arith.constant 0 : index
    %5 = vector.load %arg2[%c0, %4, %c0_2, %c0_3] : memref<1x10x10x128xf32, #tpu.memory_space<vmem>>, vector<1x1x10x128xf32>
    %6 = vector.shape_cast %5 : vector<1x1x10x128xf32> to vector<10x128xf32>
    %c1_i32 = arith.constant 1 : i32
    %7 = arith.addi %arg1, %c1_i32 : i32
    %c0_4 = arith.constant 0 : index
    %8 = arith.index_cast %7 : i32 to index
    %c0_5 = arith.constant 0 : index
    %c0_6 = arith.constant 0 : index
    %9 = vector.load %arg2[%c0_4, %8, %c0_5, %c0_6] : memref<1x10x10x128xf32, #tpu.memory_space<vmem>>, vector<1x1x10x128xf32>
    %10 = vector.shape_cast %9 : vector<1x1x10x128xf32> to vector<10x128xf32>
    %c2_i32 = arith.constant 2 : i32
    %11 = arith.addi %arg1, %c2_i32 : i32
    %c0_7 = arith.constant 0 : index
    %12 = arith.index_cast %11 : i32 to index
    %c0_8 = arith.constant 0 : index
    %c0_9 = arith.constant 0 : index
    %13 = vector.load %arg2[%c0_7, %12, %c0_8, %c0_9] : memref<1x10x10x128xf32, #tpu.memory_space<vmem>>, vector<1x1x10x128xf32>
    %14 = vector.shape_cast %13 : vector<1x1x10x128xf32> to vector<10x128xf32>
    %15 = vector.extract_strided_slice %6 {offsets = [0, 0], sizes = [8, 128], strides = [1, 1]} : vector<10x128xf32> to vector<8x128xf32>
    %16 = vector.extract_strided_slice %6 {offsets = [1, 0], sizes = [8, 128], strides = [1, 1]} : vector<10x128xf32> to vector<8x128xf32>
    %17 = vector.extract_strided_slice %6 {offsets = [2, 0], sizes = [8, 128], strides = [1, 1]} : vector<10x128xf32> to vector<8x128xf32>
    %18 = vector.extract_strided_slice %10 {offsets = [0, 0], sizes = [8, 128], strides = [1, 1]} : vector<10x128xf32> to vector<8x128xf32>
    %19 = vector.extract_strided_slice %10 {offsets = [1, 0], sizes = [8, 128], strides = [1, 1]} : vector<10x128xf32> to vector<8x128xf32>
    %20 = vector.extract_strided_slice %10 {offsets = [2, 0], sizes = [8, 128], strides = [1, 1]} : vector<10x128xf32> to vector<8x128xf32>
    %21 = vector.extract_strided_slice %14 {offsets = [0, 0], sizes = [8, 128], strides = [1, 1]} : vector<10x128xf32> to vector<8x128xf32>
    %22 = vector.extract_strided_slice %14 {offsets = [1, 0], sizes = [8, 128], strides = [1, 1]} : vector<10x128xf32> to vector<8x128xf32>
    %23 = vector.extract_strided_slice %14 {offsets = [2, 0], sizes = [8, 128], strides = [1, 1]} : vector<10x128xf32> to vector<8x128xf32>
    %24 = tpu.concatenate %15, %16, %17, %18, %19, %20, %21, %22, %23 in 1 : vector<8x128xf32>, vector<8x128xf32>, vector<8x128xf32>, vector<8x128xf32>, vector<8x128xf32>, vector<8x128xf32>, vector<8x128xf32>, vector<8x128xf32>, vector<8x128xf32> -> vector<8x1152xf32>
    %25 = arith.truncf %24 : vector<8x1152xf32> to vector<8x1152xbf16>
    %c0_10 = arith.constant 0 : index
    %c0_11 = arith.constant 0 : index
    %26 = vector.load %arg3[%c0_10, %c0_11] : memref<1152x128xbf16, #tpu.memory_space<vmem>>, vector<1152x128xbf16>
    %cst = arith.constant dense<0.000000e+00> : vector<8x128xf32>
    %27 = tpu.matmul %25, %26, %cst {dimension_numbers = #tpu.dot_dimension_numbers<[1], [0], [0], [1], [0, 0, 1, 1], [], []>} : vector<8x1152xbf16>, vector<1152x128xbf16>, vector<8x128xf32> -> vector<8x128xf32>
    %c0_12 = arith.constant 0 : index
    %c0_13 = arith.constant 0 : index
    %28 = vector.load %arg4[%c0_12, %c0_13] : memref<1x128xf32, #tpu.memory_space<vmem>>, vector<1x128xf32>
    %29 = vector.broadcast %28 : vector<1x128xf32> to vector<8x128xf32>
    %30 = arith.addf %27, %29 : vector<8x128xf32>
    %c0_14 = arith.constant 0 : index
    %c0_15 = arith.constant 0 : index
    %c0_16 = arith.constant 0 : index
    %c0_17 = arith.constant 0 : index
    %31 = vector.load %arg5[%c0_14, %c0_15, %c0_16, %c0_17] : memref<1x1x8x128xf32, #tpu.memory_space<vmem>>, vector<1x1x8x128xf32>
    %32 = vector.shape_cast %31 : vector<1x1x8x128xf32> to vector<8x128xf32>
    %33 = vector.shape_cast %30 : vector<8x128xf32> to vector<1x1x8x128xf32>
    tpu.vector_store %arg5[%c0_14, %c0_15, %c0_16, %c0_17], %33 {strides = array<i32>} : memref<1x1x8x128xf32, #tpu.memory_space<vmem>>, vector<1x1x8x128xf32>,
    %c0_18 = arith.constant 0 : index
    %c0_19 = arith.constant 0 : index
    %c0_20 = arith.constant 0 : index
    %34 = vector.load %arg6[%c0_18, %c0_19, %c0_20] : memref<1x1x128xf32, #tpu.memory_space<vmem>>, vector<1x1x128xf32>
    %35 = vector.shape_cast %34 : vector<1x1x128xf32> to vector<1x128xf32>
    %cst_21 = arith.constant dense<0.000000e+00> : vector<128xf32>
    %36 = vector.multi_reduction <add>, %30, %cst_21 [0] : vector<8x128xf32> to vector<128xf32>
    %37 = vector.shape_cast %36 : vector<128xf32> to vector<1x128xf32>
    %38 = arith.addf %35, %37 : vector<1x128xf32>
    %c0_22 = arith.constant 0 : index
    %c0_23 = arith.constant 0 : index
    %c0_24 = arith.constant 0 : index
    %39 = vector.load %arg6[%c0_22, %c0_23, %c0_24] : memref<1x1x128xf32, #tpu.memory_space<vmem>>, vector<1x1x128xf32>
    %40 = vector.shape_cast %39 : vector<1x1x128xf32> to vector<1x128xf32>
    %41 = vector.shape_cast %38 : vector<1x128xf32> to vector<1x1x128xf32>
    tpu.vector_store %arg6[%c0_22, %c0_23, %c0_24], %41 {strides = array<i32>} : memref<1x1x128xf32, #tpu.memory_space<vmem>>, vector<1x1x128xf32>,
    %c0_25 = arith.constant 0 : index
    %c0_26 = arith.constant 0 : index
    %c0_27 = arith.constant 0 : index
    %42 = vector.load %arg7[%c0_25, %c0_26, %c0_27] : memref<1x1x128xf32, #tpu.memory_space<vmem>>, vector<1x1x128xf32>
    %43 = vector.shape_cast %42 : vector<1x1x128xf32> to vector<1x128xf32>
    %44 = arith.mulf %30, %30 : vector<8x128xf32>
    %cst_28 = arith.constant dense<0.000000e+00> : vector<128xf32>
    %45 = vector.multi_reduction <add>, %44, %cst_28 [0] : vector<8x128xf32> to vector<128xf32>
    %46 = vector.shape_cast %45 : vector<128xf32> to vector<1x128xf32>
    %47 = arith.addf %43, %46 : vector<1x128xf32>
    %c0_29 = arith.constant 0 : index
    %c0_30 = arith.constant 0 : index
    %c0_31 = arith.constant 0 : index
    %48 = vector.load %arg7[%c0_29, %c0_30, %c0_31] : memref<1x1x128xf32, #tpu.memory_space<vmem>>, vector<1x1x128xf32>
    %49 = vector.shape_cast %48 : vector<1x1x128xf32> to vector<1x128xf32>
    %50 = vector.shape_cast %47 : vector<1x128xf32> to vector<1x1x128xf32>
    tpu.vector_store %arg7[%c0_29, %c0_30, %c0_31], %50 {strides = array<i32>} : memref<1x1x128xf32, #tpu.memory_space<vmem>>, vector<1x1x128xf32>,
    return
  }
  func.func @transform_0(%arg0: i32, %arg1: i32) -> (i32, i32, i32, i32) {
    %c0_i32 = arith.constant 0 : i32
    %c0_i32_0 = arith.constant 0 : i32
    %c0_i32_1 = arith.constant 0 : i32
    %c0_i32_2 = arith.constant 0 : i32
    return %arg0, %c0_i32, %c0_i32_0, %c0_i32_1 : i32, i32, i32, i32
  }
  func.func @transform_1(%arg0: i32, %arg1: i32) -> (i32, i32) {
    %c0_i32 = arith.constant 0 : i32
    %c0_i32_0 = arith.constant 0 : i32
    %c0_i32_1 = arith.constant 0 : i32
    return %c0_i32, %c0_i32_0 : i32, i32
  }
  func.func @transform_2(%arg0: i32, %arg1: i32) -> (i32, i32) {
    %c0_i32 = arith.constant 0 : i32
    %c0_i32_0 = arith.constant 0 : i32
    %c0_i32_1 = arith.constant 0 : i32
    return %c0_i32, %c0_i32_0 : i32, i32
  }
  func.func @transform_3(%arg0: i32, %arg1: i32) -> (i32, i32, i32, i32) {
    %c0_i32 = arith.constant 0 : i32
    %c0_i32_0 = arith.constant 0 : i32
    %c0_i32_1 = arith.constant 0 : i32
    return %arg0, %arg1, %c0_i32, %c0_i32_0 : i32, i32, i32, i32
  }
  func.func @transform_4(%arg0: i32, %arg1: i32) -> (i32, i32, i32) {
    %c0_i32 = arith.constant 0 : i32
    %c0_i32_0 = arith.constant 0 : i32
    %c0_i32_1 = arith.constant 0 : i32
    return %arg0, %c0_i32, %c0_i32_0 : i32, i32, i32
  }
  func.func @transform_5(%arg0: i32, %arg1: i32) -> (i32, i32, i32) {
    %c0_i32 = arith.constant 0 : i32
    %c0_i32_0 = arith.constant 0 : i32
    %c0_i32_1 = arith.constant 0 : i32
    return %arg0, %c0_i32, %c0_i32_0 : i32, i32, i32
  }
}

module attributes {stable_mosaic.version = 11 : i64} {
  func.func @_bn_relu_kernel(%arg0: i32, %arg1: memref<128x128xf32, #tpu.memory_space<vmem>>, %arg2: memref<1x128xf32, #tpu.memory_space<vmem>>, %arg3: memref<1x128xf32, #tpu.memory_space<vmem>>, %arg4: memref<128x128xf32, #tpu.memory_space<vmem>>) attributes {dimension_semantics = [#tpu.dimension_semantics<arbitrary>], iteration_bounds = array<i64: 1>, scalar_prefetch = 0 : i64, scratch_operands = 0 : i64, tpu.core_type = #tpu.core_type<tc>, window_params = [{pipeline_mode = #tpu.pipeline_mode<synchronous>, transform_indices = @transform_0, window_bounds = array<i64: 128, 128>}, {pipeline_mode = #tpu.pipeline_mode<synchronous>, transform_indices = @transform_1, window_bounds = array<i64: 1, 128>}, {pipeline_mode = #tpu.pipeline_mode<synchronous>, transform_indices = @transform_2, window_bounds = array<i64: 1, 128>}, {pipeline_mode = #tpu.pipeline_mode<synchronous>, transform_indices = @transform_3, window_bounds = array<i64: 128, 128>}]} {
    %c0 = arith.constant 0 : index
    %c0_0 = arith.constant 0 : index
    %0 = vector.load %arg1[%c0, %c0_0] : memref<128x128xf32, #tpu.memory_space<vmem>>, vector<128x128xf32>
    %c0_1 = arith.constant 0 : index
    %c0_2 = arith.constant 0 : index
    %1 = vector.load %arg2[%c0_1, %c0_2] : memref<1x128xf32, #tpu.memory_space<vmem>>, vector<1x128xf32>
    %2 = vector.broadcast %1 : vector<1x128xf32> to vector<128x128xf32>
    %3 = arith.mulf %0, %2 : vector<128x128xf32>
    %c0_3 = arith.constant 0 : index
    %c0_4 = arith.constant 0 : index
    %4 = vector.load %arg3[%c0_3, %c0_4] : memref<1x128xf32, #tpu.memory_space<vmem>>, vector<1x128xf32>
    %5 = vector.broadcast %4 : vector<1x128xf32> to vector<128x128xf32>
    %6 = arith.addf %3, %5 : vector<128x128xf32>
    %cst = arith.constant 0.000000e+00 : f32
    %7 = vector.broadcast %cst : f32 to vector<128x128xf32>
    %8 = arith.maximumf %6, %7 : vector<128x128xf32>
    %c0_5 = arith.constant 0 : index
    %c0_6 = arith.constant 0 : index
    %9 = vector.load %arg4[%c0_5, %c0_6] : memref<128x128xf32, #tpu.memory_space<vmem>>, vector<128x128xf32>
    tpu.vector_store %arg4[%c0_5, %c0_6], %8 {strides = array<i32>} : memref<128x128xf32, #tpu.memory_space<vmem>>, vector<128x128xf32>,
    return
  }
  func.func @transform_0(%arg0: i32) -> (i32, i32) {
    %c0_i32 = arith.constant 0 : i32
    %c0_i32_0 = arith.constant 0 : i32
    %c0_i32_1 = arith.constant 0 : i32
    return %c0_i32, %c0_i32_0 : i32, i32
  }
  func.func @transform_1(%arg0: i32) -> (i32, i32) {
    %c0_i32 = arith.constant 0 : i32
    %c0_i32_0 = arith.constant 0 : i32
    %c0_i32_1 = arith.constant 0 : i32
    return %c0_i32, %c0_i32_0 : i32, i32
  }
  func.func @transform_2(%arg0: i32) -> (i32, i32) {
    %c0_i32 = arith.constant 0 : i32
    %c0_i32_0 = arith.constant 0 : i32
    %c0_i32_1 = arith.constant 0 : i32
    return %c0_i32, %c0_i32_0 : i32, i32
  }
  func.func @transform_3(%arg0: i32) -> (i32, i32) {
    %c0_i32 = arith.constant 0 : i32
    %c0_i32_0 = arith.constant 0 : i32
    %c0_i32_1 = arith.constant 0 : i32
    return %c0_i32, %c0_i32_0 : i32, i32
  }
}

module attributes {stable_mosaic.version = 11 : i64} {
  func.func @_tconv4x4s2_kernel(%arg0: i32, %arg1: i32, %arg2: memref<1x10x10x128xf32, #tpu.memory_space<vmem>>, %arg3: memref<2x2x512x128xbf16, #tpu.memory_space<vmem>>, %arg4: memref<1x128xf32, #tpu.memory_space<vmem>>, %arg5: memref<1x1x8x128xf32, #tpu.memory_space<vmem>>, %arg6: memref<1x1x8x128xf32, #tpu.memory_space<vmem>>, %arg7: memref<1x1x8x128xf32, #tpu.memory_space<vmem>>, %arg8: memref<1x1x8x128xf32, #tpu.memory_space<vmem>>) attributes {dimension_semantics = [#tpu.dimension_semantics<parallel>, #tpu.dimension_semantics<parallel>], iteration_bounds = array<i64: 2, 8>, scalar_prefetch = 0 : i64, scratch_operands = 0 : i64, tpu.core_type = #tpu.core_type<tc>, window_params = [{transform_indices = @transform_0, window_bounds = array<i64: 1, 10, 10, 128>}, {pipeline_mode = #tpu.pipeline_mode<synchronous>, transform_indices = @transform_1, window_bounds = array<i64: 2, 2, 512, 128>}, {pipeline_mode = #tpu.pipeline_mode<synchronous>, transform_indices = @transform_2, window_bounds = array<i64: 1, 128>}, {transform_indices = @transform_3, window_bounds = array<i64: 1, 1, 8, 128>}, {transform_indices = @transform_4, window_bounds = array<i64: 1, 1, 8, 128>}, {transform_indices = @transform_5, window_bounds = array<i64: 1, 1, 8, 128>}, {transform_indices = @transform_6, window_bounds = array<i64: 1, 1, 8, 128>}]} {
    %c1_i32 = arith.constant 1 : i32
    %0 = arith.addi %arg1, %c1_i32 : i32
    %c0 = arith.constant 0 : index
    %1 = arith.index_cast %0 : i32 to index
    %c0_0 = arith.constant 0 : index
    %c0_1 = arith.constant 0 : index
    %2 = vector.load %arg2[%c0, %1, %c0_0, %c0_1] : memref<1x10x10x128xf32, #tpu.memory_space<vmem>>, vector<1x1x10x128xf32>
    %3 = vector.shape_cast %2 : vector<1x1x10x128xf32> to vector<10x128xf32>
    %c0_2 = arith.constant 0 : index
    %4 = arith.index_cast %arg1 : i32 to index
    %c0_3 = arith.constant 0 : index
    %c0_4 = arith.constant 0 : index
    %5 = vector.load %arg2[%c0_2, %4, %c0_3, %c0_4] : memref<1x10x10x128xf32, #tpu.memory_space<vmem>>, vector<1x1x10x128xf32>
    %6 = vector.shape_cast %5 : vector<1x1x10x128xf32> to vector<10x128xf32>
    %c2_i32 = arith.constant 2 : i32
    %7 = arith.addi %arg1, %c2_i32 : i32
    %c0_5 = arith.constant 0 : index
    %8 = arith.index_cast %7 : i32 to index
    %c0_6 = arith.constant 0 : index
    %c0_7 = arith.constant 0 : index
    %9 = vector.load %arg2[%c0_5, %8, %c0_6, %c0_7] : memref<1x10x10x128xf32, #tpu.memory_space<vmem>>, vector<1x1x10x128xf32>
    %10 = vector.shape_cast %9 : vector<1x1x10x128xf32> to vector<10x128xf32>
    %11 = vector.extract_strided_slice %3 {offsets = [1, 0], sizes = [8, 128], strides = [1, 1]} : vector<10x128xf32> to vector<8x128xf32>
    %12 = vector.extract_strided_slice %3 {offsets = [0, 0], sizes = [8, 128], strides = [1, 1]} : vector<10x128xf32> to vector<8x128xf32>
    %13 = vector.extract_strided_slice %6 {offsets = [1, 0], sizes = [8, 128], strides = [1, 1]} : vector<10x128xf32> to vector<8x128xf32>
    %14 = vector.extract_strided_slice %6 {offsets = [0, 0], sizes = [8, 128], strides = [1, 1]} : vector<10x128xf32> to vector<8x128xf32>
    %15 = tpu.concatenate %11, %12, %13, %14 in 1 : vector<8x128xf32>, vector<8x128xf32>, vector<8x128xf32>, vector<8x128xf32> -> vector<8x512xf32>
    %16 = arith.truncf %15 : vector<8x512xf32> to vector<8x512xbf16>
    %c0_8 = arith.constant 0 : index
    %c0_9 = arith.constant 0 : index
    %c0_10 = arith.constant 0 : index
    %c0_11 = arith.constant 0 : index
    %17 = vector.load %arg3[%c0_8, %c0_9, %c0_10, %c0_11] : memref<2x2x512x128xbf16, #tpu.memory_space<vmem>>, vector<1x1x512x128xbf16>
    %18 = vector.shape_cast %17 : vector<1x1x512x128xbf16> to vector<512x128xbf16>
    %cst = arith.constant dense<0.000000e+00> : vector<8x128xf32>
    %19 = tpu.matmul %16, %18, %cst {dimension_numbers = #tpu.dot_dimension_numbers<[1], [0], [0], [1], [0, 0, 1, 1], [], []>} : vector<8x512xbf16>, vector<512x128xbf16>, vector<8x128xf32> -> vector<8x128xf32>
    %c0_12 = arith.constant 0 : index
    %c0_13 = arith.constant 0 : index
    %20 = vector.load %arg4[%c0_12, %c0_13] : memref<1x128xf32, #tpu.memory_space<vmem>>, vector<1x128xf32>
    %21 = vector.broadcast %20 : vector<1x128xf32> to vector<8x128xf32>
    %22 = arith.addf %19, %21 : vector<8x128xf32>
    %c0_14 = arith.constant 0 : index
    %c0_15 = arith.constant 0 : index
    %c0_16 = arith.constant 0 : index
    %c0_17 = arith.constant 0 : index
    %23 = vector.load %arg5[%c0_14, %c0_15, %c0_16, %c0_17] : memref<1x1x8x128xf32, #tpu.memory_space<vmem>>, vector<1x1x8x128xf32>
    %24 = vector.shape_cast %23 : vector<1x1x8x128xf32> to vector<8x128xf32>
    %25 = vector.shape_cast %22 : vector<8x128xf32> to vector<1x1x8x128xf32>
    tpu.vector_store %arg5[%c0_14, %c0_15, %c0_16, %c0_17], %25 {strides = array<i32>} : memref<1x1x8x128xf32, #tpu.memory_space<vmem>>, vector<1x1x8x128xf32>,
    %26 = vector.extract_strided_slice %3 {offsets = [1, 0], sizes = [8, 128], strides = [1, 1]} : vector<10x128xf32> to vector<8x128xf32>
    %27 = vector.extract_strided_slice %3 {offsets = [2, 0], sizes = [8, 128], strides = [1, 1]} : vector<10x128xf32> to vector<8x128xf32>
    %28 = vector.extract_strided_slice %6 {offsets = [1, 0], sizes = [8, 128], strides = [1, 1]} : vector<10x128xf32> to vector<8x128xf32>
    %29 = vector.extract_strided_slice %6 {offsets = [2, 0], sizes = [8, 128], strides = [1, 1]} : vector<10x128xf32> to vector<8x128xf32>
    %30 = tpu.concatenate %26, %27, %28, %29 in 1 : vector<8x128xf32>, vector<8x128xf32>, vector<8x128xf32>, vector<8x128xf32> -> vector<8x512xf32>
    %31 = arith.truncf %30 : vector<8x512xf32> to vector<8x512xbf16>
    %c0_18 = arith.constant 0 : index
    %c1 = arith.constant 1 : index
    %c0_19 = arith.constant 0 : index
    %c0_20 = arith.constant 0 : index
    %32 = vector.load %arg3[%c0_18, %c1, %c0_19, %c0_20] : memref<2x2x512x128xbf16, #tpu.memory_space<vmem>>, vector<1x1x512x128xbf16>
    %33 = vector.shape_cast %32 : vector<1x1x512x128xbf16> to vector<512x128xbf16>
    %cst_21 = arith.constant dense<0.000000e+00> : vector<8x128xf32>
    %34 = tpu.matmul %31, %33, %cst_21 {dimension_numbers = #tpu.dot_dimension_numbers<[1], [0], [0], [1], [0, 0, 1, 1], [], []>} : vector<8x512xbf16>, vector<512x128xbf16>, vector<8x128xf32> -> vector<8x128xf32>
    %c0_22 = arith.constant 0 : index
    %c0_23 = arith.constant 0 : index
    %35 = vector.load %arg4[%c0_22, %c0_23] : memref<1x128xf32, #tpu.memory_space<vmem>>, vector<1x128xf32>
    %36 = vector.broadcast %35 : vector<1x128xf32> to vector<8x128xf32>
    %37 = arith.addf %34, %36 : vector<8x128xf32>
    %c0_24 = arith.constant 0 : index
    %c0_25 = arith.constant 0 : index
    %c0_26 = arith.constant 0 : index
    %c0_27 = arith.constant 0 : index
    %38 = vector.load %arg6[%c0_24, %c0_25, %c0_26, %c0_27] : memref<1x1x8x128xf32, #tpu.memory_space<vmem>>, vector<1x1x8x128xf32>
    %39 = vector.shape_cast %38 : vector<1x1x8x128xf32> to vector<8x128xf32>
    %40 = vector.shape_cast %37 : vector<8x128xf32> to vector<1x1x8x128xf32>
    tpu.vector_store %arg6[%c0_24, %c0_25, %c0_26, %c0_27], %40 {strides = array<i32>} : memref<1x1x8x128xf32, #tpu.memory_space<vmem>>, vector<1x1x8x128xf32>,
    %41 = vector.extract_strided_slice %3 {offsets = [1, 0], sizes = [8, 128], strides = [1, 1]} : vector<10x128xf32> to vector<8x128xf32>
    %42 = vector.extract_strided_slice %3 {offsets = [0, 0], sizes = [8, 128], strides = [1, 1]} : vector<10x128xf32> to vector<8x128xf32>
    %43 = vector.extract_strided_slice %10 {offsets = [1, 0], sizes = [8, 128], strides = [1, 1]} : vector<10x128xf32> to vector<8x128xf32>
    %44 = vector.extract_strided_slice %10 {offsets = [0, 0], sizes = [8, 128], strides = [1, 1]} : vector<10x128xf32> to vector<8x128xf32>
    %45 = tpu.concatenate %41, %42, %43, %44 in 1 : vector<8x128xf32>, vector<8x128xf32>, vector<8x128xf32>, vector<8x128xf32> -> vector<8x512xf32>
    %46 = arith.truncf %45 : vector<8x512xf32> to vector<8x512xbf16>
    %c1_28 = arith.constant 1 : index
    %c0_29 = arith.constant 0 : index
    %c0_30 = arith.constant 0 : index
    %c0_31 = arith.constant 0 : index
    %47 = vector.load %arg3[%c1_28, %c0_29, %c0_30, %c0_31] : memref<2x2x512x128xbf16, #tpu.memory_space<vmem>>, vector<1x1x512x128xbf16>
    %48 = vector.shape_cast %47 : vector<1x1x512x128xbf16> to vector<512x128xbf16>
    %cst_32 = arith.constant dense<0.000000e+00> : vector<8x128xf32>
    %49 = tpu.matmul %46, %48, %cst_32 {dimension_numbers = #tpu.dot_dimension_numbers<[1], [0], [0], [1], [0, 0, 1, 1], [], []>} : vector<8x512xbf16>, vector<512x128xbf16>, vector<8x128xf32> -> vector<8x128xf32>
    %c0_33 = arith.constant 0 : index
    %c0_34 = arith.constant 0 : index
    %50 = vector.load %arg4[%c0_33, %c0_34] : memref<1x128xf32, #tpu.memory_space<vmem>>, vector<1x128xf32>
    %51 = vector.broadcast %50 : vector<1x128xf32> to vector<8x128xf32>
    %52 = arith.addf %49, %51 : vector<8x128xf32>
    %c0_35 = arith.constant 0 : index
    %c0_36 = arith.constant 0 : index
    %c0_37 = arith.constant 0 : index
    %c0_38 = arith.constant 0 : index
    %53 = vector.load %arg7[%c0_35, %c0_36, %c0_37, %c0_38] : memref<1x1x8x128xf32, #tpu.memory_space<vmem>>, vector<1x1x8x128xf32>
    %54 = vector.shape_cast %53 : vector<1x1x8x128xf32> to vector<8x128xf32>
    %55 = vector.shape_cast %52 : vector<8x128xf32> to vector<1x1x8x128xf32>
    tpu.vector_store %arg7[%c0_35, %c0_36, %c0_37, %c0_38], %55 {strides = array<i32>} : memref<1x1x8x128xf32, #tpu.memory_space<vmem>>, vector<1x1x8x128xf32>,
    %56 = vector.extract_strided_slice %3 {offsets = [1, 0], sizes = [8, 128], strides = [1, 1]} : vector<10x128xf32> to vector<8x128xf32>
    %57 = vector.extract_strided_slice %3 {offsets = [2, 0], sizes = [8, 128], strides = [1, 1]} : vector<10x128xf32> to vector<8x128xf32>
    %58 = vector.extract_strided_slice %10 {offsets = [1, 0], sizes = [8, 128], strides = [1, 1]} : vector<10x128xf32> to vector<8x128xf32>
    %59 = vector.extract_strided_slice %10 {offsets = [2, 0], sizes = [8, 128], strides = [1, 1]} : vector<10x128xf32> to vector<8x128xf32>
    %60 = tpu.concatenate %56, %57, %58, %59 in 1 : vector<8x128xf32>, vector<8x128xf32>, vector<8x128xf32>, vector<8x128xf32> -> vector<8x512xf32>
    %61 = arith.truncf %60 : vector<8x512xf32> to vector<8x512xbf16>
    %c1_39 = arith.constant 1 : index
    %c1_40 = arith.constant 1 : index
    %c0_41 = arith.constant 0 : index
    %c0_42 = arith.constant 0 : index
    %62 = vector.load %arg3[%c1_39, %c1_40, %c0_41, %c0_42] : memref<2x2x512x128xbf16, #tpu.memory_space<vmem>>, vector<1x1x512x128xbf16>
    %63 = vector.shape_cast %62 : vector<1x1x512x128xbf16> to vector<512x128xbf16>
    %cst_43 = arith.constant dense<0.000000e+00> : vector<8x128xf32>
    %64 = tpu.matmul %61, %63, %cst_43 {dimension_numbers = #tpu.dot_dimension_numbers<[1], [0], [0], [1], [0, 0, 1, 1], [], []>} : vector<8x512xbf16>, vector<512x128xbf16>, vector<8x128xf32> -> vector<8x128xf32>
    %c0_44 = arith.constant 0 : index
    %c0_45 = arith.constant 0 : index
    %65 = vector.load %arg4[%c0_44, %c0_45] : memref<1x128xf32, #tpu.memory_space<vmem>>, vector<1x128xf32>
    %66 = vector.broadcast %65 : vector<1x128xf32> to vector<8x128xf32>
    %67 = arith.addf %64, %66 : vector<8x128xf32>
    %c0_46 = arith.constant 0 : index
    %c0_47 = arith.constant 0 : index
    %c0_48 = arith.constant 0 : index
    %c0_49 = arith.constant 0 : index
    %68 = vector.load %arg8[%c0_46, %c0_47, %c0_48, %c0_49] : memref<1x1x8x128xf32, #tpu.memory_space<vmem>>, vector<1x1x8x128xf32>
    %69 = vector.shape_cast %68 : vector<1x1x8x128xf32> to vector<8x128xf32>
    %70 = vector.shape_cast %67 : vector<8x128xf32> to vector<1x1x8x128xf32>
    tpu.vector_store %arg8[%c0_46, %c0_47, %c0_48, %c0_49], %70 {strides = array<i32>} : memref<1x1x8x128xf32, #tpu.memory_space<vmem>>, vector<1x1x8x128xf32>,
    return
  }
  func.func @transform_0(%arg0: i32, %arg1: i32) -> (i32, i32, i32, i32) {
    %c0_i32 = arith.constant 0 : i32
    %c0_i32_0 = arith.constant 0 : i32
    %c0_i32_1 = arith.constant 0 : i32
    %c0_i32_2 = arith.constant 0 : i32
    return %arg0, %c0_i32, %c0_i32_0, %c0_i32_1 : i32, i32, i32, i32
  }
  func.func @transform_1(%arg0: i32, %arg1: i32) -> (i32, i32, i32, i32) {
    %c0_i32 = arith.constant 0 : i32
    %c0_i32_0 = arith.constant 0 : i32
    %c0_i32_1 = arith.constant 0 : i32
    %c0_i32_2 = arith.constant 0 : i32
    %c0_i32_3 = arith.constant 0 : i32
    return %c0_i32, %c0_i32_0, %c0_i32_1, %c0_i32_2 : i32, i32, i32, i32
  }
  func.func @transform_2(%arg0: i32, %arg1: i32) -> (i32, i32) {
    %c0_i32 = arith.constant 0 : i32
    %c0_i32_0 = arith.constant 0 : i32
    %c0_i32_1 = arith.constant 0 : i32
    return %c0_i32, %c0_i32_0 : i32, i32
  }
  func.func @transform_3(%arg0: i32, %arg1: i32) -> (i32, i32, i32, i32) {
    %c0_i32 = arith.constant 0 : i32
    %c0_i32_0 = arith.constant 0 : i32
    %c0_i32_1 = arith.constant 0 : i32
    return %arg0, %arg1, %c0_i32, %c0_i32_0 : i32, i32, i32, i32
  }
  func.func @transform_4(%arg0: i32, %arg1: i32) -> (i32, i32, i32, i32) {
    %c0_i32 = arith.constant 0 : i32
    %c0_i32_0 = arith.constant 0 : i32
    %c0_i32_1 = arith.constant 0 : i32
    return %arg0, %arg1, %c0_i32, %c0_i32_0 : i32, i32, i32, i32
  }
  func.func @transform_5(%arg0: i32, %arg1: i32) -> (i32, i32, i32, i32) {
    %c0_i32 = arith.constant 0 : i32
    %c0_i32_0 = arith.constant 0 : i32
    %c0_i32_1 = arith.constant 0 : i32
    return %arg0, %arg1, %c0_i32, %c0_i32_0 : i32, i32, i32, i32
  }
  func.func @transform_6(%arg0: i32, %arg1: i32) -> (i32, i32, i32, i32) {
    %c0_i32 = arith.constant 0 : i32
    %c0_i32_0 = arith.constant 0 : i32
    %c0_i32_1 = arith.constant 0 : i32
    return %arg0, %arg1, %c0_i32, %c0_i32_0 : i32, i32, i32, i32
  }
}

module attributes {stable_mosaic.version = 11 : i64} {
  func.func @_conv3x3_stats_kernel(%arg0: i32, %arg1: i32, %arg2: memref<1x18x18x128xf32, #tpu.memory_space<vmem>>, %arg3: memref<1152x128xbf16, #tpu.memory_space<vmem>>, %arg4: memref<1x128xf32, #tpu.memory_space<vmem>>, %arg5: memref<1x1x16x128xf32, #tpu.memory_space<vmem>>, %arg6: memref<1x1x128xf32, #tpu.memory_space<vmem>>, %arg7: memref<1x1x128xf32, #tpu.memory_space<vmem>>) attributes {dimension_semantics = [#tpu.dimension_semantics<parallel>, #tpu.dimension_semantics<arbitrary>], iteration_bounds = array<i64: 2, 16>, scalar_prefetch = 0 : i64, scratch_operands = 0 : i64, tpu.core_type = #tpu.core_type<tc>, window_params = [{transform_indices = @transform_0, window_bounds = array<i64: 1, 18, 18, 128>}, {pipeline_mode = #tpu.pipeline_mode<synchronous>, transform_indices = @transform_1, window_bounds = array<i64: 1152, 128>}, {pipeline_mode = #tpu.pipeline_mode<synchronous>, transform_indices = @transform_2, window_bounds = array<i64: 1, 128>}, {transform_indices = @transform_3, window_bounds = array<i64: 1, 1, 16, 128>}, {transform_indices = @transform_4, window_bounds = array<i64: 1, 1, 128>}, {transform_indices = @transform_5, window_bounds = array<i64: 1, 1, 128>}]} {
    %c0_i32 = arith.constant 0 : i32
    %0 = arith.cmpi eq, %arg1, %c0_i32 : i32
    %1 = arith.extui %0 : i1 to i32
    %c0_i32_0 = arith.constant 0 : i32
    %2 = arith.cmpi ne, %1, %c0_i32_0 : i32
    scf.if %2 {
      %cst_32 = arith.constant 0.000000e+00 : f32
      %51 = vector.broadcast %cst_32 : f32 to vector<1x1x128xf32>
      %c0_33 = arith.constant 0 : index
      %c0_34 = arith.constant 0 : index
      %c0_35 = arith.constant 0 : index
      %52 = vector.load %arg6[%c0_33, %c0_34, %c0_35] : memref<1x1x128xf32, #tpu.memory_space<vmem>>, vector<1x1x128xf32>
      tpu.vector_store %arg6[%c0_33, %c0_34, %c0_35], %51 {strides = array<i32>} : memref<1x1x128xf32, #tpu.memory_space<vmem>>, vector<1x1x128xf32>,
      %cst_36 = arith.constant 0.000000e+00 : f32
      %53 = vector.broadcast %cst_36 : f32 to vector<1x1x128xf32>
      %c0_37 = arith.constant 0 : index
      %c0_38 = arith.constant 0 : index
      %c0_39 = arith.constant 0 : index
      %54 = vector.load %arg7[%c0_37, %c0_38, %c0_39] : memref<1x1x128xf32, #tpu.memory_space<vmem>>, vector<1x1x128xf32>
      tpu.vector_store %arg7[%c0_37, %c0_38, %c0_39], %53 {strides = array<i32>} : memref<1x1x128xf32, #tpu.memory_space<vmem>>, vector<1x1x128xf32>,
    } else {
    }
    %c0_i32_1 = arith.constant 0 : i32
    %3 = arith.addi %arg1, %c0_i32_1 : i32
    %c0 = arith.constant 0 : index
    %4 = arith.index_cast %3 : i32 to index
    %c0_2 = arith.constant 0 : index
    %c0_3 = arith.constant 0 : index
    %5 = vector.load %arg2[%c0, %4, %c0_2, %c0_3] : memref<1x18x18x128xf32, #tpu.memory_space<vmem>>, vector<1x1x18x128xf32>
    %6 = vector.shape_cast %5 : vector<1x1x18x128xf32> to vector<18x128xf32>
    %c1_i32 = arith.constant 1 : i32
    %7 = arith.addi %arg1, %c1_i32 : i32
    %c0_4 = arith.constant 0 : index
    %8 = arith.index_cast %7 : i32 to index
    %c0_5 = arith.constant 0 : index
    %c0_6 = arith.constant 0 : index
    %9 = vector.load %arg2[%c0_4, %8, %c0_5, %c0_6] : memref<1x18x18x128xf32, #tpu.memory_space<vmem>>, vector<1x1x18x128xf32>
    %10 = vector.shape_cast %9 : vector<1x1x18x128xf32> to vector<18x128xf32>
    %c2_i32 = arith.constant 2 : i32
    %11 = arith.addi %arg1, %c2_i32 : i32
    %c0_7 = arith.constant 0 : index
    %12 = arith.index_cast %11 : i32 to index
    %c0_8 = arith.constant 0 : index
    %c0_9 = arith.constant 0 : index
    %13 = vector.load %arg2[%c0_7, %12, %c0_8, %c0_9] : memref<1x18x18x128xf32, #tpu.memory_space<vmem>>, vector<1x1x18x128xf32>
    %14 = vector.shape_cast %13 : vector<1x1x18x128xf32> to vector<18x128xf32>
    %15 = vector.extract_strided_slice %6 {offsets = [0, 0], sizes = [16, 128], strides = [1, 1]} : vector<18x128xf32> to vector<16x128xf32>
    %16 = vector.extract_strided_slice %6 {offsets = [1, 0], sizes = [16, 128], strides = [1, 1]} : vector<18x128xf32> to vector<16x128xf32>
    %17 = vector.extract_strided_slice %6 {offsets = [2, 0], sizes = [16, 128], strides = [1, 1]} : vector<18x128xf32> to vector<16x128xf32>
    %18 = vector.extract_strided_slice %10 {offsets = [0, 0], sizes = [16, 128], strides = [1, 1]} : vector<18x128xf32> to vector<16x128xf32>
    %19 = vector.extract_strided_slice %10 {offsets = [1, 0], sizes = [16, 128], strides = [1, 1]} : vector<18x128xf32> to vector<16x128xf32>
    %20 = vector.extract_strided_slice %10 {offsets = [2, 0], sizes = [16, 128], strides = [1, 1]} : vector<18x128xf32> to vector<16x128xf32>
    %21 = vector.extract_strided_slice %14 {offsets = [0, 0], sizes = [16, 128], strides = [1, 1]} : vector<18x128xf32> to vector<16x128xf32>
    %22 = vector.extract_strided_slice %14 {offsets = [1, 0], sizes = [16, 128], strides = [1, 1]} : vector<18x128xf32> to vector<16x128xf32>
    %23 = vector.extract_strided_slice %14 {offsets = [2, 0], sizes = [16, 128], strides = [1, 1]} : vector<18x128xf32> to vector<16x128xf32>
    %24 = tpu.concatenate %15, %16, %17, %18, %19, %20, %21, %22, %23 in 1 : vector<16x128xf32>, vector<16x128xf32>, vector<16x128xf32>, vector<16x128xf32>, vector<16x128xf32>, vector<16x128xf32>, vector<16x128xf32>, vector<16x128xf32>, vector<16x128xf32> -> vector<16x1152xf32>
    %25 = arith.truncf %24 : vector<16x1152xf32> to vector<16x1152xbf16>
    %c0_10 = arith.constant 0 : index
    %c0_11 = arith.constant 0 : index
    %26 = vector.load %arg3[%c0_10, %c0_11] : memref<1152x128xbf16, #tpu.memory_space<vmem>>, vector<1152x128xbf16>
    %cst = arith.constant dense<0.000000e+00> : vector<16x128xf32>
    %27 = tpu.matmul %25, %26, %cst {dimension_numbers = #tpu.dot_dimension_numbers<[1], [0], [0], [1], [0, 0, 1, 1], [], []>} : vector<16x1152xbf16>, vector<1152x128xbf16>, vector<16x128xf32> -> vector<16x128xf32>
    %c0_12 = arith.constant 0 : index
    %c0_13 = arith.constant 0 : index
    %28 = vector.load %arg4[%c0_12, %c0_13] : memref<1x128xf32, #tpu.memory_space<vmem>>, vector<1x128xf32>
    %29 = vector.broadcast %28 : vector<1x128xf32> to vector<16x128xf32>
    %30 = arith.addf %27, %29 : vector<16x128xf32>
    %c0_14 = arith.constant 0 : index
    %c0_15 = arith.constant 0 : index
    %c0_16 = arith.constant 0 : index
    %c0_17 = arith.constant 0 : index
    %31 = vector.load %arg5[%c0_14, %c0_15, %c0_16, %c0_17] : memref<1x1x16x128xf32, #tpu.memory_space<vmem>>, vector<1x1x16x128xf32>
    %32 = vector.shape_cast %31 : vector<1x1x16x128xf32> to vector<16x128xf32>
    %33 = vector.shape_cast %30 : vector<16x128xf32> to vector<1x1x16x128xf32>
    tpu.vector_store %arg5[%c0_14, %c0_15, %c0_16, %c0_17], %33 {strides = array<i32>} : memref<1x1x16x128xf32, #tpu.memory_space<vmem>>, vector<1x1x16x128xf32>,
    %c0_18 = arith.constant 0 : index
    %c0_19 = arith.constant 0 : index
    %c0_20 = arith.constant 0 : index
    %34 = vector.load %arg6[%c0_18, %c0_19, %c0_20] : memref<1x1x128xf32, #tpu.memory_space<vmem>>, vector<1x1x128xf32>
    %35 = vector.shape_cast %34 : vector<1x1x128xf32> to vector<1x128xf32>
    %cst_21 = arith.constant dense<0.000000e+00> : vector<128xf32>
    %36 = vector.multi_reduction <add>, %30, %cst_21 [0] : vector<16x128xf32> to vector<128xf32>
    %37 = vector.shape_cast %36 : vector<128xf32> to vector<1x128xf32>
    %38 = arith.addf %35, %37 : vector<1x128xf32>
    %c0_22 = arith.constant 0 : index
    %c0_23 = arith.constant 0 : index
    %c0_24 = arith.constant 0 : index
    %39 = vector.load %arg6[%c0_22, %c0_23, %c0_24] : memref<1x1x128xf32, #tpu.memory_space<vmem>>, vector<1x1x128xf32>
    %40 = vector.shape_cast %39 : vector<1x1x128xf32> to vector<1x128xf32>
    %41 = vector.shape_cast %38 : vector<1x128xf32> to vector<1x1x128xf32>
    tpu.vector_store %arg6[%c0_22, %c0_23, %c0_24], %41 {strides = array<i32>} : memref<1x1x128xf32, #tpu.memory_space<vmem>>, vector<1x1x128xf32>,
    %c0_25 = arith.constant 0 : index
    %c0_26 = arith.constant 0 : index
    %c0_27 = arith.constant 0 : index
    %42 = vector.load %arg7[%c0_25, %c0_26, %c0_27] : memref<1x1x128xf32, #tpu.memory_space<vmem>>, vector<1x1x128xf32>
    %43 = vector.shape_cast %42 : vector<1x1x128xf32> to vector<1x128xf32>
    %44 = arith.mulf %30, %30 : vector<16x128xf32>
    %cst_28 = arith.constant dense<0.000000e+00> : vector<128xf32>
    %45 = vector.multi_reduction <add>, %44, %cst_28 [0] : vector<16x128xf32> to vector<128xf32>
    %46 = vector.shape_cast %45 : vector<128xf32> to vector<1x128xf32>
    %47 = arith.addf %43, %46 : vector<1x128xf32>
    %c0_29 = arith.constant 0 : index
    %c0_30 = arith.constant 0 : index
    %c0_31 = arith.constant 0 : index
    %48 = vector.load %arg7[%c0_29, %c0_30, %c0_31] : memref<1x1x128xf32, #tpu.memory_space<vmem>>, vector<1x1x128xf32>
    %49 = vector.shape_cast %48 : vector<1x1x128xf32> to vector<1x128xf32>
    %50 = vector.shape_cast %47 : vector<1x128xf32> to vector<1x1x128xf32>
    tpu.vector_store %arg7[%c0_29, %c0_30, %c0_31], %50 {strides = array<i32>} : memref<1x1x128xf32, #tpu.memory_space<vmem>>, vector<1x1x128xf32>,
    return
  }
  func.func @transform_0(%arg0: i32, %arg1: i32) -> (i32, i32, i32, i32) {
    %c0_i32 = arith.constant 0 : i32
    %c0_i32_0 = arith.constant 0 : i32
    %c0_i32_1 = arith.constant 0 : i32
    %c0_i32_2 = arith.constant 0 : i32
    return %arg0, %c0_i32, %c0_i32_0, %c0_i32_1 : i32, i32, i32, i32
  }
  func.func @transform_1(%arg0: i32, %arg1: i32) -> (i32, i32) {
    %c0_i32 = arith.constant 0 : i32
    %c0_i32_0 = arith.constant 0 : i32
    %c0_i32_1 = arith.constant 0 : i32
    return %c0_i32, %c0_i32_0 : i32, i32
  }
  func.func @transform_2(%arg0: i32, %arg1: i32) -> (i32, i32) {
    %c0_i32 = arith.constant 0 : i32
    %c0_i32_0 = arith.constant 0 : i32
    %c0_i32_1 = arith.constant 0 : i32
    return %c0_i32, %c0_i32_0 : i32, i32
  }
  func.func @transform_3(%arg0: i32, %arg1: i32) -> (i32, i32, i32, i32) {
    %c0_i32 = arith.constant 0 : i32
    %c0_i32_0 = arith.constant 0 : i32
    %c0_i32_1 = arith.constant 0 : i32
    return %arg0, %arg1, %c0_i32, %c0_i32_0 : i32, i32, i32, i32
  }
  func.func @transform_4(%arg0: i32, %arg1: i32) -> (i32, i32, i32) {
    %c0_i32 = arith.constant 0 : i32
    %c0_i32_0 = arith.constant 0 : i32
    %c0_i32_1 = arith.constant 0 : i32
    return %arg0, %c0_i32, %c0_i32_0 : i32, i32, i32
  }
  func.func @transform_5(%arg0: i32, %arg1: i32) -> (i32, i32, i32) {
    %c0_i32 = arith.constant 0 : i32
    %c0_i32_0 = arith.constant 0 : i32
    %c0_i32_1 = arith.constant 0 : i32
    return %arg0, %c0_i32, %c0_i32_0 : i32, i32, i32
  }
}

module attributes {stable_mosaic.version = 11 : i64} {
  func.func @_bn_relu_kernel(%arg0: i32, %arg1: memref<512x128xf32, #tpu.memory_space<vmem>>, %arg2: memref<1x128xf32, #tpu.memory_space<vmem>>, %arg3: memref<1x128xf32, #tpu.memory_space<vmem>>, %arg4: memref<512x128xf32, #tpu.memory_space<vmem>>) attributes {dimension_semantics = [#tpu.dimension_semantics<arbitrary>], iteration_bounds = array<i64: 1>, scalar_prefetch = 0 : i64, scratch_operands = 0 : i64, tpu.core_type = #tpu.core_type<tc>, window_params = [{pipeline_mode = #tpu.pipeline_mode<synchronous>, transform_indices = @transform_0, window_bounds = array<i64: 512, 128>}, {pipeline_mode = #tpu.pipeline_mode<synchronous>, transform_indices = @transform_1, window_bounds = array<i64: 1, 128>}, {pipeline_mode = #tpu.pipeline_mode<synchronous>, transform_indices = @transform_2, window_bounds = array<i64: 1, 128>}, {pipeline_mode = #tpu.pipeline_mode<synchronous>, transform_indices = @transform_3, window_bounds = array<i64: 512, 128>}]} {
    %c0 = arith.constant 0 : index
    %c0_0 = arith.constant 0 : index
    %0 = vector.load %arg1[%c0, %c0_0] : memref<512x128xf32, #tpu.memory_space<vmem>>, vector<512x128xf32>
    %c0_1 = arith.constant 0 : index
    %c0_2 = arith.constant 0 : index
    %1 = vector.load %arg2[%c0_1, %c0_2] : memref<1x128xf32, #tpu.memory_space<vmem>>, vector<1x128xf32>
    %2 = vector.broadcast %1 : vector<1x128xf32> to vector<512x128xf32>
    %3 = arith.mulf %0, %2 : vector<512x128xf32>
    %c0_3 = arith.constant 0 : index
    %c0_4 = arith.constant 0 : index
    %4 = vector.load %arg3[%c0_3, %c0_4] : memref<1x128xf32, #tpu.memory_space<vmem>>, vector<1x128xf32>
    %5 = vector.broadcast %4 : vector<1x128xf32> to vector<512x128xf32>
    %6 = arith.addf %3, %5 : vector<512x128xf32>
    %cst = arith.constant 0.000000e+00 : f32
    %7 = vector.broadcast %cst : f32 to vector<512x128xf32>
    %8 = arith.maximumf %6, %7 : vector<512x128xf32>
    %c0_5 = arith.constant 0 : index
    %c0_6 = arith.constant 0 : index
    %9 = vector.load %arg4[%c0_5, %c0_6] : memref<512x128xf32, #tpu.memory_space<vmem>>, vector<512x128xf32>
    tpu.vector_store %arg4[%c0_5, %c0_6], %8 {strides = array<i32>} : memref<512x128xf32, #tpu.memory_space<vmem>>, vector<512x128xf32>,
    return
  }
  func.func @transform_0(%arg0: i32) -> (i32, i32) {
    %c0_i32 = arith.constant 0 : i32
    %c0_i32_0 = arith.constant 0 : i32
    %c0_i32_1 = arith.constant 0 : i32
    return %c0_i32, %c0_i32_0 : i32, i32
  }
  func.func @transform_1(%arg0: i32) -> (i32, i32) {
    %c0_i32 = arith.constant 0 : i32
    %c0_i32_0 = arith.constant 0 : i32
    %c0_i32_1 = arith.constant 0 : i32
    return %c0_i32, %c0_i32_0 : i32, i32
  }
  func.func @transform_2(%arg0: i32) -> (i32, i32) {
    %c0_i32 = arith.constant 0 : i32
    %c0_i32_0 = arith.constant 0 : i32
    %c0_i32_1 = arith.constant 0 : i32
    return %c0_i32, %c0_i32_0 : i32, i32
  }
  func.func @transform_3(%arg0: i32) -> (i32, i32) {
    %c0_i32 = arith.constant 0 : i32
    %c0_i32_0 = arith.constant 0 : i32
    %c0_i32_1 = arith.constant 0 : i32
    return %c0_i32, %c0_i32_0 : i32, i32
  }
}

module attributes {stable_mosaic.version = 11 : i64} {
  func.func @_tconv4x4s2_kernel(%arg0: i32, %arg1: i32, %arg2: memref<1x18x18x128xf32, #tpu.memory_space<vmem>>, %arg3: memref<2x2x512x128xbf16, #tpu.memory_space<vmem>>, %arg4: memref<1x128xf32, #tpu.memory_space<vmem>>, %arg5: memref<1x1x16x128xf32, #tpu.memory_space<vmem>>, %arg6: memref<1x1x16x128xf32, #tpu.memory_space<vmem>>, %arg7: memref<1x1x16x128xf32, #tpu.memory_space<vmem>>, %arg8: memref<1x1x16x128xf32, #tpu.memory_space<vmem>>) attributes {dimension_semantics = [#tpu.dimension_semantics<parallel>, #tpu.dimension_semantics<parallel>], iteration_bounds = array<i64: 2, 16>, scalar_prefetch = 0 : i64, scratch_operands = 0 : i64, tpu.core_type = #tpu.core_type<tc>, window_params = [{transform_indices = @transform_0, window_bounds = array<i64: 1, 18, 18, 128>}, {pipeline_mode = #tpu.pipeline_mode<synchronous>, transform_indices = @transform_1, window_bounds = array<i64: 2, 2, 512, 128>}, {pipeline_mode = #tpu.pipeline_mode<synchronous>, transform_indices = @transform_2, window_bounds = array<i64: 1, 128>}, {transform_indices = @transform_3, window_bounds = array<i64: 1, 1, 16, 128>}, {transform_indices = @transform_4, window_bounds = array<i64: 1, 1, 16, 128>}, {transform_indices = @transform_5, window_bounds = array<i64: 1, 1, 16, 128>}, {transform_indices = @transform_6, window_bounds = array<i64: 1, 1, 16, 128>}]} {
    %c1_i32 = arith.constant 1 : i32
    %0 = arith.addi %arg1, %c1_i32 : i32
    %c0 = arith.constant 0 : index
    %1 = arith.index_cast %0 : i32 to index
    %c0_0 = arith.constant 0 : index
    %c0_1 = arith.constant 0 : index
    %2 = vector.load %arg2[%c0, %1, %c0_0, %c0_1] : memref<1x18x18x128xf32, #tpu.memory_space<vmem>>, vector<1x1x18x128xf32>
    %3 = vector.shape_cast %2 : vector<1x1x18x128xf32> to vector<18x128xf32>
    %c0_2 = arith.constant 0 : index
    %4 = arith.index_cast %arg1 : i32 to index
    %c0_3 = arith.constant 0 : index
    %c0_4 = arith.constant 0 : index
    %5 = vector.load %arg2[%c0_2, %4, %c0_3, %c0_4] : memref<1x18x18x128xf32, #tpu.memory_space<vmem>>, vector<1x1x18x128xf32>
    %6 = vector.shape_cast %5 : vector<1x1x18x128xf32> to vector<18x128xf32>
    %c2_i32 = arith.constant 2 : i32
    %7 = arith.addi %arg1, %c2_i32 : i32
    %c0_5 = arith.constant 0 : index
    %8 = arith.index_cast %7 : i32 to index
    %c0_6 = arith.constant 0 : index
    %c0_7 = arith.constant 0 : index
    %9 = vector.load %arg2[%c0_5, %8, %c0_6, %c0_7] : memref<1x18x18x128xf32, #tpu.memory_space<vmem>>, vector<1x1x18x128xf32>
    %10 = vector.shape_cast %9 : vector<1x1x18x128xf32> to vector<18x128xf32>
    %11 = vector.extract_strided_slice %3 {offsets = [1, 0], sizes = [16, 128], strides = [1, 1]} : vector<18x128xf32> to vector<16x128xf32>
    %12 = vector.extract_strided_slice %3 {offsets = [0, 0], sizes = [16, 128], strides = [1, 1]} : vector<18x128xf32> to vector<16x128xf32>
    %13 = vector.extract_strided_slice %6 {offsets = [1, 0], sizes = [16, 128], strides = [1, 1]} : vector<18x128xf32> to vector<16x128xf32>
    %14 = vector.extract_strided_slice %6 {offsets = [0, 0], sizes = [16, 128], strides = [1, 1]} : vector<18x128xf32> to vector<16x128xf32>
    %15 = tpu.concatenate %11, %12, %13, %14 in 1 : vector<16x128xf32>, vector<16x128xf32>, vector<16x128xf32>, vector<16x128xf32> -> vector<16x512xf32>
    %16 = arith.truncf %15 : vector<16x512xf32> to vector<16x512xbf16>
    %c0_8 = arith.constant 0 : index
    %c0_9 = arith.constant 0 : index
    %c0_10 = arith.constant 0 : index
    %c0_11 = arith.constant 0 : index
    %17 = vector.load %arg3[%c0_8, %c0_9, %c0_10, %c0_11] : memref<2x2x512x128xbf16, #tpu.memory_space<vmem>>, vector<1x1x512x128xbf16>
    %18 = vector.shape_cast %17 : vector<1x1x512x128xbf16> to vector<512x128xbf16>
    %cst = arith.constant dense<0.000000e+00> : vector<16x128xf32>
    %19 = tpu.matmul %16, %18, %cst {dimension_numbers = #tpu.dot_dimension_numbers<[1], [0], [0], [1], [0, 0, 1, 1], [], []>} : vector<16x512xbf16>, vector<512x128xbf16>, vector<16x128xf32> -> vector<16x128xf32>
    %c0_12 = arith.constant 0 : index
    %c0_13 = arith.constant 0 : index
    %20 = vector.load %arg4[%c0_12, %c0_13] : memref<1x128xf32, #tpu.memory_space<vmem>>, vector<1x128xf32>
    %21 = vector.broadcast %20 : vector<1x128xf32> to vector<16x128xf32>
    %22 = arith.addf %19, %21 : vector<16x128xf32>
    %23 = math.tanh %22 : vector<16x128xf32>
    %c0_14 = arith.constant 0 : index
    %c0_15 = arith.constant 0 : index
    %c0_16 = arith.constant 0 : index
    %c0_17 = arith.constant 0 : index
    %24 = vector.load %arg5[%c0_14, %c0_15, %c0_16, %c0_17] : memref<1x1x16x128xf32, #tpu.memory_space<vmem>>, vector<1x1x16x128xf32>
    %25 = vector.shape_cast %24 : vector<1x1x16x128xf32> to vector<16x128xf32>
    %26 = vector.shape_cast %23 : vector<16x128xf32> to vector<1x1x16x128xf32>
    tpu.vector_store %arg5[%c0_14, %c0_15, %c0_16, %c0_17], %26 {strides = array<i32>} : memref<1x1x16x128xf32, #tpu.memory_space<vmem>>, vector<1x1x16x128xf32>,
    %27 = vector.extract_strided_slice %3 {offsets = [1, 0], sizes = [16, 128], strides = [1, 1]} : vector<18x128xf32> to vector<16x128xf32>
    %28 = vector.extract_strided_slice %3 {offsets = [2, 0], sizes = [16, 128], strides = [1, 1]} : vector<18x128xf32> to vector<16x128xf32>
    %29 = vector.extract_strided_slice %6 {offsets = [1, 0], sizes = [16, 128], strides = [1, 1]} : vector<18x128xf32> to vector<16x128xf32>
    %30 = vector.extract_strided_slice %6 {offsets = [2, 0], sizes = [16, 128], strides = [1, 1]} : vector<18x128xf32> to vector<16x128xf32>
    %31 = tpu.concatenate %27, %28, %29, %30 in 1 : vector<16x128xf32>, vector<16x128xf32>, vector<16x128xf32>, vector<16x128xf32> -> vector<16x512xf32>
    %32 = arith.truncf %31 : vector<16x512xf32> to vector<16x512xbf16>
    %c0_18 = arith.constant 0 : index
    %c1 = arith.constant 1 : index
    %c0_19 = arith.constant 0 : index
    %c0_20 = arith.constant 0 : index
    %33 = vector.load %arg3[%c0_18, %c1, %c0_19, %c0_20] : memref<2x2x512x128xbf16, #tpu.memory_space<vmem>>, vector<1x1x512x128xbf16>
    %34 = vector.shape_cast %33 : vector<1x1x512x128xbf16> to vector<512x128xbf16>
    %cst_21 = arith.constant dense<0.000000e+00> : vector<16x128xf32>
    %35 = tpu.matmul %32, %34, %cst_21 {dimension_numbers = #tpu.dot_dimension_numbers<[1], [0], [0], [1], [0, 0, 1, 1], [], []>} : vector<16x512xbf16>, vector<512x128xbf16>, vector<16x128xf32> -> vector<16x128xf32>
    %c0_22 = arith.constant 0 : index
    %c0_23 = arith.constant 0 : index
    %36 = vector.load %arg4[%c0_22, %c0_23] : memref<1x128xf32, #tpu.memory_space<vmem>>, vector<1x128xf32>
    %37 = vector.broadcast %36 : vector<1x128xf32> to vector<16x128xf32>
    %38 = arith.addf %35, %37 : vector<16x128xf32>
    %39 = math.tanh %38 : vector<16x128xf32>
    %c0_24 = arith.constant 0 : index
    %c0_25 = arith.constant 0 : index
    %c0_26 = arith.constant 0 : index
    %c0_27 = arith.constant 0 : index
    %40 = vector.load %arg6[%c0_24, %c0_25, %c0_26, %c0_27] : memref<1x1x16x128xf32, #tpu.memory_space<vmem>>, vector<1x1x16x128xf32>
    %41 = vector.shape_cast %40 : vector<1x1x16x128xf32> to vector<16x128xf32>
    %42 = vector.shape_cast %39 : vector<16x128xf32> to vector<1x1x16x128xf32>
    tpu.vector_store %arg6[%c0_24, %c0_25, %c0_26, %c0_27], %42 {strides = array<i32>} : memref<1x1x16x128xf32, #tpu.memory_space<vmem>>, vector<1x1x16x128xf32>,
    %43 = vector.extract_strided_slice %3 {offsets = [1, 0], sizes = [16, 128], strides = [1, 1]} : vector<18x128xf32> to vector<16x128xf32>
    %44 = vector.extract_strided_slice %3 {offsets = [0, 0], sizes = [16, 128], strides = [1, 1]} : vector<18x128xf32> to vector<16x128xf32>
    %45 = vector.extract_strided_slice %10 {offsets = [1, 0], sizes = [16, 128], strides = [1, 1]} : vector<18x128xf32> to vector<16x128xf32>
    %46 = vector.extract_strided_slice %10 {offsets = [0, 0], sizes = [16, 128], strides = [1, 1]} : vector<18x128xf32> to vector<16x128xf32>
    %47 = tpu.concatenate %43, %44, %45, %46 in 1 : vector<16x128xf32>, vector<16x128xf32>, vector<16x128xf32>, vector<16x128xf32> -> vector<16x512xf32>
    %48 = arith.truncf %47 : vector<16x512xf32> to vector<16x512xbf16>
    %c1_28 = arith.constant 1 : index
    %c0_29 = arith.constant 0 : index
    %c0_30 = arith.constant 0 : index
    %c0_31 = arith.constant 0 : index
    %49 = vector.load %arg3[%c1_28, %c0_29, %c0_30, %c0_31] : memref<2x2x512x128xbf16, #tpu.memory_space<vmem>>, vector<1x1x512x128xbf16>
    %50 = vector.shape_cast %49 : vector<1x1x512x128xbf16> to vector<512x128xbf16>
    %cst_32 = arith.constant dense<0.000000e+00> : vector<16x128xf32>
    %51 = tpu.matmul %48, %50, %cst_32 {dimension_numbers = #tpu.dot_dimension_numbers<[1], [0], [0], [1], [0, 0, 1, 1], [], []>} : vector<16x512xbf16>, vector<512x128xbf16>, vector<16x128xf32> -> vector<16x128xf32>
    %c0_33 = arith.constant 0 : index
    %c0_34 = arith.constant 0 : index
    %52 = vector.load %arg4[%c0_33, %c0_34] : memref<1x128xf32, #tpu.memory_space<vmem>>, vector<1x128xf32>
    %53 = vector.broadcast %52 : vector<1x128xf32> to vector<16x128xf32>
    %54 = arith.addf %51, %53 : vector<16x128xf32>
    %55 = math.tanh %54 : vector<16x128xf32>
    %c0_35 = arith.constant 0 : index
    %c0_36 = arith.constant 0 : index
    %c0_37 = arith.constant 0 : index
    %c0_38 = arith.constant 0 : index
    %56 = vector.load %arg7[%c0_35, %c0_36, %c0_37, %c0_38] : memref<1x1x16x128xf32, #tpu.memory_space<vmem>>, vector<1x1x16x128xf32>
    %57 = vector.shape_cast %56 : vector<1x1x16x128xf32> to vector<16x128xf32>
    %58 = vector.shape_cast %55 : vector<16x128xf32> to vector<1x1x16x128xf32>
    tpu.vector_store %arg7[%c0_35, %c0_36, %c0_37, %c0_38], %58 {strides = array<i32>} : memref<1x1x16x128xf32, #tpu.memory_space<vmem>>, vector<1x1x16x128xf32>,
    %59 = vector.extract_strided_slice %3 {offsets = [1, 0], sizes = [16, 128], strides = [1, 1]} : vector<18x128xf32> to vector<16x128xf32>
    %60 = vector.extract_strided_slice %3 {offsets = [2, 0], sizes = [16, 128], strides = [1, 1]} : vector<18x128xf32> to vector<16x128xf32>
    %61 = vector.extract_strided_slice %10 {offsets = [1, 0], sizes = [16, 128], strides = [1, 1]} : vector<18x128xf32> to vector<16x128xf32>
    %62 = vector.extract_strided_slice %10 {offsets = [2, 0], sizes = [16, 128], strides = [1, 1]} : vector<18x128xf32> to vector<16x128xf32>
    %63 = tpu.concatenate %59, %60, %61, %62 in 1 : vector<16x128xf32>, vector<16x128xf32>, vector<16x128xf32>, vector<16x128xf32> -> vector<16x512xf32>
    %64 = arith.truncf %63 : vector<16x512xf32> to vector<16x512xbf16>
    %c1_39 = arith.constant 1 : index
    %c1_40 = arith.constant 1 : index
    %c0_41 = arith.constant 0 : index
    %c0_42 = arith.constant 0 : index
    %65 = vector.load %arg3[%c1_39, %c1_40, %c0_41, %c0_42] : memref<2x2x512x128xbf16, #tpu.memory_space<vmem>>, vector<1x1x512x128xbf16>
    %66 = vector.shape_cast %65 : vector<1x1x512x128xbf16> to vector<512x128xbf16>
    %cst_43 = arith.constant dense<0.000000e+00> : vector<16x128xf32>
    %67 = tpu.matmul %64, %66, %cst_43 {dimension_numbers = #tpu.dot_dimension_numbers<[1], [0], [0], [1], [0, 0, 1, 1], [], []>} : vector<16x512xbf16>, vector<512x128xbf16>, vector<16x128xf32> -> vector<16x128xf32>
    %c0_44 = arith.constant 0 : index
    %c0_45 = arith.constant 0 : index
    %68 = vector.load %arg4[%c0_44, %c0_45] : memref<1x128xf32, #tpu.memory_space<vmem>>, vector<1x128xf32>
    %69 = vector.broadcast %68 : vector<1x128xf32> to vector<16x128xf32>
    %70 = arith.addf %67, %69 : vector<16x128xf32>
    %71 = math.tanh %70 : vector<16x128xf32>
    %c0_46 = arith.constant 0 : index
    %c0_47 = arith.constant 0 : index
    %c0_48 = arith.constant 0 : index
    %c0_49 = arith.constant 0 : index
    %72 = vector.load %arg8[%c0_46, %c0_47, %c0_48, %c0_49] : memref<1x1x16x128xf32, #tpu.memory_space<vmem>>, vector<1x1x16x128xf32>
    %73 = vector.shape_cast %72 : vector<1x1x16x128xf32> to vector<16x128xf32>
    %74 = vector.shape_cast %71 : vector<16x128xf32> to vector<1x1x16x128xf32>
    tpu.vector_store %arg8[%c0_46, %c0_47, %c0_48, %c0_49], %74 {strides = array<i32>} : memref<1x1x16x128xf32, #tpu.memory_space<vmem>>, vector<1x1x16x128xf32>,
    return
  }
  func.func @transform_0(%arg0: i32, %arg1: i32) -> (i32, i32, i32, i32) {
    %c0_i32 = arith.constant 0 : i32
    %c0_i32_0 = arith.constant 0 : i32
    %c0_i32_1 = arith.constant 0 : i32
    %c0_i32_2 = arith.constant 0 : i32
    return %arg0, %c0_i32, %c0_i32_0, %c0_i32_1 : i32, i32, i32, i32
  }
  func.func @transform_1(%arg0: i32, %arg1: i32) -> (i32, i32, i32, i32) {
    %c0_i32 = arith.constant 0 : i32
    %c0_i32_0 = arith.constant 0 : i32
    %c0_i32_1 = arith.constant 0 : i32
    %c0_i32_2 = arith.constant 0 : i32
    %c0_i32_3 = arith.constant 0 : i32
    return %c0_i32, %c0_i32_0, %c0_i32_1, %c0_i32_2 : i32, i32, i32, i32
  }
  func.func @transform_2(%arg0: i32, %arg1: i32) -> (i32, i32) {
    %c0_i32 = arith.constant 0 : i32
    %c0_i32_0 = arith.constant 0 : i32
    %c0_i32_1 = arith.constant 0 : i32
    return %c0_i32, %c0_i32_0 : i32, i32
  }
  func.func @transform_3(%arg0: i32, %arg1: i32) -> (i32, i32, i32, i32) {
    %c0_i32 = arith.constant 0 : i32
    %c0_i32_0 = arith.constant 0 : i32
    %c0_i32_1 = arith.constant 0 : i32
    return %arg0, %arg1, %c0_i32, %c0_i32_0 : i32, i32, i32, i32
  }
  func.func @transform_4(%arg0: i32, %arg1: i32) -> (i32, i32, i32, i32) {
    %c0_i32 = arith.constant 0 : i32
    %c0_i32_0 = arith.constant 0 : i32
    %c0_i32_1 = arith.constant 0 : i32
    return %arg0, %arg1, %c0_i32, %c0_i32_0 : i32, i32, i32, i32
  }
  func.func @transform_5(%arg0: i32, %arg1: i32) -> (i32, i32, i32, i32) {
    %c0_i32 = arith.constant 0 : i32
    %c0_i32_0 = arith.constant 0 : i32
    %c0_i32_1 = arith.constant 0 : i32
    return %arg0, %arg1, %c0_i32, %c0_i32_0 : i32, i32, i32, i32
  }
  func.func @transform_6(%arg0: i32, %arg1: i32) -> (i32, i32, i32, i32) {
    %c0_i32 = arith.constant 0 : i32
    %c0_i32_0 = arith.constant 0 : i32
    %c0_i32_1 = arith.constant 0 : i32
    return %arg0, %arg1, %c0_i32, %c0_i32_0 : i32, i32, i32, i32
  }
}

</mosaic_0001>

<bundles_post_ra>
// kernel: generator_forward.12
= control target key start
LH: loop header
LB: loop body
LE: loop exit
PB: predicated region body
PF: predicated region fallthrough
CT: control target
= control target key end

     0   :  { %s104_s0 = inlined_call_operand.vmem [shape: f32[32,128], index: 0, kind: input, shape index: {}]   ;;  %s105_s1 = inlined_call_operand.vmem [shape: f32[1,128], index: 1, kind: input, shape index: {}]   ;;  %s106_s2 = inlined_call_operand.vmem [shape: f32[1,128], index: 2, kind: input, shape index: {}]   ;;  %s107_s3 = inlined_call_operand.vmem [shape: f32[32,128], index: 3, kind: output, shape index: {}]  }
   0x1   :  { %v14_v0 = vld [vmem:[%s104_s0] sm:$0xff]  ;;  %v15_v4 = vld [vmem:[%s104_s0 + $0x8] sm:$0xff]  ;;  %v16_v5 = vld [vmem:[%s104_s0 + $0x10] sm:$0xff] }
   0x2   :  { %v52_v1 = vld [vmem:[%s105_s1] ss:$0 sm:$0xff]  ;;  %v17_v6 = vld [vmem:[%s104_s0 + $0x18] sm:$0xff] }
   0x3   :  { %v53_v2 = vld [vmem:[%s106_s2] ss:$0 sm:$0xff]  ;;  %v25_v3 = vmul.f32 %v52_v1, %v14_v0  ;;  %v26_v7 = vmul.f32 %v52_v1, %v15_v4  ;;  %v27_v8 = vmul.f32 %v52_v1, %v16_v5  ;;  %v28_v9 = vmul.f32 %v52_v1, %v17_v6 }
   0x5   :  { %v36_v10 = vadd.f32 %v53_v2, %v25_v3  ;;  %v37_v11 = vadd.f32 %v53_v2, %v26_v7  ;;  %v38_v12 = vadd.f32 %v53_v2, %v27_v8  ;;  %v39_v13 = vadd.f32 %v53_v2, %v28_v9 }
   0x7   :  { %v40_v14 = vmax.f32 %v36_v10, 0.0  ;;  %v41_v15 = vmax.f32 %v37_v11, 0.0  ;;  %v42_v16 = vmax.f32 %v38_v12, 0.0  ;;  %v43_v17 = vmax.f32 %v39_v13, 0.0 }
   0x9   :  { %44 = vst [vmem:[%s107_s3] sm:$0xff] %v40_v14  ;;  %45 = vst [vmem:[%s107_s3 + $0x8] sm:$0xff] %v41_v15 }
   0xa   :  { %46 = vst [vmem:[%s107_s3 + $0x10] sm:$0xff] %v42_v16  ;;  %47 = vst [vmem:[%s107_s3 + $0x18] sm:$0xff] %v43_v17 }

// kernel: generator_forward.11
= control target key start
LH: loop header
LB: loop body
LE: loop exit
PB: predicated region body
PF: predicated region fallthrough
CT: control target
= control target key end

     0   :  { %s1643_s18 = smov 0   ;;  %s1645_s19 = smov 0   ;;  %s1952_s0 = inlined_call_operand.vmem [shape: f32[2,6,6,128], index: 0, kind: input, shape index: {}]   ;;  %s1953_s1 = inlined_call_operand.vmem [shape: bf16[1152,128], index: 1, kind: input, shape index: {}]   ;;  %s1954_s2 = inlined_call_operand.vmem [shape: f32[1,128], index: 2, kind: input, shape index: {}]   ;;  %s1955_s3 = inlined_call_operand.vmem [shape: f32[2,4,4,128], index: 3, kind: output, shape index: {0}]   ;;  %s1956_s4 = inlined_call_operand.vmem [shape: f32[2,1,128], index: 4, kind: output, shape index: {1}]   ;;  %s1957_s5 = inlined_call_operand.vmem [shape: f32[2,1,128], index: 5, kind: output, shape index: {2}]  }
   0x1   :  { %s1647_s20 = smov 0   ;;  %s1649_s21 = smov 0  }
   0x2   :  { %s1651_s22 = smov 0  }
   0x3 LB: > { %s25_s23 = sadd.s32 1, %s1600_s20  ;;  %s28_s24 = sadd.s32 1, %s1604_s21  ;;  %s1608_s22 = sphi %s1651_s22, %s16_s22   ;;  %s1604_s21 = sphi %s1649_s21, %s1961_s21   ;;  %s1600_s20 = sphi %s1647_s20, %s1960_s20   ;;  %s1596_s19 = sphi %s1645_s19, %s1959_s19   ;;  %s1592_s18 = sphi %s1643_s18, %s1958_s18  }
   0x4   : > { %p26_p0 = scmp.ge.s32.totalorder %s25_s23, 4  ;;  %p1252_p1 = scmp.ge.s32.totalorder %s1608_s22, 1 }
   0x5   : > { %p206_p2 = scmp.lt.s32.totalorder %s1608_s22, 9 }
   0x6   : > { %s1963_s23 = smov (%p26_p0, %s25_s23), 0  ;;  %s1965_s24 = smov (!%p26_p0, %s28_s24), %s1604_s21 }
   0x7   : > { %p207_p3 = pnand %p1252_p1, %p206_p2  ;;  %p30_p4 = scmp.ge.s32.totalorder %s1965_s24, 2 }
   0x8   : > { %p243_p5 = scmp.lt.s32.totalorder (!%p207_p3), %s1596_s19, 1  ;;  %p250_p6 = scmp.lt.s32.totalorder (!%p207_p3), %s1592_s18, 3 }
   0x9   : > { %s1967_s24 = smov (%p30_p4, %s1965_s24), 0  ;;  %210 = sbr.rel (%p207_p3) target bundleno = 352 (0x160), region = 32 }
   0xa   : > { %p1256_p7 = scmp.ne.s32.totalorder (!%p207_p3), %s1592_s18, 0 }
  0x10   : > { %s1969_s19 = smov (!%p243_p5, %s1596_s19), 1  ;;  %266 = sbr.rel (%p1256_p7) target bundleno = 23 (0x17), region = 36 }
  0x11   : > { %s251_s25 = scalar_select %p250_p6, %s1592_s18, 3 }
  0x12   : > { %s1454_s26 = smul.u32 48, %s1969_s19  ;;  %s1254_s27 = sshll.u32 %s1969_s19, 2  ;;  %v1610_v0 = vmov (!%p1256_p7), 0.0  }
  0x13   : > { %s253_s28 = sadd.s32 %s1254_s27, %s251_s25  ;;  %s1680_s6 = scalar_lea.vmem %s1956_s4, %s1969_s19 }
  0x14   : > { %s1685_s9 = scalar_lea.vmem %s1952_s0, %s1454_s26  ;;  %s1255_s10 = sshll.u32 %s253_s28, 2  ;;  %267 = vst [vmem:[%s1680_s6] sm:$0x1] (!%p1256_p7), %v1610_v0 }
  0x15   : > { %s1690_s13 = scalar_lea.vmem %s1955_s3, %s1255_s10  ;;  %s1695_s16 = scalar_lea.vmem %s1957_s5, %s1969_s19 }
  0x16   : > { %268 = vst [vmem:[%s1695_s16] sm:$0x1] (!%p1256_p7), %v1610_v0 }
  0x17 PF: > { %v1498_v1 = vld [vmem:[%s1953_s1 + $0x40] sm:$0xff]   ;;  %v1502_v5 = vld [vmem:[%s1953_s1 + $0x48] sm:$0xff]   ;;  %v1506_v9 = vld [vmem:[%s1953_s1 + $0x50] sm:$0xff]   ;;  %s1257_s30 = sshll.u32 %s1592_s18, 3  ;;  %vm1612_vm0 = vmmov 0   ;;  %vm1089_vm1 = vcmask 1043456  }
  0x18   : > { %v1499_v2 = vld [vmem:[%s1953_s1] sm:$0xff]   ;;  %1337 = vmatprep.subr.bf16.mxu0 %v1498_v1  ;;  %v1503_v6 = vld [vmem:[%s1953_s1 + $0x8] sm:$0xff]   ;;  %v1507_v10 = vld [vmem:[%s1953_s1 + $0x10] sm:$0xff]   ;;  %s1789_s15 = scalar_lea.vmem %s1685_s9, %s1257_s30 }
  0x19   : > { %v1500_v3 = vld [vmem:[%s1953_s1 + $0xc0] sm:$0xff]   ;;  %1338 = vmatpush3.bf16.msra.mxu0 %v1499_v2  ;;  %v1504_v7 = vld [vmem:[%s1953_s1 + $0xc8] sm:$0xff]   ;;  %v1508_v11 = vld [vmem:[%s1953_s1 + $0xd0] sm:$0xff]  }
  0x1a   : > { %v1501_v4 = vld [vmem:[%s1953_s1 + $0x80] sm:$0xff]   ;;  %1359 = vmatprep.subr.bf16.mxu1 %v1500_v3  ;;  %1339 = vmatprep.subr.bf16.mxu0 %v1502_v5  ;;  %v1505_v8 = vld [vmem:[%s1953_s1 + $0x88] sm:$0xff]   ;;  %v1509_v12 = vld [vmem:[%s1953_s1 + $0x90] sm:$0xff]  }
  0x1b   : > { %1360 = vmatpush3.bf16.msra.mxu1 %v1501_v4  ;;  %v1510_v13 = vld [vmem:[%s1953_s1 + $0x58] sm:$0xff]   ;;  %v1514_v17 = vld [vmem:[%s1953_s1 + $0x60] sm:$0xff]   ;;  %v1518_v21 = vld [vmem:[%s1953_s1 + $0x68] sm:$0xff]  }
  0x1c   : > { %1361 = vmatprep.subr.bf16.mxu1 %v1504_v7  ;;  %v1511_v14 = vld [vmem:[%s1953_s1 + $0x18] sm:$0xff]   ;;  %v1515_v18 = vld [vmem:[%s1953_s1 + $0x20] sm:$0xff]   ;;  %v1519_v22 = vld [vmem:[%s1953_s1 + $0x28] sm:$0xff]  }
  0x1d   : > { %1340 = vmatpush3.bf16.msra.mxu0 %v1503_v6  ;;  %v1512_v15 = vld [vmem:[%s1953_s1 + $0xd8] sm:$0xff]   ;;  %v1516_v19 = vld [vmem:[%s1953_s1 + $0xe0] sm:$0xff]   ;;  %v1520_v23 = vld [vmem:[%s1953_s1 + $0xe8] sm:$0xff]  }
  0x1e   : > { %1341 = vmatprep.subr.bf16.mxu0 %v1506_v9  ;;  %v1513_v16 = vld [vmem:[%s1953_s1 + $0x98] sm:$0xff]   ;;  %v1517_v20 = vld [vmem:[%s1953_s1 + $0xa0] sm:$0xff]   ;;  %v1521_v24 = vld [vmem:[%s1953_s1 + $0xa8] sm:$0xff]  }
  0x1f   : > { %1362 = vmatpush3.bf16.msra.mxu1 %v1505_v8  ;;  %v1522_v25 = vld [vmem:[%s1953_s1 + $0x70] sm:$0xff]   ;;  %v1526_v29 = vld [vmem:[%s1953_s1 + $0x78] sm:$0xff]   ;;  %v271_v32 = vld [vmem:[%s1789_s15] sm:$0x3f] }
  0x20   : > { %1363 = vmatprep.subr.bf16.mxu1 %v1508_v11  ;;  %v1523_v26 = vld [vmem:[%s1953_s1 + $0x30] sm:$0xff]   ;;  %v1527_v30 = vld [vmem:[%s1953_s1 + $0x38] sm:$0xff]   ;;  %v281_v33 = vrot.slane %v271_v32, 1  ;;  %v295_v35 = vpack.c.bf16 %v271_v32, %v271_v32  ;;  %v1530_v36 = vld [vmem:[%s1953_s1 + $0x140] sm:$0xff]   ;;  %v283_v38 = vrot.slane %v271_v32, 2 }
  0x21   : > { %1342 = vmatpush3.bf16.msra.mxu0 %v1507_v10  ;;  %v1524_v27 = vld [vmem:[%s1953_s1 + $0xf0] sm:$0xff]   ;;  %v1528_v31 = vld [vmem:[%s1953_s1 + $0xf8] sm:$0xff]   ;;  %v1805_v37 = vld [vmem:[%s1789_s15 + $0x8] sm:$0x3f] }
  0x22   : > { %1343 = vmatprep.subr.bf16.mxu0 %v1510_v13  ;;  %v1525_v28 = vld [vmem:[%s1953_s1 + $0xb0] sm:$0xff]   ;;  %v1529_v34 = vld [vmem:[%s1953_s1 + $0xb8] sm:$0xff]   ;;  %v296_v39 = vpack.c.bf16 %v281_v33, %v281_v33  ;;  %v298_v40 = vpack.c.bf16 %v1805_v37, %v1805_v37  ;;  %v1531_v41 = vld [vmem:[%s1953_s1 + $0x100] sm:$0xff]   ;;  %v297_v42 = vpack.c.bf16 %v283_v38, %v283_v38  ;;  %v288_v44 = vrot.slane %v1805_v37, 2 }
  0x23   : > { %1364 = vmatpush3.bf16.msra.mxu1 %v1509_v12  ;;  %v1532_v43 = vld [vmem:[%s1953_s1 + $0x1c0] sm:$0xff]   ;;  %v1534_v46 = vld [vmem:[%s1953_s1 + $0x148] sm:$0xff]   ;;  %v1538_v51 = vld [vmem:[%s1953_s1 + $0x150] sm:$0xff]   ;;  %v286_v7 = vrot.slane %v1805_v37, 1 }
  0x24   : > { %1365 = vmatprep.subr.bf16.mxu1 %v1512_v15  ;;  %919 = vmatprep.mubr.bf16.mxu0 %v296_v39  ;;  %v1533_v45 = vld [vmem:[%s1953_s1 + $0x180] sm:$0xff]   ;;  %v300_v47 = vpack.c.bf16 %v288_v44, %v288_v44  ;;  %v1535_v48 = vld [vmem:[%s1953_s1 + $0x108] sm:$0xff]   ;;  %v1539_v52 = vld [vmem:[%s1953_s1 + $0x110] sm:$0xff]  }
  0x25   : > { %1344 = vmatpush3.bf16.msra.mxu0 %v1511_v14  ;;  %959 = vmatprep.mubr.bf16.mxu1 %v298_v40  ;;  %v1536_v49 = vld [vmem:[%s1953_s1 + $0x1c8] sm:$0xff]   ;;  %v1540_v53 = vld [vmem:[%s1953_s1 + $0x1d0] sm:$0xff]   ;;  %v1542_v55 = vld [vmem:[%s1953_s1 + $0x158] sm:$0xff]   ;;  %v299_v13 = vpack.c.bf16 %v286_v7, %v286_v7 }
  0x26   : > { %1345 = vmatprep.subr.bf16.mxu0 %v1514_v17  ;;  %v1537_v50 = vld [vmem:[%s1953_s1 + $0x188] sm:$0xff]   ;;  %v1541_v54 = vld [vmem:[%s1953_s1 + $0x190] sm:$0xff]   ;;  %v1543_v56 = vld [vmem:[%s1953_s1 + $0x118] sm:$0xff]   ;;  %v1611_v17 = vmov 0.0  }
  0x27   : > { %1366 = vmatpush3.bf16.msra.mxu1 %v1513_v16  ;;  %v1544_v57 = vld [vmem:[%s1953_s1 + $0x1d8] sm:$0xff]   ;;  %v1546_v59 = vld [vmem:[%s1953_s1 + $0x160] sm:$0xff]   ;;  %v1550_v63 = vld [vmem:[%s1953_s1 + $0x168] sm:$0xff]  }
  0x28   : > { %1367 = vmatprep.subr.bf16.mxu1 %v1516_v19  ;;  %v1545_v58 = vld [vmem:[%s1953_s1 + $0x198] sm:$0xff]   ;;  %v1547_v60 = vld [vmem:[%s1953_s1 + $0x120] sm:$0xff]   ;;  %v1551_v0 = vld [vmem:[%s1953_s1 + $0x128] sm:$0xff]  }
  0x29   : > { %1346 = vmatpush3.bf16.msra.mxu0 %v1515_v18  ;;  %v1548_v61 = vld [vmem:[%s1953_s1 + $0x1e0] sm:$0xff]   ;;  %v1552_v1 = vld [vmem:[%s1953_s1 + $0x1e8] sm:$0xff]   ;;  %v1554_v3 = vld [vmem:[%s1953_s1 + $0x170] sm:$0xff]  }
  0x2a   : > { %1347 = vmatprep.subr.bf16.mxu0 %v1518_v21  ;;  %v1549_v62 = vld [vmem:[%s1953_s1 + $0x1a0] sm:$0xff]   ;;  %v1553_v2 = vld [vmem:[%s1953_s1 + $0x1a8] sm:$0xff]   ;;  %v1555_v4 = vld [vmem:[%s1953_s1 + $0x130] sm:$0xff]  }
  0x2b   : > { %1368 = vmatpush3.bf16.msra.mxu1 %v1517_v20  ;;  %v1556_v5 = vld [vmem:[%s1953_s1 + $0x1f0] sm:$0xff]   ;;  %v1558_v8 = vld [vmem:[%s1953_s1 + $0x178] sm:$0xff]   ;;  %v1562_v15 = vld [vmem:[%s1953_s1 + $0x200] sm:$0xff]  }
  0x2c   : > { %1369 = vmatprep.subr.bf16.mxu1 %v1520_v23  ;;  %v1557_v6 = vld [vmem:[%s1953_s1 + $0x1b0] sm:$0xff]   ;;  %v1559_v9 = vld [vmem:[%s1953_s1 + $0x138] sm:$0xff]   ;;  %v1563_v19 = vld [vmem:[%s1953_s1 + $0x208] sm:$0xff]  }
  0x2d   : > { %1348 = vmatpush3.bf16.msra.mxu0 %v1519_v22  ;;  %v1560_v10 = vld [vmem:[%s1953_s1 + $0x1f8] sm:$0xff]   ;;  %v1261_v12 = vld [vmem:[%s1789_s15 + $0x10] sm:$0x3f]  ;;  %v1566_v22 = vld [vmem:[%s1953_s1 + $0x220] sm:$0xff]  }
  0x2e   : > { %1349 = vmatprep.subr.bf16.mxu0 %v1522_v25  ;;  %v1561_v11 = vld [vmem:[%s1953_s1 + $0x1b8] sm:$0xff]   ;;  %v291_v14 = vrot.slane %v1261_v12, 1  ;;  %v301_v16 = vpack.c.bf16 %v1261_v12, %v1261_v12  ;;  %v1564_v20 = vld [vmem:[%s1953_s1 + $0x210] sm:$0xff]   ;;  %v1567_v23 = vld [vmem:[%s1953_s1 + $0x228] sm:$0xff]   ;;  %v293_v25 = vrot.slane %v1261_v12, 2 }
  0x2f   : > { %1370 = vmatpush3.bf16.msra.mxu1 %v1521_v24  ;;  %v1565_v21 = vld [vmem:[%s1953_s1 + $0x218] sm:$0xff]   ;;  %v1568_v24 = vld [vmem:[%s1953_s1 + $0x230] sm:$0xff]  }
  0x30   : > { %1371 = vmatprep.subr.bf16.mxu1 %v1524_v27  ;;  %v302_v18 = vpack.c.bf16 %v291_v14, %v291_v14  ;;  %v303_v27 = vpack.c.bf16 %v293_v25, %v293_v25 }
  0x31   : > { %1350 = vmatpush3.bf16.msra.mxu0 %v1523_v26  ;;  %v1569_v26 = vld [vmem:[%s1953_s1 + $0x238] sm:$0xff]  }
  0x32   : > { %1351 = vmatprep.subr.bf16.mxu0 %v1526_v29 }
  0x33   : > { %1372 = vmatpush3.bf16.msra.mxu1 %v1525_v28 }
  0x34   : > { %1373 = vmatprep.subr.bf16.mxu1 %v1528_v31 }
  0x35   : > { %1352 = vmatpush3.bf16.msra.mxu0 %v1527_v30  ;;  %v1262_v30 = vld [vmem:[%s1954_s2] ss:$0 sm:$0xff] }
  0x36   : > { %1381 = vmatprep.subr.bf16.mxu0 %v1530_v36 }
  0x37   : > { %1374 = vmatpush3.bf16.msra.mxu1 %v1529_v34 }
  0x38   : > { %920 = vmatmul.mubr.bf16.vlgmr.msra.gmra.mrb[0].mxu0 %v295_v35  ;;  %1403 = vmatprep.subr.bf16.mxu1 %v1532_v43 }
  0x39   : > { %1382 = vmatpush3.bf16.msra.mxu0 %v1531_v41  ;;  %999 = vmatprep.mubr.bf16.mxu0 %v300_v47 }
  0x3a   : > { %960 = vmatmul.mubr.bf16.vlgmr.msra.gmra.mrb[0].mxu1 %v297_v42  ;;  %1383 = vmatprep.subr.bf16.mxu0 %v1534_v46 }
  0x3b   : > { %1404 = vmatpush3.bf16.msra.mxu1 %v1533_v45  ;;  %1039 = vmatprep.mubr.bf16.mxu1 %v302_v18 }
  0x3c   : > { %1405 = vmatprep.subr.bf16.mxu1 %v1536_v49 }
  0x3d   : > { %1384 = vmatpush3.bf16.msra.mxu0 %v1535_v48 }
  0x3e   : > { %1385 = vmatprep.subr.bf16.mxu0 %v1538_v51 }
  0x3f   : > { %1406 = vmatpush3.bf16.msra.mxu1 %v1537_v50 }
  0x40   : > { %1407 = vmatprep.subr.bf16.mxu1 %v1540_v53 }
  0x41   : > { %1386 = vmatpush3.bf16.msra.mxu0 %v1539_v52 }
  0x42   : > { %1387 = vmatprep.subr.bf16.mxu0 %v1542_v55 }
  0x43   : > { %1408 = vmatpush3.bf16.msra.mxu1 %v1541_v54 }
  0x44   : > { %1409 = vmatprep.subr.bf16.mxu1 %v1544_v57 }
  0x45   : > { %1388 = vmatpush3.bf16.msra.mxu0 %v1543_v56 }
  0x46   : > { %1389 = vmatprep.subr.bf16.mxu0 %v1546_v59 }
  0x47   : > { %1410 = vmatpush3.bf16.msra.mxu1 %v1545_v58 }
  0x48   : > { %1411 = vmatprep.subr.bf16.mxu1 %v1548_v61 }
  0x49   : > { %1390 = vmatpush3.bf16.msra.mxu0 %v1547_v60 }
  0x4a   : > { %1391 = vmatprep.subr.bf16.mxu0 %v1550_v63 }
  0x4b   : > { %1412 = vmatpush3.bf16.msra.mxu1 %v1549_v62 }
  0x4c   : > { %1413 = vmatprep.subr.bf16.mxu1 %v1552_v1 }
  0x4d   : > { %1392 = vmatpush3.bf16.msra.mxu0 %v1551_v0 }
  0x4e   : > { %1393 = vmatprep.subr.bf16.mxu0 %v1554_v3 }
  0x4f   : > { %1414 = vmatpush3.bf16.msra.mxu1 %v1553_v2 }
  0x50   : > { %1415 = vmatprep.subr.bf16.mxu1 %v1556_v5 }
  0x51   : > { %1394 = vmatpush3.bf16.msra.mxu0 %v1555_v4 }
  0x52   : > { %1395 = vmatprep.subr.bf16.mxu0 %v1558_v8 }
  0x53   : > { %1416 = vmatpush3.bf16.msra.mxu1 %v1557_v6  ;;  %v1088_v6 = vld [vmem:[%s1680_s6] sm:$0x1] }
  0x54   : > { %1417 = vmatprep.subr.bf16.mxu1 %v1560_v10 }
  0x55   : > { %1396 = vmatpush3.bf16.msra.mxu0 %v1559_v9  ;;  %v1099_v9 = vld [vmem:[%s1695_s16] sm:$0x1] }
  0x56   : > { %1434 = vmatprep.subr.bf16.mxu0 %v1611_v17 }
  0x57   : > { %1418 = vmatpush3.bf16.msra.mxu1 %v1561_v11 }
  0x58   : > { %1000 = vmatmul.mubr.bf16.vlgmr.msra.gmra.mrb[4].mxu0 %v299_v13 }
  0x59   : > { %1435 = vmatpush3.bf16.msra.mxu0 %v1562_v15  ;;  %1450 = vmatprep.mubr.msk.bf16.mxu0 %vm1612_vm0, %v1611_v17 }
  0x5a   : > { %1040 = vmatmul.mubr.bf16.vlgmr.msra.gmra.mrb[4].mxu1 %v301_v16  ;;  %1436 = vmatprep.subr.bf16.mxu0 %v1611_v17 }
  0x5d   : > { %1437 = vmatpush3.bf16.msra.mxu0 %v1563_v19 }
  0x5e   : > { %1438 = vmatprep.subr.bf16.mxu0 %v1611_v17 }
  0x61   : > { %1439 = vmatpush3.bf16.msra.mxu0 %v1564_v20 }
  0x62   : > { %1440 = vmatprep.subr.bf16.mxu0 %v1611_v17 }
  0x65   : > { %1441 = vmatpush3.bf16.msra.mxu0 %v1565_v21 }
  0x66   : > { %1442 = vmatprep.subr.bf16.mxu0 %v1611_v17 }
  0x69   : > { %1443 = vmatpush3.bf16.msra.mxu0 %v1566_v22 }
  0x6a   : > { %1444 = vmatprep.subr.bf16.mxu0 %v1611_v17 }
  0x6d   : > { %1445 = vmatpush3.bf16.msra.mxu0 %v1567_v23 }
  0x6e   : > { %1446 = vmatprep.subr.bf16.mxu0 %v1611_v17 }
  0x71   : > { %1447 = vmatpush3.bf16.msra.mxu0 %v1568_v24 }
  0x72   : > { %1448 = vmatprep.subr.bf16.mxu0 %v1611_v17 }
  0x75   : > { %1449 = vmatpush3.bf16.msra.mxu0 %v1569_v26 }
  0x78   : > { %1451 = vmatmul.mubr.bf16.vlgmr.msra.gmra.mrb[8].mxu0 %v303_v27 }
 0x10b   : > { %v1353_v28 = vpop.f32.mrb[0].mxu0 }
 0x10c   : > { %v1354_v31 = vpop.f32.mrb[1].mxu0 }
 0x10d   : > { %v1375_v29 = vpop.f32.mrb[0].mxu1  ;;  %v1355_v33 = vadd.f32 %v1354_v31, %v1353_v28  ;;  %v1356_v34 = vpop.f32.mrb[2].mxu0 }
 0x10e   : > { %v1376_v32 = vpop.f32.mrb[1].mxu1  ;;  %v1357_v37 = vpop.f32.mrb[3].mxu0 }
 0x10f   : > { %v1377_v35 = vadd.f32 %v1376_v32, %v1375_v29  ;;  %v1378_v36 = vpop.f32.mrb[2].mxu1  ;;  %v922_v39 = vadd.f32 %v1355_v33, %v1262_v30 }
 0x110   : > { %v1379_v38 = vpop.f32.mrb[3].mxu1 }
 0x111   : > { %v962_v40 = vadd.f32 %v1377_v35, %v922_v39 }
 0x12b   : > { %v1397_v41 = vpop.f32.mrb[4].mxu0 }
 0x12c   : > { %v1398_v42 = vpop.f32.mrb[5].mxu0 }
 0x12d   : > { %v1419_v43 = vpop.f32.mrb[4].mxu1  ;;  %v1399_v44 = vadd.f32 %v1398_v42, %v1397_v41  ;;  %v1400_v45 = vpop.f32.mrb[6].mxu0 }
 0x12e   : > { %v1420_v46 = vpop.f32.mrb[5].mxu1  ;;  %v1401_v47 = vpop.f32.mrb[7].mxu0 }
 0x12f   : > { %v1421_v48 = vadd.f32 %v1420_v46, %v1419_v43  ;;  %v1422_v49 = vpop.f32.mrb[6].mxu1  ;;  %v1002_v50 = vadd.f32 %v1399_v44, %v962_v40 }
 0x130   : > { %v1423_v51 = vpop.f32.mrb[7].mxu1 }
 0x131   : > { %v1042_v52 = vadd.f32 %v1421_v48, %v1002_v50 }
 0x14b   : > { %v1081_v53 = vpop.f32.mrb[8].mxu0 }
 0x14c   : > { %v1082_v54 = vadd.f32 %v1081_v53, %v1042_v52  ;;  %v1452_v55 = vpop.f32.mrb[9].mxu0 }
 0x14d   : > { %v1084_v56 = vpop.f32.mrb[10].mxu0 }
 0x14e   : > { %1087 = vst [vmem:[%s1690_s13] sm:$0xf] %v1082_v54  ;;  %v1090_v57 = vsel %vm1089_vm1, %v1082_v54, 0.0  ;;  %v1100_v58 = vmul.f32 %v1082_v54, %v1082_v54  ;;  %v1453_v59 = vpop.f32.mrb[11].mxu0 }
 0x14f   : > { %v1091_v60 = vrot.slane %v1090_v57, 4 }
 0x150   : > { %v1101_v61 = vsel %vm1089_vm1, %v1100_v58, 0.0 }
 0x151   : > { %v1092_v62 = vadd.f32 %v1091_v60, %v1090_v57  ;;  %v1102_v63 = vrot.slane %v1101_v61, 4 }
 0x153   : > { %v1093_v0 = vrot.slane %v1092_v62, 2  ;;  %v1103_v1 = vadd.f32 %v1102_v63, %v1101_v61 }
 0x155   : > { %v1094_v2 = vadd.f32 %v1093_v0, %v1092_v62  ;;  %v1104_v3 = vrot.slane %v1103_v1, 2 }
 0x157   : > { %v1095_v4 = vrot.slane %v1094_v2, 1  ;;  %v1105_v5 = vadd.f32 %v1104_v3, %v1103_v1 }
 0x159   : > { %v1096_v7 = vadd.f32 %v1095_v4, %v1094_v2  ;;  %v1106_v8 = vrot.slane %v1105_v5, 1 }
 0x15b   : > { %v1097_v10 = vadd.f32 %v1096_v7, %v1088_v6  ;;  %v1107_v11 = vadd.f32 %v1106_v8, %v1105_v5 }
 0x15d   : > { %1098 = vst [vmem:[%s1680_s6] sm:$0x1] %v1097_v10  ;;  %v1108_v12 = vadd.f32 %v1107_v11, %v1099_v9 }
 0x15f   : > { %1109 = vst [vmem:[%s1695_s16] sm:$0x1] %v1108_v12 }
 0x160 PF: > { %s16_s22 = sadd.s32 1, %s1608_s22   ;;  %s1958_s18 = smov %s1600_s20 }
 0x161   : > { %p13_p8 = scmp.ge.s32.totalorder %s16_s22, 10   ;;  %s1959_s19 = smov %s1604_s21 }
 0x162   : > { %s1960_s20 = smov %s1963_s23  ;;  %s1961_s21 = smov %s1967_s24 }
 0x163   :  { %15 = sbr.rel (!%p13_p8) target bundleno = 3 (0x3), region = 93 }

// kernel: generator_forward.10
= control target key start
LH: loop header
LB: loop body
LE: loop exit
PB: predicated region body
PF: predicated region fallthrough
CT: control target
= control target key end

     0   :  { %8 = vsyncpa [#allocation3], 0  ;;  %s1465_s12 = smov [#allocation2]   ;;  %s1562_s0 = inlined_call_operand.vmem [shape: f32[2,128], index: 0, kind: input, shape index: {}]   ;;  %s1563_s1 = inlined_call_operand.hbm [shape: bf16[128,2048], index: 1, kind: input, shape index: {}]   ;;  %s1564_s2 = inlined_call_operand.vmem [shape: f32[1,2048], index: 2, kind: input, shape index: {}]   ;;  %s1565_s3 = inlined_call_operand.vmem [shape: f32[2,2048], index: 3, kind: output, shape index: {}]  }
   0x1   :  { %s16_s13 = sshll.u32 %s1465_s12, 4  ;;  %s1441_s16 = scalar_lea.hbm %s1563_s1, 16384  ;;  %s17_s13 = int_to_ptr.vmem [resolvable:$true] %s16_s13 }
   0x2   :  { %p1442_p0 = scmp.ne.s32.totalorder %s1563_s1, %s1441_s16  ;;  %p1445_p1 = scmp.lt.u32.totalorder %s1441_s16, %s1563_s1 }
   0x4   :  { %p1447_p2 = pnand %p1445_p1, %p1442_p0 }
   0x6   :  { %1450 = shalt.err (!%p1447_p2)
}
   0x7   :  { %s1451_s21 = scalar_lea.vmem %s17_s13, 16384  ;;  %p1456_p4 = scmp.lt.s32.totalorder %s17_s13, %s17_s13 }
   0x8   :  { %p1452_p3 = scmp.ne.s32.totalorder %s17_s13, %s1451_s21  ;;  %p1457_p5 = scmp.lt.s32.totalorder %s1451_s21, %s1451_s21 }
   0xa   :  { %p1458_p6 = por %p1457_p5, %p1456_p4 }
   0xc   :  { %p1459_p7 = pnand %p1458_p6, %p1452_p3 }
   0xe   :  { %1462 = shalt.err (!%p1459_p7)
}
   0xf   :  { %s1466_s22 = smov 1024   ;;  %s1467_s23 = smov 64  }
  0x10   :  { %22 = dma.hbm_to_vmem [thread:$0]  %s1563_s1, 16384, %s17_s13, [#allocation3], %s1466_s22, %s1466_s22, %s1467_s23  }
  0x11   :  { %1463 = dma.done.wait [#allocation3], 16384  }
  0x12   :  { %1464 = vsyncadd [#allocation3], 4294950912  ;;  %v1468_v0 = vmov 0   ;;  %v31_v1 = vld [vmem:[#allocation2] sm:$0xff]  ;;  %v32_v3 = vld [vmem:[#allocation2 + $0x8] sm:$0xff] }
  0x13   :  { %915 = vmatprep.mubr.bf16.mxu0 %v1468_v0  ;;  %956 = vmatprep.mubr.bf16.mxu1 %v1468_v0  ;;  %v39_v2 = vld [vmem:[#allocation2 + $0x40] sm:$0xff]  ;;  %v40_v5 = vld [vmem:[#allocation2 + $0x48] sm:$0xff]  ;;  %v33_v63 = vld [vmem:[#allocation2 + $0x10] sm:$0xff] }
  0x14   :  { %v1309_v4 = vcombine.high %v31_v1, %v39_v2  ;;  %v1308_v6 = vcombine.low %v31_v1, %v39_v2  ;;  %v47_v7 = vld [vmem:[#allocation2 + $0x80] sm:$0xff]  ;;  %v1311_v9 = vcombine.high %v32_v3, %v40_v5  ;;  %v1310_v10 = vcombine.low %v32_v3, %v40_v5  ;;  %v48_v12 = vld [vmem:[#allocation2 + $0x88] sm:$0xff]  ;;  %v41_v1 = vld [vmem:[#allocation2 + $0x50] sm:$0xff] }
  0x15   :  { %v55_v8 = vld [vmem:[#allocation2 + $0xc0] sm:$0xff]  ;;  %v56_v13 = vld [vmem:[#allocation2 + $0xc8] sm:$0xff]  ;;  %v34_v2 = vld [vmem:[#allocation2 + $0x18] sm:$0xff] }
  0x16   :  { %v1325_v11 = vcombine.high %v47_v7, %v55_v8  ;;  %v63_v14 = vld [vmem:[#allocation2 + $0x100] sm:$0xff]  ;;  %883 = vmatprep.subr.bf16.mxu0 %v1309_v4  ;;  %v1327_v15 = vcombine.high %v48_v12, %v56_v13  ;;  %v64_v17 = vld [vmem:[#allocation2 + $0x108] sm:$0xff]  ;;  %924 = vmatprep.subr.bf16.mxu1 %v1311_v9  ;;  %v1324_v19 = vcombine.low %v47_v7, %v55_v8  ;;  %v42_v3 = vld [vmem:[#allocation2 + $0x58] sm:$0xff] }
  0x17   :  { %v71_v16 = vld [vmem:[#allocation2 + $0x140] sm:$0xff]  ;;  %v72_v18 = vld [vmem:[#allocation2 + $0x148] sm:$0xff]  ;;  %884 = vmatpush1.bf16.msra.mxu0 %v1308_v6  ;;  %925 = vmatpush1.bf16.msra.mxu1 %v1310_v10  ;;  %v1326_v20 = vcombine.low %v48_v12, %v56_v13  ;;  %v1313_v7 = vcombine.high %v33_v63, %v41_v1  ;;  %v1315_v8 = vcombine.high %v34_v2, %v42_v3  ;;  %v49_v9 = vld [vmem:[#allocation2 + $0x90] sm:$0xff] }
  0x18   :  { %885 = vmatprep.subr.bf16.mxu0 %v1325_v11  ;;  %v1341_v21 = vcombine.high %v63_v14, %v71_v16  ;;  %926 = vmatprep.subr.bf16.mxu1 %v1327_v15  ;;  %v1343_v22 = vcombine.high %v64_v17, %v72_v18  ;;  %v79_v23 = vld [vmem:[#allocation2 + $0x180] sm:$0xff]  ;;  %v80_v25 = vld [vmem:[#allocation2 + $0x188] sm:$0xff]  ;;  %v1340_v27 = vcombine.low %v63_v14, %v71_v16  ;;  %v57_v10 = vld [vmem:[#allocation2 + $0xd0] sm:$0xff] }
  0x19   :  { %v87_v24 = vld [vmem:[#allocation2 + $0x1c0] sm:$0xff]  ;;  %v88_v26 = vld [vmem:[#allocation2 + $0x1c8] sm:$0xff]  ;;  %v1342_v28 = vcombine.low %v64_v17, %v72_v18  ;;  %v50_v12 = vld [vmem:[#allocation2 + $0x98] sm:$0xff]  ;;  %v1312_v14 = vcombine.low %v33_v63, %v41_v1  ;;  %v1314_v15 = vcombine.low %v34_v2, %v42_v3  ;;  %v1329_v16 = vcombine.high %v49_v9, %v57_v10 }
  0x1a   :  { %v1357_v29 = vcombine.high %v79_v23, %v87_v24  ;;  %v1359_v30 = vcombine.high %v80_v25, %v88_v26  ;;  %v95_v31 = vld [vmem:[#allocation2 + $0x200] sm:$0xff]  ;;  %v96_v33 = vld [vmem:[#allocation2 + $0x208] sm:$0xff]  ;;  %v1356_v35 = vcombine.low %v79_v23, %v87_v24  ;;  %v1358_v36 = vcombine.low %v80_v25, %v88_v26  ;;  %v58_v13 = vld [vmem:[#allocation2 + $0xd8] sm:$0xff] }
  0x1b   :  { %886 = vmatpush1.bf16.msra.mxu0 %v1324_v19  ;;  %927 = vmatpush1.bf16.msra.mxu1 %v1326_v20  ;;  %v103_v32 = vld [vmem:[#allocation2 + $0x240] sm:$0xff]  ;;  %v104_v34 = vld [vmem:[#allocation2 + $0x248] sm:$0xff]  ;;  %v1331_v17 = vcombine.high %v50_v12, %v58_v13  ;;  %v65_v18 = vld [vmem:[#allocation2 + $0x110] sm:$0xff]  ;;  %v1330_v23 = vcombine.low %v50_v12, %v58_v13 }
  0x1c   :  { %887 = vmatprep.subr.bf16.mxu0 %v1341_v21  ;;  %928 = vmatprep.subr.bf16.mxu1 %v1343_v22  ;;  %v1373_v37 = vcombine.high %v95_v31, %v103_v32  ;;  %v1375_v38 = vcombine.high %v96_v33, %v104_v34  ;;  %v111_v39 = vld [vmem:[#allocation2 + $0x280] sm:$0xff]  ;;  %v112_v41 = vld [vmem:[#allocation2 + $0x288] sm:$0xff]  ;;  %v1372_v43 = vcombine.low %v95_v31, %v103_v32  ;;  %v73_v19 = vld [vmem:[#allocation2 + $0x150] sm:$0xff] }
  0x1d   :  { %v119_v40 = vld [vmem:[#allocation2 + $0x2c0] sm:$0xff]  ;;  %v120_v42 = vld [vmem:[#allocation2 + $0x2c8] sm:$0xff]  ;;  %v1374_v44 = vcombine.low %v96_v33, %v104_v34  ;;  %v66_v20 = vld [vmem:[#allocation2 + $0x118] sm:$0xff]  ;;  %v1328_v22 = vcombine.low %v49_v9, %v57_v10  ;;  %v1345_v24 = vcombine.high %v65_v18, %v73_v19 }
  0x1e   :  { %v1389_v45 = vcombine.high %v111_v39, %v119_v40  ;;  %v1391_v46 = vcombine.high %v112_v41, %v120_v42  ;;  %v127_v47 = vld [vmem:[#allocation2 + $0x300] sm:$0xff]  ;;  %v128_v49 = vld [vmem:[#allocation2 + $0x308] sm:$0xff]  ;;  %v1388_v51 = vcombine.low %v111_v39, %v119_v40  ;;  %v1390_v52 = vcombine.low %v112_v41, %v120_v42  ;;  %v74_v21 = vld [vmem:[#allocation2 + $0x158] sm:$0xff] }
  0x1f   :  { %888 = vmatpush1.bf16.msra.mxu0 %v1340_v27  ;;  %929 = vmatpush1.bf16.msra.mxu1 %v1342_v28  ;;  %v135_v48 = vld [vmem:[#allocation2 + $0x340] sm:$0xff]  ;;  %v136_v50 = vld [vmem:[#allocation2 + $0x348] sm:$0xff]  ;;  %v1347_v25 = vcombine.high %v66_v20, %v74_v21  ;;  %v81_v26 = vld [vmem:[#allocation2 + $0x190] sm:$0xff]  ;;  %v1346_v31 = vcombine.low %v66_v20, %v74_v21 }
  0x20   :  { %889 = vmatprep.subr.bf16.mxu0 %v1357_v29  ;;  %930 = vmatprep.subr.bf16.mxu1 %v1359_v30  ;;  %v1405_v53 = vcombine.high %v127_v47, %v135_v48  ;;  %v1407_v54 = vcombine.high %v128_v49, %v136_v50  ;;  %v143_v55 = vld [vmem:[#allocation2 + $0x380] sm:$0xff]  ;;  %v144_v57 = vld [vmem:[#allocation2 + $0x388] sm:$0xff]  ;;  %v1404_v59 = vcombine.low %v127_v47, %v135_v48  ;;  %v89_v27 = vld [vmem:[#allocation2 + $0x1d0] sm:$0xff] }
  0x21   :  { %v151_v56 = vld [vmem:[#allocation2 + $0x3c0] sm:$0xff]  ;;  %v152_v58 = vld [vmem:[#allocation2 + $0x3c8] sm:$0xff]  ;;  %v1406_v60 = vcombine.low %v128_v49, %v136_v50  ;;  %v82_v28 = vld [vmem:[#allocation2 + $0x198] sm:$0xff]  ;;  %v1344_v30 = vcombine.low %v65_v18, %v73_v19  ;;  %v1361_v32 = vcombine.high %v81_v26, %v89_v27 }
  0x22   :  { %v1421_v61 = vcombine.high %v143_v55, %v151_v56  ;;  %v1423_v62 = vcombine.high %v144_v57, %v152_v58  ;;  %v1420_v4 = vcombine.low %v143_v55, %v151_v56  ;;  %v29_v5 = vld [vmem:[%s1562_s0] sm:$0x3]  ;;  %v1422_v6 = vcombine.low %v144_v57, %v152_v58  ;;  %v90_v29 = vld [vmem:[#allocation2 + $0x1d8] sm:$0xff]  ;;  %v97_v34 = vld [vmem:[#allocation2 + $0x210] sm:$0xff] }
  0x23   :  { %890 = vmatpush1.bf16.msra.mxu0 %v1356_v35  ;;  %931 = vmatpush1.bf16.msra.mxu1 %v1358_v36  ;;  %v1507_v11 = vpack.c.bf16 %v29_v5, %v29_v5  ;;  %v1363_v33 = vcombine.high %v82_v28, %v90_v29  ;;  %v105_v35 = vld [vmem:[#allocation2 + $0x250] sm:$0xff]  ;;  %v98_v36 = vld [vmem:[#allocation2 + $0x218] sm:$0xff]  ;;  %v1362_v39 = vcombine.low %v82_v28, %v90_v29  ;;  %v35_v3 = vld [vmem:[#allocation2 + $0x20] sm:$0xff] }
  0x24   :  { %891 = vmatprep.subr.bf16.mxu0 %v1373_v37  ;;  %932 = vmatprep.subr.bf16.mxu1 %v1375_v38  ;;  %v106_v37 = vld [vmem:[#allocation2 + $0x258] sm:$0xff]  ;;  %v1360_v38 = vcombine.low %v81_v26, %v89_v27  ;;  %v1377_v40 = vcombine.high %v97_v34, %v105_v35  ;;  %v113_v42 = vld [vmem:[#allocation2 + $0x290] sm:$0xff]  ;;  %v36_v5 = vld [vmem:[#allocation2 + $0x28] sm:$0xff] }
  0x25   :  { %v1379_v41 = vcombine.high %v98_v36, %v106_v37  ;;  %v1378_v47 = vcombine.low %v98_v36, %v106_v37  ;;  %v129_v50 = vld [vmem:[#allocation2 + $0x310] sm:$0xff]  ;;  %v51_v12 = vld [vmem:[#allocation2 + $0xa0] sm:$0xff] }
  0x26   :  { %v145_v58 = vld [vmem:[#allocation2 + $0x390] sm:$0xff]  ;;  %v59_v13 = vld [vmem:[#allocation2 + $0xe0] sm:$0xff] }
  0x27   :  { %892 = vmatpush1.bf16.msra.mxu0 %v1372_v43  ;;  %933 = vmatpush1.bf16.msra.mxu1 %v1374_v44  ;;  %v121_v43 = vld [vmem:[#allocation2 + $0x2d0] sm:$0xff]  ;;  %v114_v44 = vld [vmem:[#allocation2 + $0x298] sm:$0xff]  ;;  %v1333_v18 = vcombine.high %v51_v12, %v59_v13  ;;  %v67_v20 = vld [vmem:[#allocation2 + $0x120] sm:$0xff] }
  0x28   :  { %893 = vmatprep.subr.bf16.mxu0 %v1389_v45  ;;  %934 = vmatprep.subr.bf16.mxu1 %v1391_v46  ;;  %v122_v45 = vld [vmem:[#allocation2 + $0x2d8] sm:$0xff]  ;;  %v1376_v46 = vcombine.low %v97_v34, %v105_v35  ;;  %v1393_v48 = vcombine.high %v113_v42, %v121_v43  ;;  %v75_v21 = vld [vmem:[#allocation2 + $0x160] sm:$0xff] }
  0x29   :  { %v1395_v49 = vcombine.high %v114_v44, %v122_v45  ;;  %v1394_v55 = vcombine.low %v114_v44, %v122_v45  ;;  %v1349_v26 = vcombine.high %v67_v20, %v75_v21  ;;  %v83_v28 = vld [vmem:[#allocation2 + $0x1a0] sm:$0xff] }
  0x2a   :  { %v91_v29 = vld [vmem:[#allocation2 + $0x1e0] sm:$0xff] }
  0x2b   :  { %894 = vmatpush1.bf16.msra.mxu0 %v1388_v51  ;;  %935 = vmatpush1.bf16.msra.mxu1 %v1390_v52  ;;  %v137_v51 = vld [vmem:[#allocation2 + $0x350] sm:$0xff]  ;;  %v130_v52 = vld [vmem:[#allocation2 + $0x318] sm:$0xff]  ;;  %v1365_v34 = vcombine.high %v83_v28, %v91_v29  ;;  %v99_v36 = vld [vmem:[#allocation2 + $0x220] sm:$0xff] }
  0x2c   :  { %895 = vmatprep.subr.bf16.mxu0 %v1405_v53  ;;  %936 = vmatprep.subr.bf16.mxu1 %v1407_v54  ;;  %v138_v53 = vld [vmem:[#allocation2 + $0x358] sm:$0xff]  ;;  %v1392_v54 = vcombine.low %v113_v42, %v121_v43  ;;  %v1409_v56 = vcombine.high %v129_v50, %v137_v51  ;;  %v107_v37 = vld [vmem:[#allocation2 + $0x260] sm:$0xff] }
  0x2d   :  { %v1411_v57 = vcombine.high %v130_v52, %v138_v53  ;;  %v1410_v63 = vcombine.low %v130_v52, %v138_v53  ;;  %v1381_v42 = vcombine.high %v99_v36, %v107_v37  ;;  %v115_v44 = vld [vmem:[#allocation2 + $0x2a0] sm:$0xff] }
  0x2e   :  { %v123_v45 = vld [vmem:[#allocation2 + $0x2e0] sm:$0xff] }
  0x2f   :  { %896 = vmatpush1.bf16.msra.mxu0 %v1404_v59  ;;  %937 = vmatpush1.bf16.msra.mxu1 %v1406_v60  ;;  %v153_v59 = vld [vmem:[#allocation2 + $0x3d0] sm:$0xff]  ;;  %v146_v60 = vld [vmem:[#allocation2 + $0x398] sm:$0xff]  ;;  %v131_v52 = vld [vmem:[#allocation2 + $0x320] sm:$0xff] }
  0x30   :  { %897 = vmatprep.subr.bf16.mxu0 %v1421_v61  ;;  %938 = vmatprep.subr.bf16.mxu1 %v1423_v62  ;;  %v154_v61 = vld [vmem:[#allocation2 + $0x3d8] sm:$0xff]  ;;  %v1408_v62 = vcombine.low %v129_v50, %v137_v51  ;;  %v1425_v1 = vcombine.high %v145_v58, %v153_v59  ;;  %v1397_v50 = vcombine.high %v115_v44, %v123_v45  ;;  %v139_v53 = vld [vmem:[#allocation2 + $0x360] sm:$0xff] }
  0x31   :  { %v1427_v2 = vcombine.high %v146_v60, %v154_v61 }
  0x33   :  { %898 = vmatpush1.bf16.msra.mxu0 %v1420_v4  ;;  %939 = vmatpush1.bf16.msra.mxu1 %v1422_v6  ;;  %v43_v4 = vld [vmem:[#allocation2 + $0x60] sm:$0xff]  ;;  %v44_v6 = vld [vmem:[#allocation2 + $0x68] sm:$0xff] }
  0x34   :  { %965 = vmatprep.subr.bf16.mxu0 %v1313_v7  ;;  %1006 = vmatprep.subr.bf16.mxu1 %v1315_v8  ;;  %v1424_v7 = vcombine.low %v145_v58, %v153_v59  ;;  %v1426_v8 = vcombine.low %v146_v60, %v154_v61  ;;  %v1317_v9 = vcombine.high %v35_v3, %v43_v4  ;;  %v147_v60 = vld [vmem:[#allocation2 + $0x3a0] sm:$0xff] }
  0x35   :  { %v1319_v10 = vcombine.high %v36_v5, %v44_v6  ;;  %v1413_v58 = vcombine.high %v131_v52, %v139_v53  ;;  %v155_v61 = vld [vmem:[#allocation2 + $0x3e0] sm:$0xff] }
  0x36   :  { %916 = vmatmul.mubr.bf16.vlgmr.msra.gmra.mrb[0].mxu0 %v1507_v11  ;;  %957 = vmatmul.mubr.bf16.vlgmr.msra.gmra.mrb[0].mxu1 %v1507_v11 }
  0x37   :  { %966 = vmatpush1.bf16.msra.mxu0 %v1312_v14  ;;  %1007 = vmatpush1.bf16.msra.mxu1 %v1314_v15  ;;  %v52_v14 = vld [vmem:[#allocation2 + $0xa8] sm:$0xff] }
  0x38   :  { %967 = vmatprep.subr.bf16.mxu0 %v1329_v16  ;;  %1008 = vmatprep.subr.bf16.mxu1 %v1331_v17  ;;  %v60_v15 = vld [vmem:[#allocation2 + $0xe8] sm:$0xff]  ;;  %v1316_v16 = vcombine.low %v35_v3, %v43_v4  ;;  %v1318_v17 = vcombine.low %v36_v5, %v44_v6  ;;  %v1429_v3 = vcombine.high %v147_v60, %v155_v61  ;;  %v37_v5 = vld [vmem:[#allocation2 + $0x30] sm:$0xff] }
  0x39   :  { %997 = vmatprep.mubr.bf16.mxu0 %v1468_v0  ;;  %1038 = vmatprep.mubr.bf16.mxu1 %v1468_v0  ;;  %v1335_v19 = vcombine.high %v52_v14, %v60_v15  ;;  %v45_v6 = vld [vmem:[#allocation2 + $0x70] sm:$0xff] }
  0x3b   :  { %968 = vmatpush1.bf16.msra.mxu0 %v1328_v22  ;;  %1009 = vmatpush1.bf16.msra.mxu1 %v1330_v23  ;;  %v68_v22 = vld [vmem:[#allocation2 + $0x128] sm:$0xff] }
  0x3c   :  { %969 = vmatprep.subr.bf16.mxu0 %v1345_v24  ;;  %1010 = vmatprep.subr.bf16.mxu1 %v1347_v25  ;;  %v76_v23 = vld [vmem:[#allocation2 + $0x168] sm:$0xff]  ;;  %v1332_v24 = vcombine.low %v51_v12, %v59_v13  ;;  %v1334_v25 = vcombine.low %v52_v14, %v60_v15  ;;  %v1321_v12 = vcombine.high %v37_v5, %v45_v6  ;;  %v53_v14 = vld [vmem:[#allocation2 + $0xb0] sm:$0xff] }
  0x3d   :  { %v1351_v27 = vcombine.high %v68_v22, %v76_v23  ;;  %v61_v15 = vld [vmem:[#allocation2 + $0xf0] sm:$0xff] }
  0x3f   :  { %970 = vmatpush1.bf16.msra.mxu0 %v1344_v30  ;;  %1011 = vmatpush1.bf16.msra.mxu1 %v1346_v31  ;;  %v84_v30 = vld [vmem:[#allocation2 + $0x1a8] sm:$0xff] }
  0x40   :  { %971 = vmatprep.subr.bf16.mxu0 %v1361_v32  ;;  %1012 = vmatprep.subr.bf16.mxu1 %v1363_v33  ;;  %v92_v31 = vld [vmem:[#allocation2 + $0x1e8] sm:$0xff]  ;;  %v1348_v32 = vcombine.low %v67_v20, %v75_v21  ;;  %v1350_v33 = vcombine.low %v68_v22, %v76_v23  ;;  %v1337_v20 = vcombine.high %v53_v14, %v61_v15  ;;  %v69_v22 = vld [vmem:[#allocation2 + $0x130] sm:$0xff] }
  0x41   :  { %v1367_v35 = vcombine.high %v84_v30, %v92_v31  ;;  %v77_v23 = vld [vmem:[#allocation2 + $0x170] sm:$0xff] }
  0x43   :  { %972 = vmatpush1.bf16.msra.mxu0 %v1360_v38  ;;  %1013 = vmatpush1.bf16.msra.mxu1 %v1362_v39  ;;  %v100_v38 = vld [vmem:[#allocation2 + $0x228] sm:$0xff] }
  0x44   :  { %973 = vmatprep.subr.bf16.mxu0 %v1377_v40  ;;  %1014 = vmatprep.subr.bf16.mxu1 %v1379_v41  ;;  %v108_v39 = vld [vmem:[#allocation2 + $0x268] sm:$0xff]  ;;  %v1364_v40 = vcombine.low %v83_v28, %v91_v29  ;;  %v1366_v41 = vcombine.low %v84_v30, %v92_v31  ;;  %v1353_v28 = vcombine.high %v69_v22, %v77_v23  ;;  %v85_v30 = vld [vmem:[#allocation2 + $0x1b0] sm:$0xff] }
  0x45   :  { %v1383_v43 = vcombine.high %v100_v38, %v108_v39  ;;  %v93_v31 = vld [vmem:[#allocation2 + $0x1f0] sm:$0xff] }
  0x47   :  { %974 = vmatpush1.bf16.msra.mxu0 %v1376_v46  ;;  %1015 = vmatpush1.bf16.msra.mxu1 %v1378_v47  ;;  %v116_v46 = vld [vmem:[#allocation2 + $0x2a8] sm:$0xff] }
  0x48   :  { %975 = vmatprep.subr.bf16.mxu0 %v1393_v48  ;;  %1016 = vmatprep.subr.bf16.mxu1 %v1395_v49  ;;  %v124_v47 = vld [vmem:[#allocation2 + $0x2e8] sm:$0xff]  ;;  %v1380_v48 = vcombine.low %v99_v36, %v107_v37  ;;  %v1382_v49 = vcombine.low %v100_v38, %v108_v39  ;;  %v1369_v36 = vcombine.high %v85_v30, %v93_v31  ;;  %v101_v38 = vld [vmem:[#allocation2 + $0x230] sm:$0xff] }
  0x49   :  { %v1399_v51 = vcombine.high %v116_v46, %v124_v47  ;;  %v109_v39 = vld [vmem:[#allocation2 + $0x270] sm:$0xff] }
  0x4b   :  { %976 = vmatpush1.bf16.msra.mxu0 %v1392_v54  ;;  %1017 = vmatpush1.bf16.msra.mxu1 %v1394_v55  ;;  %v132_v54 = vld [vmem:[#allocation2 + $0x328] sm:$0xff] }
  0x4c   :  { %977 = vmatprep.subr.bf16.mxu0 %v1409_v56  ;;  %1018 = vmatprep.subr.bf16.mxu1 %v1411_v57  ;;  %v140_v55 = vld [vmem:[#allocation2 + $0x368] sm:$0xff]  ;;  %v1396_v56 = vcombine.low %v115_v44, %v123_v45  ;;  %v1398_v57 = vcombine.low %v116_v46, %v124_v47  ;;  %v1385_v44 = vcombine.high %v101_v38, %v109_v39  ;;  %v117_v45 = vld [vmem:[#allocation2 + $0x2b0] sm:$0xff]  ;;  %v118_v47 = vld [vmem:[#allocation2 + $0x2b8] sm:$0xff] }
  0x4d   :  { %v1415_v59 = vcombine.high %v132_v54, %v140_v55  ;;  %v125_v46 = vld [vmem:[#allocation2 + $0x2f0] sm:$0xff] }
  0x4f   :  { %978 = vmatpush1.bf16.msra.mxu0 %v1408_v62  ;;  %1019 = vmatpush1.bf16.msra.mxu1 %v1410_v63  ;;  %v148_v62 = vld [vmem:[#allocation2 + $0x3a8] sm:$0xff] }
  0x50   :  { %979 = vmatprep.subr.bf16.mxu0 %v1425_v1  ;;  %1020 = vmatprep.subr.bf16.mxu1 %v1427_v2  ;;  %v156_v63 = vld [vmem:[#allocation2 + $0x3e8] sm:$0xff]  ;;  %v1412_v1 = vcombine.low %v131_v52, %v139_v53  ;;  %v1414_v2 = vcombine.low %v132_v54, %v140_v55  ;;  %v133_v53 = vld [vmem:[#allocation2 + $0x330] sm:$0xff]  ;;  %v134_v55 = vld [vmem:[#allocation2 + $0x338] sm:$0xff] }
  0x51   :  { %v1431_v4 = vcombine.high %v148_v62, %v156_v63  ;;  %v141_v54 = vld [vmem:[#allocation2 + $0x370] sm:$0xff] }
  0x53   :  { %980 = vmatpush1.bf16.msra.mxu0 %v1424_v7  ;;  %1021 = vmatpush1.bf16.msra.mxu1 %v1426_v8  ;;  %v38_v7 = vld [vmem:[#allocation2 + $0x38] sm:$0xff] }
  0x54   :  { %1047 = vmatprep.subr.bf16.mxu0 %v1317_v9  ;;  %1088 = vmatprep.subr.bf16.mxu1 %v1319_v10  ;;  %v46_v8 = vld [vmem:[#allocation2 + $0x78] sm:$0xff]  ;;  %v1428_v9 = vcombine.low %v147_v60, %v155_v61  ;;  %v1430_v10 = vcombine.low %v148_v62, %v156_v63  ;;  %v149_v61 = vld [vmem:[#allocation2 + $0x3b0] sm:$0xff] }
  0x55   :  { %v1323_v13 = vcombine.high %v38_v7, %v46_v8  ;;  %v157_v62 = vld [vmem:[#allocation2 + $0x3f0] sm:$0xff]  ;;  %v150_v63 = vld [vmem:[#allocation2 + $0x3b8] sm:$0xff] }
  0x56   :  { %998 = vmatmul.mubr.bf16.vlgmr.msra.gmra.mrb[4].mxu0 %v1507_v11  ;;  %1039 = vmatmul.mubr.bf16.vlgmr.msra.gmra.mrb[4].mxu1 %v1507_v11 }
  0x57   :  { %1048 = vmatpush1.bf16.msra.mxu0 %v1316_v16  ;;  %1089 = vmatpush1.bf16.msra.mxu1 %v1318_v17  ;;  %v54_v16 = vld [vmem:[#allocation2 + $0xb8] sm:$0xff] }
  0x58   :  { %1049 = vmatprep.subr.bf16.mxu0 %v1333_v18  ;;  %1090 = vmatprep.subr.bf16.mxu1 %v1335_v19  ;;  %v62_v17 = vld [vmem:[#allocation2 + $0xf8] sm:$0xff]  ;;  %v1320_v18 = vcombine.low %v37_v5, %v45_v6  ;;  %v1322_v19 = vcombine.low %v38_v7, %v46_v8  ;;  %v1432_v6 = vcombine.low %v149_v61, %v157_v62  ;;  %v163_v8 = vlaneseq }
  0x59   :  { %1079 = vmatprep.mubr.bf16.mxu0 %v1468_v0  ;;  %1120 = vmatprep.mubr.bf16.mxu1 %v1468_v0  ;;  %v1339_v21 = vcombine.high %v54_v16, %v62_v17 }
  0x5b   :  { %1050 = vmatpush1.bf16.msra.mxu0 %v1332_v24  ;;  %1091 = vmatpush1.bf16.msra.mxu1 %v1334_v25  ;;  %v70_v24 = vld [vmem:[#allocation2 + $0x138] sm:$0xff] }
  0x5c   :  { %1051 = vmatprep.subr.bf16.mxu0 %v1349_v26  ;;  %1092 = vmatprep.subr.bf16.mxu1 %v1351_v27  ;;  %v78_v25 = vld [vmem:[#allocation2 + $0x178] sm:$0xff]  ;;  %v1336_v26 = vcombine.low %v53_v14, %v61_v15  ;;  %v1338_v27 = vcombine.low %v54_v16, %v62_v17  ;;  %v1469_v15 = vmov 1983009808  }
  0x5d   :  { %v1355_v29 = vcombine.high %v70_v24, %v78_v25  ;;  %v1230_v16 = vunpack.c.l.s4 %v1469_v15 }
  0x5f   :  { %1052 = vmatpush1.bf16.msra.mxu0 %v1348_v32  ;;  %1093 = vmatpush1.bf16.msra.mxu1 %v1350_v33  ;;  %v86_v32 = vld [vmem:[#allocation2 + $0x1b8] sm:$0xff] }
  0x60   :  { %1053 = vmatprep.subr.bf16.mxu0 %v1365_v34  ;;  %1094 = vmatprep.subr.bf16.mxu1 %v1367_v35  ;;  %v94_v33 = vld [vmem:[#allocation2 + $0x1f8] sm:$0xff]  ;;  %v1352_v34 = vcombine.low %v69_v22, %v77_v23  ;;  %v1354_v35 = vcombine.low %v70_v24, %v78_v25 }
  0x61   :  { %v1371_v37 = vcombine.high %v86_v32, %v94_v33 }
  0x63   :  { %1054 = vmatpush1.bf16.msra.mxu0 %v1364_v40  ;;  %1095 = vmatpush1.bf16.msra.mxu1 %v1366_v41  ;;  %v102_v40 = vld [vmem:[#allocation2 + $0x238] sm:$0xff] }
  0x64   :  { %1055 = vmatprep.subr.bf16.mxu0 %v1381_v42  ;;  %1096 = vmatprep.subr.bf16.mxu1 %v1383_v43  ;;  %v110_v41 = vld [vmem:[#allocation2 + $0x278] sm:$0xff]  ;;  %v1368_v42 = vcombine.low %v85_v30, %v93_v31  ;;  %v1370_v43 = vcombine.low %v86_v32, %v94_v33 }
  0x67   :  { %1056 = vmatpush1.bf16.msra.mxu0 %v1380_v48  ;;  %1097 = vmatpush1.bf16.msra.mxu1 %v1382_v49  ;;  %v126_v48 = vld [vmem:[#allocation2 + $0x2f8] sm:$0xff]  ;;  %v1384_v49 = vcombine.low %v101_v38, %v109_v39 }
  0x68   :  { %1057 = vmatprep.subr.bf16.mxu0 %v1397_v50  ;;  %1098 = vmatprep.subr.bf16.mxu1 %v1399_v51  ;;  %v1386_v50 = vcombine.low %v102_v40, %v110_v41  ;;  %v1401_v51 = vcombine.high %v117_v45, %v125_v46  ;;  %v1403_v52 = vcombine.high %v118_v47, %v126_v48 }
  0x6b   :  { %1058 = vmatpush1.bf16.msra.mxu0 %v1396_v56  ;;  %1099 = vmatpush1.bf16.msra.mxu1 %v1398_v57  ;;  %v142_v56 = vld [vmem:[#allocation2 + $0x378] sm:$0xff]  ;;  %v1400_v57 = vcombine.low %v117_v45, %v125_v46 }
  0x6c   :  { %1059 = vmatprep.subr.bf16.mxu0 %v1413_v58  ;;  %1100 = vmatprep.subr.bf16.mxu1 %v1415_v59  ;;  %v1402_v58 = vcombine.low %v118_v47, %v126_v48  ;;  %v1417_v59 = vcombine.high %v133_v53, %v141_v54  ;;  %v1419_v60 = vcombine.high %v134_v55, %v142_v56 }
  0x6f   :  { %1060 = vmatpush1.bf16.msra.mxu0 %v1412_v1  ;;  %1101 = vmatpush1.bf16.msra.mxu1 %v1414_v2  ;;  %v158_v1 = vld [vmem:[#allocation2 + $0x3f8] sm:$0xff]  ;;  %v1416_v2 = vcombine.low %v133_v53, %v141_v54 }
  0x70   :  { %1061 = vmatprep.subr.bf16.mxu0 %v1429_v3  ;;  %1102 = vmatprep.subr.bf16.mxu1 %v1431_v4  ;;  %v1418_v3 = vcombine.low %v134_v55, %v142_v56  ;;  %v1433_v4 = vcombine.high %v149_v61, %v157_v62  ;;  %v1435_v5 = vcombine.high %v150_v63, %v158_v1 }
  0x71   :  { %v1434_v7 = vcombine.low %v150_v63, %v158_v1  ;;  %v160_v1 = vld [vmem:[%s1564_s2 + $0x8] sm:$0xff] }
  0x73   :  { %1062 = vmatpush1.bf16.msra.mxu0 %v1428_v9  ;;  %1103 = vmatpush1.bf16.msra.mxu1 %v1430_v10  ;;  %v1523_v9 = vshrl.u32 %v163_v8, 7 }
  0x74   :  { %1129 = vmatprep.subr.bf16.mxu0 %v1321_v12  ;;  %1170 = vmatprep.subr.bf16.mxu1 %v1323_v13  ;;  %v159_v12 = vld [vmem:[%s1564_s2] sm:$0xff] }
  0x75   :  { %v165_v10 = vsub.s32 0, %v1523_v9  ;;  %v173_v13 = vsub.s32 2, %v1523_v9  ;;  %v169_v14 = vsub.s32 1, %v1523_v9  ;;  %v177_v17 = vsub.s32 3, %v1523_v9 }
  0x76   :  { %1080 = vmatmul.mubr.bf16.vlgmr.msra.gmra.mrb[8].mxu0 %v1507_v11  ;;  %1121 = vmatmul.mubr.bf16.vlgmr.msra.gmra.mrb[8].mxu1 %v1507_v11 }
  0x77   :  { %1130 = vmatpush1.bf16.msra.mxu0 %v1320_v18  ;;  %1171 = vmatpush1.bf16.msra.mxu1 %v1322_v19  ;;  %v166_v18 = vrot.slane %v159_v12, %v165_v10  ;;  %v174_v19 = vrot.slane %v159_v12, %v173_v13 }
  0x78   :  { %1131 = vmatprep.subr.bf16.mxu0 %v1337_v20  ;;  %1172 = vmatprep.subr.bf16.mxu1 %v1339_v21  ;;  %v1231_v20 = vunpack.c.0.s8 %v1230_v16  ;;  %v178_v21 = vrot.slane %v159_v12, %v177_v17 }
  0x79   :  { %1161 = vmatprep.mubr.bf16.mxu0 %v1468_v0  ;;  %1202 = vmatprep.mubr.bf16.mxu1 %v1468_v0  ;;  %v1387_v0 = vcombine.high %v102_v40, %v110_v41  ;;  %v181_v40 = vsub.s32 4, %v1523_v9  ;;  %v189_v41 = vsub.s32 6, %v1523_v9 }
  0x7b   :  { %1132 = vmatpush1.bf16.msra.mxu0 %v1336_v26  ;;  %1173 = vmatpush1.bf16.msra.mxu1 %v1338_v27 }
  0x7c   :  { %1133 = vmatprep.subr.bf16.mxu0 %v1353_v28  ;;  %1174 = vmatprep.subr.bf16.mxu1 %v1355_v29  ;;  %v1533_v28 = vsub.s32 %v1231_v20, %v1523_v9 }
  0x7f   :  { %1134 = vmatpush1.bf16.msra.mxu0 %v1352_v34  ;;  %1175 = vmatpush1.bf16.msra.mxu1 %v1354_v35 }
  0x80   :  { %1135 = vmatprep.subr.bf16.mxu0 %v1369_v36  ;;  %1176 = vmatprep.subr.bf16.mxu1 %v1371_v37 }
  0x83   :  { %1136 = vmatpush1.bf16.msra.mxu0 %v1368_v42  ;;  %1177 = vmatpush1.bf16.msra.mxu1 %v1370_v43  ;;  %v185_v42 = vsub.s32 5, %v1523_v9  ;;  %v193_v43 = vsub.s32 7, %v1523_v9 }
  0x84   :  { %1137 = vmatprep.subr.bf16.mxu0 %v1385_v44  ;;  %1178 = vmatprep.subr.bf16.mxu1 %v1387_v0  ;;  %v182_v44 = vrot.slane %v159_v12, %v181_v40  ;;  %v190_v0 = vrot.slane %v159_v12, %v189_v41 }
  0x85   :  { %v186_v45 = vrot.slane %v159_v12, %v185_v42  ;;  %v194_v46 = vrot.slane %v159_v12, %v193_v43 }
  0x87   :  { %1138 = vmatpush1.bf16.msra.mxu0 %v1384_v49  ;;  %1179 = vmatpush1.bf16.msra.mxu1 %v1386_v50 }
  0x88   :  { %1139 = vmatprep.subr.bf16.mxu0 %v1401_v51  ;;  %1180 = vmatprep.subr.bf16.mxu1 %v1403_v52 }
  0x8b   :  { %1140 = vmatpush1.bf16.msra.mxu0 %v1400_v57  ;;  %1181 = vmatpush1.bf16.msra.mxu1 %v1402_v58 }
  0x8c   :  { %1141 = vmatprep.subr.bf16.mxu0 %v1417_v59  ;;  %1182 = vmatprep.subr.bf16.mxu1 %v1419_v60 }
  0x8f   :  { %1142 = vmatpush1.bf16.msra.mxu0 %v1416_v2  ;;  %1183 = vmatpush1.bf16.msra.mxu1 %v1418_v3  ;;  %v198_v2 = vrot.slane %v160_v1, %v165_v10  ;;  %v206_v3 = vrot.slane %v160_v1, %v173_v13 }
  0x90   :  { %1143 = vmatprep.subr.bf16.mxu0 %v1433_v4  ;;  %1184 = vmatprep.subr.bf16.mxu1 %v1435_v5  ;;  %v202_v4 = vrot.slane %v160_v1, %v169_v14  ;;  %v210_v5 = vrot.slane %v160_v1, %v177_v17  ;;  %v222_v17 = vrot.slane %v160_v1, %v189_v41 }
  0x93   :  { %1144 = vmatpush1.bf16.msra.mxu0 %v1432_v6  ;;  %1185 = vmatpush1.bf16.msra.mxu1 %v1434_v7 }
  0x96   :  { %1162 = vmatmul.mubr.bf16.vlgmr.msra.gmra.mrb[12].mxu0 %v1507_v11  ;;  %1203 = vmatmul.mubr.bf16.vlgmr.msra.gmra.mrb[12].mxu1 %v1507_v11  ;;  %v170_v11 = vrot.slane %v159_v12, %v169_v14  ;;  %v214_v14 = vrot.slane %v160_v1, %v181_v40 }
 0x109   :  { %v917_v22 = vpop.f32.mrb[0].mxu0  ;;  %v958_v24 = vpop.f32.mrb[0].mxu1 }
 0x10a   :  { %v918_v23 = vadd.f32 %v917_v22, %v166_v18  ;;  %v919_v25 = vpop.f32.mrb[1].mxu0  ;;  %v959_v26 = vadd.f32 %v958_v24, %v174_v19  ;;  %v960_v29 = vpop.f32.mrb[1].mxu1 }
 0x10b   :  { %v920_v27 = vadd.f32 %v919_v25, %v170_v11  ;;  %v921_v30 = vpop.f32.mrb[2].mxu0  ;;  %v961_v31 = vadd.f32 %v960_v29, %v178_v21  ;;  %v962_v32 = vpop.f32.mrb[2].mxu1  ;;  %v218_v25 = vrot.slane %v160_v1, %v185_v42 }
 0x10c   :  { %v922_v33 = vpop.f32.mrb[3].mxu0  ;;  %v963_v35 = vpop.f32.mrb[3].mxu1 }
 0x10d   :  { %v1227_v34 = vcombine.low %v918_v23, %v920_v27  ;;  %v1228_v36 = vcombine.low %v959_v26, %v961_v31  ;;  %v226_v26 = vrot.slane %v160_v1, %v193_v43 }
 0x10f   :  { %v1235_v37 = vrot.slane %v1227_v34, %v1533_v28  ;;  %v1242_v38 = vrot.slane %v1228_v36, %v1533_v28 }
 0x111   :  { %v1243_v39 = vcombine.low %v1235_v37, %v1242_v38 }
 0x113   :  { %1299 = vst [vmem:[%s1565_s3] sm:$0xff] %v1243_v39 }
 0x129   :  { %v999_v47 = vpop.f32.mrb[4].mxu0  ;;  %v1040_v49 = vpop.f32.mrb[4].mxu1 }
 0x12a   :  { %v1000_v48 = vadd.f32 %v999_v47, %v182_v44  ;;  %v1001_v50 = vpop.f32.mrb[5].mxu0  ;;  %v1041_v51 = vadd.f32 %v1040_v49, %v190_v0  ;;  %v1042_v53 = vpop.f32.mrb[5].mxu1 }
 0x12b   :  { %v1002_v52 = vadd.f32 %v1001_v50, %v186_v45  ;;  %v1003_v54 = vpop.f32.mrb[6].mxu0  ;;  %v1043_v55 = vadd.f32 %v1042_v53, %v194_v46  ;;  %v1044_v56 = vpop.f32.mrb[6].mxu1 }
 0x12c   :  { %v1004_v57 = vpop.f32.mrb[7].mxu0  ;;  %v1045_v59 = vpop.f32.mrb[7].mxu1 }
 0x12d   :  { %v1244_v58 = vcombine.low %v1000_v48, %v1002_v52  ;;  %v1245_v60 = vcombine.low %v1041_v51, %v1043_v55 }
 0x12f   :  { %v1252_v61 = vrot.slane %v1244_v58, %v1533_v28  ;;  %v1259_v62 = vrot.slane %v1245_v60, %v1533_v28 }
 0x131   :  { %v1260_v63 = vcombine.low %v1252_v61, %v1259_v62 }
 0x133   :  { %1300 = vst [vmem:[%s1565_s3 + $0x8] sm:$0xff] %v1260_v63 }
 0x149   :  { %v1081_v6 = vpop.f32.mrb[8].mxu0  ;;  %v1122_v8 = vpop.f32.mrb[8].mxu1 }
 0x14a   :  { %v1082_v7 = vadd.f32 %v1081_v6, %v198_v2  ;;  %v1083_v9 = vpop.f32.mrb[9].mxu0  ;;  %v1123_v12 = vadd.f32 %v1122_v8, %v206_v3  ;;  %v1124_v16 = vpop.f32.mrb[9].mxu1 }
 0x14b   :  { %v1084_v15 = vadd.f32 %v1083_v9, %v202_v4  ;;  %v1085_v18 = vpop.f32.mrb[10].mxu0  ;;  %v1125_v19 = vadd.f32 %v1124_v16, %v210_v5  ;;  %v1126_v11 = vpop.f32.mrb[10].mxu1 }
 0x14c   :  { %v1086_v20 = vpop.f32.mrb[11].mxu0  ;;  %v1127_v22 = vpop.f32.mrb[11].mxu1 }
 0x14d   :  { %v1261_v21 = vcombine.low %v1082_v7, %v1084_v15  ;;  %v1262_v23 = vcombine.low %v1123_v12, %v1125_v19 }
 0x14f   :  { %v1269_v24 = vrot.slane %v1261_v21, %v1533_v28  ;;  %v1276_v10 = vrot.slane %v1262_v23, %v1533_v28 }
 0x151   :  { %v1277_v13 = vcombine.low %v1269_v24, %v1276_v10 }
 0x153   :  { %1301 = vst [vmem:[%s1565_s3 + $0x10] sm:$0xff] %v1277_v13 }
 0x169   :  { %v1163_v27 = vpop.f32.mrb[12].mxu0  ;;  %v1204_v30 = vpop.f32.mrb[12].mxu1 }
 0x16a   :  { %v1164_v29 = vadd.f32 %v1163_v27, %v214_v14  ;;  %v1165_v31 = vpop.f32.mrb[13].mxu0  ;;  %v1205_v32 = vadd.f32 %v1204_v30, %v222_v17  ;;  %v1206_v34 = vpop.f32.mrb[13].mxu1 }
 0x16b   :  { %v1166_v33 = vadd.f32 %v1165_v31, %v218_v25  ;;  %v1167_v35 = vpop.f32.mrb[14].mxu0  ;;  %v1207_v36 = vadd.f32 %v1206_v34, %v226_v26  ;;  %v1208_v37 = vpop.f32.mrb[14].mxu1 }
 0x16c   :  { %v1168_v38 = vpop.f32.mrb[15].mxu0  ;;  %v1209_v44 = vpop.f32.mrb[15].mxu1 }
 0x16d   :  { %v1278_v39 = vcombine.low %v1164_v29, %v1166_v33  ;;  %v1279_v0 = vcombine.low %v1205_v32, %v1207_v36 }
 0x16f   :  { %v1286_v45 = vrot.slane %v1278_v39, %v1533_v28  ;;  %v1293_v40 = vrot.slane %v1279_v0, %v1533_v28 }
 0x171   :  { %v1294_v41 = vcombine.low %v1286_v45, %v1293_v40 }
 0x173   :  { %1302 = vst [vmem:[%s1565_s3 + $0x18] sm:$0xff] %v1294_v41 }
 0x174   :  { %1307 = vsyncpa [#allocation3], 1 }

// kernel: generator_forward.13
= control target key start
LH: loop header
LB: loop body
LE: loop exit
PB: predicated region body
PF: predicated region fallthrough
CT: control target
= control target key end

     0   :  { %s2814_s21 = smov 0   ;;  %s2816_s22 = smov 0   ;;  %s3307_s0 = inlined_call_operand.vmem [shape: f32[2,6,6,128], index: 0, kind: input, shape index: {}]   ;;  %s3308_s1 = inlined_call_operand.vmem [shape: bf16[2,2,512,128], index: 1, kind: input, shape index: {}]   ;;  %s3309_s2 = inlined_call_operand.vmem [shape: f32[1,128], index: 2, kind: input, shape index: {}]   ;;  %s3310_s3 = inlined_call_operand.vmem [shape: f32[2,4,4,128], index: 3, kind: output, shape index: {0}]   ;;  %s3311_s4 = inlined_call_operand.vmem [shape: f32[2,4,4,128], index: 4, kind: output, shape index: {1}]   ;;  %s3312_s5 = inlined_call_operand.vmem [shape: f32[2,4,4,128], index: 5, kind: output, shape index: {2}]   ;;  %s3313_s6 = inlined_call_operand.vmem [shape: f32[2,4,4,128], index: 6, kind: output, shape index: {3}]  }
   0x1   :  { %s2818_s23 = smov 0   ;;  %s2820_s24 = smov 0  }
   0x2   :  { %s2822_s25 = smov 0  }
   0x3 LB: > { %s26_s26 = sadd.s32 1, %s2769_s23  ;;  %s29_s27 = sadd.s32 1, %s2773_s24  ;;  %s2777_s25 = sphi %s2822_s25, %s17_s25   ;;  %s2773_s24 = sphi %s2820_s24, %s3317_s24   ;;  %s2769_s23 = sphi %s2818_s23, %s3316_s23   ;;  %s2765_s22 = sphi %s2816_s22, %s3315_s22   ;;  %s2761_s21 = sphi %s2814_s21, %s3314_s21  }
   0x4   : > { %p27_p0 = scmp.ge.s32.totalorder %s26_s26, 4  ;;  %p2053_p1 = scmp.ge.s32.totalorder %s2777_s25, 1 }
   0x5   : > { %p239_p2 = scmp.lt.s32.totalorder %s2777_s25, 9 }
   0x6   : > { %s3319_s26 = smov (%p27_p0, %s26_s26), 0  ;;  %s3321_s27 = smov (!%p27_p0, %s29_s27), %s2773_s24 }
   0x7   : > { %p240_p3 = pnand %p2053_p1, %p239_p2  ;;  %p31_p4 = scmp.ge.s32.totalorder %s3321_s27, 2 }
   0x8   : > { %v2611_v0 = vld [vmem:[%s3308_s1 + $0x40] sm:$0xff] (!%p240_p3)   ;;  %v2615_v4 = vld [vmem:[%s3308_s1 + $0x48] sm:$0xff] (!%p240_p3)   ;;  %v2619_v8 = vld [vmem:[%s3308_s1 + $0x50] sm:$0xff] (!%p240_p3)   ;;  %p296_p5 = scmp.lt.s32.totalorder (!%p240_p3), %s2765_s22, 1  ;;  %s2063_s11 = sshll.u32 (!%p240_p3), %s2761_s21, 3 }
   0x9   : > { %s3323_s27 = smov (%p31_p4, %s3321_s27), 0  ;;  %243 = sbr.rel (%p240_p3) target bundleno = 359 (0x167), region = 32 }
   0xa   : > { %v2612_v1 = vld [vmem:[%s3308_s1 + $0xc0] sm:$0xff] (!%p240_p3)   ;;  %2394 = vmatprep.subr.bf16.mxu0 (!%p240_p3), %v2611_v0  ;;  %v2616_v5 = vld [vmem:[%s3308_s1 + $0xc8] sm:$0xff] (!%p240_p3)   ;;  %v2620_v9 = vld [vmem:[%s3308_s1 + $0xd0] sm:$0xff] (!%p240_p3)   ;;  %p303_p6 = scmp.lt.s32.totalorder (!%p240_p3), %s2761_s21, 3 }
   0xb   : > { %v2613_v2 = vld [vmem:[%s3308_s1] sm:$0xff] (!%p240_p3)   ;;  %2416 = vmatprep.subr.bf16.mxu1 (!%p240_p3), %v2612_v1  ;;  %v2617_v6 = vld [vmem:[%s3308_s1 + $0x8] sm:$0xff] (!%p240_p3)   ;;  %v2621_v10 = vld [vmem:[%s3308_s1 + $0x10] sm:$0xff] (!%p240_p3)  }
   0xc   : > { %v2614_v3 = vld [vmem:[%s3308_s1 + $0x80] sm:$0xff] (!%p240_p3)   ;;  %2395 = vmatpush3.bf16.msra.mxu0 (!%p240_p3), %v2613_v2  ;;  %v2618_v7 = vld [vmem:[%s3308_s1 + $0x88] sm:$0xff] (!%p240_p3)   ;;  %v2622_v11 = vld [vmem:[%s3308_s1 + $0x90] sm:$0xff] (!%p240_p3)  }
   0xd   : > { %2417 = vmatpush3.bf16.msra.mxu1 (!%p240_p3), %v2614_v3  ;;  %2396 = vmatprep.subr.bf16.mxu0 (!%p240_p3), %v2615_v4  ;;  %v2623_v12 = vld [vmem:[%s3308_s1 + $0x58] sm:$0xff] (!%p240_p3)   ;;  %v2627_v16 = vld [vmem:[%s3308_s1 + $0x60] sm:$0xff] (!%p240_p3)   ;;  %v2631_v20 = vld [vmem:[%s3308_s1 + $0x68] sm:$0xff] (!%p240_p3)  }
   0xe   : > { %2418 = vmatprep.subr.bf16.mxu1 (!%p240_p3), %v2616_v5  ;;  %v2624_v13 = vld [vmem:[%s3308_s1 + $0xd8] sm:$0xff] (!%p240_p3)   ;;  %v2628_v17 = vld [vmem:[%s3308_s1 + $0xe0] sm:$0xff] (!%p240_p3)   ;;  %v2632_v21 = vld [vmem:[%s3308_s1 + $0xe8] sm:$0xff] (!%p240_p3)  }
   0xf   : > { %v2625_v14 = vld [vmem:[%s3308_s1 + $0x18] sm:$0xff] (!%p240_p3)   ;;  %v2629_v18 = vld [vmem:[%s3308_s1 + $0x20] sm:$0xff] (!%p240_p3)   ;;  %v2633_v22 = vld [vmem:[%s3308_s1 + $0x28] sm:$0xff] (!%p240_p3)  }
  0x10   : > { %2397 = vmatpush3.bf16.msra.mxu0 %v2617_v6  ;;  %v2626_v15 = vld [vmem:[%s3308_s1 + $0x98] sm:$0xff]   ;;  %s3325_s22 = smov (!%p296_p5, %s2765_s22), 1  ;;  %v2630_v19 = vld [vmem:[%s3308_s1 + $0xa0] sm:$0xff]   ;;  %v2634_v23 = vld [vmem:[%s3308_s1 + $0xa8] sm:$0xff]   ;;  %s3327_s21 = smov (!%p303_p6, %s2761_s21), 3 }
  0x11   : > { %2419 = vmatpush3.bf16.msra.mxu1 %v2618_v7  ;;  %2398 = vmatprep.subr.bf16.mxu0 %v2619_v8  ;;  %s2570_s16 = smul.u32 48, %s3325_s22  ;;  %v2635_v24 = vld [vmem:[%s3308_s1 + $0x70] sm:$0xff]   ;;  %v2639_v28 = vld [vmem:[%s3308_s1 + $0x78] sm:$0xff]   ;;  %v2643_v38 = vld [vmem:[%s3308_s1 + $0x140] sm:$0xff]  }
  0x12   : > { %2420 = vmatprep.subr.bf16.mxu1 %v2620_v9  ;;  %v2636_v25 = vld [vmem:[%s3308_s1 + $0xf0] sm:$0xff]   ;;  %v2640_v29 = vld [vmem:[%s3308_s1 + $0xf8] sm:$0xff]   ;;  %v2644_v39 = vld [vmem:[%s3308_s1 + $0x1c0] sm:$0xff]  }
  0x13   : > { %v2637_v26 = vld [vmem:[%s3308_s1 + $0x30] sm:$0xff]   ;;  %s300_s10 = scalar_lea.vmem %s3307_s0, %s2570_s16  ;;  %v2641_v30 = vld [vmem:[%s3308_s1 + $0x38] sm:$0xff]   ;;  %v2645_v54 = vld [vmem:[%s3308_s1 + $0x100] sm:$0xff]   ;;  %s2055_s16 = sshll.u32 %s3325_s22, 2 }
  0x14   : > { %2399 = vmatpush3.bf16.msra.mxu0 %v2621_v10  ;;  %v2638_v27 = vld [vmem:[%s3308_s1 + $0xb0] sm:$0xff]   ;;  %s2947_s19 = scalar_lea.vmem %s300_s10, %s2063_s11  ;;  %v2642_v31 = vld [vmem:[%s3308_s1 + $0xb8] sm:$0xff]   ;;  %v2646_v57 = vld [vmem:[%s3308_s1 + $0x180] sm:$0xff]   ;;  %s306_s20 = sadd.s32 %s2055_s16, %s3327_s21 }
  0x15   : > { %2421 = vmatpush3.bf16.msra.mxu1 %v2622_v11  ;;  %2400 = vmatprep.subr.bf16.mxu0 %v2623_v12  ;;  %v2064_v32 = vld [vmem:[%s2947_s19 + $0x8] sm:$0x3f]  ;;  %v340_v33 = vld [vmem:[%s2947_s19] sm:$0x3f]  ;;  %v2651_v3 = vld [vmem:[%s3308_s1 + $0x150] sm:$0xff]   ;;  %s3274_s30 = sshll.u32 %s306_s20, 2 }
  0x16   : > { %2422 = vmatprep.subr.bf16.mxu1 %v2624_v13  ;;  %v346_v34 = vrot.slane %v2064_v32, 7  ;;  %v351_v35 = vpack.c.bf16 %v2064_v32, %v2064_v32  ;;  %v349_v36 = vrot.slane %v340_v33, 7  ;;  %v353_v37 = vpack.c.bf16 %v340_v33, %v340_v33  ;;  %v2647_v61 = vld [vmem:[%s3308_s1 + $0x148] sm:$0xff]   ;;  %v2652_v7 = vld [vmem:[%s3308_s1 + $0x1d0] sm:$0xff]   ;;  %v2655_v13 = vld [vmem:[%s3308_s1 + $0x158] sm:$0xff]   ;;  %s308_s7 = scalar_lea.vmem %s3310_s3, %s3274_s30  ;;  %s316_s9 = scalar_lea.vmem %s3311_s4, %s3274_s30 }
  0x17   : > { %v731_v58 = vrot.slane %v2064_v32, 1  ;;  %v733_v62 = vrot.slane %v340_v33, 1  ;;  %v2648_v63 = vld [vmem:[%s3308_s1 + $0x1c8] sm:$0xff]   ;;  %v2653_v8 = vld [vmem:[%s3308_s1 + $0x110] sm:$0xff]   ;;  %v2671_v32 = vld [vmem:[%s3308_s1 + $0x178] sm:$0xff]   ;;  %s324_s12 = scalar_lea.vmem %s3312_s5, %s3274_s30  ;;  %s332_s15 = scalar_lea.vmem %s3313_s6, %s3274_s30 }
  0x18   : > { %2401 = vmatpush3.bf16.msra.mxu0 %v2625_v14  ;;  %v352_v40 = vpack.c.bf16 %v346_v34, %v346_v34  ;;  %v354_v41 = vpack.c.bf16 %v349_v36, %v349_v36  ;;  %v427_v42 = vshrl.u32 %v351_v35, 16  ;;  %v429_v43 = vshll.u32 %v351_v35, 16  ;;  %v2649_v1 = vld [vmem:[%s3308_s1 + $0x108] sm:$0xff]   ;;  %v2654_v9 = vld [vmem:[%s3308_s1 + $0x190] sm:$0xff]   ;;  %v2672_v33 = vld [vmem:[%s3308_s1 + $0x1f8] sm:$0xff]  }
  0x19   : > { %2423 = vmatpush3.bf16.msra.mxu1 %v2626_v15  ;;  %2402 = vmatprep.subr.bf16.mxu0 %v2627_v16  ;;  %v441_v44 = vshrl.u32 %v353_v37, 16  ;;  %v443_v45 = vshll.u32 %v353_v37, 16  ;;  %v735_v0 = vpack.c.bf16 %v731_v58, %v731_v58  ;;  %v2650_v2 = vld [vmem:[%s3308_s1 + $0x188] sm:$0xff]   ;;  %v736_v4 = vpack.c.bf16 %v733_v62, %v733_v62  ;;  %v2656_v15 = vld [vmem:[%s3308_s1 + $0x1d8] sm:$0xff]   ;;  %v2675_v36 = vld [vmem:[%s3308_s1 + $0x240] sm:$0xff]  }
  0x1a   : > { %2424 = vmatprep.subr.bf16.mxu1 %v2628_v17  ;;  %v434_v46 = vshrl.u32 %v352_v40, 16  ;;  %v436_v47 = vshll.u32 %v352_v40, 16  ;;  %v448_v48 = vshrl.u32 %v354_v41, 16  ;;  %v450_v49 = vshll.u32 %v354_v41, 16  ;;  %v2657_v17 = vld [vmem:[%s3308_s1 + $0x118] sm:$0xff]   ;;  %v2676_v37 = vld [vmem:[%s3308_s1 + $0x2c0] sm:$0xff]  }
  0x1b   : > { %v431_v50 = vrot.slane %v429_v43, 1  ;;  %v445_v51 = vrot.slane %v443_v45, 1  ;;  %v810_v5 = vshrl.u32 %v735_v0, 16  ;;  %v812_v6 = vshll.u32 %v735_v0, 16  ;;  %v2673_v34 = vld [vmem:[%s3308_s1 + $0x138] sm:$0xff]   ;;  %v2679_v40 = vld [vmem:[%s3308_s1 + $0x248] sm:$0xff]  }
  0x1c   : > { %2403 = vmatpush3.bf16.msra.mxu0 %v2629_v18  ;;  %v438_v52 = vrot.slane %v436_v47, 1  ;;  %v452_v53 = vrot.slane %v450_v49, 1  ;;  %v817_v11 = vshrl.u32 %v736_v4, 16  ;;  %v819_v12 = vshll.u32 %v736_v4, 16  ;;  %v2658_v18 = vld [vmem:[%s3308_s1 + $0x198] sm:$0xff]   ;;  %v2680_v41 = vld [vmem:[%s3308_s1 + $0x2c8] sm:$0xff]  }
  0x1d   : > { %2425 = vmatpush3.bf16.msra.mxu1 %v2630_v19  ;;  %2404 = vmatprep.subr.bf16.mxu0 %v2631_v20  ;;  %v2966_v55 = vor.u32 %v431_v50, %v427_v42  ;;  %v2968_v56 = vor.u32 %v445_v51, %v441_v44  ;;  %v814_v10 = vrot.slane %v812_v6, 1  ;;  %v2659_v20 = vld [vmem:[%s3308_s1 + $0x160] sm:$0xff]   ;;  %v2674_v35 = vld [vmem:[%s3308_s1 + $0x1b8] sm:$0xff]   ;;  %v2681_v42 = vld [vmem:[%s3308_s1 + $0x208] sm:$0xff]  }
  0x1e   : > { %2426 = vmatprep.subr.bf16.mxu1 %v2632_v21  ;;  %v2973_v59 = vor.u32 %v438_v52, %v434_v46  ;;  %v453_v60 = vor.u32 %v452_v53, %v448_v48  ;;  %v821_v16 = vrot.slane %v819_v12, 1  ;;  %v2660_v21 = vld [vmem:[%s3308_s1 + $0x1e0] sm:$0xff]   ;;  %v2682_v43 = vld [vmem:[%s3308_s1 + $0x288] sm:$0xff]   ;;  %v2683_v44 = vld [vmem:[%s3308_s1 + $0x250] sm:$0xff]  }
  0x1f   : > { %v3005_v14 = vor.u32 %v814_v10, %v810_v5  ;;  %v2684_v45 = vld [vmem:[%s3308_s1 + $0x2d0] sm:$0xff]   ;;  %v2687_v48 = vld [vmem:[%s3308_s1 + $0x258] sm:$0xff]   ;;  %v2691_v52 = vld [vmem:[%s3308_s1 + $0x260] sm:$0xff]  }
  0x20   : > { %2405 = vmatpush3.bf16.msra.mxu0 %v2633_v22  ;;  %682 = vmatprep.mubr.bf16.mxu0 %v2973_v59  ;;  %v822_v19 = vor.u32 %v821_v16, %v817_v11  ;;  %v2661_v22 = vld [vmem:[%s3308_s1 + $0x120] sm:$0xff]   ;;  %v2685_v46 = vld [vmem:[%s3308_s1 + $0x210] sm:$0xff]   ;;  %v2688_v49 = vld [vmem:[%s3308_s1 + $0x2d8] sm:$0xff]  }
  0x21   : > { %2427 = vmatpush3.bf16.msra.mxu1 %v2634_v23  ;;  %2406 = vmatprep.subr.bf16.mxu0 %v2635_v24  ;;  %v2662_v23 = vld [vmem:[%s3308_s1 + $0x1a0] sm:$0xff]   ;;  %v2663_v24 = vld [vmem:[%s3308_s1 + $0x168] sm:$0xff]   ;;  %v2686_v47 = vld [vmem:[%s3308_s1 + $0x290] sm:$0xff]  }
  0x22   : > { %2428 = vmatprep.subr.bf16.mxu1 %v2636_v25  ;;  %722 = vmatprep.mubr.bf16.mxu1 %v453_v60  ;;  %v2664_v25 = vld [vmem:[%s3308_s1 + $0x1e8] sm:$0xff]   ;;  %v2689_v50 = vld [vmem:[%s3308_s1 + $0x218] sm:$0xff]   ;;  %v2692_v53 = vld [vmem:[%s3308_s1 + $0x2e0] sm:$0xff]  }
  0x23   : > { %v2690_v51 = vld [vmem:[%s3308_s1 + $0x298] sm:$0xff]   ;;  %v2696_v58 = vld [vmem:[%s3308_s1 + $0x2e8] sm:$0xff]   ;;  %v2700_v62 = vld [vmem:[%s3308_s1 + $0x2f0] sm:$0xff]  }
  0x24   : > { %2407 = vmatpush3.bf16.msra.mxu0 %v2637_v26  ;;  %v2665_v26 = vld [vmem:[%s3308_s1 + $0x128] sm:$0xff]   ;;  %v2702_v0 = vld [vmem:[%s3308_s1 + $0x2b0] sm:$0xff]   ;;  %v2705_v4 = vld [vmem:[%s3308_s1 + $0x238] sm:$0xff]  }
  0x25   : > { %2429 = vmatpush3.bf16.msra.mxu1 %v2638_v27  ;;  %2408 = vmatprep.subr.bf16.mxu0 %v2639_v28  ;;  %v2666_v27 = vld [vmem:[%s3308_s1 + $0x1a8] sm:$0xff]   ;;  %v2667_v28 = vld [vmem:[%s3308_s1 + $0x170] sm:$0xff]   ;;  %v2707_v12 = vld [vmem:[%s3308_s1 + $0x340] sm:$0xff]  }
  0x26   : > { %2430 = vmatprep.subr.bf16.mxu1 %v2640_v29  ;;  %v2668_v29 = vld [vmem:[%s3308_s1 + $0x1f0] sm:$0xff]   ;;  %v2698_v60 = vld [vmem:[%s3308_s1 + $0x2a8] sm:$0xff]  }
  0x28   : > { %2409 = vmatpush3.bf16.msra.mxu0 %v2641_v30  ;;  %v2669_v30 = vld [vmem:[%s3308_s1 + $0x130] sm:$0xff]  }
  0x29   : > { %2431 = vmatpush3.bf16.msra.mxu1 %v2642_v31  ;;  %2438 = vmatprep.subr.bf16.mxu0 %v2643_v38  ;;  %v2670_v31 = vld [vmem:[%s3308_s1 + $0x1b0] sm:$0xff]   ;;  %v2677_v38 = vld [vmem:[%s3308_s1 + $0x200] sm:$0xff]  }
  0x2a   : > { %2460 = vmatprep.subr.bf16.mxu1 %v2644_v39  ;;  %v2678_v39 = vld [vmem:[%s3308_s1 + $0x280] sm:$0xff]  }
  0x2b   : > { %683 = vmatmul.mubr.bf16.vlgmr.msra.gmra.mrb[0].mxu0 %v2966_v55 }
  0x2c   : > { %723 = vmatmul.mubr.bf16.vlgmr.msra.gmra.mrb[0].mxu1 %v2968_v56  ;;  %2439 = vmatpush3.bf16.msra.mxu0 %v2645_v54  ;;  %v2693_v54 = vld [vmem:[%s3308_s1 + $0x220] sm:$0xff]  }
  0x2d   : > { %2461 = vmatpush3.bf16.msra.mxu1 %v2646_v57  ;;  %2440 = vmatprep.subr.bf16.mxu0 %v2647_v61  ;;  %v2695_v57 = vld [vmem:[%s3308_s1 + $0x268] sm:$0xff]   ;;  %v2699_v61 = vld [vmem:[%s3308_s1 + $0x270] sm:$0xff]  }
  0x2e   : > { %2462 = vmatprep.subr.bf16.mxu1 %v2648_v63  ;;  %1049 = vmatprep.mubr.bf16.mxu0 %v3005_v14  ;;  %v2701_v63 = vld [vmem:[%s3308_s1 + $0x230] sm:$0xff]  }
  0x2f   : > { %1089 = vmatprep.mubr.bf16.mxu1 %v822_v19  ;;  %v2709_v19 = vld [vmem:[%s3308_s1 + $0x300] sm:$0xff]  }
  0x30   : > { %2441 = vmatpush3.bf16.msra.mxu0 %v2649_v1  ;;  %v2703_v1 = vld [vmem:[%s3308_s1 + $0x278] sm:$0xff]  }
  0x31   : > { %2463 = vmatpush3.bf16.msra.mxu1 %v2650_v2  ;;  %2442 = vmatprep.subr.bf16.mxu0 %v2651_v3  ;;  %v2704_v2 = vld [vmem:[%s3308_s1 + $0x2f8] sm:$0xff]   ;;  %v2067_v3 = vld [vmem:[%s2947_s19 + $0x10] sm:$0x3f] }
  0x32   : > { %2464 = vmatprep.subr.bf16.mxu1 %v2652_v7  ;;  %v1099_v5 = vrot.slane %v2067_v3, 7  ;;  %v1101_v6 = vpack.c.bf16 %v2067_v3, %v2067_v3  ;;  %v2706_v7 = vld [vmem:[%s3308_s1 + $0x2b8] sm:$0xff]  }
  0x34   : > { %2443 = vmatpush3.bf16.msra.mxu0 %v2653_v8  ;;  %v1464_v8 = vrot.slane %v2067_v3, 1  ;;  %v1176_v10 = vshrl.u32 %v1101_v6, 16  ;;  %v1178_v11 = vshll.u32 %v1101_v6, 16 }
  0x35   : > { %2465 = vmatpush3.bf16.msra.mxu1 %v2654_v9  ;;  %2444 = vmatprep.subr.bf16.mxu0 %v2655_v13  ;;  %v1102_v9 = vpack.c.bf16 %v1099_v5, %v1099_v5  ;;  %v2708_v13 = vld [vmem:[%s3308_s1 + $0x3c0] sm:$0xff]  }
  0x36   : > { %2466 = vmatprep.subr.bf16.mxu1 %v2656_v15  ;;  %v1466_v15 = vpack.c.bf16 %v1464_v8, %v1464_v8 }
  0x37   : > { %v1183_v16 = vshrl.u32 %v1102_v9, 16 }
  0x38   : > { %2445 = vmatpush3.bf16.msra.mxu0 %v2657_v17  ;;  %v1185_v17 = vshll.u32 %v1102_v9, 16 }
  0x39   : > { %2467 = vmatpush3.bf16.msra.mxu1 %v2658_v18  ;;  %2446 = vmatprep.subr.bf16.mxu0 %v2659_v20  ;;  %v1180_v18 = vrot.slane %v1178_v11, 1 }
  0x3a   : > { %2468 = vmatprep.subr.bf16.mxu1 %v2660_v21  ;;  %v1187_v20 = vrot.slane %v1185_v17, 1  ;;  %v2711_v21 = vld [vmem:[%s3308_s1 + $0x348] sm:$0xff]  }
  0x3c   : > { %2447 = vmatpush3.bf16.msra.mxu0 %v2661_v22  ;;  %v3177_v22 = vor.u32 %v1180_v18, %v1176_v10 }
  0x3d   : > { %2469 = vmatpush3.bf16.msra.mxu1 %v2662_v23  ;;  %2448 = vmatprep.subr.bf16.mxu0 %v2663_v24  ;;  %v1540_v23 = vshrl.u32 %v1466_v15, 16  ;;  %v1542_v24 = vshll.u32 %v1466_v15, 16 }
  0x3e   : > { %2470 = vmatprep.subr.bf16.mxu1 %v2664_v25  ;;  %v1188_v25 = vor.u32 %v1187_v20, %v1183_v16 }
  0x40   : > { %2449 = vmatpush3.bf16.msra.mxu0 %v2665_v26  ;;  %v2710_v26 = vld [vmem:[%s3308_s1 + $0x380] sm:$0xff]  }
  0x41   : > { %2471 = vmatpush3.bf16.msra.mxu1 %v2666_v27  ;;  %2450 = vmatprep.subr.bf16.mxu0 %v2667_v28  ;;  %v2712_v27 = vld [vmem:[%s3308_s1 + $0x3c8] sm:$0xff]   ;;  %v1544_v28 = vrot.slane %v1542_v24, 1 }
  0x42   : > { %2472 = vmatprep.subr.bf16.mxu1 %v2668_v29  ;;  %v2713_v29 = vld [vmem:[%s3308_s1 + $0x308] sm:$0xff]  }
  0x44   : > { %2451 = vmatpush3.bf16.msra.mxu0 %v2669_v30  ;;  %v2715_v30 = vld [vmem:[%s3308_s1 + $0x350] sm:$0xff]  }
  0x45   : > { %2473 = vmatpush3.bf16.msra.mxu1 %v2670_v31  ;;  %2452 = vmatprep.subr.bf16.mxu0 %v2671_v32  ;;  %v1545_v31 = vor.u32 %v1544_v28, %v1540_v23  ;;  %v2714_v32 = vld [vmem:[%s3308_s1 + $0x388] sm:$0xff]  }
  0x46   : > { %2474 = vmatprep.subr.bf16.mxu1 %v2672_v33  ;;  %v2716_v33 = vld [vmem:[%s3308_s1 + $0x3d0] sm:$0xff]  }
  0x48   : > { %2453 = vmatpush3.bf16.msra.mxu0 %v2673_v34  ;;  %v2717_v34 = vld [vmem:[%s3308_s1 + $0x310] sm:$0xff]  }
  0x49   : > { %2475 = vmatpush3.bf16.msra.mxu1 %v2674_v35  ;;  %2482 = vmatprep.subr.bf16.mxu0 %v2675_v36  ;;  %v2719_v35 = vld [vmem:[%s3308_s1 + $0x358] sm:$0xff]  }
  0x4a   : > { %2504 = vmatprep.subr.bf16.mxu1 %v2676_v37  ;;  %v2720_v36 = vld [vmem:[%s3308_s1 + $0x3d8] sm:$0xff]  }
  0x4b   : > { %1050 = vmatmul.mubr.bf16.vlgmr.msra.gmra.mrb[4].mxu0 %v2966_v55  ;;  %v2721_v37 = vld [vmem:[%s3308_s1 + $0x318] sm:$0xff]  }
  0x4c   : > { %1090 = vmatmul.mubr.bf16.vlgmr.msra.gmra.mrb[4].mxu1 %v2968_v56  ;;  %2483 = vmatpush3.bf16.msra.mxu0 %v2677_v38  ;;  %v2694_v56 = vld [vmem:[%s3308_s1 + $0x2a0] sm:$0xff]  }
  0x4d   : > { %2505 = vmatpush3.bf16.msra.mxu1 %v2678_v39  ;;  %2484 = vmatprep.subr.bf16.mxu0 %v2679_v40  ;;  %v2723_v38 = vld [vmem:[%s3308_s1 + $0x360] sm:$0xff]   ;;  %v2722_v39 = vld [vmem:[%s3308_s1 + $0x398] sm:$0xff]  }
  0x4e   : > { %2506 = vmatprep.subr.bf16.mxu1 %v2680_v41  ;;  %1415 = vmatprep.mubr.bf16.mxu0 %v2973_v59  ;;  %v2697_v59 = vld [vmem:[%s3308_s1 + $0x228] sm:$0xff]   ;;  %v2724_v40 = vld [vmem:[%s3308_s1 + $0x3e0] sm:$0xff]  }
  0x4f   : > { %1455 = vmatprep.mubr.bf16.mxu1 %v1188_v25  ;;  %v2725_v41 = vld [vmem:[%s3308_s1 + $0x320] sm:$0xff]  }
  0x50   : > { %2485 = vmatpush3.bf16.msra.mxu0 %v2681_v42  ;;  %v2727_v42 = vld [vmem:[%s3308_s1 + $0x368] sm:$0xff]  }
  0x51   : > { %2507 = vmatpush3.bf16.msra.mxu1 %v2682_v43  ;;  %2486 = vmatprep.subr.bf16.mxu0 %v2683_v44  ;;  %v2726_v43 = vld [vmem:[%s3308_s1 + $0x3a0] sm:$0xff]   ;;  %v2728_v44 = vld [vmem:[%s3308_s1 + $0x3e8] sm:$0xff]  }
  0x52   : > { %2508 = vmatprep.subr.bf16.mxu1 %v2684_v45  ;;  %v2729_v45 = vld [vmem:[%s3308_s1 + $0x328] sm:$0xff]  }
  0x54   : > { %2487 = vmatpush3.bf16.msra.mxu0 %v2685_v46  ;;  %v2731_v46 = vld [vmem:[%s3308_s1 + $0x370] sm:$0xff]  }
  0x55   : > { %2509 = vmatpush3.bf16.msra.mxu1 %v2686_v47  ;;  %2488 = vmatprep.subr.bf16.mxu0 %v2687_v48  ;;  %v2730_v47 = vld [vmem:[%s3308_s1 + $0x3a8] sm:$0xff]   ;;  %v2732_v48 = vld [vmem:[%s3308_s1 + $0x3f0] sm:$0xff]  }
  0x56   : > { %2510 = vmatprep.subr.bf16.mxu1 %v2688_v49  ;;  %v2733_v49 = vld [vmem:[%s3308_s1 + $0x330] sm:$0xff]  }
  0x58   : > { %2489 = vmatpush3.bf16.msra.mxu0 %v2689_v50  ;;  %v2735_v50 = vld [vmem:[%s3308_s1 + $0x378] sm:$0xff]  }
  0x59   : > { %2511 = vmatpush3.bf16.msra.mxu1 %v2690_v51  ;;  %2490 = vmatprep.subr.bf16.mxu0 %v2691_v52  ;;  %v2734_v51 = vld [vmem:[%s3308_s1 + $0x3b0] sm:$0xff]   ;;  %v2736_v52 = vld [vmem:[%s3308_s1 + $0x3f8] sm:$0xff]  }
  0x5a   : > { %2512 = vmatprep.subr.bf16.mxu1 %v2692_v53  ;;  %v2737_v53 = vld [vmem:[%s3308_s1 + $0x338] sm:$0xff]  }
  0x5c   : > { %2491 = vmatpush3.bf16.msra.mxu0 %v2693_v54  ;;  %v2738_v54 = vld [vmem:[%s3308_s1 + $0x3b8] sm:$0xff]  }
  0x5d   : > { %2513 = vmatpush3.bf16.msra.mxu1 %v2694_v56  ;;  %2492 = vmatprep.subr.bf16.mxu0 %v2695_v57 }
  0x5e   : > { %2514 = vmatprep.subr.bf16.mxu1 %v2696_v58  ;;  %v2068_v58 = vld [vmem:[%s3309_s2] ss:$0 sm:$0xff] }
  0x60   : > { %2493 = vmatpush3.bf16.msra.mxu0 %v2697_v59 }
  0x61   : > { %2515 = vmatpush3.bf16.msra.mxu1 %v2698_v60  ;;  %2494 = vmatprep.subr.bf16.mxu0 %v2699_v61 }
  0x62   : > { %2516 = vmatprep.subr.bf16.mxu1 %v2700_v62 }
  0x64   : > { %2495 = vmatpush3.bf16.msra.mxu0 %v2701_v63 }
  0x65   : > { %2517 = vmatpush3.bf16.msra.mxu1 %v2702_v0  ;;  %2496 = vmatprep.subr.bf16.mxu0 %v2703_v1 }
  0x66   : > { %2518 = vmatprep.subr.bf16.mxu1 %v2704_v2 }
  0x68   : > { %2497 = vmatpush3.bf16.msra.mxu0 %v2705_v4 }
  0x69   : > { %2519 = vmatpush3.bf16.msra.mxu1 %v2706_v7  ;;  %2526 = vmatprep.subr.bf16.mxu0 %v2707_v12 }
  0x6a   : > { %2548 = vmatprep.subr.bf16.mxu1 %v2708_v13 }
  0x6b   : > { %1416 = vmatmul.mubr.bf16.vlgmr.msra.gmra.mrb[8].mxu0 %v2966_v55 }
  0x6c   : > { %2527 = vmatpush3.bf16.msra.mxu0 %v2709_v19  ;;  %1456 = vmatmul.mubr.bf16.vlgmr.msra.gmra.mrb[8].mxu1 %v3177_v22 }
  0x6d   : > { %2528 = vmatprep.subr.bf16.mxu0 %v2711_v21  ;;  %2549 = vmatpush3.bf16.msra.mxu1 %v2710_v26 }
  0x6e   : > { %1771 = vmatprep.mubr.bf16.mxu0 %v3005_v14  ;;  %2550 = vmatprep.subr.bf16.mxu1 %v2712_v27  ;;  %v2718_v14 = vld [vmem:[%s3308_s1 + $0x390] sm:$0xff]  }
  0x6f   : > { %1811 = vmatprep.mubr.bf16.mxu1 %v1545_v31 }
  0x70   : > { %2529 = vmatpush3.bf16.msra.mxu0 %v2713_v29 }
  0x71   : > { %2530 = vmatprep.subr.bf16.mxu0 %v2715_v30  ;;  %2551 = vmatpush3.bf16.msra.mxu1 %v2714_v32 }
  0x72   : > { %2552 = vmatprep.subr.bf16.mxu1 %v2716_v33 }
  0x74   : > { %2531 = vmatpush3.bf16.msra.mxu0 %v2717_v34 }
  0x75   : > { %2532 = vmatprep.subr.bf16.mxu0 %v2719_v35  ;;  %2553 = vmatpush3.bf16.msra.mxu1 %v2718_v14 }
  0x76   : > { %2554 = vmatprep.subr.bf16.mxu1 %v2720_v36 }
  0x78   : > { %2533 = vmatpush3.bf16.msra.mxu0 %v2721_v37 }
  0x79   : > { %2534 = vmatprep.subr.bf16.mxu0 %v2723_v38  ;;  %2555 = vmatpush3.bf16.msra.mxu1 %v2722_v39 }
  0x7a   : > { %2556 = vmatprep.subr.bf16.mxu1 %v2724_v40 }
  0x7c   : > { %2535 = vmatpush3.bf16.msra.mxu0 %v2725_v41 }
  0x7d   : > { %2536 = vmatprep.subr.bf16.mxu0 %v2727_v42  ;;  %2557 = vmatpush3.bf16.msra.mxu1 %v2726_v43 }
  0x7e   : > { %2558 = vmatprep.subr.bf16.mxu1 %v2728_v44 }
  0x80   : > { %2537 = vmatpush3.bf16.msra.mxu0 %v2729_v45 }
  0x81   : > { %2538 = vmatprep.subr.bf16.mxu0 %v2731_v46  ;;  %2559 = vmatpush3.bf16.msra.mxu1 %v2730_v47 }
  0x82   : > { %2560 = vmatprep.subr.bf16.mxu1 %v2732_v48 }
  0x84   : > { %2539 = vmatpush3.bf16.msra.mxu0 %v2733_v49 }
  0x85   : > { %2540 = vmatprep.subr.bf16.mxu0 %v2735_v50  ;;  %2561 = vmatpush3.bf16.msra.mxu1 %v2734_v51 }
  0x86   : > { %2562 = vmatprep.subr.bf16.mxu1 %v2736_v52 }
  0x88   : > { %2541 = vmatpush3.bf16.msra.mxu0 %v2737_v53 }
  0x89   : > { %2563 = vmatpush3.bf16.msra.mxu1 %v2738_v54 }
  0x8b   : > { %1772 = vmatmul.mubr.bf16.vlgmr.msra.gmra.mrb[12].mxu0 %v2966_v55 }
  0x8c   : > { %1812 = vmatmul.mubr.bf16.vlgmr.msra.gmra.mrb[12].mxu1 %v3177_v22 }
  0xfe   : > { %v2410_v56 = vpop.f32.mrb[0].mxu0 }
  0xff   : > { %v2432_v57 = vpop.f32.mrb[0].mxu1  ;;  %v2411_v59 = vpop.f32.mrb[1].mxu0 }
 0x100   : > { %v2433_v60 = vpop.f32.mrb[1].mxu1  ;;  %v2412_v61 = vadd.f32 %v2411_v59, %v2410_v56  ;;  %v2413_v55 = vpop.f32.mrb[2].mxu0 }
 0x101   : > { %v2434_v62 = vadd.f32 %v2433_v60, %v2432_v57  ;;  %v2435_v63 = vpop.f32.mrb[2].mxu1  ;;  %v2414_v0 = vpop.f32.mrb[3].mxu0 }
 0x102   : > { %v2436_v1 = vpop.f32.mrb[3].mxu1  ;;  %v685_v2 = vadd.f32 %v2412_v61, %v2068_v58 }
 0x104   : > { %v725_v3 = vadd.f32 %v2434_v62, %v685_v2 }
 0x106   : > { %730 = vst [vmem:[%s308_s7] sm:$0xf] %v725_v3 }
 0x11e   : > { %v2454_v4 = vpop.f32.mrb[4].mxu0 }
 0x11f   : > { %v2476_v5 = vpop.f32.mrb[4].mxu1  ;;  %v2455_v6 = vpop.f32.mrb[5].mxu0 }
 0x120   : > { %v2477_v7 = vpop.f32.mrb[5].mxu1  ;;  %v2456_v8 = vadd.f32 %v2455_v6, %v2454_v4  ;;  %v2457_v10 = vpop.f32.mrb[6].mxu0 }
 0x121   : > { %v2478_v9 = vadd.f32 %v2477_v7, %v2476_v5  ;;  %v2479_v11 = vpop.f32.mrb[6].mxu1  ;;  %v2458_v12 = vpop.f32.mrb[7].mxu0 }
 0x122   : > { %v2480_v13 = vpop.f32.mrb[7].mxu1  ;;  %v1052_v15 = vadd.f32 %v2456_v8, %v2068_v58 }
 0x124   : > { %v1092_v16 = vadd.f32 %v2478_v9, %v1052_v15 }
 0x126   : > { %1097 = vst [vmem:[%s316_s9] sm:$0xf] %v1092_v16 }
 0x13e   : > { %v2498_v17 = vpop.f32.mrb[8].mxu0 }
 0x13f   : > { %v2499_v18 = vpop.f32.mrb[9].mxu0  ;;  %v2520_v19 = vpop.f32.mrb[8].mxu1 }
 0x140   : > { %v2500_v20 = vadd.f32 %v2499_v18, %v2498_v17  ;;  %v2501_v21 = vpop.f32.mrb[10].mxu0  ;;  %v2521_v22 = vpop.f32.mrb[9].mxu1 }
 0x141   : > { %v2502_v23 = vpop.f32.mrb[11].mxu0  ;;  %v2522_v25 = vadd.f32 %v2521_v22, %v2520_v19  ;;  %v2523_v26 = vpop.f32.mrb[10].mxu1 }
 0x142   : > { %v1418_v24 = vadd.f32 %v2500_v20, %v2068_v58  ;;  %v2524_v27 = vpop.f32.mrb[11].mxu1 }
 0x144   : > { %v1458_v28 = vadd.f32 %v2522_v25, %v1418_v24 }
 0x146   : > { %1463 = vst [vmem:[%s324_s12] sm:$0xf] %v1458_v28 }
 0x15e   : > { %v2542_v29 = vpop.f32.mrb[12].mxu0 }
 0x15f   : > { %v2543_v30 = vpop.f32.mrb[13].mxu0  ;;  %v2564_v31 = vpop.f32.mrb[12].mxu1 }
 0x160   : > { %v2544_v32 = vadd.f32 %v2543_v30, %v2542_v29  ;;  %v2545_v33 = vpop.f32.mrb[14].mxu0  ;;  %v2565_v34 = vpop.f32.mrb[13].mxu1 }
 0x161   : > { %v2546_v35 = vpop.f32.mrb[15].mxu0  ;;  %v2566_v36 = vadd.f32 %v2565_v34, %v2564_v31  ;;  %v2567_v37 = vpop.f32.mrb[14].mxu1 }
 0x162   : > { %v1774_v14 = vadd.f32 %v2544_v32, %v2068_v58  ;;  %v2568_v38 = vpop.f32.mrb[15].mxu1 }
 0x164   : > { %v1814_v39 = vadd.f32 %v2566_v36, %v1774_v14 }
 0x166   : > { %1819 = vst [vmem:[%s332_s15] sm:$0xf] %v1814_v39 }
 0x167 PF: > { %s17_s25 = sadd.s32 1, %s2777_s25   ;;  %s3314_s21 = smov %s2769_s23 }
 0x168   : > { %p14_p7 = scmp.ge.s32.totalorder %s17_s25, 10   ;;  %s3315_s22 = smov %s2773_s24 }
 0x169   : > { %s3316_s23 = smov %s3319_s26  ;;  %s3317_s24 = smov %s3323_s27 }
 0x16a   :  { %16 = sbr.rel (!%p14_p7) target bundleno = 3 (0x3), region = 104 }

// kernel: generator_forward.15
= control target key start
LH: loop header
LB: loop body
LE: loop exit
PB: predicated region body
PF: predicated region fallthrough
CT: control target
= control target key end

     0   :  { %s254_s0 = inlined_call_operand.vmem [shape: f32[128,128], index: 0, kind: input, shape index: {}]   ;;  %s255_s1 = inlined_call_operand.vmem [shape: f32[1,128], index: 1, kind: input, shape index: {}]   ;;  %s256_s2 = inlined_call_operand.vmem [shape: f32[1,128], index: 2, kind: input, shape index: {}]   ;;  %s257_s3 = inlined_call_operand.vmem [shape: f32[128,128], index: 3, kind: output, shape index: {}]  }
   0x1   :  { %v14_v0 = vld [vmem:[%s254_s0] sm:$0xff]  ;;  %v15_v4 = vld [vmem:[%s254_s0 + $0x8] sm:$0xff]  ;;  %v16_v5 = vld [vmem:[%s254_s0 + $0x10] sm:$0xff] }
   0x2   :  { %v112_v1 = vld [vmem:[%s255_s1] ss:$0 sm:$0xff]  ;;  %v17_v6 = vld [vmem:[%s254_s0 + $0x18] sm:$0xff]  ;;  %v19_v11 = vld [vmem:[%s254_s0 + $0x28] sm:$0xff] }
   0x3   :  { %v143_v2 = vld [vmem:[%s256_s2] ss:$0 sm:$0xff]  ;;  %v37_v3 = vmul.f32 %v112_v1, %v14_v0  ;;  %v38_v7 = vmul.f32 %v112_v1, %v15_v4  ;;  %v39_v8 = vmul.f32 %v112_v1, %v16_v5  ;;  %v40_v9 = vmul.f32 %v112_v1, %v17_v6  ;;  %v20_v12 = vld [vmem:[%s254_s0 + $0x30] sm:$0xff]  ;;  %v21_v17 = vld [vmem:[%s254_s0 + $0x38] sm:$0xff] }
   0x4   :  { %v18_v10 = vld [vmem:[%s254_s0 + $0x20] sm:$0xff]  ;;  %v42_v15 = vmul.f32 %v112_v1, %v19_v11  ;;  %v43_v16 = vmul.f32 %v112_v1, %v20_v12  ;;  %v44_v21 = vmul.f32 %v112_v1, %v21_v17  ;;  %v23_v27 = vld [vmem:[%s254_s0 + $0x48] sm:$0xff]  ;;  %v24_v28 = vld [vmem:[%s254_s0 + $0x50] sm:$0xff] }
   0x5   :  { %v60_v13 = vadd.f32 %v143_v2, %v37_v3  ;;  %v41_v14 = vmul.f32 %v112_v1, %v18_v10  ;;  %v61_v18 = vadd.f32 %v143_v2, %v38_v7  ;;  %v62_v19 = vadd.f32 %v143_v2, %v39_v8  ;;  %v22_v22 = vld [vmem:[%s254_s0 + $0x40] sm:$0xff]  ;;  %v25_v29 = vld [vmem:[%s254_s0 + $0x58] sm:$0xff]  ;;  %v27_v35 = vld [vmem:[%s254_s0 + $0x68] sm:$0xff] }
   0x6   :  { %v63_v20 = vadd.f32 %v143_v2, %v40_v9  ;;  %v65_v25 = vadd.f32 %v143_v2, %v42_v15  ;;  %v66_v26 = vadd.f32 %v143_v2, %v43_v16  ;;  %v67_v33 = vadd.f32 %v143_v2, %v44_v21  ;;  %v26_v34 = vld [vmem:[%s254_s0 + $0x60] sm:$0xff]  ;;  %v28_v36 = vld [vmem:[%s254_s0 + $0x70] sm:$0xff]  ;;  %v29_v41 = vld [vmem:[%s254_s0 + $0x78] sm:$0xff] }
   0x7   :  { %v76_v23 = vmax.f32 %v60_v13, 0.0  ;;  %v64_v24 = vadd.f32 %v143_v2, %v41_v14  ;;  %v77_v30 = vmax.f32 %v61_v18, 0.0  ;;  %v78_v31 = vmax.f32 %v62_v19, 0.0 }
   0x8   :  { %v79_v32 = vmax.f32 %v63_v20, 0.0  ;;  %v81_v38 = vmax.f32 %v65_v25, 0.0  ;;  %v82_v39 = vmax.f32 %v66_v26, 0.0  ;;  %v45_v40 = vmul.f32 %v112_v1, %v22_v22 }
   0x9   :  { %92 = vst [vmem:[%s257_s3] sm:$0xff] %v76_v23  ;;  %v80_v37 = vmax.f32 %v64_v24, 0.0  ;;  %93 = vst [vmem:[%s257_s3 + $0x8] sm:$0xff] %v77_v30  ;;  %v83_v42 = vmax.f32 %v67_v33, 0.0  ;;  %v46_v43 = vmul.f32 %v112_v1, %v23_v27  ;;  %v47_v44 = vmul.f32 %v112_v1, %v24_v28 }
   0xa   :  { %94 = vst [vmem:[%s257_s3 + $0x10] sm:$0xff] %v78_v31  ;;  %95 = vst [vmem:[%s257_s3 + $0x18] sm:$0xff] %v79_v32  ;;  %v48_v45 = vmul.f32 %v112_v1, %v25_v29  ;;  %v68_v46 = vadd.f32 %v143_v2, %v45_v40  ;;  %v49_v47 = vmul.f32 %v112_v1, %v26_v34 }
   0xb   :  { %96 = vst [vmem:[%s257_s3 + $0x20] sm:$0xff] %v80_v37  ;;  %97 = vst [vmem:[%s257_s3 + $0x28] sm:$0xff] %v81_v38  ;;  %v50_v48 = vmul.f32 %v112_v1, %v27_v35  ;;  %v51_v49 = vmul.f32 %v112_v1, %v28_v36  ;;  %v69_v50 = vadd.f32 %v143_v2, %v46_v43 }
   0xc   :  { %98 = vst [vmem:[%s257_s3 + $0x30] sm:$0xff] %v82_v39  ;;  %99 = vst [vmem:[%s257_s3 + $0x38] sm:$0xff] %v83_v42  ;;  %v70_v51 = vadd.f32 %v143_v2, %v47_v44  ;;  %v71_v52 = vadd.f32 %v143_v2, %v48_v45  ;;  %v52_v53 = vmul.f32 %v112_v1, %v29_v41  ;;  %v84_v54 = vmax.f32 %v68_v46, 0.0 }
   0xd   :  { %v72_v55 = vadd.f32 %v143_v2, %v49_v47  ;;  %v73_v56 = vadd.f32 %v143_v2, %v50_v48  ;;  %v74_v57 = vadd.f32 %v143_v2, %v51_v49  ;;  %v85_v58 = vmax.f32 %v69_v50, 0.0 }
   0xe   :  { %v86_v59 = vmax.f32 %v70_v51, 0.0  ;;  %v87_v60 = vmax.f32 %v71_v52, 0.0  ;;  %v75_v61 = vadd.f32 %v143_v2, %v52_v53  ;;  %100 = vst [vmem:[%s257_s3 + $0x40] sm:$0xff] %v84_v54 }
   0xf   :  { %v88_v62 = vmax.f32 %v72_v55, 0.0  ;;  %v89_v63 = vmax.f32 %v73_v56, 0.0  ;;  %v90_v0 = vmax.f32 %v74_v57, 0.0  ;;  %101 = vst [vmem:[%s257_s3 + $0x48] sm:$0xff] %v85_v58 }
  0x10   :  { %102 = vst [vmem:[%s257_s3 + $0x50] sm:$0xff] %v86_v59  ;;  %103 = vst [vmem:[%s257_s3 + $0x58] sm:$0xff] %v87_v60  ;;  %v91_v1 = vmax.f32 %v75_v61, 0.0 }
  0x11   :  { %104 = vst [vmem:[%s257_s3 + $0x60] sm:$0xff] %v88_v62  ;;  %105 = vst [vmem:[%s257_s3 + $0x68] sm:$0xff] %v89_v63 }
  0x12   :  { %106 = vst [vmem:[%s257_s3 + $0x70] sm:$0xff] %v90_v0  ;;  %107 = vst [vmem:[%s257_s3 + $0x78] sm:$0xff] %v91_v1 }

// kernel: generator_forward.14
= control target key start
LH: loop header
LB: loop body
LE: loop exit
PB: predicated region body
PF: predicated region fallthrough
CT: control target
= control target key end

     0   :  { %s1662_s18 = smov 0   ;;  %s1664_s19 = smov 0   ;;  %s1980_s0 = inlined_call_operand.vmem [shape: f32[2,10,10,128], index: 0, kind: input, shape index: {}]   ;;  %s1981_s1 = inlined_call_operand.vmem [shape: bf16[1152,128], index: 1, kind: input, shape index: {}]   ;;  %s1982_s2 = inlined_call_operand.vmem [shape: f32[1,128], index: 2, kind: input, shape index: {}]   ;;  %s1983_s3 = inlined_call_operand.vmem [shape: f32[2,8,8,128], index: 3, kind: output, shape index: {0}]   ;;  %s1984_s4 = inlined_call_operand.vmem [shape: f32[2,1,128], index: 4, kind: output, shape index: {1}]   ;;  %s1985_s5 = inlined_call_operand.vmem [shape: f32[2,1,128], index: 5, kind: output, shape index: {2}]  }
   0x1   :  { %s1666_s20 = smov 0   ;;  %s1668_s21 = smov 0  }
   0x2   :  { %s1670_s22 = smov 0  }
   0x3 LB: > { %s25_s23 = sadd.s32 1, %s1619_s20  ;;  %s28_s24 = sadd.s32 1, %s1623_s21  ;;  %s1627_s22 = sphi %s1670_s22, %s16_s22   ;;  %s1623_s21 = sphi %s1668_s21, %s1989_s21   ;;  %s1619_s20 = sphi %s1666_s20, %s1988_s20   ;;  %s1615_s19 = sphi %s1664_s19, %s1987_s19   ;;  %s1611_s18 = sphi %s1662_s18, %s1986_s18  }
   0x4   : > { %p26_p0 = scmp.ge.s32.totalorder %s25_s23, 8  ;;  %p1269_p1 = scmp.ge.s32.totalorder %s1627_s22, 1 }
   0x5   : > { %p206_p2 = scmp.lt.s32.totalorder %s1627_s22, 17 }
   0x6   : > { %s1991_s23 = smov (%p26_p0, %s25_s23), 0  ;;  %s1993_s24 = smov (!%p26_p0, %s28_s24), %s1623_s21 }
   0x7   : > { %p207_p3 = pnand %p1269_p1, %p206_p2  ;;  %p30_p4 = scmp.ge.s32.totalorder %s1993_s24, 2 }
   0x8   : > { %p243_p5 = scmp.lt.s32.totalorder (!%p207_p3), %s1615_s19, 1  ;;  %p250_p6 = scmp.lt.s32.totalorder (!%p207_p3), %s1611_s18, 7 }
   0x9   : > { %s1995_s24 = smov (%p30_p4, %s1993_s24), 0  ;;  %210 = sbr.rel (%p207_p3) target bundleno = 351 (0x15f), region = 32 }
   0xa   : > { %p1273_p7 = scmp.ne.s32.totalorder (!%p207_p3), %s1611_s18, 0 }
  0x10   : > { %s1997_s19 = smov (!%p243_p5, %s1615_s19), 1  ;;  %266 = sbr.rel (%p1273_p7) target bundleno = 23 (0x17), region = 36 }
  0x11   : > { %s251_s25 = scalar_select %p250_p6, %s1611_s18, 7 }
  0x12   : > { %s1473_s26 = smul.u32 160, %s1997_s19  ;;  %s1271_s27 = sshll.u32 %s1997_s19, 3  ;;  %v1629_v0 = vmov (!%p1273_p7), 0.0  }
  0x13   : > { %s253_s28 = sadd.s32 %s1271_s27, %s251_s25  ;;  %s1699_s6 = scalar_lea.vmem %s1984_s4, %s1997_s19 }
  0x14   : > { %s1704_s9 = scalar_lea.vmem %s1980_s0, %s1473_s26  ;;  %s1272_s10 = sshll.u32 %s253_s28, 3  ;;  %267 = vst [vmem:[%s1699_s6] sm:$0x1] (!%p1273_p7), %v1629_v0 }
  0x15   : > { %s1709_s13 = scalar_lea.vmem %s1983_s3, %s1272_s10  ;;  %s1714_s16 = scalar_lea.vmem %s1985_s5, %s1997_s19 }
  0x16   : > { %268 = vst [vmem:[%s1714_s16] sm:$0x1] (!%p1273_p7), %v1629_v0 }
  0x17 PF: > { %v1517_v1 = vld [vmem:[%s1981_s1 + $0x40] sm:$0xff]   ;;  %v1521_v5 = vld [vmem:[%s1981_s1 + $0x48] sm:$0xff]   ;;  %v1525_v9 = vld [vmem:[%s1981_s1 + $0x50] sm:$0xff]   ;;  %s1274_s30 = sshll.u32 %s1611_s18, 4  ;;  %vm285_vm0 = vcmask 1046528   ;;  %vm290_vm1 = vcmask 1045504  }
  0x18   : > { %v1518_v2 = vld [vmem:[%s1981_s1] sm:$0xff]   ;;  %1356 = vmatprep.subr.bf16.mxu0 %v1517_v1  ;;  %v1522_v6 = vld [vmem:[%s1981_s1 + $0x8] sm:$0xff]   ;;  %v1526_v10 = vld [vmem:[%s1981_s1 + $0x10] sm:$0xff]   ;;  %s1808_s15 = scalar_lea.vmem %s1704_s9, %s1274_s30  ;;  %vm1631_vm2 = vmmov 0  }
  0x19   : > { %v1519_v3 = vld [vmem:[%s1981_s1 + $0xc0] sm:$0xff]   ;;  %1357 = vmatpush3.bf16.msra.mxu0 %v1518_v2  ;;  %v1523_v7 = vld [vmem:[%s1981_s1 + $0xc8] sm:$0xff]   ;;  %v1527_v11 = vld [vmem:[%s1981_s1 + $0xd0] sm:$0xff]  }
  0x1a   : > { %v1520_v4 = vld [vmem:[%s1981_s1 + $0x80] sm:$0xff]   ;;  %1378 = vmatprep.subr.bf16.mxu1 %v1519_v3  ;;  %1358 = vmatprep.subr.bf16.mxu0 %v1521_v5  ;;  %v1524_v8 = vld [vmem:[%s1981_s1 + $0x88] sm:$0xff]   ;;  %v1528_v12 = vld [vmem:[%s1981_s1 + $0x90] sm:$0xff]  }
  0x1b   : > { %1379 = vmatpush3.bf16.msra.mxu1 %v1520_v4  ;;  %v1529_v13 = vld [vmem:[%s1981_s1 + $0x58] sm:$0xff]   ;;  %v1533_v17 = vld [vmem:[%s1981_s1 + $0x60] sm:$0xff]   ;;  %v1537_v21 = vld [vmem:[%s1981_s1 + $0x68] sm:$0xff]  }
  0x1c   : > { %1380 = vmatprep.subr.bf16.mxu1 %v1523_v7  ;;  %v1530_v14 = vld [vmem:[%s1981_s1 + $0x18] sm:$0xff]   ;;  %v1534_v18 = vld [vmem:[%s1981_s1 + $0x20] sm:$0xff]   ;;  %v1538_v22 = vld [vmem:[%s1981_s1 + $0x28] sm:$0xff]  }
  0x1d   : > { %1359 = vmatpush3.bf16.msra.mxu0 %v1522_v6  ;;  %v1531_v15 = vld [vmem:[%s1981_s1 + $0xd8] sm:$0xff]   ;;  %v1535_v19 = vld [vmem:[%s1981_s1 + $0xe0] sm:$0xff]   ;;  %v1539_v23 = vld [vmem:[%s1981_s1 + $0xe8] sm:$0xff]  }
  0x1e   : > { %1360 = vmatprep.subr.bf16.mxu0 %v1525_v9  ;;  %v1532_v16 = vld [vmem:[%s1981_s1 + $0x98] sm:$0xff]   ;;  %v1536_v20 = vld [vmem:[%s1981_s1 + $0xa0] sm:$0xff]   ;;  %v1540_v24 = vld [vmem:[%s1981_s1 + $0xa8] sm:$0xff]  }
  0x1f   : > { %1381 = vmatpush3.bf16.msra.mxu1 %v1524_v8  ;;  %v1541_v25 = vld [vmem:[%s1981_s1 + $0x70] sm:$0xff]   ;;  %v1545_v29 = vld [vmem:[%s1981_s1 + $0x78] sm:$0xff]   ;;  %v271_v32 = vld [vmem:[%s1808_s15] sm:$0xff] }
  0x20   : > { %1382 = vmatprep.subr.bf16.mxu1 %v1527_v11  ;;  %v1542_v26 = vld [vmem:[%s1981_s1 + $0x30] sm:$0xff]   ;;  %v1546_v30 = vld [vmem:[%s1981_s1 + $0x38] sm:$0xff]   ;;  %v272_v33 = vld [vmem:[%s1808_s15 + $0x8] sm:$0x3]  ;;  %v286_v34 = vrot.slane %v271_v32, 1  ;;  %v291_v39 = vrot.slane %v271_v32, 2  ;;  %v315_v41 = vpack.c.bf16 %v271_v32, %v271_v32 }
  0x21   : > { %1361 = vmatpush3.bf16.msra.mxu0 %v1526_v10  ;;  %v1543_v27 = vld [vmem:[%s1981_s1 + $0xf0] sm:$0xff]   ;;  %v1547_v31 = vld [vmem:[%s1981_s1 + $0xf8] sm:$0xff]   ;;  %v287_v35 = vrot.slane %v272_v33, 1  ;;  %v292_v36 = vrot.slane %v272_v33, 2  ;;  %v1549_v38 = vld [vmem:[%s1981_s1 + $0x140] sm:$0xff]  }
  0x22   : > { %1362 = vmatprep.subr.bf16.mxu0 %v1529_v13  ;;  %v1544_v28 = vld [vmem:[%s1981_s1 + $0xb0] sm:$0xff]   ;;  %v1548_v37 = vld [vmem:[%s1981_s1 + $0xb8] sm:$0xff]   ;;  %v1550_v45 = vld [vmem:[%s1981_s1 + $0x100] sm:$0xff]  }
  0x23   : > { %1383 = vmatpush3.bf16.msra.mxu1 %v1528_v12  ;;  %v288_v40 = vsel %vm285_vm0, %v286_v34, %v287_v35  ;;  %v1826_v42 = vld [vmem:[%s1808_s15 + $0x10] sm:$0xff]  ;;  %v1551_v46 = vld [vmem:[%s1981_s1 + $0x1c0] sm:$0xff]   ;;  %v293_v47 = vsel %vm290_vm1, %v291_v39, %v292_v36  ;;  %v1553_v50 = vld [vmem:[%s1981_s1 + $0x148] sm:$0xff]  }
  0x24   : > { %1384 = vmatprep.subr.bf16.mxu1 %v1531_v15  ;;  %v316_v43 = vpack.c.bf16 %v288_v40, %v288_v40  ;;  %v318_v44 = vpack.c.bf16 %v1826_v42, %v1826_v42  ;;  %v317_v48 = vpack.c.bf16 %v293_v47, %v293_v47  ;;  %v1552_v49 = vld [vmem:[%s1981_s1 + $0x180] sm:$0xff]   ;;  %v1554_v51 = vld [vmem:[%s1981_s1 + $0x108] sm:$0xff]   ;;  %v1557_v54 = vld [vmem:[%s1981_s1 + $0x150] sm:$0xff]   ;;  %v297_v10 = vrot.slane %v1826_v42, 1 }
  0x25   : > { %1363 = vmatpush3.bf16.msra.mxu0 %v1530_v14  ;;  %v1555_v52 = vld [vmem:[%s1981_s1 + $0x1c8] sm:$0xff]   ;;  %v1558_v55 = vld [vmem:[%s1981_s1 + $0x110] sm:$0xff]   ;;  %v1561_v58 = vld [vmem:[%s1981_s1 + $0x158] sm:$0xff]   ;;  %v301_v12 = vrot.slane %v1826_v42, 2 }
  0x26   : > { %1364 = vmatprep.subr.bf16.mxu0 %v1533_v17  ;;  %939 = vmatprep.mubr.bf16.mxu0 %v316_v43  ;;  %v1556_v53 = vld [vmem:[%s1981_s1 + $0x188] sm:$0xff]   ;;  %v1559_v56 = vld [vmem:[%s1981_s1 + $0x1d0] sm:$0xff]   ;;  %v1562_v59 = vld [vmem:[%s1981_s1 + $0x118] sm:$0xff]  }
  0x27   : > { %1385 = vmatpush3.bf16.msra.mxu1 %v1532_v16  ;;  %979 = vmatprep.mubr.bf16.mxu1 %v318_v44  ;;  %v1560_v57 = vld [vmem:[%s1981_s1 + $0x190] sm:$0xff]   ;;  %v1563_v60 = vld [vmem:[%s1981_s1 + $0x1d8] sm:$0xff]   ;;  %v1565_v62 = vld [vmem:[%s1981_s1 + $0x160] sm:$0xff]  }
  0x28   : > { %1386 = vmatprep.subr.bf16.mxu1 %v1535_v19  ;;  %v1564_v61 = vld [vmem:[%s1981_s1 + $0x198] sm:$0xff]   ;;  %v1566_v63 = vld [vmem:[%s1981_s1 + $0x120] sm:$0xff]   ;;  %v1569_v2 = vld [vmem:[%s1981_s1 + $0x168] sm:$0xff]  }
  0x29   : > { %1365 = vmatpush3.bf16.msra.mxu0 %v1534_v18  ;;  %v1567_v0 = vld [vmem:[%s1981_s1 + $0x1e0] sm:$0xff]   ;;  %v1570_v3 = vld [vmem:[%s1981_s1 + $0x128] sm:$0xff]   ;;  %v1573_v6 = vld [vmem:[%s1981_s1 + $0x170] sm:$0xff]  }
  0x2a   : > { %1366 = vmatprep.subr.bf16.mxu0 %v1537_v21  ;;  %v1568_v1 = vld [vmem:[%s1981_s1 + $0x1a0] sm:$0xff]   ;;  %v1571_v4 = vld [vmem:[%s1981_s1 + $0x1e8] sm:$0xff]   ;;  %v1574_v7 = vld [vmem:[%s1981_s1 + $0x130] sm:$0xff]  }
  0x2b   : > { %1387 = vmatpush3.bf16.msra.mxu1 %v1536_v20  ;;  %v1572_v5 = vld [vmem:[%s1981_s1 + $0x1a8] sm:$0xff]   ;;  %v1575_v8 = vld [vmem:[%s1981_s1 + $0x1f0] sm:$0xff]   ;;  %v1577_v11 = vld [vmem:[%s1981_s1 + $0x178] sm:$0xff]  }
  0x2c   : > { %1388 = vmatprep.subr.bf16.mxu1 %v1539_v23  ;;  %v1576_v9 = vld [vmem:[%s1981_s1 + $0x1b0] sm:$0xff]   ;;  %v1578_v13 = vld [vmem:[%s1981_s1 + $0x138] sm:$0xff]   ;;  %v1279_v19 = vld [vmem:[%s1808_s15 + $0x20] sm:$0xff] }
  0x2d   : > { %1367 = vmatpush3.bf16.msra.mxu0 %v1538_v22  ;;  %v1579_v14 = vld [vmem:[%s1981_s1 + $0x1f8] sm:$0xff]   ;;  %v1280_v20 = vld [vmem:[%s1808_s15 + $0x28] sm:$0x3]  ;;  %v307_v21 = vrot.slane %v1279_v19, 1  ;;  %v1583_v33 = vld [vmem:[%s1981_s1 + $0x210] sm:$0xff]   ;;  %v311_v39 = vrot.slane %v1279_v19, 2 }
  0x2e   : > { %1368 = vmatprep.subr.bf16.mxu0 %v1541_v25  ;;  %v1277_v15 = vld [vmem:[%s1808_s15 + $0x18] sm:$0x3]  ;;  %v1582_v32 = vld [vmem:[%s1981_s1 + $0x208] sm:$0xff]   ;;  %v1585_v35 = vld [vmem:[%s1981_s1 + $0x220] sm:$0xff]  }
  0x2f   : > { %1389 = vmatpush3.bf16.msra.mxu1 %v1540_v24  ;;  %v298_v16 = vrot.slane %v1277_v15, 1  ;;  %v302_v17 = vrot.slane %v1277_v15, 2  ;;  %v1580_v18 = vld [vmem:[%s1981_s1 + $0x1b8] sm:$0xff]   ;;  %v308_v24 = vrot.slane %v1280_v20, 1  ;;  %v1586_v36 = vld [vmem:[%s1981_s1 + $0x228] sm:$0xff]  }
  0x30   : > { %1390 = vmatprep.subr.bf16.mxu1 %v1543_v27  ;;  %v1630_v27 = vmov 0.0   ;;  %v1584_v34 = vld [vmem:[%s1981_s1 + $0x218] sm:$0xff]   ;;  %v1281_v44 = vld [vmem:[%s1982_s2] ss:$0 sm:$0xff] }
  0x31   : > { %1369 = vmatpush3.bf16.msra.mxu0 %v1542_v26  ;;  %v303_v22 = vsel %vm290_vm1, %v301_v12, %v302_v17  ;;  %v299_v23 = vsel %vm285_vm0, %v297_v10, %v298_v16  ;;  %v1588_v40 = vld [vmem:[%s1981_s1 + $0x238] sm:$0xff]  }
  0x32   : > { %1370 = vmatprep.subr.bf16.mxu0 %v1545_v29  ;;  %v320_v25 = vpack.c.bf16 %v303_v22, %v303_v22  ;;  %v319_v26 = vpack.c.bf16 %v299_v23, %v299_v23  ;;  %v309_v29 = vsel %vm285_vm0, %v307_v21, %v308_v24  ;;  %v1117_v22 = vld [vmem:[%s1714_s16] sm:$0x1] }
  0x33   : > { %1391 = vmatpush3.bf16.msra.mxu1 %v1544_v28  ;;  %v1581_v28 = vld [vmem:[%s1981_s1 + $0x200] sm:$0xff]  }
  0x34   : > { %1392 = vmatprep.subr.bf16.mxu1 %v1547_v31  ;;  %v322_v31 = vpack.c.bf16 %v309_v29, %v309_v29 }
  0x35   : > { %1371 = vmatpush3.bf16.msra.mxu0 %v1546_v30  ;;  %v321_v30 = vpack.c.bf16 %v1279_v19, %v1279_v19  ;;  %v1108_v19 = vld [vmem:[%s1699_s6] sm:$0x1] }
  0x36   : > { %1400 = vmatprep.subr.bf16.mxu0 %v1549_v38  ;;  %v1587_v38 = vld [vmem:[%s1981_s1 + $0x230] sm:$0xff]  }
  0x37   : > { %1393 = vmatpush3.bf16.msra.mxu1 %v1548_v37  ;;  %v312_v37 = vrot.slane %v1280_v20, 2 }
  0x38   : > { %940 = vmatmul.mubr.bf16.vlgmr.msra.gmra.mrb[0].mxu0 %v315_v41  ;;  %1422 = vmatprep.subr.bf16.mxu1 %v1551_v46 }
  0x39   : > { %1401 = vmatpush3.bf16.msra.mxu0 %v1550_v45  ;;  %1019 = vmatprep.mubr.bf16.mxu0 %v320_v25  ;;  %v313_v41 = vsel %vm290_vm1, %v311_v39, %v312_v37 }
  0x3a   : > { %980 = vmatmul.mubr.bf16.vlgmr.msra.gmra.mrb[0].mxu1 %v317_v48  ;;  %1402 = vmatprep.subr.bf16.mxu0 %v1553_v50  ;;  %v323_v42 = vpack.c.bf16 %v313_v41, %v313_v41 }
  0x3b   : > { %1423 = vmatpush3.bf16.msra.mxu1 %v1552_v49  ;;  %1059 = vmatprep.mubr.bf16.mxu1 %v322_v31 }
  0x3c   : > { %1424 = vmatprep.subr.bf16.mxu1 %v1555_v52 }
  0x3d   : > { %1403 = vmatpush3.bf16.msra.mxu0 %v1554_v51 }
  0x3e   : > { %1404 = vmatprep.subr.bf16.mxu0 %v1557_v54 }
  0x3f   : > { %1425 = vmatpush3.bf16.msra.mxu1 %v1556_v53 }
  0x40   : > { %1426 = vmatprep.subr.bf16.mxu1 %v1559_v56 }
  0x41   : > { %1405 = vmatpush3.bf16.msra.mxu0 %v1558_v55 }
  0x42   : > { %1406 = vmatprep.subr.bf16.mxu0 %v1561_v58 }
  0x43   : > { %1427 = vmatpush3.bf16.msra.mxu1 %v1560_v57 }
  0x44   : > { %1428 = vmatprep.subr.bf16.mxu1 %v1563_v60 }
  0x45   : > { %1407 = vmatpush3.bf16.msra.mxu0 %v1562_v59 }
  0x46   : > { %1408 = vmatprep.subr.bf16.mxu0 %v1565_v62 }
  0x47   : > { %1429 = vmatpush3.bf16.msra.mxu1 %v1564_v61 }
  0x48   : > { %1430 = vmatprep.subr.bf16.mxu1 %v1567_v0 }
  0x49   : > { %1409 = vmatpush3.bf16.msra.mxu0 %v1566_v63 }
  0x4a   : > { %1410 = vmatprep.subr.bf16.mxu0 %v1569_v2 }
  0x4b   : > { %1431 = vmatpush3.bf16.msra.mxu1 %v1568_v1 }
  0x4c   : > { %1432 = vmatprep.subr.bf16.mxu1 %v1571_v4 }
  0x4d   : > { %1411 = vmatpush3.bf16.msra.mxu0 %v1570_v3 }
  0x4e   : > { %1412 = vmatprep.subr.bf16.mxu0 %v1573_v6 }
  0x4f   : > { %1433 = vmatpush3.bf16.msra.mxu1 %v1572_v5 }
  0x50   : > { %1434 = vmatprep.subr.bf16.mxu1 %v1575_v8 }
  0x51   : > { %1413 = vmatpush3.bf16.msra.mxu0 %v1574_v7 }
  0x52   : > { %1414 = vmatprep.subr.bf16.mxu0 %v1577_v11 }
  0x53   : > { %1435 = vmatpush3.bf16.msra.mxu1 %v1576_v9 }
  0x54   : > { %1436 = vmatprep.subr.bf16.mxu1 %v1579_v14 }
  0x55   : > { %1415 = vmatpush3.bf16.msra.mxu0 %v1578_v13 }
  0x56   : > { %1453 = vmatprep.subr.bf16.mxu0 %v1630_v27 }
  0x57   : > { %1437 = vmatpush3.bf16.msra.mxu1 %v1580_v18 }
  0x58   : > { %1020 = vmatmul.mubr.bf16.vlgmr.msra.gmra.mrb[4].mxu0 %v319_v26 }
  0x59   : > { %1454 = vmatpush3.bf16.msra.mxu0 %v1581_v28  ;;  %1469 = vmatprep.mubr.msk.bf16.mxu0 %vm1631_vm2, %v1630_v27 }
  0x5a   : > { %1060 = vmatmul.mubr.bf16.vlgmr.msra.gmra.mrb[4].mxu1 %v321_v30  ;;  %1455 = vmatprep.subr.bf16.mxu0 %v1630_v27 }
  0x5d   : > { %1456 = vmatpush3.bf16.msra.mxu0 %v1582_v32 }
  0x5e   : > { %1457 = vmatprep.subr.bf16.mxu0 %v1630_v27 }
  0x61   : > { %1458 = vmatpush3.bf16.msra.mxu0 %v1583_v33 }
  0x62   : > { %1459 = vmatprep.subr.bf16.mxu0 %v1630_v27 }
  0x65   : > { %1460 = vmatpush3.bf16.msra.mxu0 %v1584_v34 }
  0x66   : > { %1461 = vmatprep.subr.bf16.mxu0 %v1630_v27 }
  0x69   : > { %1462 = vmatpush3.bf16.msra.mxu0 %v1585_v35 }
  0x6a   : > { %1463 = vmatprep.subr.bf16.mxu0 %v1630_v27 }
  0x6d   : > { %1464 = vmatpush3.bf16.msra.mxu0 %v1586_v36 }
  0x6e   : > { %1465 = vmatprep.subr.bf16.mxu0 %v1630_v27 }
  0x71   : > { %1466 = vmatpush3.bf16.msra.mxu0 %v1587_v38 }
  0x72   : > { %1467 = vmatprep.subr.bf16.mxu0 %v1630_v27 }
  0x75   : > { %1468 = vmatpush3.bf16.msra.mxu0 %v1588_v40 }
  0x78   : > { %1470 = vmatmul.mubr.bf16.vlgmr.msra.gmra.mrb[8].mxu0 %v323_v42 }
 0x10b   : > { %v1372_v43 = vpop.f32.mrb[0].mxu0 }
 0x10c   : > { %v1373_v45 = vpop.f32.mrb[1].mxu0 }
 0x10d   : > { %v1394_v46 = vpop.f32.mrb[0].mxu1  ;;  %v1374_v47 = vadd.f32 %v1373_v45, %v1372_v43  ;;  %v1375_v48 = vpop.f32.mrb[2].mxu0 }
 0x10e   : > { %v1395_v49 = vpop.f32.mrb[1].mxu1  ;;  %v1376_v50 = vpop.f32.mrb[3].mxu0 }
 0x10f   : > { %v1396_v51 = vadd.f32 %v1395_v49, %v1394_v46  ;;  %v1397_v52 = vpop.f32.mrb[2].mxu1  ;;  %v942_v53 = vadd.f32 %v1374_v47, %v1281_v44 }
 0x110   : > { %v1398_v54 = vpop.f32.mrb[3].mxu1 }
 0x111   : > { %v982_v55 = vadd.f32 %v1396_v51, %v942_v53 }
 0x12b   : > { %v1416_v56 = vpop.f32.mrb[4].mxu0 }
 0x12c   : > { %v1417_v57 = vpop.f32.mrb[5].mxu0 }
 0x12d   : > { %v1418_v58 = vadd.f32 %v1417_v57, %v1416_v56  ;;  %v1419_v59 = vpop.f32.mrb[6].mxu0  ;;  %v1438_v60 = vpop.f32.mrb[4].mxu1 }
 0x12e   : > { %v1420_v61 = vpop.f32.mrb[7].mxu0  ;;  %v1439_v62 = vpop.f32.mrb[5].mxu1 }
 0x12f   : > { %v1022_v63 = vadd.f32 %v1418_v58, %v982_v55  ;;  %v1440_v0 = vadd.f32 %v1439_v62, %v1438_v60  ;;  %v1441_v1 = vpop.f32.mrb[6].mxu1 }
 0x130   : > { %v1442_v2 = vpop.f32.mrb[7].mxu1 }
 0x131   : > { %v1062_v3 = vadd.f32 %v1440_v0, %v1022_v63 }
 0x14b   : > { %v1101_v4 = vpop.f32.mrb[8].mxu0 }
 0x14c   : > { %v1102_v5 = vadd.f32 %v1101_v4, %v1062_v3  ;;  %v1471_v6 = vpop.f32.mrb[9].mxu0 }
 0x14d   : > { %v1104_v7 = vpop.f32.mrb[10].mxu0 }
 0x14e   : > { %1107 = vst [vmem:[%s1709_s13] sm:$0xff] %v1102_v5  ;;  %v1109_v8 = vrot.slane %v1102_v5, 4  ;;  %v1118_v9 = vmul.f32 %v1102_v5, %v1102_v5  ;;  %v1472_v10 = vpop.f32.mrb[11].mxu0 }
 0x150   : > { %v1110_v11 = vadd.f32 %v1109_v8, %v1102_v5  ;;  %v1119_v12 = vrot.slane %v1118_v9, 4 }
 0x152   : > { %v1111_v13 = vrot.slane %v1110_v11, 2  ;;  %v1120_v14 = vadd.f32 %v1119_v12, %v1118_v9 }
 0x154   : > { %v1112_v15 = vadd.f32 %v1111_v13, %v1110_v11  ;;  %v1121_v16 = vrot.slane %v1120_v14, 2 }
 0x156   : > { %v1113_v17 = vrot.slane %v1112_v15, 1  ;;  %v1122_v18 = vadd.f32 %v1121_v16, %v1120_v14 }
 0x158   : > { %v1114_v20 = vadd.f32 %v1113_v17, %v1112_v15  ;;  %v1123_v21 = vrot.slane %v1122_v18, 1 }
 0x15a   : > { %v1115_v23 = vadd.f32 %v1114_v20, %v1108_v19  ;;  %v1124_v24 = vadd.f32 %v1123_v21, %v1122_v18 }
 0x15c   : > { %1116 = vst [vmem:[%s1699_s6] sm:$0x1] %v1115_v23  ;;  %v1125_v25 = vadd.f32 %v1124_v24, %v1117_v22 }
 0x15e   : > { %1126 = vst [vmem:[%s1714_s16] sm:$0x1] %v1125_v25 }
 0x15f PF: > { %s16_s22 = sadd.s32 1, %s1627_s22   ;;  %s1986_s18 = smov %s1619_s20 }
 0x160   : > { %p13_p8 = scmp.ge.s32.totalorder %s16_s22, 18   ;;  %s1987_s19 = smov %s1623_s21 }
 0x161   : > { %s1988_s20 = smov %s1991_s23  ;;  %s1989_s21 = smov %s1995_s24 }
 0x162   :  { %15 = sbr.rel (!%p13_p8) target bundleno = 3 (0x3), region = 93 }

// kernel: generator_forward.16
= control target key start
LH: loop header
LB: loop body
LE: loop exit
PB: predicated region body
PF: predicated region fallthrough
CT: control target
= control target key end

     0   :  { %s2832_s21 = smov 0   ;;  %s2834_s22 = smov 0   ;;  %s3331_s0 = inlined_call_operand.vmem [shape: f32[2,10,10,128], index: 0, kind: input, shape index: {}]   ;;  %s3332_s1 = inlined_call_operand.vmem [shape: bf16[2,2,512,128], index: 1, kind: input, shape index: {}]   ;;  %s3333_s2 = inlined_call_operand.vmem [shape: f32[1,128], index: 2, kind: input, shape index: {}]   ;;  %s3334_s3 = inlined_call_operand.vmem [shape: f32[2,8,8,128], index: 3, kind: output, shape index: {0}]   ;;  %s3335_s4 = inlined_call_operand.vmem [shape: f32[2,8,8,128], index: 4, kind: output, shape index: {1}]   ;;  %s3336_s5 = inlined_call_operand.vmem [shape: f32[2,8,8,128], index: 5, kind: output, shape index: {2}]   ;;  %s3337_s6 = inlined_call_operand.vmem [shape: f32[2,8,8,128], index: 6, kind: output, shape index: {3}]  }
   0x1   :  { %s2836_s23 = smov 0   ;;  %s2838_s24 = smov 0  }
   0x2   :  { %s2840_s25 = smov 0  }
   0x3 LB: > { %s26_s26 = sadd.s32 1, %s2787_s23  ;;  %s29_s27 = sadd.s32 1, %s2791_s24  ;;  %s2795_s25 = sphi %s2840_s25, %s17_s25   ;;  %s2791_s24 = sphi %s2838_s24, %s3341_s24   ;;  %s2787_s23 = sphi %s2836_s23, %s3340_s23   ;;  %s2783_s22 = sphi %s2834_s22, %s3339_s22   ;;  %s2779_s21 = sphi %s2832_s21, %s3338_s21  }
   0x4   : > { %p27_p0 = scmp.ge.s32.totalorder %s26_s26, 8  ;;  %p2069_p1 = scmp.ge.s32.totalorder %s2795_s25, 1 }
   0x5   : > { %p239_p2 = scmp.lt.s32.totalorder %s2795_s25, 17 }
   0x6   : > { %s3343_s26 = smov (%p27_p0, %s26_s26), 0  ;;  %s3345_s27 = smov (!%p27_p0, %s29_s27), %s2791_s24 }
   0x7   : > { %p240_p3 = pnand %p2069_p1, %p239_p2  ;;  %p31_p4 = scmp.ge.s32.totalorder %s3345_s27, 2 }
   0x8   : > { %v2629_v0 = vld [vmem:[%s3332_s1 + $0x40] sm:$0xff] (!%p240_p3)   ;;  %v2633_v4 = vld [vmem:[%s3332_s1 + $0x48] sm:$0xff] (!%p240_p3)   ;;  %v2637_v8 = vld [vmem:[%s3332_s1 + $0x50] sm:$0xff] (!%p240_p3)   ;;  %p296_p5 = scmp.lt.s32.totalorder (!%p240_p3), %s2783_s22, 1  ;;  %s2079_s11 = sshll.u32 (!%p240_p3), %s2779_s21, 4  ;;  %vm735_vm0 = vcmask (!%p240_p3), 1046528  }
   0x9   : > { %s3347_s27 = smov (%p31_p4, %s3345_s27), 0  ;;  %243 = sbr.rel (%p240_p3) target bundleno = 359 (0x167), region = 32 }
   0xa   : > { %v2630_v1 = vld [vmem:[%s3332_s1 + $0xc0] sm:$0xff] (!%p240_p3)   ;;  %2412 = vmatprep.subr.bf16.mxu0 (!%p240_p3), %v2629_v0  ;;  %v2634_v5 = vld [vmem:[%s3332_s1 + $0xc8] sm:$0xff] (!%p240_p3)   ;;  %v2638_v9 = vld [vmem:[%s3332_s1 + $0xd0] sm:$0xff] (!%p240_p3)   ;;  %p303_p6 = scmp.lt.s32.totalorder (!%p240_p3), %s2779_s21, 7 }
   0xb   : > { %v2631_v2 = vld [vmem:[%s3332_s1] sm:$0xff] (!%p240_p3)   ;;  %2434 = vmatprep.subr.bf16.mxu1 (!%p240_p3), %v2630_v1  ;;  %v2635_v6 = vld [vmem:[%s3332_s1 + $0x8] sm:$0xff] (!%p240_p3)   ;;  %v2639_v10 = vld [vmem:[%s3332_s1 + $0x10] sm:$0xff] (!%p240_p3)  }
   0xc   : > { %v2632_v3 = vld [vmem:[%s3332_s1 + $0x80] sm:$0xff] (!%p240_p3)   ;;  %2413 = vmatpush3.bf16.msra.mxu0 (!%p240_p3), %v2631_v2  ;;  %v2636_v7 = vld [vmem:[%s3332_s1 + $0x88] sm:$0xff] (!%p240_p3)   ;;  %v2640_v11 = vld [vmem:[%s3332_s1 + $0x90] sm:$0xff] (!%p240_p3)  }
   0xd   : > { %2435 = vmatpush3.bf16.msra.mxu1 (!%p240_p3), %v2632_v3  ;;  %2414 = vmatprep.subr.bf16.mxu0 (!%p240_p3), %v2633_v4  ;;  %v2641_v12 = vld [vmem:[%s3332_s1 + $0x58] sm:$0xff] (!%p240_p3)   ;;  %v2645_v16 = vld [vmem:[%s3332_s1 + $0x60] sm:$0xff] (!%p240_p3)   ;;  %v2649_v20 = vld [vmem:[%s3332_s1 + $0x68] sm:$0xff] (!%p240_p3)  }
   0xe   : > { %2436 = vmatprep.subr.bf16.mxu1 (!%p240_p3), %v2634_v5  ;;  %v2642_v13 = vld [vmem:[%s3332_s1 + $0xd8] sm:$0xff] (!%p240_p3)   ;;  %v2646_v17 = vld [vmem:[%s3332_s1 + $0xe0] sm:$0xff] (!%p240_p3)   ;;  %v2650_v21 = vld [vmem:[%s3332_s1 + $0xe8] sm:$0xff] (!%p240_p3)  }
   0xf   : > { %v2643_v14 = vld [vmem:[%s3332_s1 + $0x18] sm:$0xff] (!%p240_p3)   ;;  %v2647_v18 = vld [vmem:[%s3332_s1 + $0x20] sm:$0xff] (!%p240_p3)   ;;  %v2651_v22 = vld [vmem:[%s3332_s1 + $0x28] sm:$0xff] (!%p240_p3)  }
  0x10   : > { %2415 = vmatpush3.bf16.msra.mxu0 %v2635_v6  ;;  %v2644_v15 = vld [vmem:[%s3332_s1 + $0x98] sm:$0xff]   ;;  %s3349_s22 = smov (!%p296_p5, %s2783_s22), 1  ;;  %v2648_v19 = vld [vmem:[%s3332_s1 + $0xa0] sm:$0xff]   ;;  %v2652_v23 = vld [vmem:[%s3332_s1 + $0xa8] sm:$0xff]   ;;  %s3351_s21 = smov (!%p303_p6, %s2779_s21), 7 }
  0x11   : > { %2437 = vmatpush3.bf16.msra.mxu1 %v2636_v7  ;;  %2416 = vmatprep.subr.bf16.mxu0 %v2637_v8  ;;  %s2588_s16 = smul.u32 160, %s3349_s22  ;;  %v2653_v24 = vld [vmem:[%s3332_s1 + $0x70] sm:$0xff]   ;;  %v2657_v28 = vld [vmem:[%s3332_s1 + $0x78] sm:$0xff]   ;;  %v2661_v40 = vld [vmem:[%s3332_s1 + $0x140] sm:$0xff]  }
  0x12   : > { %2438 = vmatprep.subr.bf16.mxu1 %v2638_v9  ;;  %v2654_v25 = vld [vmem:[%s3332_s1 + $0xf0] sm:$0xff]   ;;  %v2658_v29 = vld [vmem:[%s3332_s1 + $0xf8] sm:$0xff]   ;;  %v2662_v43 = vld [vmem:[%s3332_s1 + $0x1c0] sm:$0xff]  }
  0x13   : > { %v2655_v26 = vld [vmem:[%s3332_s1 + $0x30] sm:$0xff]   ;;  %s300_s10 = scalar_lea.vmem %s3331_s0, %s2588_s16  ;;  %v2659_v30 = vld [vmem:[%s3332_s1 + $0x38] sm:$0xff]   ;;  %v2663_v58 = vld [vmem:[%s3332_s1 + $0x100] sm:$0xff]   ;;  %s2071_s16 = sshll.u32 %s3349_s22, 3 }
  0x14   : > { %2417 = vmatpush3.bf16.msra.mxu0 %v2639_v10  ;;  %v2656_v27 = vld [vmem:[%s3332_s1 + $0xb0] sm:$0xff]   ;;  %s2965_s19 = scalar_lea.vmem %s300_s10, %s2079_s11  ;;  %v2660_v31 = vld [vmem:[%s3332_s1 + $0xb8] sm:$0xff]   ;;  %v2664_v61 = vld [vmem:[%s3332_s1 + $0x180] sm:$0xff]   ;;  %s306_s20 = sadd.s32 %s2071_s16, %s3351_s21 }
  0x15   : > { %2439 = vmatpush3.bf16.msra.mxu1 %v2640_v11  ;;  %2418 = vmatprep.subr.bf16.mxu0 %v2641_v12  ;;  %v2080_v32 = vld [vmem:[%s2965_s19 + $0x10] sm:$0xff]  ;;  %v2081_v33 = vld [vmem:[%s2965_s19 + $0x18] sm:$0x3]  ;;  %v341_v34 = vld [vmem:[%s2965_s19] sm:$0xff]  ;;  %s3298_s30 = sshll.u32 %s306_s20, 3 }
  0x16   : > { %2440 = vmatprep.subr.bf16.mxu1 %v2642_v13  ;;  %v349_v35 = vrot.slane %v2080_v32, 7  ;;  %v354_v36 = vpack.c.bf16 %v2081_v33, %v2080_v32  ;;  %v736_v37 = vrot.slane %v2080_v32, 1  ;;  %v352_v38 = vrot.slane %v341_v34, 7  ;;  %v342_v39 = vld [vmem:[%s2965_s19 + $0x8] sm:$0x3]  ;;  %v2669_v9 = vld [vmem:[%s3332_s1 + $0x150] sm:$0xff]   ;;  %s308_s7 = scalar_lea.vmem %s3334_s3, %s3298_s30  ;;  %s316_s9 = scalar_lea.vmem %s3335_s4, %s3298_s30 }
  0x17   : > { %v742_v41 = vrot.slane %v341_v34, 1  ;;  %v356_v42 = vpack.c.bf16 %v342_v39, %v341_v34  ;;  %v737_v62 = vrot.slane %v2081_v33, 1  ;;  %v2665_v1 = vld [vmem:[%s3332_s1 + $0x148] sm:$0xff]   ;;  %v743_v2 = vrot.slane %v342_v39, 1  ;;  %v2670_v10 = vld [vmem:[%s3332_s1 + $0x1d0] sm:$0xff]   ;;  %v2690_v39 = vld [vmem:[%s3332_s1 + $0x1f8] sm:$0xff]   ;;  %s324_s12 = scalar_lea.vmem %s3336_s5, %s3298_s30  ;;  %s332_s15 = scalar_lea.vmem %s3337_s6, %s3298_s30 }
  0x18   : > { %2419 = vmatpush3.bf16.msra.mxu0 %v2643_v14  ;;  %v355_v44 = vpack.c.bf16 %v349_v35, %v349_v35  ;;  %v357_v45 = vpack.c.bf16 %v352_v38, %v352_v38  ;;  %v430_v46 = vshrl.u32 %v354_v36, 16  ;;  %v432_v47 = vshll.u32 %v354_v36, 16  ;;  %v2666_v3 = vld [vmem:[%s3332_s1 + $0x1c8] sm:$0xff]   ;;  %v2671_v14 = vld [vmem:[%s3332_s1 + $0x110] sm:$0xff]   ;;  %v2689_v38 = vld [vmem:[%s3332_s1 + $0x178] sm:$0xff]  }
  0x19   : > { %2441 = vmatpush3.bf16.msra.mxu1 %v2644_v15  ;;  %2420 = vmatprep.subr.bf16.mxu0 %v2645_v16  ;;  %v444_v48 = vshrl.u32 %v356_v42, 16  ;;  %v446_v49 = vshll.u32 %v356_v42, 16  ;;  %v738_v4 = vsel %vm735_vm0, %v736_v37, %v737_v62  ;;  %v2667_v5 = vld [vmem:[%s3332_s1 + $0x108] sm:$0xff]   ;;  %v744_v8 = vsel %vm735_vm0, %v742_v41, %v743_v2  ;;  %v2672_v15 = vld [vmem:[%s3332_s1 + $0x190] sm:$0xff]   ;;  %v2692_v41 = vld [vmem:[%s3332_s1 + $0x1b8] sm:$0xff]  }
  0x1a   : > { %2442 = vmatprep.subr.bf16.mxu1 %v2646_v17  ;;  %v437_v50 = vshrl.u32 %v355_v44, 16  ;;  %v439_v51 = vshll.u32 %v355_v44, 16  ;;  %v451_v52 = vshrl.u32 %v357_v45, 16  ;;  %v453_v53 = vshll.u32 %v357_v45, 16  ;;  %v2668_v6 = vld [vmem:[%s3332_s1 + $0x188] sm:$0xff]   ;;  %v2685_v34 = vld [vmem:[%s3332_s1 + $0x170] sm:$0xff]  }
  0x1b   : > { %v434_v54 = vrot.slane %v432_v47, 1  ;;  %v448_v55 = vrot.slane %v446_v49, 1  ;;  %v747_v7 = vpack.c.bf16 %v737_v62, %v738_v4  ;;  %v748_v11 = vpack.c.bf16 %v743_v2, %v744_v8  ;;  %v2683_v32 = vld [vmem:[%s3332_s1 + $0x128] sm:$0xff]   ;;  %v2686_v35 = vld [vmem:[%s3332_s1 + $0x1f0] sm:$0xff]   ;;  %v2693_v42 = vld [vmem:[%s3332_s1 + $0x240] sm:$0xff]  }
  0x1c   : > { %2421 = vmatpush3.bf16.msra.mxu0 %v2647_v18  ;;  %v441_v56 = vrot.slane %v439_v51, 1  ;;  %v455_v57 = vrot.slane %v453_v53, 1  ;;  %v2673_v18 = vld [vmem:[%s3332_s1 + $0x158] sm:$0xff]   ;;  %v2684_v33 = vld [vmem:[%s3332_s1 + $0x1a8] sm:$0xff]   ;;  %v2687_v36 = vld [vmem:[%s3332_s1 + $0x130] sm:$0xff]  }
  0x1d   : > { %2443 = vmatpush3.bf16.msra.mxu1 %v2648_v19  ;;  %2422 = vmatprep.subr.bf16.mxu0 %v2649_v20  ;;  %v2986_v59 = vor.u32 %v434_v54, %v430_v46  ;;  %v2988_v60 = vor.u32 %v448_v55, %v444_v48  ;;  %v822_v12 = vshrl.u32 %v747_v7, 16  ;;  %v824_v13 = vshll.u32 %v747_v7, 16  ;;  %v2674_v20 = vld [vmem:[%s3332_s1 + $0x1d8] sm:$0xff]   ;;  %v2688_v37 = vld [vmem:[%s3332_s1 + $0x1b0] sm:$0xff]   ;;  %v2695_v44 = vld [vmem:[%s3332_s1 + $0x200] sm:$0xff]  }
  0x1e   : > { %2444 = vmatprep.subr.bf16.mxu1 %v2650_v21  ;;  %v2993_v63 = vor.u32 %v441_v56, %v437_v50  ;;  %v456_v0 = vor.u32 %v455_v57, %v451_v52  ;;  %v829_v17 = vshrl.u32 %v748_v11, 16  ;;  %v831_v19 = vshll.u32 %v748_v11, 16  ;;  %v2696_v45 = vld [vmem:[%s3332_s1 + $0x280] sm:$0xff]   ;;  %v2697_v46 = vld [vmem:[%s3332_s1 + $0x248] sm:$0xff]   ;;  %v2701_v50 = vld [vmem:[%s3332_s1 + $0x250] sm:$0xff]  }
  0x1f   : > { %v826_v16 = vrot.slane %v824_v13, 1  ;;  %v2698_v47 = vld [vmem:[%s3332_s1 + $0x2c8] sm:$0xff]   ;;  %v2702_v51 = vld [vmem:[%s3332_s1 + $0x2d0] sm:$0xff]   ;;  %v2705_v54 = vld [vmem:[%s3332_s1 + $0x258] sm:$0xff]  }
  0x20   : > { %2423 = vmatpush3.bf16.msra.mxu0 %v2651_v22  ;;  %685 = vmatprep.mubr.bf16.mxu0 %v2993_v63  ;;  %v2675_v22 = vld [vmem:[%s3332_s1 + $0x118] sm:$0xff]   ;;  %v2699_v48 = vld [vmem:[%s3332_s1 + $0x208] sm:$0xff]   ;;  %v2703_v52 = vld [vmem:[%s3332_s1 + $0x210] sm:$0xff]  }
  0x21   : > { %2445 = vmatpush3.bf16.msra.mxu1 %v2652_v23  ;;  %2424 = vmatprep.subr.bf16.mxu0 %v2653_v24  ;;  %v3030_v21 = vor.u32 %v826_v16, %v822_v12  ;;  %v833_v23 = vrot.slane %v831_v19, 1  ;;  %v2676_v24 = vld [vmem:[%s3332_s1 + $0x198] sm:$0xff]   ;;  %v2700_v49 = vld [vmem:[%s3332_s1 + $0x288] sm:$0xff]   ;;  %v2704_v53 = vld [vmem:[%s3332_s1 + $0x290] sm:$0xff]  }
  0x22   : > { %2446 = vmatprep.subr.bf16.mxu1 %v2654_v25  ;;  %725 = vmatprep.mubr.bf16.mxu1 %v456_v0  ;;  %v2677_v25 = vld [vmem:[%s3332_s1 + $0x160] sm:$0xff]   ;;  %v2706_v55 = vld [vmem:[%s3332_s1 + $0x2d8] sm:$0xff]   ;;  %v2714_v0 = vld [vmem:[%s3332_s1 + $0x2e8] sm:$0xff]  }
  0x23   : > { %v2707_v56 = vld [vmem:[%s3332_s1 + $0x218] sm:$0xff]   ;;  %v2712_v62 = vld [vmem:[%s3332_s1 + $0x2a0] sm:$0xff]   ;;  %v2716_v2 = vld [vmem:[%s3332_s1 + $0x2a8] sm:$0xff]  }
  0x24   : > { %2425 = vmatpush3.bf16.msra.mxu0 %v2655_v26  ;;  %v834_v26 = vor.u32 %v833_v23, %v829_v17  ;;  %v2708_v57 = vld [vmem:[%s3332_s1 + $0x298] sm:$0xff]   ;;  %v2718_v4 = vld [vmem:[%s3332_s1 + $0x2f0] sm:$0xff]   ;;  %v2085_v11 = vld [vmem:[%s2965_s19 + $0x28] sm:$0x3] }
  0x25   : > { %2447 = vmatpush3.bf16.msra.mxu1 %v2656_v27  ;;  %2426 = vmatprep.subr.bf16.mxu0 %v2657_v28  ;;  %v2678_v27 = vld [vmem:[%s3332_s1 + $0x1e0] sm:$0xff]   ;;  %v2721_v7 = vld [vmem:[%s3332_s1 + $0x278] sm:$0xff]   ;;  %v1478_v16 = vrot.slane %v2085_v11, 1 }
  0x26   : > { %2448 = vmatprep.subr.bf16.mxu1 %v2658_v29  ;;  %v2679_v28 = vld [vmem:[%s3332_s1 + $0x120] sm:$0xff]   ;;  %v2722_v8 = vld [vmem:[%s3332_s1 + $0x2f8] sm:$0xff]  }
  0x27   : > { %v2680_v29 = vld [vmem:[%s3332_s1 + $0x1a0] sm:$0xff]  }
  0x28   : > { %2427 = vmatpush3.bf16.msra.mxu0 %v2659_v30  ;;  %v2681_v30 = vld [vmem:[%s3332_s1 + $0x168] sm:$0xff]  }
  0x29   : > { %2449 = vmatpush3.bf16.msra.mxu1 %v2660_v31  ;;  %2456 = vmatprep.subr.bf16.mxu0 %v2661_v40  ;;  %v2682_v31 = vld [vmem:[%s3332_s1 + $0x1e8] sm:$0xff]   ;;  %v2691_v40 = vld [vmem:[%s3332_s1 + $0x138] sm:$0xff]  }
  0x2a   : > { %2478 = vmatprep.subr.bf16.mxu1 %v2662_v43  ;;  %v2694_v43 = vld [vmem:[%s3332_s1 + $0x2c0] sm:$0xff]  }
  0x2b   : > { %686 = vmatmul.mubr.bf16.vlgmr.msra.gmra.mrb[0].mxu0 %v2986_v59 }
  0x2c   : > { %726 = vmatmul.mubr.bf16.vlgmr.msra.gmra.mrb[0].mxu1 %v2988_v60  ;;  %2457 = vmatpush3.bf16.msra.mxu0 %v2663_v58  ;;  %v2709_v58 = vld [vmem:[%s3332_s1 + $0x260] sm:$0xff]  }
  0x2d   : > { %2479 = vmatpush3.bf16.msra.mxu1 %v2664_v61  ;;  %2458 = vmatprep.subr.bf16.mxu0 %v2665_v1  ;;  %v2711_v61 = vld [vmem:[%s3332_s1 + $0x220] sm:$0xff]   ;;  %v2715_v1 = vld [vmem:[%s3332_s1 + $0x228] sm:$0xff]  }
  0x2e   : > { %2480 = vmatprep.subr.bf16.mxu1 %v2666_v3  ;;  %1061 = vmatprep.mubr.bf16.mxu0 %v3030_v21  ;;  %v2717_v3 = vld [vmem:[%s3332_s1 + $0x270] sm:$0xff]  }
  0x2f   : > { %1101 = vmatprep.mubr.bf16.mxu1 %v834_v26 }
  0x30   : > { %2459 = vmatpush3.bf16.msra.mxu0 %v2667_v5  ;;  %v2719_v5 = vld [vmem:[%s3332_s1 + $0x230] sm:$0xff]  }
  0x31   : > { %2481 = vmatpush3.bf16.msra.mxu1 %v2668_v6  ;;  %2460 = vmatprep.subr.bf16.mxu0 %v2669_v9  ;;  %v2720_v6 = vld [vmem:[%s3332_s1 + $0x2b0] sm:$0xff]   ;;  %v2723_v9 = vld [vmem:[%s3332_s1 + $0x238] sm:$0xff]  }
  0x32   : > { %2482 = vmatprep.subr.bf16.mxu1 %v2670_v10  ;;  %v2084_v10 = vld [vmem:[%s2965_s19 + $0x20] sm:$0xff] }
  0x33   : > { %v1111_v12 = vrot.slane %v2084_v10, 7  ;;  %v1477_v13 = vrot.slane %v2084_v10, 1 }
  0x34   : > { %2461 = vmatpush3.bf16.msra.mxu0 %v2671_v14  ;;  %v1113_v14 = vpack.c.bf16 %v2085_v11, %v2084_v10 }
  0x35   : > { %2483 = vmatpush3.bf16.msra.mxu1 %v2672_v15  ;;  %2462 = vmatprep.subr.bf16.mxu0 %v2673_v18  ;;  %v2724_v15 = vld [vmem:[%s3332_s1 + $0x2b8] sm:$0xff]   ;;  %v1114_v17 = vpack.c.bf16 %v1111_v12, %v1111_v12  ;;  %v1479_v23 = vsel %vm735_vm0, %v1477_v13, %v1478_v16 }
  0x36   : > { %2484 = vmatprep.subr.bf16.mxu1 %v2674_v20  ;;  %v1188_v18 = vshrl.u32 %v1113_v14, 16  ;;  %v1190_v19 = vshll.u32 %v1113_v14, 16  ;;  %v2725_v20 = vld [vmem:[%s3332_s1 + $0x340] sm:$0xff]  }
  0x38   : > { %2463 = vmatpush3.bf16.msra.mxu0 %v2675_v22  ;;  %v2726_v22 = vld [vmem:[%s3332_s1 + $0x3c0] sm:$0xff]   ;;  %v1192_v26 = vrot.slane %v1190_v19, 1 }
  0x39   : > { %2485 = vmatpush3.bf16.msra.mxu1 %v2676_v24  ;;  %2464 = vmatprep.subr.bf16.mxu0 %v2677_v25  ;;  %v1195_v24 = vshrl.u32 %v1114_v17, 16  ;;  %v1197_v25 = vshll.u32 %v1114_v17, 16 }
  0x3a   : > { %2486 = vmatprep.subr.bf16.mxu1 %v2678_v27  ;;  %v1482_v27 = vpack.c.bf16 %v1478_v16, %v1479_v23 }
  0x3c   : > { %2465 = vmatpush3.bf16.msra.mxu0 %v2679_v28  ;;  %v2727_v28 = vld [vmem:[%s3332_s1 + $0x300] sm:$0xff]  }
  0x3d   : > { %2487 = vmatpush3.bf16.msra.mxu1 %v2680_v29  ;;  %2466 = vmatprep.subr.bf16.mxu0 %v2681_v30  ;;  %v1199_v29 = vrot.slane %v1197_v25, 1  ;;  %v2728_v30 = vld [vmem:[%s3332_s1 + $0x380] sm:$0xff]  }
  0x3e   : > { %2488 = vmatprep.subr.bf16.mxu1 %v2682_v31  ;;  %v2729_v31 = vld [vmem:[%s3332_s1 + $0x348] sm:$0xff]  }
  0x40   : > { %2467 = vmatpush3.bf16.msra.mxu0 %v2683_v32  ;;  %v3204_v32 = vor.u32 %v1192_v26, %v1188_v18 }
  0x41   : > { %2489 = vmatpush3.bf16.msra.mxu1 %v2684_v33  ;;  %2468 = vmatprep.subr.bf16.mxu0 %v2685_v34  ;;  %v2730_v33 = vld [vmem:[%s3332_s1 + $0x3c8] sm:$0xff]   ;;  %v1200_v34 = vor.u32 %v1199_v29, %v1195_v24 }
  0x42   : > { %2490 = vmatprep.subr.bf16.mxu1 %v2686_v35  ;;  %v1556_v35 = vshrl.u32 %v1482_v27, 16 }
  0x44   : > { %2469 = vmatpush3.bf16.msra.mxu0 %v2687_v36  ;;  %v1558_v36 = vshll.u32 %v1482_v27, 16 }
  0x45   : > { %2491 = vmatpush3.bf16.msra.mxu1 %v2688_v37  ;;  %2470 = vmatprep.subr.bf16.mxu0 %v2689_v38  ;;  %v2731_v37 = vld [vmem:[%s3332_s1 + $0x308] sm:$0xff]   ;;  %v2733_v38 = vld [vmem:[%s3332_s1 + $0x350] sm:$0xff]  }
  0x46   : > { %2492 = vmatprep.subr.bf16.mxu1 %v2690_v39  ;;  %v1560_v39 = vrot.slane %v1558_v36, 1 }
  0x48   : > { %2471 = vmatpush3.bf16.msra.mxu0 %v2691_v40  ;;  %v2732_v40 = vld [vmem:[%s3332_s1 + $0x388] sm:$0xff]  }
  0x49   : > { %2493 = vmatpush3.bf16.msra.mxu1 %v2692_v41  ;;  %2500 = vmatprep.subr.bf16.mxu0 %v2693_v42  ;;  %v2734_v41 = vld [vmem:[%s3332_s1 + $0x3d0] sm:$0xff]   ;;  %v1561_v42 = vor.u32 %v1560_v39, %v1556_v35 }
  0x4a   : > { %2522 = vmatprep.subr.bf16.mxu1 %v2694_v43  ;;  %v2737_v43 = vld [vmem:[%s3332_s1 + $0x358] sm:$0xff]  }
  0x4b   : > { %1062 = vmatmul.mubr.bf16.vlgmr.msra.gmra.mrb[4].mxu0 %v2986_v59 }
  0x4c   : > { %1102 = vmatmul.mubr.bf16.vlgmr.msra.gmra.mrb[4].mxu1 %v2988_v60  ;;  %2501 = vmatpush3.bf16.msra.mxu0 %v2695_v44  ;;  %v2710_v60 = vld [vmem:[%s3332_s1 + $0x2e0] sm:$0xff]   ;;  %v2736_v44 = vld [vmem:[%s3332_s1 + $0x390] sm:$0xff]  }
  0x4d   : > { %2523 = vmatpush3.bf16.msra.mxu1 %v2696_v45  ;;  %2502 = vmatprep.subr.bf16.mxu0 %v2697_v46  ;;  %v2738_v45 = vld [vmem:[%s3332_s1 + $0x3d8] sm:$0xff]  }
  0x4e   : > { %2524 = vmatprep.subr.bf16.mxu1 %v2698_v47  ;;  %1427 = vmatprep.mubr.bf16.mxu0 %v2993_v63  ;;  %v2713_v63 = vld [vmem:[%s3332_s1 + $0x268] sm:$0xff]   ;;  %v2739_v46 = vld [vmem:[%s3332_s1 + $0x318] sm:$0xff]   ;;  %v2741_v47 = vld [vmem:[%s3332_s1 + $0x360] sm:$0xff]  }
  0x4f   : > { %1467 = vmatprep.mubr.bf16.mxu1 %v1200_v34 }
  0x50   : > { %2503 = vmatpush3.bf16.msra.mxu0 %v2699_v48  ;;  %v2740_v48 = vld [vmem:[%s3332_s1 + $0x398] sm:$0xff]  }
  0x51   : > { %2525 = vmatpush3.bf16.msra.mxu1 %v2700_v49  ;;  %2504 = vmatprep.subr.bf16.mxu0 %v2701_v50  ;;  %v2742_v49 = vld [vmem:[%s3332_s1 + $0x3e0] sm:$0xff]  }
  0x52   : > { %2526 = vmatprep.subr.bf16.mxu1 %v2702_v51  ;;  %v2743_v50 = vld [vmem:[%s3332_s1 + $0x320] sm:$0xff]   ;;  %v2745_v51 = vld [vmem:[%s3332_s1 + $0x368] sm:$0xff]  }
  0x54   : > { %2505 = vmatpush3.bf16.msra.mxu0 %v2703_v52  ;;  %v2744_v52 = vld [vmem:[%s3332_s1 + $0x3a0] sm:$0xff]  }
  0x55   : > { %2527 = vmatpush3.bf16.msra.mxu1 %v2704_v53  ;;  %2506 = vmatprep.subr.bf16.mxu0 %v2705_v54  ;;  %v2746_v53 = vld [vmem:[%s3332_s1 + $0x3e8] sm:$0xff]  }
  0x56   : > { %2528 = vmatprep.subr.bf16.mxu1 %v2706_v55  ;;  %v2747_v54 = vld [vmem:[%s3332_s1 + $0x328] sm:$0xff]   ;;  %v2749_v55 = vld [vmem:[%s3332_s1 + $0x370] sm:$0xff]  }
  0x58   : > { %2507 = vmatpush3.bf16.msra.mxu0 %v2707_v56  ;;  %v2748_v56 = vld [vmem:[%s3332_s1 + $0x3a8] sm:$0xff]  }
  0x59   : > { %2529 = vmatpush3.bf16.msra.mxu1 %v2708_v57  ;;  %2508 = vmatprep.subr.bf16.mxu0 %v2709_v58  ;;  %v2750_v57 = vld [vmem:[%s3332_s1 + $0x3f0] sm:$0xff]  }
  0x5a   : > { %2530 = vmatprep.subr.bf16.mxu1 %v2710_v60  ;;  %v2751_v58 = vld [vmem:[%s3332_s1 + $0x330] sm:$0xff]   ;;  %v2753_v60 = vld [vmem:[%s3332_s1 + $0x378] sm:$0xff]  }
  0x5c   : > { %2509 = vmatpush3.bf16.msra.mxu0 %v2711_v61  ;;  %v2752_v61 = vld [vmem:[%s3332_s1 + $0x3b0] sm:$0xff]  }
  0x5d   : > { %2531 = vmatpush3.bf16.msra.mxu1 %v2712_v62  ;;  %2510 = vmatprep.subr.bf16.mxu0 %v2713_v63  ;;  %v2754_v62 = vld [vmem:[%s3332_s1 + $0x3f8] sm:$0xff]  }
  0x5e   : > { %2532 = vmatprep.subr.bf16.mxu1 %v2714_v0  ;;  %v2755_v63 = vld [vmem:[%s3332_s1 + $0x338] sm:$0xff]  }
  0x5f   : > { %v2756_v0 = vld [vmem:[%s3332_s1 + $0x3b8] sm:$0xff]  }
  0x60   : > { %2511 = vmatpush3.bf16.msra.mxu0 %v2715_v1 }
  0x61   : > { %2533 = vmatpush3.bf16.msra.mxu1 %v2716_v2  ;;  %2512 = vmatprep.subr.bf16.mxu0 %v2717_v3  ;;  %v2086_v3 = vld [vmem:[%s3333_s2] ss:$0 sm:$0xff] }
  0x62   : > { %2534 = vmatprep.subr.bf16.mxu1 %v2718_v4 }
  0x64   : > { %2513 = vmatpush3.bf16.msra.mxu0 %v2719_v5 }
  0x65   : > { %2535 = vmatpush3.bf16.msra.mxu1 %v2720_v6  ;;  %2514 = vmatprep.subr.bf16.mxu0 %v2721_v7 }
  0x66   : > { %2536 = vmatprep.subr.bf16.mxu1 %v2722_v8 }
  0x68   : > { %2515 = vmatpush3.bf16.msra.mxu0 %v2723_v9 }
  0x69   : > { %2537 = vmatpush3.bf16.msra.mxu1 %v2724_v15  ;;  %2544 = vmatprep.subr.bf16.mxu0 %v2725_v20 }
  0x6a   : > { %2566 = vmatprep.subr.bf16.mxu1 %v2726_v22 }
  0x6b   : > { %1428 = vmatmul.mubr.bf16.vlgmr.msra.gmra.mrb[8].mxu0 %v2986_v59 }
  0x6c   : > { %2545 = vmatpush3.bf16.msra.mxu0 %v2727_v28  ;;  %1787 = vmatprep.mubr.bf16.mxu0 %v3030_v21  ;;  %v2735_v21 = vld [vmem:[%s3332_s1 + $0x310] sm:$0xff]  }
  0x6d   : > { %2546 = vmatprep.subr.bf16.mxu0 %v2729_v31  ;;  %1468 = vmatmul.mubr.bf16.vlgmr.msra.gmra.mrb[8].mxu1 %v3204_v32 }
  0x6e   : > { %2567 = vmatpush3.bf16.msra.mxu1 %v2728_v30  ;;  %1827 = vmatprep.mubr.bf16.mxu1 %v1561_v42 }
  0x6f   : > { %2568 = vmatprep.subr.bf16.mxu1 %v2730_v33 }
  0x70   : > { %2547 = vmatpush3.bf16.msra.mxu0 %v2731_v37 }
  0x71   : > { %2548 = vmatprep.subr.bf16.mxu0 %v2733_v38 }
  0x72   : > { %2569 = vmatpush3.bf16.msra.mxu1 %v2732_v40 }
  0x73   : > { %2570 = vmatprep.subr.bf16.mxu1 %v2734_v41 }
  0x74   : > { %2549 = vmatpush3.bf16.msra.mxu0 %v2735_v21 }
  0x75   : > { %2550 = vmatprep.subr.bf16.mxu0 %v2737_v43 }
  0x76   : > { %2571 = vmatpush3.bf16.msra.mxu1 %v2736_v44 }
  0x77   : > { %2572 = vmatprep.subr.bf16.mxu1 %v2738_v45 }
  0x78   : > { %2551 = vmatpush3.bf16.msra.mxu0 %v2739_v46 }
  0x79   : > { %2552 = vmatprep.subr.bf16.mxu0 %v2741_v47 }
  0x7a   : > { %2573 = vmatpush3.bf16.msra.mxu1 %v2740_v48 }
  0x7b   : > { %2574 = vmatprep.subr.bf16.mxu1 %v2742_v49 }
  0x7c   : > { %2553 = vmatpush3.bf16.msra.mxu0 %v2743_v50 }
  0x7d   : > { %2554 = vmatprep.subr.bf16.mxu0 %v2745_v51 }
  0x7e   : > { %2575 = vmatpush3.bf16.msra.mxu1 %v2744_v52 }
  0x7f   : > { %2576 = vmatprep.subr.bf16.mxu1 %v2746_v53 }
  0x80   : > { %2555 = vmatpush3.bf16.msra.mxu0 %v2747_v54 }
  0x81   : > { %2556 = vmatprep.subr.bf16.mxu0 %v2749_v55 }
  0x82   : > { %2577 = vmatpush3.bf16.msra.mxu1 %v2748_v56 }
  0x83   : > { %2578 = vmatprep.subr.bf16.mxu1 %v2750_v57 }
  0x84   : > { %2557 = vmatpush3.bf16.msra.mxu0 %v2751_v58 }
  0x85   : > { %2558 = vmatprep.subr.bf16.mxu0 %v2753_v60 }
  0x86   : > { %2579 = vmatpush3.bf16.msra.mxu1 %v2752_v61 }
  0x87   : > { %2580 = vmatprep.subr.bf16.mxu1 %v2754_v62 }
  0x88   : > { %2559 = vmatpush3.bf16.msra.mxu0 %v2755_v63 }
  0x8a   : > { %2581 = vmatpush3.bf16.msra.mxu1 %v2756_v0 }
  0x8b   : > { %1788 = vmatmul.mubr.bf16.vlgmr.msra.gmra.mrb[12].mxu0 %v2986_v59 }
  0x8d   : > { %1828 = vmatmul.mubr.bf16.vlgmr.msra.gmra.mrb[12].mxu1 %v3204_v32 }
  0xfe   : > { %v2428_v1 = vpop.f32.mrb[0].mxu0 }
  0xff   : > { %v2450_v2 = vpop.f32.mrb[0].mxu1  ;;  %v2429_v4 = vpop.f32.mrb[1].mxu0 }
 0x100   : > { %v2451_v5 = vpop.f32.mrb[1].mxu1  ;;  %v2430_v6 = vadd.f32 %v2429_v4, %v2428_v1  ;;  %v2431_v59 = vpop.f32.mrb[2].mxu0 }
 0x101   : > { %v2452_v7 = vadd.f32 %v2451_v5, %v2450_v2  ;;  %v2453_v8 = vpop.f32.mrb[2].mxu1  ;;  %v2432_v9 = vpop.f32.mrb[3].mxu0 }
 0x102   : > { %v2454_v10 = vpop.f32.mrb[3].mxu1  ;;  %v688_v11 = vadd.f32 %v2430_v6, %v2086_v3 }
 0x104   : > { %v728_v12 = vadd.f32 %v2452_v7, %v688_v11 }
 0x106   : > { %733 = vst [vmem:[%s308_s7] sm:$0xff] %v728_v12 }
 0x11e   : > { %v2472_v13 = vpop.f32.mrb[4].mxu0 }
 0x11f   : > { %v2494_v14 = vpop.f32.mrb[4].mxu1  ;;  %v2473_v15 = vpop.f32.mrb[5].mxu0 }
 0x120   : > { %v2495_v16 = vpop.f32.mrb[5].mxu1  ;;  %v2474_v17 = vadd.f32 %v2473_v15, %v2472_v13  ;;  %v2475_v19 = vpop.f32.mrb[6].mxu0 }
 0x121   : > { %v2496_v18 = vadd.f32 %v2495_v16, %v2494_v14  ;;  %v2497_v20 = vpop.f32.mrb[6].mxu1  ;;  %v2476_v22 = vpop.f32.mrb[7].mxu0 }
 0x122   : > { %v2498_v23 = vpop.f32.mrb[7].mxu1  ;;  %v1064_v24 = vadd.f32 %v2474_v17, %v2086_v3 }
 0x124   : > { %v1104_v25 = vadd.f32 %v2496_v18, %v1064_v24 }
 0x126   : > { %1109 = vst [vmem:[%s316_s9] sm:$0xff] %v1104_v25 }
 0x13e   : > { %v2516_v26 = vpop.f32.mrb[8].mxu0 }
 0x13f   : > { %v2517_v27 = vpop.f32.mrb[9].mxu0 }
 0x140   : > { %v2518_v28 = vadd.f32 %v2517_v27, %v2516_v26  ;;  %v2519_v29 = vpop.f32.mrb[10].mxu0  ;;  %v2538_v30 = vpop.f32.mrb[8].mxu1 }
 0x141   : > { %v2520_v31 = vpop.f32.mrb[11].mxu0  ;;  %v2539_v33 = vpop.f32.mrb[9].mxu1 }
 0x142   : > { %v1430_v32 = vadd.f32 %v2518_v28, %v2086_v3  ;;  %v2540_v34 = vadd.f32 %v2539_v33, %v2538_v30  ;;  %v2541_v35 = vpop.f32.mrb[10].mxu1 }
 0x143   : > { %v2542_v36 = vpop.f32.mrb[11].mxu1 }
 0x144   : > { %v1470_v37 = vadd.f32 %v2540_v34, %v1430_v32 }
 0x146   : > { %1475 = vst [vmem:[%s324_s12] sm:$0xff] %v1470_v37 }
 0x15e   : > { %v2560_v38 = vpop.f32.mrb[12].mxu0 }
 0x15f   : > { %v2561_v39 = vpop.f32.mrb[13].mxu0 }
 0x160   : > { %v2562_v40 = vadd.f32 %v2561_v39, %v2560_v38  ;;  %v2563_v41 = vpop.f32.mrb[14].mxu0  ;;  %v2582_v42 = vpop.f32.mrb[12].mxu1 }
 0x161   : > { %v2564_v21 = vpop.f32.mrb[15].mxu0  ;;  %v2583_v44 = vpop.f32.mrb[13].mxu1 }
 0x162   : > { %v1790_v43 = vadd.f32 %v2562_v40, %v2086_v3  ;;  %v2584_v45 = vadd.f32 %v2583_v44, %v2582_v42  ;;  %v2585_v46 = vpop.f32.mrb[14].mxu1 }
 0x163   : > { %v2586_v47 = vpop.f32.mrb[15].mxu1 }
 0x164   : > { %v1830_v48 = vadd.f32 %v2584_v45, %v1790_v43 }
 0x166   : > { %1835 = vst [vmem:[%s332_s15] sm:$0xff] %v1830_v48 }
 0x167 PF: > { %s17_s25 = sadd.s32 1, %s2795_s25   ;;  %s3338_s21 = smov %s2787_s23 }
 0x168   : > { %p14_p7 = scmp.ge.s32.totalorder %s17_s25, 18   ;;  %s3339_s22 = smov %s2791_s24 }
 0x169   : > { %s3340_s23 = smov %s3343_s26  ;;  %s3341_s24 = smov %s3347_s27 }
 0x16a   :  { %16 = sbr.rel (!%p14_p7) target bundleno = 3 (0x3), region = 104 }

// kernel: generator_forward.18
= control target key start
LH: loop header
LB: loop body
LE: loop exit
PB: predicated region body
PF: predicated region fallthrough
CT: control target
= control target key end

     0   :  { %s896_s0 = inlined_call_operand.vmem [shape: f32[512,128], index: 0, kind: input, shape index: {}]   ;;  %s897_s1 = inlined_call_operand.vmem [shape: f32[1,128], index: 1, kind: input, shape index: {}]   ;;  %s898_s2 = inlined_call_operand.vmem [shape: f32[1,128], index: 2, kind: input, shape index: {}]   ;;  %s899_s3 = inlined_call_operand.vmem [shape: f32[512,128], index: 3, kind: output, shape index: {}]  }
   0x1   :  { %v14_v0 = vld [vmem:[%s896_s0] sm:$0xff]  ;;  %v15_v4 = vld [vmem:[%s896_s0 + $0x8] sm:$0xff]  ;;  %v16_v5 = vld [vmem:[%s896_s0 + $0x10] sm:$0xff] }
   0x2   :  { %v380_v1 = vld [vmem:[%s897_s1] ss:$0 sm:$0xff]  ;;  %v17_v6 = vld [vmem:[%s896_s0 + $0x18] sm:$0xff]  ;;  %v19_v11 = vld [vmem:[%s896_s0 + $0x28] sm:$0xff] }
   0x3   :  { %v385_v2 = vld [vmem:[%s898_s2] ss:$0 sm:$0xff]  ;;  %v85_v3 = vmul.f32 %v380_v1, %v14_v0  ;;  %v86_v7 = vmul.f32 %v380_v1, %v15_v4  ;;  %v87_v8 = vmul.f32 %v380_v1, %v16_v5  ;;  %v88_v9 = vmul.f32 %v380_v1, %v17_v6  ;;  %v20_v12 = vld [vmem:[%s896_s0 + $0x30] sm:$0xff]  ;;  %v21_v17 = vld [vmem:[%s896_s0 + $0x38] sm:$0xff] }
   0x4   :  { %v18_v10 = vld [vmem:[%s896_s0 + $0x20] sm:$0xff]  ;;  %v90_v15 = vmul.f32 %v380_v1, %v19_v11  ;;  %v91_v16 = vmul.f32 %v380_v1, %v20_v12  ;;  %v92_v21 = vmul.f32 %v380_v1, %v21_v17  ;;  %v23_v27 = vld [vmem:[%s896_s0 + $0x48] sm:$0xff]  ;;  %v24_v28 = vld [vmem:[%s896_s0 + $0x50] sm:$0xff] }
   0x5   :  { %v156_v13 = vadd.f32 %v385_v2, %v85_v3  ;;  %v89_v14 = vmul.f32 %v380_v1, %v18_v10  ;;  %v157_v18 = vadd.f32 %v385_v2, %v86_v7  ;;  %v158_v19 = vadd.f32 %v385_v2, %v87_v8  ;;  %v22_v22 = vld [vmem:[%s896_s0 + $0x40] sm:$0xff]  ;;  %v25_v29 = vld [vmem:[%s896_s0 + $0x58] sm:$0xff]  ;;  %v27_v35 = vld [vmem:[%s896_s0 + $0x68] sm:$0xff] }
   0x6   :  { %v159_v20 = vadd.f32 %v385_v2, %v88_v9  ;;  %v161_v25 = vadd.f32 %v385_v2, %v90_v15  ;;  %v162_v26 = vadd.f32 %v385_v2, %v91_v16  ;;  %v163_v33 = vadd.f32 %v385_v2, %v92_v21  ;;  %v26_v34 = vld [vmem:[%s896_s0 + $0x60] sm:$0xff]  ;;  %v28_v36 = vld [vmem:[%s896_s0 + $0x70] sm:$0xff]  ;;  %v29_v41 = vld [vmem:[%s896_s0 + $0x78] sm:$0xff] }
   0x7   :  { %v220_v23 = vmax.f32 %v156_v13, 0.0  ;;  %v160_v24 = vadd.f32 %v385_v2, %v89_v14  ;;  %v221_v30 = vmax.f32 %v157_v18, 0.0  ;;  %v222_v31 = vmax.f32 %v158_v19, 0.0  ;;  %v30_v54 = vld [vmem:[%s896_s0 + $0x80] sm:$0xff]  ;;  %v31_v59 = vld [vmem:[%s896_s0 + $0x88] sm:$0xff]  ;;  %v32_v60 = vld [vmem:[%s896_s0 + $0x90] sm:$0xff] }
   0x8   :  { %v223_v32 = vmax.f32 %v159_v20, 0.0  ;;  %v225_v38 = vmax.f32 %v161_v25, 0.0  ;;  %v226_v39 = vmax.f32 %v162_v26, 0.0  ;;  %v93_v40 = vmul.f32 %v380_v1, %v22_v22  ;;  %v33_v61 = vld [vmem:[%s896_s0 + $0x98] sm:$0xff]  ;;  %v34_v4 = vld [vmem:[%s896_s0 + $0xa0] sm:$0xff]  ;;  %v35_v5 = vld [vmem:[%s896_s0 + $0xa8] sm:$0xff] }
   0x9   :  { %284 = vst [vmem:[%s899_s3] sm:$0xff] %v220_v23  ;;  %v224_v37 = vmax.f32 %v160_v24, 0.0  ;;  %285 = vst [vmem:[%s899_s3 + $0x8] sm:$0xff] %v221_v30  ;;  %v227_v42 = vmax.f32 %v163_v33, 0.0  ;;  %v94_v43 = vmul.f32 %v380_v1, %v23_v27  ;;  %v95_v44 = vmul.f32 %v380_v1, %v24_v28  ;;  %v36_v6 = vld [vmem:[%s896_s0 + $0xb0] sm:$0xff]  ;;  %v37_v11 = vld [vmem:[%s896_s0 + $0xb8] sm:$0xff] }
   0xa   :  { %286 = vst [vmem:[%s899_s3 + $0x10] sm:$0xff] %v222_v31  ;;  %287 = vst [vmem:[%s899_s3 + $0x18] sm:$0xff] %v223_v32  ;;  %v96_v45 = vmul.f32 %v380_v1, %v25_v29  ;;  %v164_v46 = vadd.f32 %v385_v2, %v93_v40  ;;  %v97_v47 = vmul.f32 %v380_v1, %v26_v34  ;;  %v38_v24 = vld [vmem:[%s896_s0 + $0xc0] sm:$0xff]  ;;  %v39_v29 = vld [vmem:[%s896_s0 + $0xc8] sm:$0xff] }
   0xb   :  { %288 = vst [vmem:[%s899_s3 + $0x20] sm:$0xff] %v224_v37  ;;  %289 = vst [vmem:[%s899_s3 + $0x28] sm:$0xff] %v225_v38  ;;  %v98_v48 = vmul.f32 %v380_v1, %v27_v35  ;;  %v99_v49 = vmul.f32 %v380_v1, %v28_v36  ;;  %v165_v50 = vadd.f32 %v385_v2, %v94_v43  ;;  %v40_v30 = vld [vmem:[%s896_s0 + $0xd0] sm:$0xff]  ;;  %v41_v31 = vld [vmem:[%s896_s0 + $0xd8] sm:$0xff] }
   0xc   :  { %290 = vst [vmem:[%s899_s3 + $0x30] sm:$0xff] %v226_v39  ;;  %291 = vst [vmem:[%s899_s3 + $0x38] sm:$0xff] %v227_v42  ;;  %v166_v51 = vadd.f32 %v385_v2, %v95_v44  ;;  %v167_v52 = vadd.f32 %v385_v2, %v96_v45  ;;  %v100_v53 = vmul.f32 %v380_v1, %v29_v41  ;;  %v228_v55 = vmax.f32 %v164_v46, 0.0  ;;  %v42_v36 = vld [vmem:[%s896_s0 + $0xe0] sm:$0xff]  ;;  %v43_v37 = vld [vmem:[%s896_s0 + $0xe8] sm:$0xff] }
   0xd   :  { %v168_v56 = vadd.f32 %v385_v2, %v97_v47  ;;  %v169_v57 = vadd.f32 %v385_v2, %v98_v48  ;;  %v170_v58 = vadd.f32 %v385_v2, %v99_v49  ;;  %v229_v62 = vmax.f32 %v165_v50, 0.0  ;;  %v44_v38 = vld [vmem:[%s896_s0 + $0xf0] sm:$0xff]  ;;  %v45_v43 = vld [vmem:[%s896_s0 + $0xf8] sm:$0xff] }
   0xe   :  { %v230_v63 = vmax.f32 %v166_v51, 0.0  ;;  %v231_v0 = vmax.f32 %v167_v52, 0.0  ;;  %v171_v3 = vadd.f32 %v385_v2, %v100_v53  ;;  %292 = vst [vmem:[%s899_s3 + $0x40] sm:$0xff] %v228_v55  ;;  %v101_v10 = vmul.f32 %v380_v1, %v30_v54 }
   0xf   :  { %v232_v7 = vmax.f32 %v168_v56, 0.0  ;;  %v233_v8 = vmax.f32 %v169_v57, 0.0  ;;  %v234_v9 = vmax.f32 %v170_v58, 0.0  ;;  %293 = vst [vmem:[%s899_s3 + $0x48] sm:$0xff] %v229_v62  ;;  %v102_v13 = vmul.f32 %v380_v1, %v31_v59  ;;  %v46_v56 = vld [vmem:[%s896_s0 + $0x100] sm:$0xff]  ;;  %v48_v62 = vld [vmem:[%s896_s0 + $0x110] sm:$0xff] }
  0x10   :  { %294 = vst [vmem:[%s899_s3 + $0x50] sm:$0xff] %v230_v63  ;;  %295 = vst [vmem:[%s899_s3 + $0x58] sm:$0xff] %v231_v0  ;;  %v235_v12 = vmax.f32 %v171_v3, 0.0  ;;  %v103_v14 = vmul.f32 %v380_v1, %v32_v60  ;;  %v104_v15 = vmul.f32 %v380_v1, %v33_v61  ;;  %v172_v16 = vadd.f32 %v385_v2, %v101_v10  ;;  %v47_v61 = vld [vmem:[%s896_s0 + $0x108] sm:$0xff]  ;;  %v49_v63 = vld [vmem:[%s896_s0 + $0x118] sm:$0xff] }
  0x11   :  { %296 = vst [vmem:[%s899_s3 + $0x60] sm:$0xff] %v232_v7  ;;  %297 = vst [vmem:[%s899_s3 + $0x68] sm:$0xff] %v233_v8  ;;  %v105_v17 = vmul.f32 %v380_v1, %v34_v4  ;;  %v106_v18 = vmul.f32 %v380_v1, %v35_v5  ;;  %v107_v19 = vmul.f32 %v380_v1, %v36_v6  ;;  %v50_v6 = vld [vmem:[%s896_s0 + $0x120] sm:$0xff]  ;;  %v51_v7 = vld [vmem:[%s896_s0 + $0x128] sm:$0xff] }
  0x12   :  { %298 = vst [vmem:[%s899_s3 + $0x70] sm:$0xff] %v234_v9  ;;  %299 = vst [vmem:[%s899_s3 + $0x78] sm:$0xff] %v235_v12  ;;  %v173_v20 = vadd.f32 %v385_v2, %v102_v13  ;;  %v174_v21 = vadd.f32 %v385_v2, %v103_v14  ;;  %v175_v22 = vadd.f32 %v385_v2, %v104_v15  ;;  %v236_v25 = vmax.f32 %v172_v16, 0.0  ;;  %v52_v8 = vld [vmem:[%s896_s0 + $0x130] sm:$0xff]  ;;  %v53_v13 = vld [vmem:[%s896_s0 + $0x138] sm:$0xff] }
  0x13   :  { %v108_v23 = vmul.f32 %v380_v1, %v37_v11  ;;  %v176_v26 = vadd.f32 %v385_v2, %v105_v17  ;;  %v177_v27 = vadd.f32 %v385_v2, %v106_v18  ;;  %v178_v28 = vadd.f32 %v385_v2, %v107_v19 }
  0x14   :  { %v237_v32 = vmax.f32 %v173_v20, 0.0  ;;  %v238_v33 = vmax.f32 %v174_v21, 0.0  ;;  %v239_v34 = vmax.f32 %v175_v22, 0.0  ;;  %300 = vst [vmem:[%s899_s3 + $0x80] sm:$0xff] %v236_v25  ;;  %v109_v42 = vmul.f32 %v380_v1, %v38_v24 }
  0x15   :  { %v179_v35 = vadd.f32 %v385_v2, %v108_v23  ;;  %v240_v39 = vmax.f32 %v176_v26, 0.0  ;;  %v241_v40 = vmax.f32 %v177_v27, 0.0  ;;  %v242_v41 = vmax.f32 %v178_v28, 0.0  ;;  %v54_v26 = vld [vmem:[%s896_s0 + $0x140] sm:$0xff] }
  0x16   :  { %301 = vst [vmem:[%s899_s3 + $0x88] sm:$0xff] %v237_v32  ;;  %302 = vst [vmem:[%s899_s3 + $0x90] sm:$0xff] %v238_v33  ;;  %v110_v45 = vmul.f32 %v380_v1, %v39_v29  ;;  %v111_v46 = vmul.f32 %v380_v1, %v40_v30  ;;  %v112_v47 = vmul.f32 %v380_v1, %v41_v31  ;;  %v55_v31 = vld [vmem:[%s896_s0 + $0x148] sm:$0xff]  ;;  %v56_v32 = vld [vmem:[%s896_s0 + $0x150] sm:$0xff] }
  0x17   :  { %303 = vst [vmem:[%s899_s3 + $0x98] sm:$0xff] %v239_v34  ;;  %v243_v44 = vmax.f32 %v179_v35, 0.0  ;;  %304 = vst [vmem:[%s899_s3 + $0xa0] sm:$0xff] %v240_v39  ;;  %v180_v48 = vadd.f32 %v385_v2, %v109_v42  ;;  %v113_v49 = vmul.f32 %v380_v1, %v42_v36  ;;  %v114_v50 = vmul.f32 %v380_v1, %v43_v37  ;;  %v57_v33 = vld [vmem:[%s896_s0 + $0x158] sm:$0xff]  ;;  %v59_v39 = vld [vmem:[%s896_s0 + $0x168] sm:$0xff] }
  0x18   :  { %305 = vst [vmem:[%s899_s3 + $0xa8] sm:$0xff] %v241_v40  ;;  %306 = vst [vmem:[%s899_s3 + $0xb0] sm:$0xff] %v242_v41  ;;  %v115_v51 = vmul.f32 %v380_v1, %v44_v38  ;;  %v181_v52 = vadd.f32 %v385_v2, %v110_v45  ;;  %v182_v53 = vadd.f32 %v385_v2, %v111_v46  ;;  %v58_v38 = vld [vmem:[%s896_s0 + $0x160] sm:$0xff]  ;;  %v60_v40 = vld [vmem:[%s896_s0 + $0x170] sm:$0xff] }
  0x19   :  { %307 = vst [vmem:[%s899_s3 + $0xb8] sm:$0xff] %v243_v44  ;;  %v183_v54 = vadd.f32 %v385_v2, %v112_v47  ;;  %v116_v55 = vmul.f32 %v380_v1, %v45_v43  ;;  %v244_v57 = vmax.f32 %v180_v48, 0.0  ;;  %v184_v58 = vadd.f32 %v385_v2, %v113_v49  ;;  %v61_v45 = vld [vmem:[%s896_s0 + $0x178] sm:$0xff] }
  0x1a   :  { %v185_v59 = vadd.f32 %v385_v2, %v114_v50  ;;  %v186_v60 = vadd.f32 %v385_v2, %v115_v51  ;;  %v245_v0 = vmax.f32 %v181_v52, 0.0  ;;  %v246_v3 = vmax.f32 %v182_v53, 0.0 }
  0x1b   :  { %v247_v4 = vmax.f32 %v183_v54, 0.0  ;;  %v187_v5 = vadd.f32 %v385_v2, %v116_v55  ;;  %308 = vst [vmem:[%s899_s3 + $0xc0] sm:$0xff] %v244_v57  ;;  %v248_v9 = vmax.f32 %v184_v58, 0.0  ;;  %v117_v12 = vmul.f32 %v380_v1, %v46_v56  ;;  %v62_v58 = vld [vmem:[%s896_s0 + $0x180] sm:$0xff] }
  0x1c   :  { %v249_v10 = vmax.f32 %v185_v59, 0.0  ;;  %v250_v11 = vmax.f32 %v186_v60, 0.0  ;;  %309 = vst [vmem:[%s899_s3 + $0xc8] sm:$0xff] %v245_v0  ;;  %310 = vst [vmem:[%s899_s3 + $0xd0] sm:$0xff] %v246_v3  ;;  %v118_v15 = vmul.f32 %v380_v1, %v47_v61  ;;  %v119_v16 = vmul.f32 %v380_v1, %v48_v62  ;;  %v64_v0 = vld [vmem:[%s896_s0 + $0x190] sm:$0xff]  ;;  %v65_v3 = vld [vmem:[%s896_s0 + $0x198] sm:$0xff] }
  0x1d   :  { %311 = vst [vmem:[%s899_s3 + $0xd8] sm:$0xff] %v247_v4  ;;  %v251_v14 = vmax.f32 %v187_v5, 0.0  ;;  %v120_v17 = vmul.f32 %v380_v1, %v49_v63  ;;  %312 = vst [vmem:[%s899_s3 + $0xe0] sm:$0xff] %v248_v9  ;;  %v188_v18 = vadd.f32 %v385_v2, %v117_v12  ;;  %v121_v19 = vmul.f32 %v380_v1, %v50_v6  ;;  %v63_v63 = vld [vmem:[%s896_s0 + $0x188] sm:$0xff] }
  0x1e   :  { %313 = vst [vmem:[%s899_s3 + $0xe8] sm:$0xff] %v249_v10  ;;  %314 = vst [vmem:[%s899_s3 + $0xf0] sm:$0xff] %v250_v11  ;;  %v122_v20 = vmul.f32 %v380_v1, %v51_v7  ;;  %v123_v21 = vmul.f32 %v380_v1, %v52_v8  ;;  %v189_v22 = vadd.f32 %v385_v2, %v118_v15  ;;  %v66_v8 = vld [vmem:[%s896_s0 + $0x1a0] sm:$0xff]  ;;  %v67_v9 = vld [vmem:[%s896_s0 + $0x1a8] sm:$0xff] }
  0x1f   :  { %315 = vst [vmem:[%s899_s3 + $0xf8] sm:$0xff] %v251_v14  ;;  %v190_v23 = vadd.f32 %v385_v2, %v119_v16  ;;  %v191_v24 = vadd.f32 %v385_v2, %v120_v17  ;;  %v124_v25 = vmul.f32 %v380_v1, %v53_v13  ;;  %v252_v27 = vmax.f32 %v188_v18, 0.0  ;;  %v68_v10 = vld [vmem:[%s896_s0 + $0x1b0] sm:$0xff]  ;;  %v69_v15 = vld [vmem:[%s896_s0 + $0x1b8] sm:$0xff] }
  0x20   :  { %v192_v28 = vadd.f32 %v385_v2, %v121_v19  ;;  %v193_v29 = vadd.f32 %v385_v2, %v122_v20  ;;  %v194_v30 = vadd.f32 %v385_v2, %v123_v21  ;;  %v253_v34 = vmax.f32 %v189_v22, 0.0 }
  0x21   :  { %v254_v35 = vmax.f32 %v190_v23, 0.0  ;;  %v255_v36 = vmax.f32 %v191_v24, 0.0  ;;  %v195_v37 = vadd.f32 %v385_v2, %v124_v25  ;;  %316 = vst [vmem:[%s899_s3 + $0x100] sm:$0xff] %v252_v27  ;;  %v125_v44 = vmul.f32 %v380_v1, %v54_v26 }
  0x22   :  { %v256_v41 = vmax.f32 %v192_v28, 0.0  ;;  %v257_v42 = vmax.f32 %v193_v29, 0.0  ;;  %v258_v43 = vmax.f32 %v194_v30, 0.0  ;;  %317 = vst [vmem:[%s899_s3 + $0x108] sm:$0xff] %v253_v34  ;;  %v126_v47 = vmul.f32 %v380_v1, %v55_v31  ;;  %v70_v28 = vld [vmem:[%s896_s0 + $0x1c0] sm:$0xff]  ;;  %v72_v34 = vld [vmem:[%s896_s0 + $0x1d0] sm:$0xff] }
  0x23   :  { %318 = vst [vmem:[%s899_s3 + $0x110] sm:$0xff] %v254_v35  ;;  %319 = vst [vmem:[%s899_s3 + $0x118] sm:$0xff] %v255_v36  ;;  %v259_v46 = vmax.f32 %v195_v37, 0.0  ;;  %v127_v48 = vmul.f32 %v380_v1, %v56_v32  ;;  %v128_v49 = vmul.f32 %v380_v1, %v57_v33  ;;  %v196_v50 = vadd.f32 %v385_v2, %v125_v44  ;;  %v71_v33 = vld [vmem:[%s896_s0 + $0x1c8] sm:$0xff]  ;;  %v73_v35 = vld [vmem:[%s896_s0 + $0x1d8] sm:$0xff] }
  0x24   :  { %320 = vst [vmem:[%s899_s3 + $0x120] sm:$0xff] %v256_v41  ;;  %321 = vst [vmem:[%s899_s3 + $0x128] sm:$0xff] %v257_v42  ;;  %v129_v51 = vmul.f32 %v380_v1, %v58_v38  ;;  %v130_v52 = vmul.f32 %v380_v1, %v59_v39  ;;  %v131_v53 = vmul.f32 %v380_v1, %v60_v40  ;;  %v74_v40 = vld [vmem:[%s896_s0 + $0x1e0] sm:$0xff]  ;;  %v75_v41 = vld [vmem:[%s896_s0 + $0x1e8] sm:$0xff] }
  0x25   :  { %322 = vst [vmem:[%s899_s3 + $0x130] sm:$0xff] %v258_v43  ;;  %323 = vst [vmem:[%s899_s3 + $0x138] sm:$0xff] %v259_v46  ;;  %v197_v54 = vadd.f32 %v385_v2, %v126_v47  ;;  %v198_v55 = vadd.f32 %v385_v2, %v127_v48  ;;  %v199_v56 = vadd.f32 %v385_v2, %v128_v49  ;;  %v260_v59 = vmax.f32 %v196_v50, 0.0  ;;  %v76_v42 = vld [vmem:[%s896_s0 + $0x1f0] sm:$0xff]  ;;  %v77_v47 = vld [vmem:[%s896_s0 + $0x1f8] sm:$0xff] }
  0x26   :  { %v132_v57 = vmul.f32 %v380_v1, %v61_v45  ;;  %v200_v60 = vadd.f32 %v385_v2, %v129_v51  ;;  %v201_v61 = vadd.f32 %v385_v2, %v130_v52  ;;  %v202_v62 = vadd.f32 %v385_v2, %v131_v53 }
  0x27   :  { %v261_v4 = vmax.f32 %v197_v54, 0.0  ;;  %v262_v5 = vmax.f32 %v198_v55, 0.0  ;;  %v263_v6 = vmax.f32 %v199_v56, 0.0  ;;  %324 = vst [vmem:[%s899_s3 + $0x140] sm:$0xff] %v260_v59  ;;  %v133_v14 = vmul.f32 %v380_v1, %v62_v58 }
  0x28   :  { %v203_v7 = vadd.f32 %v385_v2, %v132_v57  ;;  %v264_v11 = vmax.f32 %v200_v60, 0.0  ;;  %v265_v12 = vmax.f32 %v201_v61, 0.0  ;;  %v266_v13 = vmax.f32 %v202_v62, 0.0 }
  0x29   :  { %325 = vst [vmem:[%s899_s3 + $0x148] sm:$0xff] %v261_v4  ;;  %326 = vst [vmem:[%s899_s3 + $0x150] sm:$0xff] %v262_v5  ;;  %v134_v17 = vmul.f32 %v380_v1, %v63_v63  ;;  %v135_v18 = vmul.f32 %v380_v1, %v64_v0  ;;  %v136_v19 = vmul.f32 %v380_v1, %v65_v3 }
  0x2a   :  { %327 = vst [vmem:[%s899_s3 + $0x158] sm:$0xff] %v263_v6  ;;  %v267_v16 = vmax.f32 %v203_v7, 0.0  ;;  %328 = vst [vmem:[%s899_s3 + $0x160] sm:$0xff] %v264_v11  ;;  %v204_v20 = vadd.f32 %v385_v2, %v133_v14  ;;  %v137_v21 = vmul.f32 %v380_v1, %v66_v8  ;;  %v138_v22 = vmul.f32 %v380_v1, %v67_v9 }
  0x2b   :  { %329 = vst [vmem:[%s899_s3 + $0x168] sm:$0xff] %v265_v12  ;;  %330 = vst [vmem:[%s899_s3 + $0x170] sm:$0xff] %v266_v13  ;;  %v139_v23 = vmul.f32 %v380_v1, %v68_v10  ;;  %v205_v24 = vadd.f32 %v385_v2, %v134_v17  ;;  %v206_v25 = vadd.f32 %v385_v2, %v135_v18 }
  0x2c   :  { %331 = vst [vmem:[%s899_s3 + $0x178] sm:$0xff] %v267_v16  ;;  %v207_v26 = vadd.f32 %v385_v2, %v136_v19  ;;  %v140_v27 = vmul.f32 %v380_v1, %v69_v15  ;;  %v268_v29 = vmax.f32 %v204_v20, 0.0  ;;  %v208_v30 = vadd.f32 %v385_v2, %v137_v21 }
  0x2d   :  { %v209_v31 = vadd.f32 %v385_v2, %v138_v22  ;;  %v210_v32 = vadd.f32 %v385_v2, %v139_v23  ;;  %v269_v36 = vmax.f32 %v205_v24, 0.0  ;;  %v270_v37 = vmax.f32 %v206_v25, 0.0 }
  0x2e   :  { %v271_v38 = vmax.f32 %v207_v26, 0.0  ;;  %v211_v39 = vadd.f32 %v385_v2, %v140_v27  ;;  %332 = vst [vmem:[%s899_s3 + $0x180] sm:$0xff] %v268_v29  ;;  %v272_v43 = vmax.f32 %v208_v30, 0.0  ;;  %v141_v46 = vmul.f32 %v380_v1, %v70_v28 }
  0x2f   :  { %v273_v44 = vmax.f32 %v209_v31, 0.0  ;;  %v274_v45 = vmax.f32 %v210_v32, 0.0  ;;  %333 = vst [vmem:[%s899_s3 + $0x188] sm:$0xff] %v269_v36  ;;  %334 = vst [vmem:[%s899_s3 + $0x190] sm:$0xff] %v270_v37  ;;  %v142_v49 = vmul.f32 %v380_v1, %v71_v33  ;;  %v143_v50 = vmul.f32 %v380_v1, %v72_v34 }
  0x30   :  { %335 = vst [vmem:[%s899_s3 + $0x198] sm:$0xff] %v271_v38  ;;  %v275_v48 = vmax.f32 %v211_v39, 0.0  ;;  %v144_v51 = vmul.f32 %v380_v1, %v73_v35  ;;  %336 = vst [vmem:[%s899_s3 + $0x1a0] sm:$0xff] %v272_v43  ;;  %v212_v52 = vadd.f32 %v385_v2, %v141_v46  ;;  %v145_v53 = vmul.f32 %v380_v1, %v74_v40 }
  0x31   :  { %337 = vst [vmem:[%s899_s3 + $0x1a8] sm:$0xff] %v273_v44  ;;  %338 = vst [vmem:[%s899_s3 + $0x1b0] sm:$0xff] %v274_v45  ;;  %v146_v54 = vmul.f32 %v380_v1, %v75_v41  ;;  %v147_v55 = vmul.f32 %v380_v1, %v76_v42  ;;  %v213_v56 = vadd.f32 %v385_v2, %v142_v49 }
  0x32   :  { %339 = vst [vmem:[%s899_s3 + $0x1b8] sm:$0xff] %v275_v48  ;;  %v214_v57 = vadd.f32 %v385_v2, %v143_v50  ;;  %v215_v58 = vadd.f32 %v385_v2, %v144_v51  ;;  %v148_v59 = vmul.f32 %v380_v1, %v77_v47  ;;  %v276_v60 = vmax.f32 %v212_v52, 0.0 }
  0x33   :  { %v216_v61 = vadd.f32 %v385_v2, %v145_v53  ;;  %v217_v62 = vadd.f32 %v385_v2, %v146_v54  ;;  %v218_v63 = vadd.f32 %v385_v2, %v147_v55  ;;  %v277_v0 = vmax.f32 %v213_v56, 0.0 }
  0x34   :  { %v278_v3 = vmax.f32 %v214_v57, 0.0  ;;  %v279_v4 = vmax.f32 %v215_v58, 0.0  ;;  %v219_v5 = vadd.f32 %v385_v2, %v148_v59  ;;  %340 = vst [vmem:[%s899_s3 + $0x1c0] sm:$0xff] %v276_v60 }
  0x35   :  { %v280_v6 = vmax.f32 %v216_v61, 0.0  ;;  %v281_v7 = vmax.f32 %v217_v62, 0.0  ;;  %v282_v8 = vmax.f32 %v218_v63, 0.0  ;;  %341 = vst [vmem:[%s899_s3 + $0x1c8] sm:$0xff] %v277_v0 }
  0x36   :  { %342 = vst [vmem:[%s899_s3 + $0x1d0] sm:$0xff] %v278_v3  ;;  %343 = vst [vmem:[%s899_s3 + $0x1d8] sm:$0xff] %v279_v4  ;;  %v283_v1 = vmax.f32 %v219_v5, 0.0 }
  0x37   :  { %344 = vst [vmem:[%s899_s3 + $0x1e0] sm:$0xff] %v280_v6  ;;  %345 = vst [vmem:[%s899_s3 + $0x1e8] sm:$0xff] %v281_v7 }
  0x38   :  { %346 = vst [vmem:[%s899_s3 + $0x1f0] sm:$0xff] %v282_v8  ;;  %347 = vst [vmem:[%s899_s3 + $0x1f8] sm:$0xff] %v283_v1 }

// kernel: generator_forward.17
= control target key start
LH: loop header
LB: loop body
LE: loop exit
PB: predicated region body
PF: predicated region fallthrough
CT: control target
= control target key end

     0   :  { %s1703_s18 = smov 0   ;;  %s1705_s19 = smov 0   ;;  %s2035_s0 = inlined_call_operand.vmem [shape: f32[2,18,18,128], index: 0, kind: input, shape index: {}]   ;;  %s2036_s1 = inlined_call_operand.vmem [shape: bf16[1152,128], index: 1, kind: input, shape index: {}]   ;;  %s2037_s2 = inlined_call_operand.vmem [shape: f32[1,128], index: 2, kind: input, shape index: {}]   ;;  %s2038_s3 = inlined_call_operand.vmem [shape: f32[2,16,16,128], index: 3, kind: output, shape index: {0}]   ;;  %s2039_s4 = inlined_call_operand.vmem [shape: f32[2,1,128], index: 4, kind: output, shape index: {1}]   ;;  %s2040_s5 = inlined_call_operand.vmem [shape: f32[2,1,128], index: 5, kind: output, shape index: {2}]  }
   0x1   :  { %s1707_s20 = smov 0   ;;  %s1709_s21 = smov 0  }
   0x2   :  { %s1711_s22 = smov 0  }
   0x3 LB: > { %s25_s23 = sadd.s32 1, %s1660_s20  ;;  %s28_s24 = sadd.s32 1, %s1664_s21  ;;  %s1668_s22 = sphi %s1711_s22, %s16_s22   ;;  %s1664_s21 = sphi %s1709_s21, %s2044_s21   ;;  %s1660_s20 = sphi %s1707_s20, %s2043_s20   ;;  %s1656_s19 = sphi %s1705_s19, %s2042_s19   ;;  %s1652_s18 = sphi %s1703_s18, %s2041_s18  }
   0x4   : > { %p26_p0 = scmp.ge.s32.totalorder %s25_s23, 16  ;;  %p1310_p1 = scmp.ge.s32.totalorder %s1668_s22, 1 }
   0x5   : > { %p206_p2 = scmp.lt.s32.totalorder %s1668_s22, 33 }
   0x6   : > { %s2046_s23 = smov (%p26_p0, %s25_s23), 0  ;;  %s2048_s24 = smov (!%p26_p0, %s28_s24), %s1664_s21 }
   0x7   : > { %p207_p3 = pnand %p1310_p1, %p206_p2  ;;  %p30_p4 = scmp.ge.s32.totalorder %s2048_s24, 2 }
   0x8   : > { %p244_p5 = scmp.lt.s32.totalorder (!%p207_p3), %s1656_s19, 1  ;;  %p251_p6 = scmp.lt.s32.totalorder (!%p207_p3), %s1652_s18, 15 }
   0x9   : > { %s2050_s24 = smov (%p30_p4, %s2048_s24), 0  ;;  %210 = sbr.rel (%p207_p3) target bundleno = 355 (0x163), region = 32 }
   0xa   : > { %p1315_p7 = scmp.ne.s32.totalorder (!%p207_p3), %s1652_s18, 0 }
  0x10   : > { %s2052_s19 = smov (!%p244_p5, %s1656_s19), 1  ;;  %268 = sbr.rel (%p1315_p7) target bundleno = 23 (0x17), region = 36 }
  0x11   : > { %s252_s25 = scalar_select %p251_p6, %s1652_s18, 15 }
  0x12   : > { %s1514_s26 = smul.u32 432, %s2052_s19  ;;  %s1313_s27 = sshll.u32 %s2052_s19, 5  ;;  %v1670_v0 = vmov (!%p1315_p7), 0.0  }
  0x13   : > { %s1312_s28 = sshll.u32 %s252_s25, 1  ;;  %s1740_s6 = scalar_lea.vmem %s2039_s4, %s2052_s19 }
  0x14   : > { %s1745_s9 = scalar_lea.vmem %s2035_s0, %s1514_s26  ;;  %s255_s10 = sadd.s32 %s1313_s27, %s1312_s28  ;;  %269 = vst [vmem:[%s1740_s6] sm:$0x1] (!%p1315_p7), %v1670_v0 }
  0x15   : > { %s1314_s11 = sshll.u32 %s255_s10, 3  ;;  %s1750_s14 = scalar_lea.vmem %s2040_s5, %s2052_s19 }
  0x16   : > { %s1755_s17 = scalar_lea.vmem %s2038_s3, %s1314_s11  ;;  %270 = vst [vmem:[%s1750_s14] sm:$0x1] (!%p1315_p7), %v1670_v0 }
  0x17 PF: > { %v1558_v1 = vld [vmem:[%s2036_s1 + $0x40] sm:$0xff]   ;;  %v1562_v5 = vld [vmem:[%s2036_s1 + $0x48] sm:$0xff]   ;;  %v1566_v9 = vld [vmem:[%s2036_s1 + $0x50] sm:$0xff]   ;;  %s271_s29 = smul.u32 24, %s1652_s18  ;;  %vm291_vm0 = vcmask 1046528   ;;  %vm299_vm1 = vcmask 1045504  }
  0x18   : > { %v1559_v2 = vld [vmem:[%s2036_s1] sm:$0xff]   ;;  %1397 = vmatprep.subr.bf16.mxu0 %v1558_v1  ;;  %v1563_v6 = vld [vmem:[%s2036_s1 + $0x8] sm:$0xff]   ;;  %v1567_v10 = vld [vmem:[%s2036_s1 + $0x10] sm:$0xff]   ;;  %vm1672_vm2 = vmmov 0  }
  0x19   : > { %v1560_v3 = vld [vmem:[%s2036_s1 + $0xc0] sm:$0xff]   ;;  %1398 = vmatpush3.bf16.msra.mxu0 %v1559_v2  ;;  %v1564_v7 = vld [vmem:[%s2036_s1 + $0xc8] sm:$0xff]   ;;  %v1568_v11 = vld [vmem:[%s2036_s1 + $0xd0] sm:$0xff]   ;;  %s1849_s18 = scalar_lea.vmem %s1745_s9, %s271_s29 }
  0x1a   : > { %v1561_v4 = vld [vmem:[%s2036_s1 + $0x80] sm:$0xff]   ;;  %1419 = vmatprep.subr.bf16.mxu1 %v1560_v3  ;;  %1399 = vmatprep.subr.bf16.mxu0 %v1562_v5  ;;  %v1565_v8 = vld [vmem:[%s2036_s1 + $0x88] sm:$0xff]   ;;  %v1569_v12 = vld [vmem:[%s2036_s1 + $0x90] sm:$0xff]  }
  0x1b   : > { %1420 = vmatpush3.bf16.msra.mxu1 %v1561_v4  ;;  %v1570_v13 = vld [vmem:[%s2036_s1 + $0x58] sm:$0xff]   ;;  %v1574_v17 = vld [vmem:[%s2036_s1 + $0x60] sm:$0xff]   ;;  %v1578_v21 = vld [vmem:[%s2036_s1 + $0x68] sm:$0xff]  }
  0x1c   : > { %1421 = vmatprep.subr.bf16.mxu1 %v1564_v7  ;;  %v1571_v14 = vld [vmem:[%s2036_s1 + $0x18] sm:$0xff]   ;;  %v1575_v18 = vld [vmem:[%s2036_s1 + $0x20] sm:$0xff]   ;;  %v1579_v22 = vld [vmem:[%s2036_s1 + $0x28] sm:$0xff]  }
  0x1d   : > { %1400 = vmatpush3.bf16.msra.mxu0 %v1563_v6  ;;  %v1572_v15 = vld [vmem:[%s2036_s1 + $0xd8] sm:$0xff]   ;;  %v1576_v19 = vld [vmem:[%s2036_s1 + $0xe0] sm:$0xff]   ;;  %v1580_v23 = vld [vmem:[%s2036_s1 + $0xe8] sm:$0xff]  }
  0x1e   : > { %1401 = vmatprep.subr.bf16.mxu0 %v1566_v9  ;;  %v1573_v16 = vld [vmem:[%s2036_s1 + $0x98] sm:$0xff]   ;;  %v1577_v20 = vld [vmem:[%s2036_s1 + $0xa0] sm:$0xff]   ;;  %v1581_v24 = vld [vmem:[%s2036_s1 + $0xa8] sm:$0xff]  }
  0x1f   : > { %1422 = vmatpush3.bf16.msra.mxu1 %v1565_v8  ;;  %v1582_v25 = vld [vmem:[%s2036_s1 + $0x70] sm:$0xff]   ;;  %v1586_v29 = vld [vmem:[%s2036_s1 + $0x78] sm:$0xff]   ;;  %v273_v32 = vld [vmem:[%s1849_s18] sm:$0xff] }
  0x20   : > { %1423 = vmatprep.subr.bf16.mxu1 %v1568_v11  ;;  %v1583_v26 = vld [vmem:[%s2036_s1 + $0x30] sm:$0xff]   ;;  %v1587_v30 = vld [vmem:[%s2036_s1 + $0x38] sm:$0xff]   ;;  %v274_v33 = vld [vmem:[%s1849_s18 + $0x8] sm:$0xff]  ;;  %v292_v35 = vrot.slane %v273_v32, 1  ;;  %v300_v40 = vrot.slane %v273_v32, 2 }
  0x21   : > { %1402 = vmatpush3.bf16.msra.mxu0 %v1567_v10  ;;  %v1584_v27 = vld [vmem:[%s2036_s1 + $0xf0] sm:$0xff]   ;;  %v1588_v31 = vld [vmem:[%s2036_s1 + $0xf8] sm:$0xff]   ;;  %v293_v36 = vrot.slane %v274_v33, 1  ;;  %v341_v43 = vpack.c.bf16 %v274_v33, %v273_v32  ;;  %v1590_v44 = vld [vmem:[%s2036_s1 + $0x140] sm:$0xff]   ;;  %v301_v46 = vrot.slane %v274_v33, 2  ;;  %v1671_v33 = vmov 0.0  }
  0x22   : > { %1403 = vmatprep.subr.bf16.mxu0 %v1570_v13  ;;  %v1585_v28 = vld [vmem:[%s2036_s1 + $0xb0] sm:$0xff]   ;;  %v1589_v39 = vld [vmem:[%s2036_s1 + $0xb8] sm:$0xff]   ;;  %v1872_v48 = vld [vmem:[%s1849_s18 + $0x20] sm:$0xff] }
  0x23   : > { %1424 = vmatpush3.bf16.msra.mxu1 %v1569_v12  ;;  %v275_v34 = vld [vmem:[%s1849_s18 + $0x10] sm:$0x3]  ;;  %v294_v41 = vsel %vm291_vm0, %v292_v35, %v293_v36  ;;  %v1869_v45 = vld [vmem:[%s1849_s18 + $0x18] sm:$0xff]  ;;  %v1591_v49 = vld [vmem:[%s2036_s1 + $0x100] sm:$0xff]   ;;  %v302_v51 = vsel %vm299_vm1, %v300_v40, %v301_v46 }
  0x24   : > { %1425 = vmatprep.subr.bf16.mxu1 %v1572_v15  ;;  %v295_v37 = vrot.slane %v275_v34, 1  ;;  %v303_v38 = vrot.slane %v275_v34, 2  ;;  %v344_v50 = vpack.c.bf16 %v1872_v48, %v1869_v45  ;;  %v1592_v53 = vld [vmem:[%s2036_s1 + $0x1c0] sm:$0xff]   ;;  %v1594_v56 = vld [vmem:[%s2036_s1 + $0x148] sm:$0xff]   ;;  %v1598_v60 = vld [vmem:[%s2036_s1 + $0x150] sm:$0xff]   ;;  %v310_v12 = vrot.slane %v1869_v45, 1 }
  0x25   : > { %1404 = vmatpush3.bf16.msra.mxu0 %v1571_v14  ;;  %v1593_v55 = vld [vmem:[%s2036_s1 + $0x180] sm:$0xff]   ;;  %v1595_v57 = vld [vmem:[%s2036_s1 + $0x108] sm:$0xff]   ;;  %v1599_v61 = vld [vmem:[%s2036_s1 + $0x110] sm:$0xff]   ;;  %v317_v14 = vrot.slane %v1869_v45, 2 }
  0x26   : > { %1405 = vmatprep.subr.bf16.mxu0 %v1574_v17  ;;  %v296_v42 = vsel %vm291_vm0, %v293_v36, %v295_v37  ;;  %v304_v52 = vsel %vm299_vm1, %v301_v46, %v303_v38  ;;  %1006 = vmatprep.mubr.bf16.mxu1 %v344_v50  ;;  %v1596_v58 = vld [vmem:[%s2036_s1 + $0x1c8] sm:$0xff]   ;;  %v1600_v62 = vld [vmem:[%s2036_s1 + $0x1d0] sm:$0xff]   ;;  %v1602_v0 = vld [vmem:[%s2036_s1 + $0x158] sm:$0xff]  }
  0x27   : > { %1426 = vmatpush3.bf16.msra.mxu1 %v1573_v16  ;;  %v342_v47 = vpack.c.bf16 %v296_v42, %v294_v41  ;;  %v343_v54 = vpack.c.bf16 %v304_v52, %v302_v51  ;;  %v1597_v59 = vld [vmem:[%s2036_s1 + $0x188] sm:$0xff]   ;;  %v1601_v63 = vld [vmem:[%s2036_s1 + $0x190] sm:$0xff]   ;;  %v1603_v1 = vld [vmem:[%s2036_s1 + $0x118] sm:$0xff]   ;;  %v311_v16 = vrot.slane %v1872_v48, 1 }
  0x28   : > { %1427 = vmatprep.subr.bf16.mxu1 %v1576_v19  ;;  %v1604_v2 = vld [vmem:[%s2036_s1 + $0x1d8] sm:$0xff]   ;;  %v1606_v4 = vld [vmem:[%s2036_s1 + $0x160] sm:$0xff]   ;;  %v1610_v8 = vld [vmem:[%s2036_s1 + $0x168] sm:$0xff]  }
  0x29   : > { %1406 = vmatpush3.bf16.msra.mxu0 %v1575_v18  ;;  %965 = vmatprep.mubr.bf16.mxu0 %v342_v47  ;;  %v1605_v3 = vld [vmem:[%s2036_s1 + $0x198] sm:$0xff]   ;;  %v1607_v5 = vld [vmem:[%s2036_s1 + $0x120] sm:$0xff]   ;;  %v1611_v9 = vld [vmem:[%s2036_s1 + $0x128] sm:$0xff]   ;;  %v318_v18 = vrot.slane %v1872_v48, 2 }
  0x2a   : > { %1407 = vmatprep.subr.bf16.mxu0 %v1578_v21  ;;  %v1608_v6 = vld [vmem:[%s2036_s1 + $0x1e0] sm:$0xff]   ;;  %v1612_v10 = vld [vmem:[%s2036_s1 + $0x1e8] sm:$0xff]   ;;  %v1614_v13 = vld [vmem:[%s2036_s1 + $0x170] sm:$0xff]  }
  0x2b   : > { %1428 = vmatpush3.bf16.msra.mxu1 %v1577_v20  ;;  %v1609_v7 = vld [vmem:[%s2036_s1 + $0x1a0] sm:$0xff]   ;;  %v1613_v11 = vld [vmem:[%s2036_s1 + $0x1a8] sm:$0xff]   ;;  %v1615_v15 = vld [vmem:[%s2036_s1 + $0x130] sm:$0xff]  }
  0x2c   : > { %1429 = vmatprep.subr.bf16.mxu1 %v1580_v23  ;;  %v1616_v17 = vld [vmem:[%s2036_s1 + $0x1f0] sm:$0xff]   ;;  %v1618_v20 = vld [vmem:[%s2036_s1 + $0x178] sm:$0xff]   ;;  %v1318_v23 = vld [vmem:[%s1849_s18 + $0x28] sm:$0x3] }
  0x2d   : > { %1408 = vmatpush3.bf16.msra.mxu0 %v1579_v22  ;;  %v1617_v19 = vld [vmem:[%s2036_s1 + $0x1b0] sm:$0xff]   ;;  %v1619_v21 = vld [vmem:[%s2036_s1 + $0x138] sm:$0xff]   ;;  %v1321_v34 = vld [vmem:[%s1849_s18 + $0x40] sm:$0x3] }
  0x2e   : > { %1409 = vmatprep.subr.bf16.mxu0 %v1582_v25  ;;  %v1620_v22 = vld [vmem:[%s2036_s1 + $0x1f8] sm:$0xff]   ;;  %v319_v25 = vsel %vm299_vm1, %v317_v14, %v318_v18  ;;  %v1622_v40 = vld [vmem:[%s2036_s1 + $0x200] sm:$0xff]   ;;  %v1623_v45 = vld [vmem:[%s2036_s1 + $0x208] sm:$0xff]   ;;  %v337_v50 = vrot.slane %v1321_v34, 2 }
  0x2f   : > { %1430 = vmatpush3.bf16.msra.mxu1 %v1581_v24  ;;  %v313_v24 = vrot.slane %v1318_v23, 1  ;;  %v1624_v46 = vld [vmem:[%s2036_s1 + $0x210] sm:$0xff]   ;;  %v1625_v47 = vld [vmem:[%s2036_s1 + $0x218] sm:$0xff]   ;;  %v1626_v48 = vld [vmem:[%s2036_s1 + $0x220] sm:$0xff]  }
  0x30   : > { %1431 = vmatprep.subr.bf16.mxu1 %v1584_v27  ;;  %v312_v27 = vsel %vm291_vm0, %v310_v12, %v311_v16  ;;  %v1628_v51 = vld [vmem:[%s2036_s1 + $0x230] sm:$0xff]  }
  0x31   : > { %1410 = vmatpush3.bf16.msra.mxu0 %v1583_v26  ;;  %v320_v26 = vrot.slane %v1318_v23, 2  ;;  %v314_v32 = vsel %vm291_vm0, %v311_v16, %v313_v24 }
  0x32   : > { %1411 = vmatprep.subr.bf16.mxu0 %v1586_v29  ;;  %v1319_v29 = vld [vmem:[%s1849_s18 + $0x30] sm:$0xff]  ;;  %v345_v38 = vpack.c.bf16 %v314_v32, %v312_v27 }
  0x33   : > { %1432 = vmatpush3.bf16.msra.mxu1 %v1585_v28  ;;  %v1621_v28 = vld [vmem:[%s2036_s1 + $0x1b8] sm:$0xff]   ;;  %v327_v35 = vrot.slane %v1319_v29, 1  ;;  %v334_v52 = vrot.slane %v1319_v29, 2 }
  0x34   : > { %1433 = vmatprep.subr.bf16.mxu1 %v1588_v31  ;;  %v321_v31 = vsel %vm299_vm1, %v318_v18, %v320_v26 }
  0x35   : > { %1412 = vmatpush3.bf16.msra.mxu0 %v1587_v30  ;;  %v1320_v30 = vld [vmem:[%s1849_s18 + $0x38] sm:$0xff]  ;;  %v346_v37 = vpack.c.bf16 %v321_v31, %v319_v25 }
  0x36   : > { %1441 = vmatprep.subr.bf16.mxu0 %v1590_v44  ;;  %v328_v36 = vrot.slane %v1320_v30, 1 }
  0x37   : > { %1434 = vmatpush3.bf16.msra.mxu1 %v1589_v39  ;;  %v330_v39 = vrot.slane %v1321_v34, 1 }
  0x38   : > { %966 = vmatmul.mubr.bf16.vlgmr.msra.gmra.mrb[0].mxu0 %v341_v43  ;;  %1463 = vmatprep.subr.bf16.mxu1 %v1592_v53  ;;  %v329_v41 = vsel %vm291_vm0, %v327_v35, %v328_v36  ;;  %v347_v43 = vpack.c.bf16 %v1320_v30, %v1319_v29  ;;  %v335_v53 = vrot.slane %v1320_v30, 2 }
  0x39   : > { %1442 = vmatpush3.bf16.msra.mxu0 %v1591_v49  ;;  %1047 = vmatprep.mubr.bf16.mxu0 %v346_v37  ;;  %v331_v42 = vsel %vm291_vm0, %v328_v36, %v330_v39  ;;  %v1627_v49 = vld [vmem:[%s2036_s1 + $0x228] sm:$0xff]  }
  0x3a   : > { %1007 = vmatmul.mubr.bf16.vlgmr.msra.gmra.mrb[0].mxu1 %v343_v54  ;;  %1443 = vmatprep.subr.bf16.mxu0 %v1594_v56  ;;  %v348_v44 = vpack.c.bf16 %v331_v42, %v329_v41  ;;  %v1629_v54 = vld [vmem:[%s2036_s1 + $0x238] sm:$0xff]   ;;  %v338_v56 = vsel %vm299_vm1, %v335_v53, %v337_v50 }
  0x3b   : > { %1464 = vmatpush3.bf16.msra.mxu1 %v1593_v55  ;;  %v336_v55 = vsel %vm299_vm1, %v334_v52, %v335_v53 }
  0x3c   : > { %1465 = vmatprep.subr.bf16.mxu1 %v1596_v58  ;;  %1088 = vmatprep.mubr.bf16.mxu1 %v348_v44 }
  0x3d   : > { %1444 = vmatpush3.bf16.msra.mxu0 %v1595_v57  ;;  %v349_v57 = vpack.c.bf16 %v338_v56, %v336_v55 }
  0x3e   : > { %1445 = vmatprep.subr.bf16.mxu0 %v1598_v60 }
  0x3f   : > { %1466 = vmatpush3.bf16.msra.mxu1 %v1597_v59  ;;  %v1322_v59 = vld [vmem:[%s2037_s2] ss:$0 sm:$0xff] }
  0x40   : > { %1467 = vmatprep.subr.bf16.mxu1 %v1600_v62 }
  0x41   : > { %1446 = vmatpush3.bf16.msra.mxu0 %v1599_v61 }
  0x42   : > { %1447 = vmatprep.subr.bf16.mxu0 %v1602_v0 }
  0x43   : > { %1468 = vmatpush3.bf16.msra.mxu1 %v1601_v63 }
  0x44   : > { %1469 = vmatprep.subr.bf16.mxu1 %v1604_v2 }
  0x45   : > { %1448 = vmatpush3.bf16.msra.mxu0 %v1603_v1 }
  0x46   : > { %1449 = vmatprep.subr.bf16.mxu0 %v1606_v4 }
  0x47   : > { %1470 = vmatpush3.bf16.msra.mxu1 %v1605_v3 }
  0x48   : > { %1471 = vmatprep.subr.bf16.mxu1 %v1608_v6 }
  0x49   : > { %1450 = vmatpush3.bf16.msra.mxu0 %v1607_v5 }
  0x4a   : > { %1451 = vmatprep.subr.bf16.mxu0 %v1610_v8 }
  0x4b   : > { %1472 = vmatpush3.bf16.msra.mxu1 %v1609_v7 }
  0x4c   : > { %1473 = vmatprep.subr.bf16.mxu1 %v1612_v10 }
  0x4d   : > { %1452 = vmatpush3.bf16.msra.mxu0 %v1611_v9 }
  0x4e   : > { %1453 = vmatprep.subr.bf16.mxu0 %v1614_v13 }
  0x4f   : > { %1474 = vmatpush3.bf16.msra.mxu1 %v1613_v11 }
  0x50   : > { %1475 = vmatprep.subr.bf16.mxu1 %v1616_v17 }
  0x51   : > { %1454 = vmatpush3.bf16.msra.mxu0 %v1615_v15 }
  0x52   : > { %1455 = vmatprep.subr.bf16.mxu0 %v1618_v20 }
  0x53   : > { %1476 = vmatpush3.bf16.msra.mxu1 %v1617_v19 }
  0x54   : > { %1477 = vmatprep.subr.bf16.mxu1 %v1620_v22 }
  0x55   : > { %1456 = vmatpush3.bf16.msra.mxu0 %v1619_v21 }
  0x56   : > { %1494 = vmatprep.subr.bf16.mxu0 %v1671_v33 }
  0x57   : > { %1478 = vmatpush3.bf16.msra.mxu1 %v1621_v28 }
  0x58   : > { %1048 = vmatmul.mubr.bf16.vlgmr.msra.gmra.mrb[4].mxu0 %v345_v38 }
  0x59   : > { %1495 = vmatpush3.bf16.msra.mxu0 %v1622_v40  ;;  %1510 = vmatprep.mubr.msk.bf16.mxu0 %vm1672_vm2, %v1671_v33 }
  0x5a   : > { %1496 = vmatprep.subr.bf16.mxu0 %v1671_v33  ;;  %1089 = vmatmul.mubr.bf16.vlgmr.msra.gmra.mrb[4].mxu1 %v347_v43 }
  0x5d   : > { %1497 = vmatpush3.bf16.msra.mxu0 %v1623_v45 }
  0x5e   : > { %1498 = vmatprep.subr.bf16.mxu0 %v1671_v33 }
  0x61   : > { %1499 = vmatpush3.bf16.msra.mxu0 %v1624_v46  ;;  %v1140_v46 = vld [vmem:[%s1740_s6] sm:$0x1] }
  0x62   : > { %1500 = vmatprep.subr.bf16.mxu0 %v1671_v33 }
  0x65   : > { %1501 = vmatpush3.bf16.msra.mxu0 %v1625_v47 }
  0x66   : > { %1502 = vmatprep.subr.bf16.mxu0 %v1671_v33 }
  0x69   : > { %1503 = vmatpush3.bf16.msra.mxu0 %v1626_v48 }
  0x6a   : > { %1504 = vmatprep.subr.bf16.mxu0 %v1671_v33 }
  0x6d   : > { %1505 = vmatpush3.bf16.msra.mxu0 %v1627_v49  ;;  %v1150_v49 = vld [vmem:[%s1750_s14] sm:$0x1] }
  0x6e   : > { %1506 = vmatprep.subr.bf16.mxu0 %v1671_v33 }
  0x71   : > { %1507 = vmatpush3.bf16.msra.mxu0 %v1628_v51 }
  0x72   : > { %1508 = vmatprep.subr.bf16.mxu0 %v1671_v33 }
  0x75   : > { %1509 = vmatpush3.bf16.msra.mxu0 %v1629_v54 }
  0x78   : > { %1511 = vmatmul.mubr.bf16.vlgmr.msra.gmra.mrb[8].mxu0 %v349_v57 }
 0x10b   : > { %v1413_v58 = vpop.f32.mrb[0].mxu0 }
 0x10c   : > { %v1414_v60 = vpop.f32.mrb[1].mxu0 }
 0x10d   : > { %v1415_v61 = vadd.f32 %v1414_v60, %v1413_v58  ;;  %v1416_v62 = vpop.f32.mrb[2].mxu0  ;;  %v1435_v63 = vpop.f32.mrb[0].mxu1 }
 0x10e   : > { %v1417_v0 = vpop.f32.mrb[3].mxu0  ;;  %v1436_v1 = vpop.f32.mrb[1].mxu1 }
 0x10f   : > { %v968_v2 = vadd.f32 %v1415_v61, %v1322_v59  ;;  %v1418_v3 = vadd.f32 %v1417_v0, %v1416_v62  ;;  %v1437_v4 = vadd.f32 %v1436_v1, %v1435_v63  ;;  %v1438_v5 = vpop.f32.mrb[2].mxu1 }
 0x110   : > { %v1439_v6 = vpop.f32.mrb[3].mxu1 }
 0x111   : > { %v971_v7 = vadd.f32 %v1418_v3, %v1322_v59  ;;  %v1009_v8 = vadd.f32 %v1437_v4, %v968_v2  ;;  %v1440_v9 = vadd.f32 %v1439_v6, %v1438_v5 }
 0x113   : > { %v1012_v10 = vadd.f32 %v1440_v9, %v971_v7 }
 0x12b   : > { %v1457_v11 = vpop.f32.mrb[4].mxu0 }
 0x12c   : > { %v1458_v12 = vpop.f32.mrb[5].mxu0 }
 0x12d   : > { %v1459_v13 = vadd.f32 %v1458_v12, %v1457_v11  ;;  %v1460_v14 = vpop.f32.mrb[6].mxu0  ;;  %v1479_v15 = vpop.f32.mrb[4].mxu1 }
 0x12e   : > { %v1461_v16 = vpop.f32.mrb[7].mxu0  ;;  %v1480_v19 = vpop.f32.mrb[5].mxu1 }
 0x12f   : > { %v1050_v17 = vadd.f32 %v1459_v13, %v1009_v8  ;;  %v1462_v18 = vadd.f32 %v1461_v16, %v1460_v14  ;;  %v1481_v20 = vadd.f32 %v1480_v19, %v1479_v15  ;;  %v1482_v21 = vpop.f32.mrb[6].mxu1 }
 0x130   : > { %v1483_v23 = vpop.f32.mrb[7].mxu1 }
 0x131   : > { %v1053_v22 = vadd.f32 %v1462_v18, %v1012_v10  ;;  %v1484_v24 = vadd.f32 %v1483_v23, %v1482_v21  ;;  %v1091_v25 = vadd.f32 %v1481_v20, %v1050_v17 }
 0x133   : > { %v1094_v26 = vadd.f32 %v1484_v24, %v1053_v22 }
 0x14b   : > { %v1131_v27 = vpop.f32.mrb[8].mxu0 }
 0x14c   : > { %v1132_v28 = vadd.f32 %v1131_v27, %v1091_v25  ;;  %v1512_v29 = vpop.f32.mrb[9].mxu0 }
 0x14d   : > { %v1134_v30 = vpop.f32.mrb[10].mxu0 }
 0x14e   : > { %1138 = vst [vmem:[%s1755_s17] sm:$0xff] %v1132_v28  ;;  %v1135_v31 = vadd.f32 %v1134_v30, %v1094_v26  ;;  %v1513_v32 = vpop.f32.mrb[11].mxu0  ;;  %v1151_v33 = vmul.f32 %v1132_v28, %v1132_v28 }
 0x150   : > { %1139 = vst [vmem:[%s1755_s17 + $0x8] sm:$0xff] %v1135_v31  ;;  %v1141_v34 = vadd.f32 %v1135_v31, %v1132_v28  ;;  %v1152_v35 = vmul.f32 %v1135_v31, %v1135_v31 }
 0x152   : > { %v1142_v36 = vrot.slane %v1141_v34, 4  ;;  %v1153_v37 = vadd.f32 %v1152_v35, %v1151_v33 }
 0x154   : > { %v1143_v38 = vadd.f32 %v1142_v36, %v1141_v34  ;;  %v1154_v39 = vrot.slane %v1153_v37, 4 }
 0x156   : > { %v1144_v40 = vrot.slane %v1143_v38, 2  ;;  %v1155_v41 = vadd.f32 %v1154_v39, %v1153_v37 }
 0x158   : > { %v1145_v42 = vadd.f32 %v1144_v40, %v1143_v38  ;;  %v1156_v43 = vrot.slane %v1155_v41, 2 }
 0x15a   : > { %v1146_v44 = vrot.slane %v1145_v42, 1  ;;  %v1157_v45 = vadd.f32 %v1156_v43, %v1155_v41 }
 0x15c   : > { %v1147_v47 = vadd.f32 %v1146_v44, %v1145_v42  ;;  %v1158_v48 = vrot.slane %v1157_v45, 1 }
 0x15e   : > { %v1148_v50 = vadd.f32 %v1147_v47, %v1140_v46  ;;  %v1159_v51 = vadd.f32 %v1158_v48, %v1157_v45 }
 0x160   : > { %1149 = vst [vmem:[%s1740_s6] sm:$0x1] %v1148_v50  ;;  %v1160_v52 = vadd.f32 %v1159_v51, %v1150_v49 }
 0x162   : > { %1161 = vst [vmem:[%s1750_s14] sm:$0x1] %v1160_v52 }
 0x163 PF: > { %s16_s22 = sadd.s32 1, %s1668_s22   ;;  %s2041_s18 = smov %s1660_s20 }
 0x164   : > { %p13_p8 = scmp.ge.s32.totalorder %s16_s22, 34   ;;  %s2042_s19 = smov %s1664_s21 }
 0x165   : > { %s2043_s20 = smov %s2046_s23  ;;  %s2044_s21 = smov %s2050_s24 }
 0x166   :  { %15 = sbr.rel (!%p13_p8) target bundleno = 3 (0x3), region = 93 }

// kernel: generator_forward.19
= control target key start
LH: loop header
LB: loop body
LE: loop exit
PB: predicated region body
PF: predicated region fallthrough
CT: control target
= control target key end

     0   :  { %s2986_s21 = smov 0   ;;  %s2988_s22 = smov 0   ;;  %s3543_s0 = inlined_call_operand.vmem [shape: f32[2,18,18,128], index: 0, kind: input, shape index: {}]   ;;  %s3544_s1 = inlined_call_operand.vmem [shape: bf16[2,2,512,128], index: 1, kind: input, shape index: {}]   ;;  %s3545_s2 = inlined_call_operand.vmem [shape: f32[1,128], index: 2, kind: input, shape index: {}]   ;;  %s3546_s3 = inlined_call_operand.vmem [shape: f32[2,16,16,128], index: 3, kind: output, shape index: {0}]   ;;  %s3547_s4 = inlined_call_operand.vmem [shape: f32[2,16,16,128], index: 4, kind: output, shape index: {1}]   ;;  %s3548_s5 = inlined_call_operand.vmem [shape: f32[2,16,16,128], index: 5, kind: output, shape index: {2}]   ;;  %s3549_s6 = inlined_call_operand.vmem [shape: f32[2,16,16,128], index: 6, kind: output, shape index: {3}]  }
   0x1   :  { %s2990_s23 = smov 0   ;;  %s2992_s24 = smov 0  }
   0x2   :  { %s2994_s25 = smov 0  }
   0x3 LB: > { %s26_s26 = sadd.s32 1, %s2941_s23  ;;  %s29_s27 = sadd.s32 1, %s2945_s24  ;;  %s2949_s25 = sphi %s2994_s25, %s17_s25   ;;  %s2945_s24 = sphi %s2992_s24, %s3553_s24   ;;  %s2941_s23 = sphi %s2990_s23, %s3552_s23   ;;  %s2937_s22 = sphi %s2988_s22, %s3551_s22   ;;  %s2933_s21 = sphi %s2986_s21, %s3550_s21  }
   0x4   : > { %p27_p0 = scmp.ge.s32.totalorder %s26_s26, 16  ;;  %p2204_p1 = scmp.ge.s32.totalorder %s2949_s25, 1 }
   0x5   : > { %p239_p2 = scmp.lt.s32.totalorder %s2949_s25, 33 }
   0x6   : > { %s3555_s26 = smov (%p27_p0, %s26_s26), 0  ;;  %s3557_s27 = smov (!%p27_p0, %s29_s27), %s2945_s24 }
   0x7   : > { %p240_p3 = pnand %p2204_p1, %p239_p2  ;;  %p31_p4 = scmp.ge.s32.totalorder %s3557_s27, 2 }
   0x8   : > { %v2767_v0 = vld [vmem:[%s3544_s1 + $0x40] sm:$0xff] (!%p240_p3)   ;;  %v2771_v4 = vld [vmem:[%s3544_s1 + $0x48] sm:$0xff] (!%p240_p3)   ;;  %v2775_v8 = vld [vmem:[%s3544_s1 + $0x50] sm:$0xff] (!%p240_p3)   ;;  %p300_p5 = scmp.lt.s32.totalorder (!%p240_p3), %s2937_s22, 1  ;;  %s2094_s30 = smul.u32 (!%p240_p3), 24, %s2933_s21  ;;  %vm361_vm0 = vcmask (!%p240_p3), 1040384  }
   0x9   : > { %s3559_s27 = smov (%p31_p4, %s3557_s27), 0  ;;  %243 = sbr.rel (%p240_p3) target bundleno = 372 (0x174), region = 32 }
   0xa   : > { %v2768_v1 = vld [vmem:[%s3544_s1 + $0xc0] sm:$0xff] (!%p240_p3)   ;;  %2550 = vmatprep.subr.bf16.mxu0 (!%p240_p3), %v2767_v0  ;;  %v2772_v5 = vld [vmem:[%s3544_s1 + $0xc8] sm:$0xff] (!%p240_p3)   ;;  %v2776_v9 = vld [vmem:[%s3544_s1 + $0xd0] sm:$0xff] (!%p240_p3)   ;;  %vm455_vm1 = vsmask.f32 (!%p240_p3), 7424  ;;  %vm787_vm2 = vcmask (!%p240_p3), 1046528  }
   0xb   : > { %v2769_v2 = vld [vmem:[%s3544_s1] sm:$0xff] (!%p240_p3)   ;;  %2572 = vmatprep.subr.bf16.mxu1 (!%p240_p3), %v2768_v1  ;;  %v2773_v6 = vld [vmem:[%s3544_s1 + $0x8] sm:$0xff] (!%p240_p3)   ;;  %v2777_v10 = vld [vmem:[%s3544_s1 + $0x10] sm:$0xff] (!%p240_p3)   ;;  %p307_p6 = scmp.lt.s32.totalorder (!%p240_p3), %s2933_s21, 15 }
   0xc   : > { %v2770_v3 = vld [vmem:[%s3544_s1 + $0x80] sm:$0xff] (!%p240_p3)   ;;  %2551 = vmatpush3.bf16.msra.mxu0 (!%p240_p3), %v2769_v2  ;;  %v2774_v7 = vld [vmem:[%s3544_s1 + $0x88] sm:$0xff] (!%p240_p3)   ;;  %v2778_v11 = vld [vmem:[%s3544_s1 + $0x90] sm:$0xff] (!%p240_p3)  }
   0xd   : > { %2573 = vmatpush3.bf16.msra.mxu1 (!%p240_p3), %v2770_v3  ;;  %2552 = vmatprep.subr.bf16.mxu0 (!%p240_p3), %v2771_v4  ;;  %v2779_v12 = vld [vmem:[%s3544_s1 + $0x58] sm:$0xff] (!%p240_p3)   ;;  %v2783_v16 = vld [vmem:[%s3544_s1 + $0x60] sm:$0xff] (!%p240_p3)   ;;  %v2787_v20 = vld [vmem:[%s3544_s1 + $0x68] sm:$0xff] (!%p240_p3)  }
   0xe   : > { %2574 = vmatprep.subr.bf16.mxu1 (!%p240_p3), %v2772_v5  ;;  %v2780_v13 = vld [vmem:[%s3544_s1 + $0xd8] sm:$0xff] (!%p240_p3)   ;;  %v2784_v17 = vld [vmem:[%s3544_s1 + $0xe0] sm:$0xff] (!%p240_p3)   ;;  %v2788_v21 = vld [vmem:[%s3544_s1 + $0xe8] sm:$0xff] (!%p240_p3)  }
   0xf   : > { %v2781_v14 = vld [vmem:[%s3544_s1 + $0x18] sm:$0xff] (!%p240_p3)   ;;  %v2785_v18 = vld [vmem:[%s3544_s1 + $0x20] sm:$0xff] (!%p240_p3)   ;;  %v2789_v22 = vld [vmem:[%s3544_s1 + $0x28] sm:$0xff] (!%p240_p3)  }
  0x10   : > { %2553 = vmatpush3.bf16.msra.mxu0 %v2773_v6  ;;  %v2782_v15 = vld [vmem:[%s3544_s1 + $0x98] sm:$0xff]   ;;  %s3561_s22 = smov (!%p300_p5, %s2937_s22), 1  ;;  %v2786_v19 = vld [vmem:[%s3544_s1 + $0xa0] sm:$0xff]   ;;  %v2790_v23 = vld [vmem:[%s3544_s1 + $0xa8] sm:$0xff]   ;;  %s3563_s21 = smov (!%p307_p6, %s2933_s21), 15 }
  0x11   : > { %2575 = vmatpush3.bf16.msra.mxu1 %v2774_v7  ;;  %2554 = vmatprep.subr.bf16.mxu0 %v2775_v8  ;;  %s2726_s16 = smul.u32 432, %s3561_s22  ;;  %v2791_v24 = vld [vmem:[%s3544_s1 + $0x70] sm:$0xff]   ;;  %v2795_v28 = vld [vmem:[%s3544_s1 + $0x78] sm:$0xff]   ;;  %v2799_v40 = vld [vmem:[%s3544_s1 + $0x140] sm:$0xff]   ;;  %s2206_s28 = sshll.u32 %s3563_s21, 1 }
  0x12   : > { %2576 = vmatprep.subr.bf16.mxu1 %v2776_v9  ;;  %v2792_v25 = vld [vmem:[%s3544_s1 + $0xf0] sm:$0xff]   ;;  %v2796_v29 = vld [vmem:[%s3544_s1 + $0xf8] sm:$0xff]   ;;  %v2800_v55 = vld [vmem:[%s3544_s1 + $0x1c0] sm:$0xff]   ;;  %s2207_s29 = sshll.u32 %s3561_s22, 5 }
  0x13   : > { %v2793_v26 = vld [vmem:[%s3544_s1 + $0x30] sm:$0xff]   ;;  %s304_s11 = scalar_lea.vmem %s3543_s0, %s2726_s16  ;;  %v2797_v30 = vld [vmem:[%s3544_s1 + $0x38] sm:$0xff]  }
  0x14   : > { %2555 = vmatpush3.bf16.msra.mxu0 %v2777_v10  ;;  %v2794_v27 = vld [vmem:[%s3544_s1 + $0xb0] sm:$0xff]   ;;  %s3119_s19 = scalar_lea.vmem %s304_s11, %s2094_s30  ;;  %v2798_v31 = vld [vmem:[%s3544_s1 + $0xb8] sm:$0xff]   ;;  %s311_s30 = sadd.s32 %s2207_s29, %s2206_s28 }
  0x15   : > { %2577 = vmatpush3.bf16.msra.mxu1 %v2778_v11  ;;  %2556 = vmatprep.subr.bf16.mxu0 %v2779_v12  ;;  %v3128_v32 = vld [vmem:[%s3119_s19 + $0x18] sm:$0xff]  ;;  %v3131_v33 = vld [vmem:[%s3119_s19 + $0x20] sm:$0xff]  ;;  %v3141_v39 = vld [vmem:[%s3119_s19 + $0x8] sm:$0xff]  ;;  %s3504_s7 = sshll.u32 %s311_s30, 3 }
  0x16   : > { %2578 = vmatprep.subr.bf16.mxu1 %v2780_v13  ;;  %v3134_v34 = vld [vmem:[%s3119_s19] sm:$0xff]  ;;  %v362_v35 = vrot.slane %v3128_v32, 7  ;;  %v363_v36 = vrot.slane %v3131_v33, 7  ;;  %v788_v37 = vrot.slane %v3128_v32, 1  ;;  %v789_v38 = vrot.slane %v3131_v33, 1  ;;  %s313_s9 = scalar_lea.vmem %s3546_s3, %s3504_s7  ;;  %s322_s10 = scalar_lea.vmem %s3547_s4, %s3504_s7 }
  0x17   : > { %v370_v41 = vrot.slane %v3134_v34, 7  ;;  %v371_v42 = vrot.slane %v3141_v39, 7  ;;  %v797_v43 = vrot.slane %v3134_v34, 1  ;;  %v798_v44 = vrot.slane %v3141_v39, 1  ;;  %v2220_v45 = vld [vmem:[%s3119_s19 + $0x28] sm:$0x3]  ;;  %s331_s13 = scalar_lea.vmem %s3548_s5, %s3504_s7  ;;  %s340_s17 = scalar_lea.vmem %s3549_s6, %s3504_s7 }
  0x18   : > { %2557 = vmatpush3.bf16.msra.mxu0 %v2781_v14  ;;  %v364_v46 = vsel %vm361_vm0, %v362_v35, %v363_v36  ;;  %v381_v47 = vpack.c.bf16 %v363_v36, %v363_v36  ;;  %v376_v48 = vpack.c.bf16 %v3131_v33, %v3128_v32  ;;  %v380_v49 = vpack.c.bf16 %v2220_v45, %v2220_v45  ;;  %v352_v50 = vld [vmem:[%s3119_s19 + $0x10] sm:$0x3]  ;;  %v2801_v14 = vld [vmem:[%s3544_s1 + $0x100] sm:$0xff]  }
  0x19   : > { %2579 = vmatpush3.bf16.msra.mxu1 %v2782_v15  ;;  %2558 = vmatprep.subr.bf16.mxu0 %v2783_v16  ;;  %v377_v51 = vpack.c.bf16 %v364_v46, %v362_v35  ;;  %v372_v52 = vsel %vm361_vm0, %v370_v41, %v371_v42  ;;  %v383_v53 = vpack.c.bf16 %v371_v42, %v371_v42  ;;  %v2808_v36 = vld [vmem:[%s3544_s1 + $0x1d0] sm:$0xff]   ;;  %v2813_v46 = vld [vmem:[%s3544_s1 + $0x118] sm:$0xff]  }
  0x1a   : > { %2580 = vmatprep.subr.bf16.mxu1 %v2784_v17  ;;  %v378_v54 = vpack.c.bf16 %v3141_v39, %v3134_v34  ;;  %v476_v56 = vshll.u32 %v381_v47, 16  ;;  %v379_v57 = vpack.c.bf16 %v372_v52, %v370_v41  ;;  %v457_v58 = vshrl.u32 %v376_v48, 16  ;;  %v2809_v33 = vld [vmem:[%s3544_s1 + $0x110] sm:$0xff]   ;;  %v2811_v34 = vld [vmem:[%s3544_s1 + $0x158] sm:$0xff]  }
  0x1b   : > { %v459_v59 = vshll.u32 %v376_v48, 16  ;;  %v469_v60 = vshrl.u32 %v377_v51, 16  ;;  %v471_v61 = vshll.u32 %v377_v51, 16  ;;  %v500_v62 = vshll.u32 %v383_v53, 16  ;;  %v2810_v42 = vld [vmem:[%s3544_s1 + $0x190] sm:$0xff]   ;;  %v2812_v39 = vld [vmem:[%s3544_s1 + $0x1d8] sm:$0xff]  }
  0x1c   : > { %2559 = vmatpush3.bf16.msra.mxu0 %v2785_v18  ;;  %v464_v63 = vshll.u32 %v380_v49, 16  ;;  %v478_v0 = vrot.slane %v476_v56, 1  ;;  %v493_v1 = vshrl.u32 %v379_v57, 16  ;;  %v495_v2 = vshll.u32 %v379_v57, 16  ;;  %v2802_v18 = vld [vmem:[%s3544_s1 + $0x180] sm:$0xff]  }
  0x1d   : > { %2581 = vmatpush3.bf16.msra.mxu1 %v2786_v19  ;;  %2560 = vmatprep.subr.bf16.mxu0 %v2787_v20  ;;  %v461_v3 = vrot.slane %v459_v59, 1  ;;  %v473_v4 = vrot.slane %v471_v61, 1  ;;  %v502_v5 = vrot.slane %v500_v62, 1  ;;  %v382_v7 = vpack.c.bf16 %v352_v50, %v352_v50  ;;  %v2803_v19 = vld [vmem:[%s3544_s1 + $0x148] sm:$0xff]   ;;  %v2816_v56 = vld [vmem:[%s3544_s1 + $0x1e0] sm:$0xff]  }
  0x1e   : > { %2582 = vmatprep.subr.bf16.mxu1 %v2788_v21  ;;  %v466_v6 = vrot.slane %v464_v63, 1  ;;  %v497_v8 = vrot.slane %v495_v2, 1  ;;  %v481_v10 = vshrl.u32 %v378_v54, 16  ;;  %v483_v11 = vshll.u32 %v378_v54, 16  ;;  %v2814_v54 = vld [vmem:[%s3544_s1 + $0x198] sm:$0xff]   ;;  %v2817_v59 = vld [vmem:[%s3544_s1 + $0x120] sm:$0xff]  }
  0x1f   : > { %v462_v9 = vor.u32 %v461_v3, %v457_v58  ;;  %v474_v12 = vor.u32 %v473_v4, %v469_v60  ;;  %v488_v13 = vshll.u32 %v382_v7, 16  ;;  %v2819_v61 = vld [vmem:[%s3544_s1 + $0x168] sm:$0xff]   ;;  %v2818_v63 = vld [vmem:[%s3544_s1 + $0x1a0] sm:$0xff]   ;;  %v2823_v3 = vld [vmem:[%s3544_s1 + $0x170] sm:$0xff]  }
  0x20   : > { %2561 = vmatpush3.bf16.msra.mxu0 %v2789_v22  ;;  %v498_v15 = vor.u32 %v497_v8, %v493_v1  ;;  %v485_v17 = vrot.slane %v483_v11, 1  ;;  %v2804_v22 = vld [vmem:[%s3544_s1 + $0x1c8] sm:$0xff]   ;;  %v2827_v7 = vld [vmem:[%s3544_s1 + $0x178] sm:$0xff]   ;;  %v2826_v8 = vld [vmem:[%s3544_s1 + $0x1b0] sm:$0xff]  }
  0x21   : > { %2583 = vmatpush3.bf16.msra.mxu1 %v2790_v23  ;;  %2562 = vmatprep.subr.bf16.mxu0 %v2791_v24  ;;  %v3165_v16 = vsel %vm455_vm1, %v462_v9, %v466_v6  ;;  %v3174_v20 = vsel %vm455_vm1, %v474_v12, %v478_v0  ;;  %v490_v21 = vrot.slane %v488_v13, 1  ;;  %v2820_v0 = vld [vmem:[%s3544_s1 + $0x1e8] sm:$0xff]   ;;  %v2825_v6 = vld [vmem:[%s3544_s1 + $0x130] sm:$0xff]   ;;  %v2828_v9 = vld [vmem:[%s3544_s1 + $0x1f8] sm:$0xff]  }
  0x22   : > { %2584 = vmatprep.subr.bf16.mxu1 %v2792_v25  ;;  %732 = vmatprep.mubr.bf16.mxu0 %v3174_v20  ;;  %v503_v23 = vsel %vm455_vm1, %v498_v15, %v502_v5  ;;  %v486_v24 = vor.u32 %v485_v17, %v481_v10  ;;  %v2805_v25 = vld [vmem:[%s3544_s1 + $0x108] sm:$0xff]   ;;  %v2824_v5 = vld [vmem:[%s3544_s1 + $0x1f0] sm:$0xff]   ;;  %v2829_v10 = vld [vmem:[%s3544_s1 + $0x138] sm:$0xff]  }
  0x23   : > { %773 = vmatprep.mubr.bf16.mxu1 %v503_v23  ;;  %v2821_v2 = vld [vmem:[%s3544_s1 + $0x128] sm:$0xff]   ;;  %v2831_v11 = vld [vmem:[%s3544_s1 + $0x240] sm:$0xff]   ;;  %v2830_v12 = vld [vmem:[%s3544_s1 + $0x1b8] sm:$0xff]  }
  0x24   : > { %2563 = vmatpush3.bf16.msra.mxu0 %v2793_v26  ;;  %v790_v26 = vsel %vm787_vm2, %v788_v37, %v789_v38  ;;  %v2822_v4 = vld [vmem:[%s3544_s1 + $0x1a8] sm:$0xff]   ;;  %v2832_v13 = vld [vmem:[%s3544_s1 + $0x2c0] sm:$0xff]   ;;  %v2840_v23 = vld [vmem:[%s3544_s1 + $0x2d0] sm:$0xff]  }
  0x25   : > { %2585 = vmatpush3.bf16.msra.mxu1 %v2794_v27  ;;  %2564 = vmatprep.subr.bf16.mxu0 %v2795_v28  ;;  %v791_v27 = vrot.slane %v2220_v45, 1  ;;  %v3189_v28 = vsel %vm455_vm1, %v486_v24, %v490_v21  ;;  %v2835_v15 = vld [vmem:[%s3544_s1 + $0x248] sm:$0xff]   ;;  %v2834_v17 = vld [vmem:[%s3544_s1 + $0x280] sm:$0xff]   ;;  %v2839_v21 = vld [vmem:[%s3544_s1 + $0x250] sm:$0xff]  }
  0x26   : > { %2586 = vmatprep.subr.bf16.mxu1 %v2796_v29  ;;  %v2806_v29 = vld [vmem:[%s3544_s1 + $0x188] sm:$0xff]   ;;  %v2843_v24 = vld [vmem:[%s3544_s1 + $0x258] sm:$0xff]  }
  0x27   : > { %v792_v32 = vsel %vm787_vm2, %v789_v38, %v791_v27  ;;  %v807_v35 = vpack.c.bf16 %v791_v27, %v791_v27  ;;  %v2845_v27 = vld [vmem:[%s3544_s1 + $0x218] sm:$0xff]  }
  0x28   : > { %2565 = vmatpush3.bf16.msra.mxu0 %v2797_v30  ;;  %v800_v30 = vrot.slane %v352_v50, 1  ;;  %v805_v37 = vpack.c.bf16 %v792_v32, %v790_v26  ;;  %v2815_v50 = vld [vmem:[%s3544_s1 + $0x160] sm:$0xff]   ;;  %v2844_v26 = vld [vmem:[%s3544_s1 + $0x2d8] sm:$0xff]   ;;  %v2851_v32 = vld [vmem:[%s3544_s1 + $0x268] sm:$0xff]  }
  0x29   : > { %2587 = vmatpush3.bf16.msra.mxu1 %v2798_v31  ;;  %2594 = vmatprep.subr.bf16.mxu0 %v2799_v40  ;;  %v2807_v31 = vld [vmem:[%s3544_s1 + $0x150] sm:$0xff]   ;;  %v799_v40 = vsel %vm787_vm2, %v797_v43, %v798_v44  ;;  %v889_v38 = vshll.u32 %v807_v35, 16  ;;  %v2850_v35 = vld [vmem:[%s3544_s1 + $0x2a0] sm:$0xff]  }
  0x2a   : > { %2616 = vmatprep.subr.bf16.mxu1 %v2800_v55  ;;  %v801_v41 = vsel %vm787_vm2, %v798_v44, %v800_v30  ;;  %v882_v43 = vshrl.u32 %v805_v37, 16  ;;  %v884_v44 = vshll.u32 %v805_v37, 16  ;;  %v808_v47 = vpack.c.bf16 %v800_v30, %v800_v30  ;;  %v2848_v30 = vld [vmem:[%s3544_s1 + $0x2e0] sm:$0xff]   ;;  %v2853_v37 = vld [vmem:[%s3544_s1 + $0x228] sm:$0xff]  }
  0x2b   : > { %733 = vmatmul.mubr.bf16.vlgmr.msra.gmra.mrb[0].mxu0 %v3165_v16  ;;  %v806_v45 = vpack.c.bf16 %v801_v41, %v799_v40  ;;  %v891_v49 = vrot.slane %v889_v38, 1  ;;  %v2855_v40 = vld [vmem:[%s3544_s1 + $0x270] sm:$0xff]   ;;  %v2854_v41 = vld [vmem:[%s3544_s1 + $0x2a8] sm:$0xff]  }
  0x2c   : > { %2595 = vmatpush3.bf16.msra.mxu0 %v2801_v14  ;;  %774 = vmatmul.mubr.bf16.vlgmr.msra.gmra.mrb[0].mxu1 %v3189_v28  ;;  %v886_v48 = vrot.slane %v884_v44, 1  ;;  %v901_v55 = vshll.u32 %v808_v47, 16  ;;  %v2833_v14 = vld [vmem:[%s3544_s1 + $0x200] sm:$0xff]   ;;  %v2857_v38 = vld [vmem:[%s3544_s1 + $0x230] sm:$0xff]   ;;  %v2860_v44 = vld [vmem:[%s3544_s1 + $0x2f8] sm:$0xff]  }
  0x2d   : > { %2596 = vmatprep.subr.bf16.mxu0 %v2803_v19  ;;  %2617 = vmatpush3.bf16.msra.mxu1 %v2802_v18  ;;  %v894_v52 = vshrl.u32 %v806_v45, 16  ;;  %v896_v53 = vshll.u32 %v806_v45, 16  ;;  %v2836_v18 = vld [vmem:[%s3544_s1 + $0x2c8] sm:$0xff]   ;;  %v2861_v45 = vld [vmem:[%s3544_s1 + $0x238] sm:$0xff]  }
  0x2e   : > { %2618 = vmatprep.subr.bf16.mxu1 %v2804_v22  ;;  %v887_v51 = vor.u32 %v886_v48, %v882_v43  ;;  %v903_v60 = vrot.slane %v901_v55, 1  ;;  %v2837_v19 = vld [vmem:[%s3544_s1 + $0x208] sm:$0xff]   ;;  %v2222_v43 = vld [vmem:[%s3119_s19 + $0x38] sm:$0xff]  ;;  %v2223_v48 = vld [vmem:[%s3119_s19 + $0x40] sm:$0x3] }
  0x2f   : > { %v898_v58 = vrot.slane %v896_v53, 1  ;;  %v2838_v22 = vld [vmem:[%s3544_s1 + $0x288] sm:$0xff]   ;;  %v1188_v47 = vrot.slane %v2222_v43, 7 }
  0x30   : > { %2597 = vmatpush3.bf16.msra.mxu0 %v2805_v25  ;;  %v3237_v57 = vsel %vm455_vm1, %v887_v51, %v891_v49  ;;  %v2842_v25 = vld [vmem:[%s3544_s1 + $0x290] sm:$0xff]   ;;  %v2862_v51 = vld [vmem:[%s3544_s1 + $0x2b8] sm:$0xff]  }
  0x31   : > { %2598 = vmatprep.subr.bf16.mxu0 %v2807_v31  ;;  %2619 = vmatpush3.bf16.msra.mxu1 %v2806_v29  ;;  %v899_v62 = vor.u32 %v898_v58, %v894_v52  ;;  %v2846_v29 = vld [vmem:[%s3544_s1 + $0x298] sm:$0xff]   ;;  %v2849_v31 = vld [vmem:[%s3544_s1 + $0x220] sm:$0xff]   ;;  %v1196_v53 = vpack.c.bf16 %v1188_v47, %v1188_v47 }
  0x32   : > { %2620 = vmatprep.subr.bf16.mxu1 %v2808_v36  ;;  %1131 = vmatprep.mubr.bf16.mxu0 %v3237_v57  ;;  %v2852_v36 = vld [vmem:[%s3544_s1 + $0x2e8] sm:$0xff]  }
  0x33   : > { %v904_v1 = vsel %vm455_vm1, %v899_v62, %v903_v60  ;;  %v2864_v60 = vld [vmem:[%s3544_s1 + $0x3c0] sm:$0xff]  }
  0x34   : > { %2599 = vmatpush3.bf16.msra.mxu0 %v2809_v33  ;;  %1172 = vmatprep.mubr.bf16.mxu1 %v904_v1  ;;  %v2856_v33 = vld [vmem:[%s3544_s1 + $0x2f0] sm:$0xff]   ;;  %v1575_v1 = vrot.slane %v2222_v43, 1 }
  0x35   : > { %2600 = vmatprep.subr.bf16.mxu0 %v2811_v34  ;;  %2621 = vmatpush3.bf16.msra.mxu1 %v2810_v42  ;;  %v2859_v42 = vld [vmem:[%s3544_s1 + $0x278] sm:$0xff]   ;;  %v2858_v34 = vld [vmem:[%s3544_s1 + $0x2b0] sm:$0xff]  }
  0x36   : > { %2622 = vmatprep.subr.bf16.mxu1 %v2812_v39  ;;  %v2221_v39 = vld [vmem:[%s3119_s19 + $0x30] sm:$0xff] }
  0x37   : > { %v1193_v49 = vpack.c.bf16 %v2222_v43, %v2221_v39  ;;  %v2884_v43 = vld [vmem:[%s3544_s1 + $0x3e8] sm:$0xff]  }
  0x38   : > { %2601 = vmatpush3.bf16.msra.mxu0 %v2813_v46  ;;  %v1187_v46 = vrot.slane %v2221_v39, 7 }
  0x39   : > { %2602 = vmatprep.subr.bf16.mxu0 %v2815_v50  ;;  %2623 = vmatpush3.bf16.msra.mxu1 %v2814_v54  ;;  %v1195_v50 = vpack.c.bf16 %v2223_v48, %v2223_v48  ;;  %v1270_v54 = vshrl.u32 %v1193_v49, 16  ;;  %v1272_v55 = vshll.u32 %v1193_v49, 16  ;;  %v2890_v49 = vld [vmem:[%s3544_s1 + $0x3b0] sm:$0xff]  }
  0x3a   : > { %2624 = vmatprep.subr.bf16.mxu1 %v2816_v56  ;;  %v1189_v52 = vsel %vm361_vm0, %v1187_v46, %v1188_v47  ;;  %v2863_v56 = vld [vmem:[%s3544_s1 + $0x340] sm:$0xff]   ;;  %v2888_v47 = vld [vmem:[%s3544_s1 + $0x3f0] sm:$0xff]  }
  0x3b   : > { %v1194_v58 = vpack.c.bf16 %v1189_v52, %v1187_v46  ;;  %v1274_v62 = vrot.slane %v1272_v55, 1  ;;  %v2891_v46 = vld [vmem:[%s3544_s1 + $0x378] sm:$0xff]  }
  0x3c   : > { %2603 = vmatpush3.bf16.msra.mxu0 %v2817_v59  ;;  %v1277_v59 = vshll.u32 %v1195_v50, 16  ;;  %v2892_v50 = vld [vmem:[%s3544_s1 + $0x3f8] sm:$0xff]  }
  0x3d   : > { %2604 = vmatprep.subr.bf16.mxu0 %v2819_v61  ;;  %2625 = vmatpush3.bf16.msra.mxu1 %v2818_v63  ;;  %v1289_v61 = vshll.u32 %v1196_v53, 16  ;;  %v1282_v63 = vshrl.u32 %v1194_v58, 16  ;;  %v3498_v53 = vld [vmem:[%s3545_s2] ss:$0 sm:$0xff] }
  0x3e   : > { %2626 = vmatprep.subr.bf16.mxu1 %v2820_v0  ;;  %v1284_v0 = vshll.u32 %v1194_v58, 16 }
  0x40   : > { %2605 = vmatpush3.bf16.msra.mxu0 %v2821_v2  ;;  %v2865_v2 = vld [vmem:[%s3544_s1 + $0x300] sm:$0xff]  }
  0x41   : > { %2606 = vmatprep.subr.bf16.mxu0 %v2823_v3  ;;  %2627 = vmatpush3.bf16.msra.mxu1 %v2822_v4  ;;  %v1275_v3 = vor.u32 %v1274_v62, %v1270_v54  ;;  %v1279_v4 = vrot.slane %v1277_v59, 1 }
  0x42   : > { %2628 = vmatprep.subr.bf16.mxu1 %v2824_v5  ;;  %v2867_v5 = vld [vmem:[%s3544_s1 + $0x348] sm:$0xff]  }
  0x44   : > { %2607 = vmatpush3.bf16.msra.mxu0 %v2825_v6  ;;  %v1286_v6 = vrot.slane %v1284_v0, 1 }
  0x45   : > { %2608 = vmatprep.subr.bf16.mxu0 %v2827_v7  ;;  %2629 = vmatpush3.bf16.msra.mxu1 %v2826_v8  ;;  %v1291_v7 = vrot.slane %v1289_v61, 1  ;;  %v2866_v8 = vld [vmem:[%s3544_s1 + $0x380] sm:$0xff]  }
  0x46   : > { %2630 = vmatprep.subr.bf16.mxu1 %v2828_v9  ;;  %v1287_v9 = vor.u32 %v1286_v6, %v1282_v63 }
  0x48   : > { %2609 = vmatpush3.bf16.msra.mxu0 %v2829_v10  ;;  %v2869_v10 = vld [vmem:[%s3544_s1 + $0x308] sm:$0xff]  }
  0x49   : > { %2638 = vmatprep.subr.bf16.mxu0 %v2831_v11  ;;  %2631 = vmatpush3.bf16.msra.mxu1 %v2830_v12  ;;  %v1574_v11 = vrot.slane %v2221_v39, 1  ;;  %v3407_v12 = vsel %vm455_vm1, %v1275_v3, %v1279_v4  ;;  %v2887_v39 = vld [vmem:[%s3544_s1 + $0x370] sm:$0xff]  }
  0x4a   : > { %2660 = vmatprep.subr.bf16.mxu1 %v2832_v13  ;;  %v2871_v13 = vld [vmem:[%s3544_s1 + $0x350] sm:$0xff]  }
  0x4b   : > { %1132 = vmatmul.mubr.bf16.vlgmr.msra.gmra.mrb[4].mxu0 %v3165_v16 }
  0x4c   : > { %2639 = vmatpush3.bf16.msra.mxu0 %v2833_v14  ;;  %1519 = vmatprep.mubr.bf16.mxu0 %v3174_v20  ;;  %v2841_v20 = vld [vmem:[%s3544_s1 + $0x210] sm:$0xff]   ;;  %v1577_v14 = vrot.slane %v2223_v48, 1  ;;  %v2893_v48 = vld [vmem:[%s3544_s1 + $0x338] sm:$0xff]  }
  0x4d   : > { %1173 = vmatmul.mubr.bf16.vlgmr.msra.gmra.mrb[4].mxu1 %v3189_v28  ;;  %2640 = vmatprep.subr.bf16.mxu0 %v2835_v15  ;;  %v2847_v28 = vld [vmem:[%s3544_s1 + $0x260] sm:$0xff]   ;;  %v1292_v15 = vsel %vm455_vm1, %v1287_v9, %v1291_v7 }
  0x4e   : > { %2661 = vmatpush3.bf16.msra.mxu1 %v2834_v17  ;;  %v2868_v17 = vld [vmem:[%s3544_s1 + $0x3c8] sm:$0xff]   ;;  %1560 = vmatprep.mubr.bf16.mxu1 %v1292_v15 }
  0x4f   : > { %2662 = vmatprep.subr.bf16.mxu1 %v2836_v18  ;;  %v1576_v18 = vsel %vm787_vm2, %v1574_v11, %v1575_v1 }
  0x50   : > { %2641 = vmatpush3.bf16.msra.mxu0 %v2837_v19  ;;  %v1578_v19 = vsel %vm787_vm2, %v1575_v1, %v1577_v14 }
  0x51   : > { %2642 = vmatprep.subr.bf16.mxu0 %v2839_v21  ;;  %v1583_v21 = vpack.c.bf16 %v1577_v14, %v1577_v14 }
  0x52   : > { %2663 = vmatpush3.bf16.msra.mxu1 %v2838_v22  ;;  %v2873_v22 = vld [vmem:[%s3544_s1 + $0x310] sm:$0xff]  }
  0x53   : > { %2664 = vmatprep.subr.bf16.mxu1 %v2840_v23  ;;  %v1582_v23 = vpack.c.bf16 %v1578_v19, %v1576_v18 }
  0x54   : > { %2643 = vmatpush3.bf16.msra.mxu0 %v2841_v20  ;;  %v2875_v20 = vld [vmem:[%s3544_s1 + $0x358] sm:$0xff]  }
  0x55   : > { %2644 = vmatprep.subr.bf16.mxu0 %v2843_v24  ;;  %v1664_v24 = vshll.u32 %v1583_v21, 16 }
  0x56   : > { %2665 = vmatpush3.bf16.msra.mxu1 %v2842_v25  ;;  %v2872_v25 = vld [vmem:[%s3544_s1 + $0x3d0] sm:$0xff]  }
  0x57   : > { %2666 = vmatprep.subr.bf16.mxu1 %v2844_v26  ;;  %v2874_v26 = vld [vmem:[%s3544_s1 + $0x390] sm:$0xff]  }
  0x58   : > { %2645 = vmatpush3.bf16.msra.mxu0 %v2845_v27  ;;  %v1657_v27 = vshrl.u32 %v1582_v23, 16 }
  0x59   : > { %2646 = vmatprep.subr.bf16.mxu0 %v2847_v28  ;;  %v1659_v28 = vshll.u32 %v1582_v23, 16 }
  0x5a   : > { %2667 = vmatpush3.bf16.msra.mxu1 %v2846_v29  ;;  %v2877_v29 = vld [vmem:[%s3544_s1 + $0x318] sm:$0xff]  }
  0x5b   : > { %2668 = vmatprep.subr.bf16.mxu1 %v2848_v30  ;;  %v1666_v30 = vrot.slane %v1664_v24, 1 }
  0x5c   : > { %2647 = vmatpush3.bf16.msra.mxu0 %v2849_v31  ;;  %v2879_v31 = vld [vmem:[%s3544_s1 + $0x360] sm:$0xff]  }
  0x5d   : > { %2648 = vmatprep.subr.bf16.mxu0 %v2851_v32  ;;  %v1661_v32 = vrot.slane %v1659_v28, 1 }
  0x5e   : > { %2669 = vmatpush3.bf16.msra.mxu1 %v2850_v35  ;;  %v2876_v35 = vld [vmem:[%s3544_s1 + $0x3d8] sm:$0xff]  }
  0x5f   : > { %2670 = vmatprep.subr.bf16.mxu1 %v2852_v36  ;;  %v2878_v36 = vld [vmem:[%s3544_s1 + $0x398] sm:$0xff]  }
  0x60   : > { %2649 = vmatpush3.bf16.msra.mxu0 %v2853_v37  ;;  %v1662_v37 = vor.u32 %v1661_v32, %v1657_v27 }
  0x61   : > { %2650 = vmatprep.subr.bf16.mxu0 %v2855_v40  ;;  %v2881_v40 = vld [vmem:[%s3544_s1 + $0x320] sm:$0xff]  }
  0x62   : > { %2671 = vmatpush3.bf16.msra.mxu1 %v2854_v41  ;;  %v2883_v41 = vld [vmem:[%s3544_s1 + $0x368] sm:$0xff]  }
  0x63   : > { %2672 = vmatprep.subr.bf16.mxu1 %v2856_v33  ;;  %v1667_v33 = vsel %vm455_vm1, %v1662_v37, %v1666_v30 }
  0x64   : > { %2651 = vmatpush3.bf16.msra.mxu0 %v2857_v38  ;;  %v2880_v38 = vld [vmem:[%s3544_s1 + $0x3e0] sm:$0xff]  }
  0x65   : > { %2652 = vmatprep.subr.bf16.mxu0 %v2859_v42  ;;  %v2882_v42 = vld [vmem:[%s3544_s1 + $0x3a0] sm:$0xff]  }
  0x66   : > { %2673 = vmatpush3.bf16.msra.mxu1 %v2858_v34  ;;  %v2885_v34 = vld [vmem:[%s3544_s1 + $0x328] sm:$0xff]  }
  0x67   : > { %2674 = vmatprep.subr.bf16.mxu1 %v2860_v44  ;;  %v2886_v44 = vld [vmem:[%s3544_s1 + $0x3a8] sm:$0xff]  }
  0x68   : > { %2653 = vmatpush3.bf16.msra.mxu0 %v2861_v45  ;;  %v2889_v45 = vld [vmem:[%s3544_s1 + $0x330] sm:$0xff]  }
  0x69   : > { %2682 = vmatprep.subr.bf16.mxu0 %v2863_v56 }
  0x6a   : > { %2675 = vmatpush3.bf16.msra.mxu1 %v2862_v51  ;;  %v2894_v51 = vld [vmem:[%s3544_s1 + $0x3b8] sm:$0xff]  }
  0x6b   : > { %1520 = vmatmul.mubr.bf16.vlgmr.msra.gmra.mrb[8].mxu0 %v3165_v16  ;;  %2704 = vmatprep.subr.bf16.mxu1 %v2864_v60 }
  0x6c   : > { %2683 = vmatpush3.bf16.msra.mxu0 %v2865_v2  ;;  %1893 = vmatprep.mubr.bf16.mxu0 %v3237_v57  ;;  %v2870_v57 = vld [vmem:[%s3544_s1 + $0x388] sm:$0xff]  }
  0x6d   : > { %2684 = vmatprep.subr.bf16.mxu0 %v2867_v5  ;;  %1561 = vmatmul.mubr.bf16.vlgmr.msra.gmra.mrb[8].mxu1 %v3407_v12 }
  0x6e   : > { %2705 = vmatpush3.bf16.msra.mxu1 %v2866_v8  ;;  %1934 = vmatprep.mubr.bf16.mxu1 %v1667_v33 }
  0x6f   : > { %2706 = vmatprep.subr.bf16.mxu1 %v2868_v17 }
  0x70   : > { %2685 = vmatpush3.bf16.msra.mxu0 %v2869_v10 }
  0x71   : > { %2686 = vmatprep.subr.bf16.mxu0 %v2871_v13 }
  0x72   : > { %2707 = vmatpush3.bf16.msra.mxu1 %v2870_v57 }
  0x73   : > { %2708 = vmatprep.subr.bf16.mxu1 %v2872_v25 }
  0x74   : > { %2687 = vmatpush3.bf16.msra.mxu0 %v2873_v22 }
  0x75   : > { %2688 = vmatprep.subr.bf16.mxu0 %v2875_v20 }
  0x76   : > { %2709 = vmatpush3.bf16.msra.mxu1 %v2874_v26 }
  0x77   : > { %2710 = vmatprep.subr.bf16.mxu1 %v2876_v35 }
  0x78   : > { %2689 = vmatpush3.bf16.msra.mxu0 %v2877_v29 }
  0x79   : > { %2690 = vmatprep.subr.bf16.mxu0 %v2879_v31 }
  0x7a   : > { %2711 = vmatpush3.bf16.msra.mxu1 %v2878_v36 }
  0x7b   : > { %2712 = vmatprep.subr.bf16.mxu1 %v2880_v38 }
  0x7c   : > { %2691 = vmatpush3.bf16.msra.mxu0 %v2881_v40 }
  0x7d   : > { %2692 = vmatprep.subr.bf16.mxu0 %v2883_v41 }
  0x7e   : > { %2713 = vmatpush3.bf16.msra.mxu1 %v2882_v42 }
  0x7f   : > { %2714 = vmatprep.subr.bf16.mxu1 %v2884_v43 }
  0x80   : > { %2693 = vmatpush3.bf16.msra.mxu0 %v2885_v34 }
  0x81   : > { %2694 = vmatprep.subr.bf16.mxu0 %v2887_v39 }
  0x82   : > { %2715 = vmatpush3.bf16.msra.mxu1 %v2886_v44 }
  0x83   : > { %2716 = vmatprep.subr.bf16.mxu1 %v2888_v47 }
  0x84   : > { %2695 = vmatpush3.bf16.msra.mxu0 %v2889_v45 }
  0x85   : > { %2696 = vmatprep.subr.bf16.mxu0 %v2891_v46 }
  0x86   : > { %2717 = vmatpush3.bf16.msra.mxu1 %v2890_v49 }
  0x87   : > { %2718 = vmatprep.subr.bf16.mxu1 %v2892_v50 }
  0x88   : > { %2697 = vmatpush3.bf16.msra.mxu0 %v2893_v48 }
  0x8a   : > { %2719 = vmatpush3.bf16.msra.mxu1 %v2894_v51 }
  0x8b   : > { %1894 = vmatmul.mubr.bf16.vlgmr.msra.gmra.mrb[12].mxu0 %v3165_v16 }
  0x8d   : > { %1935 = vmatmul.mubr.bf16.vlgmr.msra.gmra.mrb[12].mxu1 %v3407_v12 }
  0xfe   : > { %v2566_v52 = vpop.f32.mrb[0].mxu0 }
  0xff   : > { %v2567_v54 = vpop.f32.mrb[1].mxu0  ;;  %v2588_v55 = vpop.f32.mrb[0].mxu1 }
 0x100   : > { %v2568_v56 = vadd.f32 %v2567_v54, %v2566_v52  ;;  %v2569_v58 = vpop.f32.mrb[2].mxu0  ;;  %v2589_v59 = vpop.f32.mrb[1].mxu1 }
 0x101   : > { %v2570_v60 = vpop.f32.mrb[3].mxu0  ;;  %v2590_v61 = vadd.f32 %v2589_v59, %v2588_v55  ;;  %v2591_v62 = vpop.f32.mrb[2].mxu1 }
 0x102   : > { %v735_v16 = vadd.f32 %v2568_v56, %v3498_v53  ;;  %v2571_v63 = vadd.f32 %v2570_v60, %v2569_v58  ;;  %v2592_v0 = vpop.f32.mrb[3].mxu1 }
 0x103   : > { %v2593_v3 = vadd.f32 %v2592_v0, %v2591_v62 }
 0x104   : > { %v776_v1 = vadd.f32 %v2590_v61, %v735_v16  ;;  %v738_v2 = vadd.f32 %v2571_v63, %v3498_v53 }
 0x106   : > { %2895 = vtanh.f32 %v776_v1  ;;  %v779_v4 = vadd.f32 %v2593_v3, %v738_v2 }
 0x108   : > { %2897 = vtanh.f32 %v779_v4 }
 0x110   : > { %v2896_v5 = vpop.eup %2895 }
 0x111   : > { %784 = vst [vmem:[%s313_s9] sm:$0xff] %v2896_v5 }
 0x112   : > { %v2898_v6 = vpop.eup %2897 }
 0x113   : > { %785 = vst [vmem:[%s313_s9 + $0x8] sm:$0xff] %v2898_v6 }
 0x11e   : > { %v2610_v7 = vpop.f32.mrb[4].mxu0 }
 0x11f   : > { %v2611_v8 = vpop.f32.mrb[5].mxu0 }
 0x120   : > { %v2632_v9 = vpop.f32.mrb[4].mxu1  ;;  %v2612_v10 = vadd.f32 %v2611_v8, %v2610_v7  ;;  %v2613_v11 = vpop.f32.mrb[6].mxu0 }
 0x121   : > { %v2633_v12 = vpop.f32.mrb[5].mxu1  ;;  %v2614_v13 = vpop.f32.mrb[7].mxu0 }
 0x122   : > { %v1134_v14 = vadd.f32 %v2612_v10, %v3498_v53  ;;  %v2634_v15 = vadd.f32 %v2633_v12, %v2632_v9  ;;  %v2635_v17 = vpop.f32.mrb[6].mxu1  ;;  %v2615_v18 = vadd.f32 %v2614_v13, %v2613_v11 }
 0x123   : > { %v2636_v57 = vpop.f32.mrb[7].mxu1 }
 0x124   : > { %v1175_v19 = vadd.f32 %v2634_v15, %v1134_v14  ;;  %v1137_v21 = vadd.f32 %v2615_v18, %v3498_v53  ;;  %v2637_v22 = vadd.f32 %v2636_v57, %v2635_v17 }
 0x126   : > { %2899 = vtanh.f32 %v1175_v19  ;;  %v1178_v23 = vadd.f32 %v2637_v22, %v1137_v21 }
 0x128   : > { %2901 = vtanh.f32 %v1178_v23 }
 0x130   : > { %v2900_v20 = vpop.eup %2899 }
 0x131   : > { %1183 = vst [vmem:[%s322_s10] sm:$0xff] %v2900_v20 }
 0x132   : > { %v2902_v24 = vpop.eup %2901 }
 0x133   : > { %1184 = vst [vmem:[%s322_s10 + $0x8] sm:$0xff] %v2902_v24 }
 0x13e   : > { %v2654_v25 = vpop.f32.mrb[8].mxu0 }
 0x13f   : > { %v2655_v26 = vpop.f32.mrb[9].mxu0 }
 0x140   : > { %v2656_v27 = vadd.f32 %v2655_v26, %v2654_v25  ;;  %v2657_v28 = vpop.f32.mrb[10].mxu0  ;;  %v2676_v31 = vpop.f32.mrb[8].mxu1 }
 0x141   : > { %v2658_v29 = vpop.f32.mrb[11].mxu0  ;;  %v2677_v35 = vpop.f32.mrb[9].mxu1 }
 0x142   : > { %v2659_v30 = vadd.f32 %v2658_v29, %v2657_v28  ;;  %v1522_v32 = vadd.f32 %v2656_v27, %v3498_v53  ;;  %v2678_v36 = vadd.f32 %v2677_v35, %v2676_v31  ;;  %v2679_v37 = vpop.f32.mrb[10].mxu1 }
 0x143   : > { %v2680_v41 = vpop.f32.mrb[11].mxu1 }
 0x144   : > { %v1525_v40 = vadd.f32 %v2659_v30, %v3498_v53  ;;  %v1563_v33 = vadd.f32 %v2678_v36, %v1522_v32  ;;  %v2681_v38 = vadd.f32 %v2680_v41, %v2679_v37 }
 0x146   : > { %2903 = vtanh.f32 %v1563_v33  ;;  %v1566_v42 = vadd.f32 %v2681_v38, %v1525_v40 }
 0x148   : > { %2905 = vtanh.f32 %v1566_v42 }
 0x150   : > { %v2904_v34 = vpop.eup %2903 }
 0x151   : > { %1571 = vst [vmem:[%s331_s13] sm:$0xff] %v2904_v34 }
 0x152   : > { %v2906_v39 = vpop.eup %2905 }
 0x153   : > { %1572 = vst [vmem:[%s331_s13 + $0x8] sm:$0xff] %v2906_v39 }
 0x15e   : > { %v2698_v43 = vpop.f32.mrb[12].mxu0 }
 0x15f   : > { %v2699_v44 = vpop.f32.mrb[13].mxu0 }
 0x160   : > { %v2700_v45 = vadd.f32 %v2699_v44, %v2698_v43  ;;  %v2701_v46 = vpop.f32.mrb[14].mxu0  ;;  %v2720_v49 = vpop.f32.mrb[12].mxu1 }
 0x161   : > { %v2702_v47 = vpop.f32.mrb[15].mxu0  ;;  %v2721_v51 = vpop.f32.mrb[13].mxu1 }
 0x162   : > { %v2703_v48 = vadd.f32 %v2702_v47, %v2701_v46  ;;  %v1896_v50 = vadd.f32 %v2700_v45, %v3498_v53  ;;  %v2722_v52 = vadd.f32 %v2721_v51, %v2720_v49  ;;  %v2723_v54 = vpop.f32.mrb[14].mxu1 }
 0x163   : > { %v2724_v56 = vpop.f32.mrb[15].mxu1 }
 0x164   : > { %v1899_v55 = vadd.f32 %v2703_v48, %v3498_v53  ;;  %v1937_v58 = vadd.f32 %v2722_v52, %v1896_v50  ;;  %v2725_v59 = vadd.f32 %v2724_v56, %v2723_v54 }
 0x166   : > { %2907 = vtanh.f32 %v1937_v58  ;;  %v1940_v60 = vadd.f32 %v2725_v59, %v1899_v55 }
 0x168   : > { %2909 = vtanh.f32 %v1940_v60 }
 0x170   : > { %v2908_v16 = vpop.eup %2907 }
 0x171   : > { %1945 = vst [vmem:[%s340_s17] sm:$0xff] %v2908_v16 }
 0x172   : > { %v2910_v61 = vpop.eup %2909 }
 0x173   : > { %1946 = vst [vmem:[%s340_s17 + $0x8] sm:$0xff] %v2910_v61 }
 0x174 PF: > { %s17_s25 = sadd.s32 1, %s2949_s25   ;;  %s3550_s21 = smov %s2941_s23 }
 0x175   : > { %p14_p7 = scmp.ge.s32.totalorder %s17_s25, 34   ;;  %s3551_s22 = smov %s2945_s24 }
 0x176   : > { %s3552_s23 = smov %s3555_s26  ;;  %s3553_s24 = smov %s3559_s27 }
 0x177   :  { %16 = sbr.rel (!%p14_p7) target bundleno = 3 (0x3), region = 104 }

</bundles_post_ra>
